<compile_context>
chip_gen: v7x
topology: tpu7x:2x2x1
jax: 0.10.0
libtpu: 0.0.40
codegen_flags: <defaults>
</compile_context>

<pallas_src>
import jax
import jax.numpy as jnp
from jax.experimental import pallas as pl
from jax.experimental.pallas import tpu as pltpu

IN_FEATURES = 32            # input_shape
N_OUTPUTS = 8               # n_outputs -> final dim = 2 * n_outputs
OUT_FEATURES = 2 * N_OUTPUTS
HIDDEN = 500                # logical hidden size (PyTorch)
HIDDEN_PAD = 512            # padded hidden size used inside the kernel
BATCH = 128                 # rows per call; DMA/overhead amortized across rows


def _softplus(v):
    # matches torch.nn.Softplus(beta=1, threshold=20); computed in f32.
    return jnp.where(v > 20.0, v, jnp.log1p(jnp.exp(jnp.minimum(v, 20.0))))


def encoder_kernel(x_ref, w1_ref, b1_ref, b2_ref, b3_ref, b4_ref,
                   w2_hbm, w3_hbm, w4_hbm, out_ref,
                   w2_vmem, w3_vmem, w4_vmem, sem):
    # Kick off the big weight DMAs immediately so they overlap with the
    # layer-1 / layer-2 matmuls and softplus work.
    cp2 = pltpu.make_async_copy(w2_hbm, w2_vmem, sem.at[0])
    cp3 = pltpu.make_async_copy(w3_hbm, w3_vmem, sem.at[1])
    cp4 = pltpu.make_async_copy(w4_hbm, w4_vmem, sem.at[2])
    cp2.start()
    cp3.start()
    cp4.start()

    # Activations held in f32; cast to bf16 only at each MXU input.
    h = x_ref[...].astype(jnp.float32)

    # Layer 1 (w1 auto-DMA'd, already resident).
    h = _softplus(
        jnp.dot(h.astype(jnp.bfloat16), w1_ref[...],
                preferred_element_type=jnp.float32) + b1_ref[...])

    # Layer 2.
    cp2.wait()
    h = _softplus(
        jnp.dot(h.astype(jnp.bfloat16), w2_vmem[...],
                preferred_element_type=jnp.float32) + b2_ref[...])

    # Layer 3.
    cp3.wait()
    h = _softplus(
        jnp.dot(h.astype(jnp.bfloat16), w3_vmem[...],
                preferred_element_type=jnp.float32) + b3_ref[...])

    # Output layer (no softplus).
    cp4.wait()
    y = jnp.dot(h.astype(jnp.bfloat16), w4_vmem[...],
                preferred_element_type=jnp.float32) + b4_ref[...]

    out_ref[...] = y.astype(out_ref.dtype)


def encoder_forward(x, params):
    """x: (B, IN_FEATURES) f32. params: padded (w1,b1,...,w4,b4), weights bf16."""
    B = x.shape[0]
    # % 16: bf16 packs 16 rows per vreg sublane tile -> full tiles on MXU LHS.
    assert B % 16 == 0, "batch must be a multiple of 16 (bf16 sublane packing)"

    w1, b1, w2, b2, w3, b3, w4, b4 = params

    vmem = pl.BlockSpec(memory_space=pltpu.MemorySpace.VMEM)
    hbm = pl.BlockSpec(memory_space=pl.ANY)   # raw ref; we DMA it manually

    flops = 2 * B * (IN_FEATURES * HIDDEN_PAD
                     + 2 * HIDDEN_PAD * HIDDEN_PAD
                     + HIDDEN_PAD * OUT_FEATURES)
    transcendentals = 2 * B * HIDDEN_PAD * 3           # exp + log1p per hidden unit
    bytes_accessed = (x.size * x.dtype.itemsize
                      + sum(p.size * p.dtype.itemsize for p in params)
                      + B * OUT_FEATURES * 4)

    return pl.pallas_call(
        encoder_kernel,
        out_shape=jax.ShapeDtypeStruct((B, OUT_FEATURES), jnp.float32),
        in_specs=[vmem, vmem, vmem, vmem, vmem, vmem, hbm, hbm, hbm],
        out_specs=vmem,
        scratch_shapes=[
            pltpu.VMEM((HIDDEN_PAD, HIDDEN_PAD), jnp.bfloat16),   # w2
            pltpu.VMEM((HIDDEN_PAD, HIDDEN_PAD), jnp.bfloat16),   # w3
            pltpu.VMEM((HIDDEN_PAD, OUT_FEATURES), jnp.bfloat16), # w4
            pltpu.SemaphoreType.DMA((3,)),
        ],
        cost_estimate=pl.CostEstimate(
            flops=flops,
            transcendentals=transcendentals,
            bytes_accessed=bytes_accessed),
    )(x, w1, b1, b2, b3, b4, w2, w3, w4)


def init_params(key):
    """Deterministic init matching nn.init.normal_(std=0.01) weights, zero biases.

    Returns:
      padded : (w1,b1,w2,b2,w3,b3,w4,b4) with bf16 weights zero-padded to 512
               and f32 biases (kernel inputs).
      logical: (w1,w2,w3,w4) bf16 weights at logical sizes (for the reference).
    """
    ks = jax.random.split(key, 4)
    std = 0.01

    # logical weights, stored (in, out), quantized to bf16 (same values the
    # kernel sees, so the reference is an exact mirror of the quantization).
    w1_l = (std * jax.random.normal(ks[0], (IN_FEATURES, HIDDEN), jnp.float32)).astype(jnp.bfloat16)
    w2_l = (std * jax.random.normal(ks[1], (HIDDEN, HIDDEN), jnp.float32)).astype(jnp.bfloat16)
    w3_l = (std * jax.random.normal(ks[2], (HIDDEN, HIDDEN), jnp.float32)).astype(jnp.bfloat16)
    w4_l = (std * jax.random.normal(ks[3], (HIDDEN, OUT_FEATURES), jnp.float32)).astype(jnp.bfloat16)

    # padded copies (zeros in padded rows/cols -- required for exactness).
    w1 = jnp.zeros((IN_FEATURES, HIDDEN_PAD), jnp.bfloat16).at[:, :HIDDEN].set(w1_l)
    w2 = jnp.zeros((HIDDEN_PAD, HIDDEN_PAD), jnp.bfloat16).at[:HIDDEN, :HIDDEN].set(w2_l)
    w3 = jnp.zeros((HIDDEN_PAD, HIDDEN_PAD), jnp.bfloat16).at[:HIDDEN, :HIDDEN].set(w3_l)
    w4 = jnp.zeros((HIDDEN_PAD, OUT_FEATURES), jnp.bfloat16).at[:HIDDEN, :].set(w4_l)

    b1 = jnp.zeros((1, HIDDEN_PAD), jnp.float32)
    b2 = jnp.zeros((1, HIDDEN_PAD), jnp.float32)
    b3 = jnp.zeros((1, HIDDEN_PAD), jnp.float32)
    b4 = jnp.zeros((1, OUT_FEATURES), jnp.float32)

    padded = (w1, b1, w2, b2, w3, b3, w4, b4)
    logical = (w1_l, w2_l, w3_l, w4_l)
    return padded, logical


def validate_padding(params):
    """Padding is only exact if the pad region of weights/biases is all-zero.

    (softplus(0)=log 2 != 0, so nonzero pad rows in w2/w3/w4 or pad bias entries
    would silently corrupt results when loading real checkpoints.)
    """
    w1, b1, w2, b2, w3, b3, w4, b4 = params
    ok = True
    ok &= bool(jnp.all(w1[:, HIDDEN:] == 0))
    ok &= bool(jnp.all(w2[HIDDEN:, :] == 0)) and bool(jnp.all(w2[:, HIDDEN:] == 0))
    ok &= bool(jnp.all(w3[HIDDEN:, :] == 0)) and bool(jnp.all(w3[:, HIDDEN:] == 0))
    ok &= bool(jnp.all(w4[HIDDEN:, :] == 0))
    ok &= bool(jnp.all(b1[:, HIDDEN:] == 0))
    ok &= bool(jnp.all(b2[:, HIDDEN:] == 0))
    ok &= bool(jnp.all(b3[:, HIDDEN:] == 0))
    assert ok, "padded region of weights/biases must be exactly zero"


def reference_forward(x, logical):
    """Pure-JAX reference at logical (unpadded) sizes, mirroring the kernel's
    bf16-weight / bf16-activation-input / f32-accumulate arithmetic."""
    w1, w2, w3, w4 = logical
    h = x.astype(jnp.float32)
    h = _softplus(jnp.dot(h.astype(jnp.bfloat16), w1, preferred_element_type=jnp.float32))
    h = _softplus(jnp.dot(h.astype(jnp.bfloat16), w2, preferred_element_type=jnp.float32))
    h = _softplus(jnp.dot(h.astype(jnp.bfloat16), w3, preferred_element_type=jnp.float32))
    return jnp.dot(h.astype(jnp.bfloat16), w4, preferred_element_type=jnp.float32)


if __name__ == "__main__":
    key = jax.random.PRNGKey(0)
    k_x, k_p = jax.random.split(key)

    x = jax.random.normal(k_x, (BATCH, IN_FEATURES), jnp.float32)
    padded_params, logical_params = init_params(k_p)
    validate_padding(padded_params)

    out = encoder_forward(x, padded_params)
    out = jax.block_until_ready(out)

    ref = reference_forward(x, logical_params)
    assert out.shape == (BATCH, OUT_FEATURES)
    assert jnp.allclose(out, ref, atol=1e-3, rtol=1e-3), "mismatch vs reference"

    print("KERNEL_OK")
</pallas_src>

<mosaic_0001>
module attributes {stable_mosaic.version = 11 : i64} {
  func.func @encoder_kernel(%arg0: memref<128x32xf32, #tpu.memory_space<vmem>>, %arg1: memref<32x512xbf16, #tpu.memory_space<vmem>>, %arg2: memref<1x512xf32, #tpu.memory_space<vmem>>, %arg3: memref<1x512xf32, #tpu.memory_space<vmem>>, %arg4: memref<1x512xf32, #tpu.memory_space<vmem>>, %arg5: memref<1x16xf32, #tpu.memory_space<vmem>>, %arg6: memref<512x512xbf16, #tpu.memory_space<any>>, %arg7: memref<512x512xbf16, #tpu.memory_space<any>>, %arg8: memref<512x16xbf16, #tpu.memory_space<any>>, %arg9: memref<128x16xf32, #tpu.memory_space<vmem>>, %arg10: memref<512x512xbf16, #tpu.memory_space<vmem>>, %arg11: memref<512x512xbf16, #tpu.memory_space<vmem>>, %arg12: memref<512x16xbf16, #tpu.memory_space<vmem>>, %arg13: memref<3x!tpu.dma_semaphore, #tpu.memory_space<semaphore_mem>>) attributes {dimension_semantics = [], scalar_prefetch = 0 : i64, scratch_operands = 4 : i64, tpu.core_type = #tpu.core_type<tc>} {
    %c0_i32 = arith.constant 0 : i32
    %0 = tpu.memref_slice %arg13[%c0_i32] : memref<3x!tpu.dma_semaphore, #tpu.memory_space<semaphore_mem>> -> memref<1x!tpu.dma_semaphore, #tpu.memory_space<semaphore_mem>>
    %1 = tpu.memref_squeeze %0 : memref<1x!tpu.dma_semaphore, #tpu.memory_space<semaphore_mem>> -> memref<!tpu.dma_semaphore, #tpu.memory_space<semaphore_mem>>
    tpu.enqueue_dma source(%arg6 : memref<512x512xbf16, #tpu.memory_space<any>>) target(%arg10 : memref<512x512xbf16, #tpu.memory_space<vmem>>) target_semaphore(%1 : memref<!tpu.dma_semaphore, #tpu.memory_space<semaphore_mem>>)
    %c1_i32 = arith.constant 1 : i32
    %2 = tpu.memref_slice %arg13[%c1_i32] : memref<3x!tpu.dma_semaphore, #tpu.memory_space<semaphore_mem>> -> memref<1x!tpu.dma_semaphore, #tpu.memory_space<semaphore_mem>>
    %3 = tpu.memref_squeeze %2 : memref<1x!tpu.dma_semaphore, #tpu.memory_space<semaphore_mem>> -> memref<!tpu.dma_semaphore, #tpu.memory_space<semaphore_mem>>
    tpu.enqueue_dma source(%arg7 : memref<512x512xbf16, #tpu.memory_space<any>>) target(%arg11 : memref<512x512xbf16, #tpu.memory_space<vmem>>) target_semaphore(%3 : memref<!tpu.dma_semaphore, #tpu.memory_space<semaphore_mem>>)
    %c2_i32 = arith.constant 2 : i32
    %4 = tpu.memref_slice %arg13[%c2_i32] : memref<3x!tpu.dma_semaphore, #tpu.memory_space<semaphore_mem>> -> memref<1x!tpu.dma_semaphore, #tpu.memory_space<semaphore_mem>>
    %5 = tpu.memref_squeeze %4 : memref<1x!tpu.dma_semaphore, #tpu.memory_space<semaphore_mem>> -> memref<!tpu.dma_semaphore, #tpu.memory_space<semaphore_mem>>
    tpu.enqueue_dma source(%arg8 : memref<512x16xbf16, #tpu.memory_space<any>>) target(%arg12 : memref<512x16xbf16, #tpu.memory_space<vmem>>) target_semaphore(%5 : memref<!tpu.dma_semaphore, #tpu.memory_space<semaphore_mem>>)
    %c0 = arith.constant 0 : index
    %c0_0 = arith.constant 0 : index
    %6 = vector.load %arg0[%c0, %c0_0] : memref<128x32xf32, #tpu.memory_space<vmem>>, vector<128x32xf32>
    %7 = arith.truncf %6 : vector<128x32xf32> to vector<128x32xbf16>
    %c0_1 = arith.constant 0 : index
    %c0_2 = arith.constant 0 : index
    %8 = vector.load %arg1[%c0_1, %c0_2] : memref<32x512xbf16, #tpu.memory_space<vmem>>, vector<32x512xbf16>
    %cst = arith.constant dense<0.000000e+00> : vector<128x512xf32>
    %9 = tpu.matmul %7, %8, %cst {dimension_numbers = #tpu.dot_dimension_numbers<[1], [0], [0], [1], [0, 0, 1, 1], [], []>} : vector<128x32xbf16>, vector<32x512xbf16>, vector<128x512xf32> -> vector<128x512xf32>
    %c0_3 = arith.constant 0 : index
    %c0_4 = arith.constant 0 : index
    %10 = vector.load %arg2[%c0_3, %c0_4] : memref<1x512xf32, #tpu.memory_space<vmem>>, vector<1x512xf32>
    %11 = vector.broadcast %10 : vector<1x512xf32> to vector<128x512xf32>
    %12 = arith.addf %9, %11 : vector<128x512xf32>
    %cst_5 = arith.constant 2.000000e+01 : f32
    %13 = vector.broadcast %cst_5 : f32 to vector<128x512xf32>
    %14 = arith.cmpf ogt, %12, %13 : vector<128x512xf32>
    %cst_6 = arith.constant 2.000000e+01 : f32
    %15 = vector.broadcast %cst_6 : f32 to vector<128x512xf32>
    %16 = arith.minimumf %12, %15 : vector<128x512xf32>
    %17 = math.exp %16 : vector<128x512xf32>
    %18 = math.log1p %17 : vector<128x512xf32>
    %19 = arith.select %14, %12, %18 : vector<128x512xi1>, vector<128x512xf32>
    %c0_i32_7 = arith.constant 0 : i32
    %20 = tpu.memref_slice %arg13[%c0_i32_7] : memref<3x!tpu.dma_semaphore, #tpu.memory_space<semaphore_mem>> -> memref<1x!tpu.dma_semaphore, #tpu.memory_space<semaphore_mem>>
    %21 = tpu.memref_squeeze %20 : memref<1x!tpu.dma_semaphore, #tpu.memory_space<semaphore_mem>> -> memref<!tpu.dma_semaphore, #tpu.memory_space<semaphore_mem>>
    tpu.wait_dma2 semaphore(%21 : memref<!tpu.dma_semaphore, #tpu.memory_space<semaphore_mem>>) src(%arg6 : memref<512x512xbf16, #tpu.memory_space<any>>) dst(%arg10 : memref<512x512xbf16, #tpu.memory_space<vmem>>)
    %22 = arith.truncf %19 : vector<128x512xf32> to vector<128x512xbf16>
    %c0_8 = arith.constant 0 : index
    %c0_9 = arith.constant 0 : index
    %23 = vector.load %arg10[%c0_8, %c0_9] : memref<512x512xbf16, #tpu.memory_space<vmem>>, vector<512x512xbf16>
    %cst_10 = arith.constant dense<0.000000e+00> : vector<128x512xf32>
    %24 = tpu.matmul %22, %23, %cst_10 {dimension_numbers = #tpu.dot_dimension_numbers<[1], [0], [0], [1], [0, 0, 1, 1], [], []>} : vector<128x512xbf16>, vector<512x512xbf16>, vector<128x512xf32> -> vector<128x512xf32>
    %c0_11 = arith.constant 0 : index
    %c0_12 = arith.constant 0 : index
    %25 = vector.load %arg3[%c0_11, %c0_12] : memref<1x512xf32, #tpu.memory_space<vmem>>, vector<1x512xf32>
    %26 = vector.broadcast %25 : vector<1x512xf32> to vector<128x512xf32>
    %27 = arith.addf %24, %26 : vector<128x512xf32>
    %cst_13 = arith.constant 2.000000e+01 : f32
    %28 = vector.broadcast %cst_13 : f32 to vector<128x512xf32>
    %29 = arith.cmpf ogt, %27, %28 : vector<128x512xf32>
    %cst_14 = arith.constant 2.000000e+01 : f32
    %30 = vector.broadcast %cst_14 : f32 to vector<128x512xf32>
    %31 = arith.minimumf %27, %30 : vector<128x512xf32>
    %32 = math.exp %31 : vector<128x512xf32>
    %33 = math.log1p %32 : vector<128x512xf32>
    %34 = arith.select %29, %27, %33 : vector<128x512xi1>, vector<128x512xf32>
    %c1_i32_15 = arith.constant 1 : i32
    %35 = tpu.memref_slice %arg13[%c1_i32_15] : memref<3x!tpu.dma_semaphore, #tpu.memory_space<semaphore_mem>> -> memref<1x!tpu.dma_semaphore, #tpu.memory_space<semaphore_mem>>
    %36 = tpu.memref_squeeze %35 : memref<1x!tpu.dma_semaphore, #tpu.memory_space<semaphore_mem>> -> memref<!tpu.dma_semaphore, #tpu.memory_space<semaphore_mem>>
    tpu.wait_dma2 semaphore(%36 : memref<!tpu.dma_semaphore, #tpu.memory_space<semaphore_mem>>) src(%arg7 : memref<512x512xbf16, #tpu.memory_space<any>>) dst(%arg11 : memref<512x512xbf16, #tpu.memory_space<vmem>>)
    %37 = arith.truncf %34 : vector<128x512xf32> to vector<128x512xbf16>
    %c0_16 = arith.constant 0 : index
    %c0_17 = arith.constant 0 : index
    %38 = vector.load %arg11[%c0_16, %c0_17] : memref<512x512xbf16, #tpu.memory_space<vmem>>, vector<512x512xbf16>
    %cst_18 = arith.constant dense<0.000000e+00> : vector<128x512xf32>
    %39 = tpu.matmul %37, %38, %cst_18 {dimension_numbers = #tpu.dot_dimension_numbers<[1], [0], [0], [1], [0, 0, 1, 1], [], []>} : vector<128x512xbf16>, vector<512x512xbf16>, vector<128x512xf32> -> vector<128x512xf32>
    %c0_19 = arith.constant 0 : index
    %c0_20 = arith.constant 0 : index
    %40 = vector.load %arg4[%c0_19, %c0_20] : memref<1x512xf32, #tpu.memory_space<vmem>>, vector<1x512xf32>
    %41 = vector.broadcast %40 : vector<1x512xf32> to vector<128x512xf32>
    %42 = arith.addf %39, %41 : vector<128x512xf32>
    %cst_21 = arith.constant 2.000000e+01 : f32
    %43 = vector.broadcast %cst_21 : f32 to vector<128x512xf32>
    %44 = arith.cmpf ogt, %42, %43 : vector<128x512xf32>
    %cst_22 = arith.constant 2.000000e+01 : f32
    %45 = vector.broadcast %cst_22 : f32 to vector<128x512xf32>
    %46 = arith.minimumf %42, %45 : vector<128x512xf32>
    %47 = math.exp %46 : vector<128x512xf32>
    %48 = math.log1p %47 : vector<128x512xf32>
    %49 = arith.select %44, %42, %48 : vector<128x512xi1>, vector<128x512xf32>
    %c2_i32_23 = arith.constant 2 : i32
    %50 = tpu.memref_slice %arg13[%c2_i32_23] : memref<3x!tpu.dma_semaphore, #tpu.memory_space<semaphore_mem>> -> memref<1x!tpu.dma_semaphore, #tpu.memory_space<semaphore_mem>>
    %51 = tpu.memref_squeeze %50 : memref<1x!tpu.dma_semaphore, #tpu.memory_space<semaphore_mem>> -> memref<!tpu.dma_semaphore, #tpu.memory_space<semaphore_mem>>
    tpu.wait_dma2 semaphore(%51 : memref<!tpu.dma_semaphore, #tpu.memory_space<semaphore_mem>>) src(%arg8 : memref<512x16xbf16, #tpu.memory_space<any>>) dst(%arg12 : memref<512x16xbf16, #tpu.memory_space<vmem>>)
    %52 = arith.truncf %49 : vector<128x512xf32> to vector<128x512xbf16>
    %c0_24 = arith.constant 0 : index
    %c0_25 = arith.constant 0 : index
    %53 = vector.load %arg12[%c0_24, %c0_25] : memref<512x16xbf16, #tpu.memory_space<vmem>>, vector<512x16xbf16>
    %cst_26 = arith.constant dense<0.000000e+00> : vector<128x16xf32>
    %54 = tpu.matmul %52, %53, %cst_26 {dimension_numbers = #tpu.dot_dimension_numbers<[1], [0], [0], [1], [0, 0, 1, 1], [], []>} : vector<128x512xbf16>, vector<512x16xbf16>, vector<128x16xf32> -> vector<128x16xf32>
    %c0_27 = arith.constant 0 : index
    %c0_28 = arith.constant 0 : index
    %55 = vector.load %arg5[%c0_27, %c0_28] : memref<1x16xf32, #tpu.memory_space<vmem>>, vector<1x16xf32>
    %56 = vector.broadcast %55 : vector<1x16xf32> to vector<128x16xf32>
    %57 = arith.addf %54, %56 : vector<128x16xf32>
    %c0_29 = arith.constant 0 : index
    %c0_30 = arith.constant 0 : index
    %58 = vector.load %arg9[%c0_29, %c0_30] : memref<128x16xf32, #tpu.memory_space<vmem>>, vector<128x16xf32>
    tpu.vector_store %arg9[%c0_29, %c0_30], %57 {strides = array<i32>} : memref<128x16xf32, #tpu.memory_space<vmem>>, vector<128x16xf32>,
    return
  }
}

</mosaic_0001>

<bundles_post_ra>
// kernel: tpu_custom_call.1
= control target key start
LH: loop header
LB: loop body
LE: loop exit
PB: predicated region body
PF: predicated region fallthrough
CT: control target
= control target key end

     0   :  { %s31_s30 = sld [smem:[#allocation0]]   ;;  %s6041_s10 = smov [#allocation2]   ;;  %s10392_s0 = inlined_call_operand.vmem [shape: f32[128,32], index: 0, kind: input, shape index: {}]   ;;  %s10393_s1 = inlined_call_operand.vmem [shape: bf16[32,512], index: 1, kind: input, shape index: {}]   ;;  %s10394_s2 = inlined_call_operand.vmem [shape: f32[1,512], index: 2, kind: input, shape index: {}]   ;;  %s10395_s3 = inlined_call_operand.vmem [shape: f32[1,512], index: 3, kind: input, shape index: {}]   ;;  %s10396_s4 = inlined_call_operand.vmem [shape: f32[1,512], index: 4, kind: input, shape index: {}]   ;;  %s10397_s5 = inlined_call_operand.vmem [shape: f32[1,16], index: 5, kind: input, shape index: {}]   ;;  %s10398_s6 = inlined_call_operand.hbm [shape: bf16[512,512], index: 6, kind: input, shape index: {}]   ;;  %s10399_s7 = inlined_call_operand.hbm [shape: bf16[512,512], index: 7, kind: input, shape index: {}]   ;;  %s10400_s8 = inlined_call_operand.vmem [shape: bf16[512,16], index: 8, kind: input, shape index: {}]   ;;  %s10401_s9 = inlined_call_operand.vmem [shape: f32[128,16], index: 9, kind: output, shape index: {}]  }
   0x1   :  { %s39_s11 = sshll.u32 %s6041_s10, 4  ;;  %s6042_s12 = smov 512   ;;  %s40_s11 = int_to_ptr.vmem [resolvable:$true] %s39_s11 }
   0x2   :  { %43 = sst [smem:[#allocation7]] %s6042_s12  ;;  %s6043_s13 = smov 4  }
   0x3   :  { %45 = sst [smem:[#allocation7 + $0x1]] %s6042_s12  ;;  %s6044_s14 = smov 64  }
   0x4   :  { %47 = sst [smem:[#allocation7 + $0x2]] %s6043_s13  ;;  %s6045_s16 = smov 128  }
   0x5   :  { %49 = sst [smem:[#allocation7 + $0x3]] %s6044_s14  ;;  %s6046_s18 = smov 2  }
   0x6   :  { %s4826_s15 = sshll.u32 %s31_s30, 26  ;;  %51 = sst [smem:[#allocation7 + $0x4]] %s6045_s16 }
   0x7   :  { %s4827_s17 = sadd.s32 134217728, %s4826_s15  ;;  %53 = sst [smem:[#allocation7 + $0x5]] %s6046_s18 }
   0x8   :  { %s6047_s19 = smov 256   ;;  %57 = sst [smem:[#allocation7 + $0x7]] %s6044_s14 }
   0x9   :  { %55 = sst [smem:[#allocation7 + $0x6]] %s6047_s19  ;;  %s6048_s20 = smov [#allocation5]  }
   0xa   :  { %59 = sst [smem:[#allocation7 + $0x8]] %s6043_s13  ;;  %s6049_s21 = smov [#allocation6]  }
   0xb   :  { %61 = dma.general %s10398_s6, 16384, %s40_s11, %s6048_s20, %s6049_s21, [#allocation7], %s4827_s17, 0  }
   0xc   :  { %78 = sst [smem:[#allocation9]] %s6042_s12  ;;  %s6050_s24 = smov [#allocation3]  }
   0xd   :  { %80 = sst [smem:[#allocation9 + $0x1]] %s6042_s12  ;;  %s74_s25 = sshll.u32 %s6050_s24, 4  ;;  %s75_s25 = int_to_ptr.vmem [resolvable:$true] %s74_s25 }
   0xe   :  { %82 = sst [smem:[#allocation9 + $0x2]] %s6043_s13  ;;  %s6051_s26 = smov [#allocation5 + $0x1]  }
   0xf   :  { %84 = sst [smem:[#allocation9 + $0x3]] %s6044_s14  ;;  %s6052_s27 = smov [#allocation8]  }
  0x10   :  { %86 = sst [smem:[#allocation9 + $0x4]] %s6045_s16 }
  0x11   :  { %88 = sst [smem:[#allocation9 + $0x5]] %s6046_s18 }
  0x12   :  { %90 = sst [smem:[#allocation9 + $0x6]] %s6047_s19 }
  0x13   :  { %92 = sst [smem:[#allocation9 + $0x7]] %s6044_s14 }
  0x14   :  { %94 = sst [smem:[#allocation9 + $0x8]] %s6043_s13 }
  0x15   :  { %96 = dma.general %s10399_s7, 16384, %s75_s25, %s6051_s26, %s6052_s27, [#allocation9], %s4827_s17, 0  }
  0x16   :  { %v6113_v0 = vld [vmem:[%s10400_s8] sm:$0xff]  ;;  %v6118_v1 = vld [vmem:[%s10400_s8 + $0x8] sm:$0xff]  ;;  %v6123_v2 = vld [vmem:[%s10400_s8 + $0x10] sm:$0xff] }
  0x17   :  { %10410 = vst [vmem:[#allocation14_spill] sm:$0xff] %v6113_v0  ;;  %10411 = vst [vmem:[#allocation15_spill] sm:$0xff] %v6118_v1  ;;  %v6128_v3 = vld [vmem:[%s10400_s8 + $0x18] sm:$0xff]  ;;  %v6133_v4 = vld [vmem:[%s10400_s8 + $0x20] sm:$0xff] }
  0x18   :  { %10412 = vst [vmem:[#allocation16_spill] sm:$0xff] %v6123_v2  ;;  %10413 = vst [vmem:[#allocation17_spill] sm:$0xff] %v6128_v3  ;;  %v6138_v5 = vld [vmem:[%s10400_s8 + $0x28] sm:$0xff]  ;;  %v6143_v6 = vld [vmem:[%s10400_s8 + $0x30] sm:$0xff] }
  0x19   :  { %10414 = vst [vmem:[#allocation18_spill] sm:$0xff] %v6133_v4  ;;  %10415 = vst [vmem:[#allocation19_spill] sm:$0xff] %v6138_v5  ;;  %v6148_v7 = vld [vmem:[%s10400_s8 + $0x38] sm:$0xff]  ;;  %v6153_v8 = vld [vmem:[%s10400_s8 + $0x40] sm:$0xff] }
  0x1a   :  { %10416 = vst [vmem:[#allocation20_spill] sm:$0xff] %v6143_v6  ;;  %10417 = vst [vmem:[#allocation21_spill] sm:$0xff] %v6148_v7  ;;  %v6158_v9 = vld [vmem:[%s10400_s8 + $0x48] sm:$0xff]  ;;  %v6163_v10 = vld [vmem:[%s10400_s8 + $0x50] sm:$0xff] }
  0x1b   :  { %10418 = vst [vmem:[#allocation22_spill] sm:$0xff] %v6153_v8  ;;  %10419 = vst [vmem:[#allocation23_spill] sm:$0xff] %v6158_v9  ;;  %v6168_v11 = vld [vmem:[%s10400_s8 + $0x58] sm:$0xff]  ;;  %v6173_v12 = vld [vmem:[%s10400_s8 + $0x60] sm:$0xff] }
  0x1c   :  { %10420 = vst [vmem:[#allocation24_spill] sm:$0xff] %v6163_v10  ;;  %10421 = vst [vmem:[#allocation25_spill] sm:$0xff] %v6168_v11  ;;  %v6178_v13 = vld [vmem:[%s10400_s8 + $0x68] sm:$0xff]  ;;  %v6183_v14 = vld [vmem:[%s10400_s8 + $0x70] sm:$0xff] }
  0x1d   :  { %10422 = vst [vmem:[#allocation26_spill] sm:$0xff] %v6173_v12  ;;  %10423 = vst [vmem:[#allocation27_spill] sm:$0xff] %v6178_v13  ;;  %v6188_v15 = vld [vmem:[%s10400_s8 + $0x78] sm:$0xff]  ;;  %v6193_v16 = vld [vmem:[%s10400_s8 + $0x80] sm:$0xff] }
  0x1e   :  { %10424 = vst [vmem:[#allocation28_spill] sm:$0xff] %v6183_v14  ;;  %10425 = vst [vmem:[#allocation29_spill] sm:$0xff] %v6188_v15  ;;  %v6198_v17 = vld [vmem:[%s10400_s8 + $0x88] sm:$0xff]  ;;  %v6203_v18 = vld [vmem:[%s10400_s8 + $0x90] sm:$0xff] }
  0x1f   :  { %10426 = vst [vmem:[#allocation30_spill] sm:$0xff] %v6193_v16  ;;  %10427 = vst [vmem:[#allocation31_spill] sm:$0xff] %v6198_v17  ;;  %v6208_v19 = vld [vmem:[%s10400_s8 + $0x98] sm:$0xff]  ;;  %v6213_v20 = vld [vmem:[%s10400_s8 + $0xa0] sm:$0xff] }
  0x20   :  { %10428 = vst [vmem:[#allocation32_spill] sm:$0xff] %v6203_v18  ;;  %10429 = vst [vmem:[#allocation33_spill] sm:$0xff] %v6208_v19  ;;  %v6218_v21 = vld [vmem:[%s10400_s8 + $0xa8] sm:$0xff]  ;;  %v6223_v22 = vld [vmem:[%s10400_s8 + $0xb0] sm:$0xff] }
  0x21   :  { %10430 = vst [vmem:[#allocation34_spill] sm:$0xff] %v6213_v20  ;;  %10431 = vst [vmem:[#allocation35_spill] sm:$0xff] %v6218_v21  ;;  %v6228_v23 = vld [vmem:[%s10400_s8 + $0xb8] sm:$0xff]  ;;  %v6233_v24 = vld [vmem:[%s10400_s8 + $0xc0] sm:$0xff] }
  0x22   :  { %10432 = vst [vmem:[#allocation36_spill] sm:$0xff] %v6223_v22  ;;  %10433 = vst [vmem:[#allocation37_spill] sm:$0xff] %v6228_v23  ;;  %v6238_v25 = vld [vmem:[%s10400_s8 + $0xc8] sm:$0xff]  ;;  %v6243_v26 = vld [vmem:[%s10400_s8 + $0xd0] sm:$0xff] }
  0x23   :  { %10434 = vst [vmem:[#allocation38_spill] sm:$0xff] %v6233_v24  ;;  %10435 = vst [vmem:[#allocation39_spill] sm:$0xff] %v6238_v25  ;;  %v6248_v27 = vld [vmem:[%s10400_s8 + $0xd8] sm:$0xff]  ;;  %v6253_v28 = vld [vmem:[%s10400_s8 + $0xe0] sm:$0xff] }
  0x24   :  { %10436 = vst [vmem:[#allocation40_spill] sm:$0xff] %v6243_v26  ;;  %10437 = vst [vmem:[#allocation41_spill] sm:$0xff] %v6248_v27  ;;  %v6258_v29 = vld [vmem:[%s10400_s8 + $0xe8] sm:$0xff]  ;;  %v6263_v30 = vld [vmem:[%s10400_s8 + $0xf0] sm:$0xff] }
  0x25   :  { %10438 = vst [vmem:[#allocation42_spill] sm:$0xff] %v6253_v28  ;;  %10439 = vst [vmem:[#allocation43_spill] sm:$0xff] %v6258_v29  ;;  %v6268_v31 = vld [vmem:[%s10400_s8 + $0xf8] sm:$0xff] }
  0x26   :  { %10440 = vst [vmem:[#allocation44_spill] sm:$0xff] %v6263_v30  ;;  %10441 = vst [vmem:[#allocation45_spill] sm:$0xff] %v6268_v31 }
  0x27   :  { %201 = vsyncadd [#allocation5 + $0x2], 4096  ;;  %v5255_v32 = vld [vmem:[%s10393_s1 + $0x4] ss:$16 sps:$4 sm:$0xff]   ;;  %v6053_v33 = vmov 0   ;;  %v203_v42 = vld [vmem:[%s10392_s0 + $0x8] sm:$0xff] }
  0x28   :  { %353 = vmatprep.mubr.bf16.mxu0 %v6053_v33  ;;  %466 = vmatprep.mubr.bf16.mxu1 %v6053_v33  ;;  %v5257_v34 = vld [vmem:[%s10393_s1 + $0xc] ss:$16 sps:$4 sm:$0xff]   ;;  %v5259_v35 = vld [vmem:[%s10393_s1] ss:$16 sps:$4 sm:$0xff]   ;;  %v5260_v36 = vld [vmem:[%s10393_s1 + $0x8] ss:$16 sps:$4 sm:$0xff]  }
  0x29   :  { %321 = vmatprep.subr.bf16.mxu0 %v5255_v32  ;;  %v5261_v37 = vld [vmem:[%s10393_s1 + $0x24] ss:$16 sps:$4 sm:$0xff]   ;;  %434 = vmatprep.subr.bf16.mxu1 %v5257_v34  ;;  %v5263_v38 = vld [vmem:[%s10393_s1 + $0x2c] ss:$16 sps:$4 sm:$0xff]   ;;  %v5265_v39 = vld [vmem:[%s10393_s1 + $0x20] ss:$16 sps:$4 sm:$0xff]   ;;  %v236_v34 = vlaneseq }
  0x2a   :  { %322 = vmatpush1.bf16.msra.mxu0 %v5259_v35  ;;  %435 = vmatpush1.bf16.msra.mxu1 %v5260_v36  ;;  %v5266_v40 = vld [vmem:[%s10393_s1 + $0x28] ss:$16 sps:$4 sm:$0xff]   ;;  %v202_v41 = vld [vmem:[%s10392_s0] sm:$0xff]  ;;  %vm296_vm0 = vcmask 261120   ;;  %v204_v44 = vld [vmem:[%s10392_s0 + $0x10] sm:$0xff] }
  0x2b   :  { %323 = vmatprep.subr.bf16.mxu0 %v5261_v37  ;;  %436 = vmatprep.subr.bf16.mxu1 %v5263_v38  ;;  %v218_v43 = vpack.c.bf16 %v203_v42, %v202_v41  ;;  %v205_v45 = vld [vmem:[%s10392_s0 + $0x18] sm:$0xff]  ;;  %v206_v47 = vld [vmem:[%s10392_s0 + $0x20] sm:$0xff]  ;;  %v207_v48 = vld [vmem:[%s10392_s0 + $0x28] sm:$0xff]  ;;  %v237_v35 = vshrl.u32 %v236_v34, 7 }
  0x2c   :  { %v219_v46 = vpack.c.bf16 %v205_v45, %v204_v44  ;;  %v220_v49 = vpack.c.bf16 %v207_v48, %v206_v47  ;;  %v208_v50 = vld [vmem:[%s10392_s0 + $0x30] sm:$0xff]  ;;  %v209_v51 = vld [vmem:[%s10392_s0 + $0x38] sm:$0xff]  ;;  %v210_v53 = vld [vmem:[%s10392_s0 + $0x40] sm:$0xff] }
  0x2d   :  { %v221_v52 = vpack.c.bf16 %v209_v51, %v208_v50  ;;  %v211_v54 = vld [vmem:[%s10392_s0 + $0x48] sm:$0xff]  ;;  %v212_v56 = vld [vmem:[%s10392_s0 + $0x50] sm:$0xff]  ;;  %v213_v57 = vld [vmem:[%s10392_s0 + $0x58] sm:$0xff]  ;;  %v6374_v36 = vsub.s32 0, %v237_v35  ;;  %v6379_v38 = vsub.s32 2, %v237_v35 }
  0x2e   :  { %324 = vmatpush1.bf16.msra.mxu0 %v5265_v39  ;;  %437 = vmatpush1.bf16.msra.mxu1 %v5266_v40  ;;  %v222_v55 = vpack.c.bf16 %v211_v54, %v210_v53  ;;  %v223_v58 = vpack.c.bf16 %v213_v57, %v212_v56  ;;  %v214_v59 = vld [vmem:[%s10392_s0 + $0x60] sm:$0xff]  ;;  %v215_v60 = vld [vmem:[%s10392_s0 + $0x68] sm:$0xff]  ;;  %v216_v62 = vld [vmem:[%s10392_s0 + $0x70] sm:$0xff]  ;;  %v6381_v39 = vsub.s32 1, %v237_v35  ;;  %v6383_v40 = vsub.s32 3, %v237_v35 }
  0x2f   :  { %v224_v61 = vpack.c.bf16 %v215_v60, %v214_v59  ;;  %v217_v63 = vld [vmem:[%s10392_s0 + $0x78] sm:$0xff]  ;;  %10442 = vst [vmem:[#allocation46_spill] sm:$0xff] %v6374_v36  ;;  %v234_v37 = vld [vmem:[%s10394_s2] sm:$0xf]  ;;  %10443 = vst [vmem:[#allocation47_spill] sm:$0xff] %v6379_v38 }
  0x30   :  { %v225_v32 = vpack.c.bf16 %v217_v63, %v216_v62  ;;  %10444 = vst [vmem:[#allocation48_spill] sm:$0xff] %v6381_v39  ;;  %10445 = vst [vmem:[#allocation49_spill] sm:$0xff] %v6383_v40  ;;  %v6389_v41 = vrot.slane %v234_v37, %v6379_v38  ;;  %v6392_v42 = vrot.slane %v234_v37, %v6381_v39 }
  0x31   :  { %4838 = vmatmul.mubr.msk.bf16.vlgmr.msra.gmra.mrb[0].mxu0 %vm296_vm0, %v218_v43  ;;  %4846 = vmatmul.mubr.msk.bf16.vlgmr.msra.gmra.mrb[0].mxu1 %vm296_vm0, %v218_v43  ;;  %v6395_v43 = vrot.slane %v234_v37, %v6383_v40 }
  0x32   :  { %363 = vmatprep.mubr.bf16.mxu0 %v6053_v33  ;;  %476 = vmatprep.mubr.bf16.mxu1 %v6053_v33 }
  0x39   :  { %4839 = vmatmul.mubr.msk.bf16.gmra.mrb[4].mxu0 %vm296_vm0, %v219_v46  ;;  %4847 = vmatmul.mubr.msk.bf16.gmra.mrb[4].mxu1 %vm296_vm0, %v219_v46 }
  0x3a   :  { %373 = vmatprep.mubr.bf16.mxu0 %v6053_v33  ;;  %486 = vmatprep.mubr.bf16.mxu1 %v6053_v33 }
  0x41   :  { %4840 = vmatmul.mubr.msk.bf16.gmra.mrb[8].mxu0 %vm296_vm0, %v220_v49  ;;  %4848 = vmatmul.mubr.msk.bf16.gmra.mrb[8].mxu1 %vm296_vm0, %v220_v49 }
  0x42   :  { %383 = vmatprep.mubr.bf16.mxu0 %v6053_v33  ;;  %496 = vmatprep.mubr.bf16.mxu1 %v6053_v33 }
  0x49   :  { %4841 = vmatmul.mubr.msk.bf16.gmra.mrb[12].mxu0 %vm296_vm0, %v221_v52  ;;  %4849 = vmatmul.mubr.msk.bf16.gmra.mrb[12].mxu1 %vm296_vm0, %v221_v52 }
  0x4a   :  { %393 = vmatprep.mubr.bf16.mxu0 %v6053_v33  ;;  %506 = vmatprep.mubr.bf16.mxu1 %v6053_v33 }
  0x51   :  { %4842 = vmatmul.mubr.msk.bf16.gmra.mrb[16].mxu0 %vm296_vm0, %v222_v55  ;;  %4850 = vmatmul.mubr.msk.bf16.gmra.mrb[16].mxu1 %vm296_vm0, %v222_v55 }
  0x52   :  { %403 = vmatprep.mubr.bf16.mxu0 %v6053_v33  ;;  %516 = vmatprep.mubr.bf16.mxu1 %v6053_v33 }
  0x59   :  { %4843 = vmatmul.mubr.msk.bf16.gmra.mrb[20].mxu0 %vm296_vm0, %v223_v58  ;;  %4851 = vmatmul.mubr.msk.bf16.gmra.mrb[20].mxu1 %vm296_vm0, %v223_v58 }
  0x5a   :  { %413 = vmatprep.mubr.bf16.mxu0 %v6053_v33  ;;  %526 = vmatprep.mubr.bf16.mxu1 %v6053_v33 }
  0x61   :  { %4844 = vmatmul.mubr.msk.bf16.gmra.mrb[24].mxu0 %vm296_vm0, %v224_v61  ;;  %4852 = vmatmul.mubr.msk.bf16.gmra.mrb[24].mxu1 %vm296_vm0, %v224_v61 }
  0x62   :  { %423 = vmatprep.mubr.bf16.mxu0 %v6053_v33  ;;  %536 = vmatprep.mubr.bf16.mxu1 %v6053_v33  ;;  %v6386_v33 = vrot.slane %v234_v37, %v6374_v36 }
  0x69   :  { %4845 = vmatmul.mubr.msk.bf16.gmra.mrb[28].mxu0 %vm296_vm0, %v225_v32  ;;  %4853 = vmatmul.mubr.msk.bf16.gmra.mrb[28].mxu1 %vm296_vm0, %v225_v32 }
 0x104   :  { %v355_v44 = vpop.f32.mrb[0].mxu0  ;;  %v468_v46 = vpop.f32.mrb[0].mxu1 }
 0x105   :  { %v6398_v45 = vadd.f32 %v355_v44, %v6386_v33  ;;  %v357_v47 = vpop.f32.mrb[1].mxu0  ;;  %v6401_v48 = vadd.f32 %v468_v46, %v6389_v41  ;;  %v470_v50 = vpop.f32.mrb[1].mxu1 }
 0x106   :  { %v6404_v49 = vadd.f32 %v357_v47, %v6392_v42  ;;  %v359_v51 = vpop.f32.mrb[2].mxu0  ;;  %v6408_v53 = vadd.f32 %v470_v50, %v6395_v43  ;;  %v472_v55 = vpop.f32.mrb[2].mxu1 }
 0x107   :  { %v611_v52 = vmin.f32 %v6398_v45, 20.0  ;;  %v6411_v54 = vadd.f32 %v359_v51, %v6386_v33  ;;  %v361_v56 = vpop.f32.mrb[3].mxu0  ;;  %v613_v57 = vmin.f32 %v6401_v48, 20.0  ;;  %v474_v59 = vpop.f32.mrb[3].mxu1  ;;  %v6418_v34 = vadd.f32 %v472_v55, %v6389_v41 }
 0x108   :  { %v612_v58 = vmin.f32 %v6404_v49, 20.0  ;;  %v614_v61 = vmin.f32 %v6408_v53, 20.0  ;;  %v6421_v37 = vadd.f32 %v361_v56, %v6392_v42  ;;  %v6424_v44 = vadd.f32 %v474_v59, %v6395_v43 }
 0x109   :  { %v675_v60 = vmul.f32 1.442695, %v611_v52  ;;  %v679_v62 = vmul.f32 1.442695, %v613_v57  ;;  %v615_v32 = vmin.f32 %v6411_v54, 20.0  ;;  %v617_v47 = vmin.f32 %v6418_v34, 20.0 }
 0x10a   :  { %v677_v63 = vmul.f32 1.442695, %v612_v58  ;;  %v681_v35 = vmul.f32 1.442695, %v614_v61  ;;  %v616_v51 = vmin.f32 %v6421_v37, 20.0  ;;  %v618_v58 = vmin.f32 %v6424_v44, 20.0 }
 0x10b   :  { %5267 = vpow2.f32 %v675_v60  ;;  %v683_v46 = vmul.f32 1.442695, %v615_v32  ;;  %v687_v55 = vmul.f32 1.442695, %v617_v47  ;;  %vm547_vm2 = vcmp.gt.f32.partialorder %v6398_v45, 20.0 }
 0x10c   :  { %5269 = vpow2.f32 %v679_v62  ;;  %v365_v50 = vpop.f32.mrb[4].mxu0  ;;  %v478_v52 = vpop.f32.mrb[4].mxu1  ;;  %v685_v61 = vmul.f32 1.442695, %v616_v51  ;;  %v689_v23 = vmul.f32 1.442695, %v618_v58 }
 0x10d   :  { %5271 = vpow2.f32 %v677_v63  ;;  %v367_v57 = vpop.f32.mrb[5].mxu0  ;;  %v6430_v56 = vadd.f32 %v365_v50, %v6386_v33  ;;  %v480_v60 = vpop.f32.mrb[5].mxu1  ;;  %v6433_v62 = vadd.f32 %v478_v52, %v6389_v41  ;;  %vm549_vm3 = vcmp.gt.f32.partialorder %v6401_v48, 20.0 }
 0x10e   :  { %5273 = vpow2.f32 %v681_v35  ;;  %v369_v59 = vpop.f32.mrb[6].mxu0  ;;  %v482_v32 = vpop.f32.mrb[6].mxu1  ;;  %v6440_v47 = vadd.f32 %v367_v57, %v6392_v42  ;;  %vm548_vm5 = vcmp.gt.f32.partialorder %v6404_v49, 20.0  ;;  %vm550_vm7 = vcmp.gt.f32.partialorder %v6408_v53, 20.0 }
 0x10f   :  { %5275 = vpow2.f32 %v683_v46  ;;  %v371_v63 = vpop.f32.mrb[7].mxu0  ;;  %v619_v7 = vmin.f32 %v6430_v56, 20.0  ;;  %v6436_v31 = vpop.f32.mrb[7].mxu1  ;;  %v621_v35 = vmin.f32 %v6433_v62, 20.0  ;;  %v6443_v46 = vadd.f32 %v480_v60, %v6395_v43 }
 0x110   :  { %5277 = vpow2.f32 %v687_v55  ;;  %v620_v15 = vmin.f32 %v6440_v47, 20.0  ;;  %v6466_v13 = vadd.f32 %v482_v32, %v6389_v41  ;;  %vm551_vm10 = vcmp.gt.f32.partialorder %v6411_v54, 20.0 }
 0x111   :  { %5279 = vpow2.f32 %v685_v61  ;;  %v691_v50 = vmul.f32 1.442695, %v619_v7  ;;  %v695_v51 = vmul.f32 1.442695, %v621_v35  ;;  %v622_v57 = vmin.f32 %v6443_v46, 20.0 }
 0x112   :  { %5281 = vpow2.f32 %v689_v23  ;;  %v6454_v7 = vadd.f32 %v369_v59, %v6386_v33  ;;  %v693_v12 = vmul.f32 1.442695, %v620_v15  ;;  %vm553_vm12 = vcmp.gt.f32.partialorder %v6418_v34, 20.0 }
 0x113   :  { %5283 = vpow2.f32 %v691_v50  ;;  %v6485_v2 = vmul.f32 1.442695, %v622_v57  ;;  %vm552_vm13 = vcmp.gt.f32.partialorder %v6421_v37, 20.0  ;;  %vm554_vm15 = vcmp.gt.f32.partialorder %v6424_v44, 20.0 }
 0x114   :  { %v6445_v52 = vpop.f32.mrb[8].mxu0  ;;  %v6448_v22 = vpop.f32.mrb[8].mxu1  ;;  %5285 = vpow2.f32 %v695_v51  ;;  %v6476_v51 = vadd.f32 %v371_v63, %v6392_v42 }
 0x115   :  { %v5268_v58 = vpop.eup %5267  ;;  %v6450_v55 = vpop.f32.mrb[9].mxu0 }
 0x116   :  { %v5270_v6 = vpop.eup %5269  ;;  %v803_v30 = vadd.f32 1.0, %v5268_v58  ;;  %v6456_v60 = vpop.f32.mrb[9].mxu1  ;;  %v806_v35 = vmul.f32 -0.5, %v5268_v58  ;;  %v809_v29 = vand.u32 2147483647, %v5268_v58 }
 0x117   :  { %v6458_v23 = vpop.f32.mrb[10].mxu0  ;;  %v6460_v61 = vpop.eup %5271  ;;  %v821_v14 = vadd.f32 1.0, %v5270_v6  ;;  %v824_v21 = vmul.f32 -0.5, %v5270_v6  ;;  %v827_v19 = vand.u32 2147483647, %v5270_v6 }
 0x118   :  { %v6462_v5 = vpop.eup %5273  ;;  %5287 = vlog2.f32 %v803_v30  ;;  %v812_v50 = vadd.f32 1.0, %v6460_v61  ;;  %v6468_v59 = vpop.f32.mrb[10].mxu1  ;;  %v815_v28 = vmul.f32 -0.5, %v6460_v61  ;;  %v807_v11 = vadd.f32 1.0, %v806_v35 }
 0x119   :  { %v6470_v20 = vpop.f32.mrb[11].mxu0  ;;  %v6472_v4 = vpop.eup %5275  ;;  %5289 = vlog2.f32 %v821_v14  ;;  %v830_v32 = vadd.f32 1.0, %v6462_v5  ;;  %v825_v18 = vadd.f32 1.0, %v824_v21  ;;  %v833_v14 = vmul.f32 -0.5, %v6462_v5 }
 0x11a   :  { %v6478_v30 = vpop.f32.mrb[11].mxu1  ;;  %5291 = vlog2.f32 %v812_v50  ;;  %v6482_v27 = vpop.eup %5277  ;;  %vm6489_vm1 = vcmp.lt.f32.partialorder %v809_v29, 0.0004427343  ;;  %v818_v50 = vand.u32 2147483647, %v6460_v61  ;;  %v839_v26 = vadd.f32 1.0, %v6472_v4 }
 0x11b   :  { %v6487_v15 = vpop.eup %5279  ;;  %5293 = vlog2.f32 %v830_v32  ;;  %v842_v3 = vmul.f32 -0.5, %v6472_v4  ;;  %v816_v21 = vadd.f32 1.0, %v815_v28  ;;  %v834_v57 = vadd.f32 1.0, %v833_v14 }
 0x11c   :  { %v6496_v10 = vpop.f32.mrb[12].mxu0  ;;  %v836_v35 = vand.u32 2147483647, %v6462_v5  ;;  %5295 = vpow2.f32 %v693_v12  ;;  %v6500_v29 = vpop.f32.mrb[12].mxu1  ;;  %v845_v32 = vand.u32 2147483647, %v6472_v4  ;;  %v808_v14 = vmul.f32 %v5268_v58, %v807_v11 }
 0x11d   :  { %v6502_v17 = vpop.eup %5281  ;;  %5297 = vlog2.f32 %v839_v26  ;;  %v857_v1 = vadd.f32 1.0, %v6482_v27  ;;  %v860_v25 = vmul.f32 -0.5, %v6482_v27  ;;  %v6508_v9 = vpop.f32.mrb[13].mxu0  ;;  %v826_v16 = vmul.f32 %v5270_v6, %v825_v18 }
 0x11e   :  { %10448 = vst [vmem:[#allocation50_spill] sm:$0xff] %v6508_v9  ;;  %v6510_v28 = vpop.f32.mrb[13].mxu1  ;;  %vm6512_vm4 = vcmp.lt.f32.partialorder %v827_v19, 0.0004427343  ;;  %v848_v26 = vadd.f32 1.0, %v6487_v15  ;;  %v6518_v0 = vpop.f32.mrb[14].mxu0  ;;  %v817_v19 = vmul.f32 %v6460_v61, %v816_v21  ;;  %v835_v36 = vmul.f32 %v6462_v5, %v834_v57 }
 0x11f   :  { %10449 = vst [vmem:[#allocation51_spill] sm:$0xff] %v6510_v28  ;;  %10452 = vst [vmem:[#allocation52_spill] sm:$0xff] %v6518_v0  ;;  %v6520_v24 = vpop.eup %5283  ;;  %v843_v8 = vadd.f32 1.0, %v842_v3  ;;  %5299 = vlog2.f32 %v857_v1  ;;  %v863_v40 = vand.u32 2147483647, %v6482_v27  ;;  %v851_v39 = vmul.f32 -0.5, %v6487_v15 }
 0x120   :  { %v6524_v11 = vpop.f32.mrb[14].mxu1  ;;  %v6526_v6 = vpop.f32.mrb[15].mxu0  ;;  %vm6531_vm6 = vcmp.lt.f32.partialorder %v818_v50, 0.0004427343  ;;  %5301 = vlog2.f32 %v848_v26  ;;  %v866_v1 = vadd.f32 1.0, %v6502_v17  ;;  %v861_v50 = vadd.f32 1.0, %v860_v25 }
 0x121   :  { %10453 = vst [vmem:[#allocation53_spill] sm:$0xff] %v6524_v11  ;;  %10454 = vst [vmem:[#allocation54_spill] sm:$0xff] %v6526_v6  ;;  %v6528_v18 = vpop.eup %5285  ;;  %v6537_v3 = vpop.f32.mrb[15].mxu1  ;;  %vm6540_vm8 = vcmp.lt.f32.partialorder %v836_v35, 0.0004427343  ;;  %v869_v26 = vmul.f32 -0.5, %v6502_v17  ;;  %v844_v57 = vmul.f32 %v6472_v4, %v843_v8 }
 0x122   :  { %10457 = vst [vmem:[#allocation55_spill] sm:$0xff] %v6537_v3  ;;  %v5288_v38 = vpop.eup %5287  ;;  %vm6544_vm9 = vcmp.lt.f32.partialorder %v845_v32, 0.0004427343  ;;  %5303 = vlog2.f32 %v866_v1  ;;  %v875_v3 = vadd.f32 1.0, %v6520_v24  ;;  %vm6552_vm11 = vcmp.lt.f32.partialorder %v863_v40, 0.0004427343 }
 0x123   :  { %v5290_v21 = vpop.eup %5289  ;;  %v805_v11 = vmul.f32 0.6931472, %v5288_v38  ;;  %v852_v32 = vadd.f32 1.0, %v851_v39  ;;  %v854_v25 = vand.u32 2147483647, %v6487_v15 }
 0x124   :  { %v5292_v0 = vpop.eup %5291  ;;  %v823_v5 = vmul.f32 0.6931472, %v5290_v21  ;;  %v6557_v28 = vpop.f32.mrb[16].mxu0  ;;  %5305 = vlog2.f32 %v875_v3  ;;  %v878_v21 = vmul.f32 -0.5, %v6520_v24  ;;  %v872_v63 = vand.u32 2147483647, %v6502_v17 }
 0x125   :  { %v811_v38 = vsel %vm6489_vm1, %v808_v14, %v805_v11  ;;  %v814_v1 = vmul.f32 0.6931472, %v5292_v0  ;;  %v6563_v9 = vpop.f32.mrb[16].mxu1  ;;  %v6565_v4 = vpop.f32.mrb[17].mxu0  ;;  %v862_v0 = vmul.f32 %v6482_v27, %v861_v50  ;;  %v870_v27 = vadd.f32 1.0, %v869_v26 }
 0x126   :  { %v5294_v8 = vpop.eup %5293  ;;  %v6570_v39 = vsel %vm547_vm2, %v6398_v45, %v811_v38  ;;  %v829_v40 = vsel %vm6512_vm4, %v826_v16, %v823_v5  ;;  %v6577_v14 = vpop.f32.mrb[17].mxu1  ;;  %vm6599_vm14 = vcmp.lt.f32.partialorder %v854_v25, 0.0004427343  ;;  %vm6616_vm0 = vcmp.lt.f32.partialorder %v872_v63, 0.0004427343 }
 0x127   :  { %10464 = vst [vmem:[#allocation56_spill] sm:$0xff] %v6570_v39  ;;  %v6579_v11 = vpop.f32.mrb[18].mxu0  ;;  %v6581_v3 = vpop.eup %5295  ;;  %v6586_v45 = vsel %vm549_vm3, %v6401_v48, %v829_v40  ;;  %v820_v16 = vsel %vm6531_vm6, %v817_v19, %v814_v1  ;;  %v832_v12 = vmul.f32 0.6931472, %v5294_v8  ;;  %v881_v48 = vand.u32 2147483647, %v6520_v24 }
 0x128   :  { %10465 = vst [vmem:[#allocation57_spill] sm:$0xff] %v6579_v11  ;;  %10466 = vst [vmem:[#allocation58_spill] sm:$0xff] %v6586_v45  ;;  %v6590_v50 = vpop.f32.mrb[18].mxu1  ;;  %v6592_v5 = vpop.f32.mrb[19].mxu0  ;;  %v6597_v39 = vsel %vm548_vm5, %v6404_v49, %v820_v16  ;;  %v893_v19 = vadd.f32 1.0, %v6528_v18  ;;  %v853_v8 = vmul.f32 %v6487_v15, %v852_v32  ;;  %v879_v49 = vadd.f32 1.0, %v878_v21 }
 0x129   :  { %v5298_v38 = vpop.eup %5297  ;;  %10467 = vst [vmem:[#allocation59_spill] sm:$0xff] %v6597_v39  ;;  %v6606_v58 = vpop.f32.mrb[19].mxu1  ;;  %v838_v26 = vsel %vm6540_vm8, %v835_v36, %v832_v12  ;;  %vm555_vm1 = vcmp.gt.f32.partialorder %v6430_v56, 20.0  ;;  %v884_v6 = vadd.f32 1.0, %v6581_v3  ;;  %v871_v21 = vmul.f32 %v6502_v17, %v870_v27 }
 0x12a   :  { %v841_v1 = vmul.f32 0.6931472, %v5298_v38  ;;  %v5300_v40 = vpop.eup %5299  ;;  %v6614_v25 = vsel %vm550_vm7, %v6408_v53, %v838_v26  ;;  %5307 = vlog2.f32 %v893_v19  ;;  %v896_v12 = vmul.f32 -0.5, %v6528_v18 }
 0x12b   :  { %10470 = vst [vmem:[#allocation60_spill] sm:$0xff] %v6614_v25  ;;  %v5302_v36 = vpop.eup %5301  ;;  %v859_v32 = vmul.f32 0.6931472, %v5300_v40  ;;  %vm6631_vm2 = vcmp.lt.f32.partialorder %v881_v48, 0.0004427343  ;;  %5309 = vlog2.f32 %v884_v6  ;;  %v880_v17 = vmul.f32 %v6520_v24, %v879_v49 }
 0x12c   :  { %v847_v15 = vsel %vm6544_vm9, %v844_v57, %v841_v1  ;;  %v850_v63 = vmul.f32 0.6931472, %v5302_v36  ;;  %v6635_v19 = vpop.f32.mrb[20].mxu0  ;;  %v5304_v61 = vpop.eup %5303  ;;  %v899_v27 = vand.u32 2147483647, %v6528_v18  ;;  %5311 = vpow2.f32 %v6485_v2 }
 0x12d   :  { %v6629_v53 = vsel %vm551_vm10, %v6411_v54, %v847_v15  ;;  %v865_v57 = vsel %vm6552_vm11, %v862_v0, %v859_v32  ;;  %v6642_v54 = vpop.f32.mrb[20].mxu1  ;;  %v6644_v26 = vpop.f32.mrb[21].mxu0  ;;  %v868_v35 = vmul.f32 0.6931472, %v5304_v61  ;;  %v10477_v0 = vmin.f32 %v6454_v7, 20.0 }
 0x12e   :  { %10473 = vst [vmem:[#allocation61_spill] sm:$0xff] %v6629_v53  ;;  %v6649_v48 = vsel %vm553_vm12, %v6418_v34, %v865_v57  ;;  %v856_v1 = vsel %vm6599_vm14, %v853_v8, %v850_v63  ;;  %v6655_v49 = vpop.f32.mrb[21].mxu1  ;;  %v6657_v40 = vpop.f32.mrb[22].mxu0  ;;  %v897_v36 = vadd.f32 1.0, %v896_v12  ;;  %v887_v34 = vmul.f32 -0.5, %v6581_v3 }
 0x12f   :  { %10476 = vst [vmem:[#allocation62_spill] sm:$0xff] %v6649_v48  ;;  %v699_v24 = vmul.f32 1.442695, %v10477_v0  ;;  %v5306_v2 = vpop.eup %5305  ;;  %v6662_v6 = vsel %vm552_vm13, %v6421_v37, %v856_v1  ;;  %v625_v11 = vmin.f32 %v6466_v13, 20.0  ;;  %v6666_v8 = vpop.f32.mrb[22].mxu1  ;;  %v874_v32 = vsel %vm6616_vm0, %v871_v21, %v868_v35 }
 0x130   :  { %10478 = vst [vmem:[#allocation63_spill] sm:$0xff] %v6662_v6  ;;  %v6668_v15 = vpop.f32.mrb[23].mxu0  ;;  %v877_v63 = vmul.f32 0.6931472, %v5306_v2  ;;  %v890_v61 = vand.u32 2147483647, %v6581_v3  ;;  %v6678_v37 = vsel %vm554_vm15, %v6424_v44, %v874_v32  ;;  %v6683_v0 = vadd.f32 %v6436_v31, %v6395_v43 }
 0x131   :  { %5313 = vpow2.f32 %v699_v24  ;;  %v6673_v57 = vpop.f32.mrb[23].mxu1  ;;  %10479 = vst [vmem:[#allocation64_spill] sm:$0xff] %v6678_v37  ;;  %v703_v12 = vmul.f32 1.442695, %v625_v11  ;;  %v624_v1 = vmin.f32 %v6476_v51, 20.0  ;;  %v6689_v21 = vadd.f32 %v6445_v52, %v6386_v33 }
 0x132   :  { %v883_v16 = vsel %vm6631_vm2, %v880_v17, %v877_v63  ;;  %v6693_v35 = vadd.f32 %v6448_v22, %v6389_v41  ;;  %v6697_v44 = vadd.f32 %v6450_v55, %v6392_v42  ;;  %v888_v24 = vadd.f32 1.0, %v887_v34 }
 0x133   :  { %v6702_v31 = vsel %vm555_vm1, %v6430_v56, %v883_v16  ;;  %5315 = vpow2.f32 %v703_v12  ;;  %v701_v38 = vmul.f32 1.442695, %v624_v1  ;;  %vm557_vm3 = vcmp.gt.f32.partialorder %v6433_v62, 20.0 }
 0x134   :  { %10480 = vst [vmem:[#allocation65_spill] sm:$0xff] %v6702_v31  ;;  %v5308_v17 = vpop.eup %5307  ;;  %vm6705_vm4 = vcmp.lt.f32.partialorder %v899_v27, 0.0004427343  ;;  %v626_v22 = vmin.f32 %v6683_v0, 20.0  ;;  %v627_v55 = vmin.f32 %v6689_v21, 20.0  ;;  %v6711_v2 = vpop.f32.mrb[24].mxu0  ;;  %v898_v56 = vmul.f32 %v6528_v18, %v897_v36 }
 0x135   :  { %v895_v11 = vmul.f32 0.6931472, %v5308_v17  ;;  %5317 = vpow2.f32 %v701_v38  ;;  %v629_v34 = vmin.f32 %v6693_v35, 20.0  ;;  %v6715_v32 = vpop.f32.mrb[24].mxu1  ;;  %v6717_v63 = vpop.f32.mrb[25].mxu0  ;;  %v628_v16 = vmin.f32 %v6697_v44, 20.0 }
 0x136   :  { %v5310_v27 = vpop.eup %5309  ;;  %vm6719_vm5 = vcmp.lt.f32.partialorder %v890_v61, 0.0004427343  ;;  %v705_v1 = vmul.f32 1.442695, %v626_v22  ;;  %v6724_v48 = vpop.f32.mrb[25].mxu1  ;;  %v889_v38 = vmul.f32 %v6581_v3, %v888_v24  ;;  %v6738_v31 = vadd.f32 %v6456_v60, %v6395_v43 }
 0x137   :  { %10485 = vst [vmem:[#allocation66_spill] sm:$0xff] %v6724_v48  ;;  %v5312_v17 = vpop.eup %5311  ;;  %v901_v18 = vsel %vm6705_vm4, %v898_v56, %v895_v11  ;;  %v886_v36 = vmul.f32 0.6931472, %v5310_v27  ;;  %v707_v45 = vmul.f32 1.442695, %v627_v55  ;;  %v6729_v37 = vpop.f32.mrb[26].mxu0  ;;  %v6745_v3 = vadd.f32 %v6458_v23, %v6386_v33 }
 0x138   :  { %10486 = vst [vmem:[#allocation67_spill] sm:$0xff] %v6729_v37  ;;  %v6734_v61 = vsel %vm557_vm3, %v6433_v62, %v901_v18  ;;  %v902_v22 = vadd.f32 1.0, %v5312_v17  ;;  %v711_v25 = vmul.f32 1.442695, %v629_v34  ;;  %vm556_vm6 = vcmp.gt.f32.partialorder %v6440_v47, 20.0 }
 0x139   :  { %10487 = vst [vmem:[#allocation68_spill] sm:$0xff] %v6734_v61  ;;  %v892_v52 = vsel %vm6719_vm5, %v889_v38, %v886_v36  ;;  %5319 = vpow2.f32 %v705_v1  ;;  %v905_v55 = vmul.f32 -0.5, %v5312_v17  ;;  %v709_v11 = vmul.f32 1.442695, %v628_v16 }
 0x13a   :  { %v6748_v62 = vsel %vm556_vm6, %v6440_v47, %v892_v52  ;;  %5321 = vlog2.f32 %v902_v22  ;;  %v630_v34 = vmin.f32 %v6738_v31, 20.0  ;;  %v908_v12 = vand.u32 2147483647, %v5312_v17 }
 0x13b   :  { %v5314_v24 = vpop.eup %5313  ;;  %10488 = vst [vmem:[#allocation69_spill] sm:$0xff] %v6748_v62  ;;  %5323 = vpow2.f32 %v707_v45  ;;  %v631_v1 = vmin.f32 %v6745_v3, 20.0  ;;  %v906_v23 = vadd.f32 1.0, %v905_v55  ;;  %vm558_vm7 = vcmp.gt.f32.partialorder %v6443_v46, 20.0 }
 0x13c   :  { %v911_v56 = vadd.f32 1.0, %v5314_v24  ;;  %v914_v60 = vmul.f32 -0.5, %v5314_v24  ;;  %5325 = vpow2.f32 %v711_v25  ;;  %v917_v38 = vand.u32 2147483647, %v5314_v24  ;;  %v6752_v25 = vpop.f32.mrb[26].mxu1 }
 0x13d   :  { %v5316_v27 = vpop.eup %5315  ;;  %v713_v22 = vmul.f32 1.442695, %v630_v34  ;;  %v715_v52 = vmul.f32 1.442695, %v631_v1  ;;  %10489 = vst [vmem:[#allocation70_spill] sm:$0xff] %v6752_v25  ;;  %vm559_vm8 = vcmp.gt.f32.partialorder %v6454_v7, 20.0  ;;  %v907_v34 = vmul.f32 %v5312_v17, %v906_v23 }
 0x13e   :  { %5327 = vlog2.f32 %v911_v56  ;;  %v929_v18 = vadd.f32 1.0, %v5316_v27  ;;  %v932_v36 = vmul.f32 -0.5, %v5316_v27  ;;  %v915_v16 = vadd.f32 1.0, %v914_v60 }
 0x13f   :  { %5329 = vpow2.f32 %v709_v11  ;;  %v5318_v47 = vpop.eup %5317  ;;  %v935_v45 = vand.u32 2147483647, %v5316_v27  ;;  %v6756_v56 = vadd.f32 %v6468_v59, %v6389_v41  ;;  %v6760_v11 = vpop.f32.mrb[27].mxu0  ;;  %vm6764_vm9 = vcmp.lt.f32.partialorder %v908_v12, 0.0004427343 }
 0x140   :  { %5331 = vlog2.f32 %v929_v18  ;;  %v920_v61 = vadd.f32 1.0, %v5318_v47  ;;  %v933_v62 = vadd.f32 1.0, %v932_v36  ;;  %v923_v55 = vmul.f32 -0.5, %v5318_v47  ;;  %10490 = vst [vmem:[#allocation71_spill] sm:$0xff] %v6760_v11 }
 0x141   :  { %5333 = vpow2.f32 %v713_v22  ;;  %v926_v18 = vand.u32 2147483647, %v5318_v47  ;;  %v916_v59 = vmul.f32 %v5314_v24, %v915_v16  ;;  %vm6768_vm10 = vcmp.lt.f32.partialorder %v917_v38, 0.0004427343  ;;  %v6782_v38 = vpop.f32.mrb[27].mxu1 }
 0x142   :  { %5335 = vlog2.f32 %v920_v61  ;;  %vm6772_vm11 = vcmp.lt.f32.partialorder %v935_v45, 0.0004427343  ;;  %vm561_vm12 = vcmp.gt.f32.partialorder %v6466_v13, 20.0  ;;  %v934_v12 = vmul.f32 %v5316_v27, %v933_v62  ;;  %10497 = vst [vmem:[#allocation72_spill] sm:$0xff] %v6782_v38 }
 0x143   :  { %v6762_v60 = vpop.eup %5319  ;;  %5337 = vpow2.f32 %v715_v52  ;;  %v633_v24 = vmin.f32 %v6756_v56, 20.0  ;;  %v924_v16 = vadd.f32 1.0, %v923_v55  ;;  %v6789_v39 = vadd.f32 %v6470_v20, %v6392_v42 }
 0x144   :  { %v5322_v36 = vpop.eup %5321  ;;  %v938_v53 = vadd.f32 1.0, %v6762_v60  ;;  %v941_v23 = vmul.f32 -0.5, %v6762_v60  ;;  %vm560_vm13 = vcmp.gt.f32.partialorder %v6476_v51, 20.0  ;;  %vm6794_vm14 = vcmp.lt.f32.partialorder %v926_v18, 0.0004427343 }
 0x145   :  { %v6777_v6 = vpop.eup %5323  ;;  %v904_v17 = vmul.f32 0.6931472, %v5322_v36  ;;  %v944_v38 = vand.u32 2147483647, %v6762_v60  ;;  %v719_v18 = vmul.f32 1.442695, %v633_v24 }
 0x146   :  { %v6784_v52 = vpop.eup %5325  ;;  %5339 = vlog2.f32 %v938_v53  ;;  %v947_v45 = vadd.f32 1.0, %v6777_v6  ;;  %v942_v1 = vadd.f32 1.0, %v941_v23  ;;  %vm562_vm15 = vcmp.gt.f32.partialorder %v6683_v0, 20.0 }
 0x147   :  { %v910_v62 = vsel %vm6764_vm9, %v907_v34, %v904_v17  ;;  %v965_v53 = vadd.f32 1.0, %v6784_v52  ;;  %v950_v34 = vmul.f32 -0.5, %v6777_v6  ;;  %v6810_v17 = vadd.f32 %v6478_v30, %v6395_v43 }
 0x148   :  { %v5328_v36 = vpop.eup %5327  ;;  %v6805_v20 = vsel %vm558_vm7, %v6443_v46, %v910_v62  ;;  %5341 = vlog2.f32 %v947_v45  ;;  %v968_v48 = vmul.f32 -0.5, %v6784_v52  ;;  %v925_v30 = vmul.f32 %v5318_v47, %v924_v16  ;;  %v6840_v16 = vpop.f32.mrb[28].mxu1 }
 0x149   :  { %v6800_v55 = vpop.eup %5329  ;;  %10500 = vst [vmem:[#allocation73_spill] sm:$0xff] %v6805_v20  ;;  %v913_v11 = vmul.f32 0.6931472, %v5328_v36  ;;  %5343 = vlog2.f32 %v965_v53  ;;  %vm6825_vm0 = vcmp.lt.f32.partialorder %v944_v38, 0.0004427343  ;;  %vm563_vm1 = vcmp.gt.f32.partialorder %v6689_v21, 20.0 }
 0x14a   :  { %v5332_v25 = vpop.eup %5331  ;;  %v956_v46 = vadd.f32 1.0, %v6800_v55  ;;  %v959_v36 = vmul.f32 -0.5, %v6800_v55  ;;  %v953_v62 = vand.u32 2147483647, %v6777_v6  ;;  %v971_v53 = vand.u32 2147483647, %v6784_v52 }
 0x14b   :  { %v919_v37 = vsel %vm6768_vm10, %v916_v59, %v913_v11  ;;  %v6817_v45 = vpop.eup %5333  ;;  %v931_v24 = vmul.f32 0.6931472, %v5332_v25  ;;  %v951_v59 = vadd.f32 1.0, %v950_v34  ;;  %v632_v25 = vmin.f32 %v6789_v39, 20.0  ;;  %v6838_v38 = vpop.f32.mrb[28].mxu0  ;;  %10505 = vst [vmem:[#allocation76_spill] sm:$0xff] %v6840_v16 }
 0x14c   :  { %v6822_v23 = vsel %vm559_vm8, %v6454_v7, %v919_v37  ;;  %v5336_v11 = vpop.eup %5335  ;;  %5345 = vlog2.f32 %v956_v46  ;;  %v974_v47 = vadd.f32 1.0, %v6817_v45  ;;  %10504 = vst [vmem:[#allocation75_spill] sm:$0xff] %v6838_v38  ;;  %v943_v46 = vmul.f32 %v6762_v60, %v942_v1  ;;  %v6869_v1 = vpop.f32.mrb[29].mxu1 }
 0x14d   :  { %10501 = vst [vmem:[#allocation74_spill] sm:$0xff] %v6822_v23  ;;  %v6831_v20 = vpop.eup %5337  ;;  %v937_v7 = vsel %vm6772_vm11, %v934_v12, %v931_v24  ;;  %v922_v37 = vmul.f32 0.6931472, %v5336_v11  ;;  %vm565_vm2 = vcmp.gt.f32.partialorder %v6693_v35, 20.0  ;;  %v969_v61 = vadd.f32 1.0, %v968_v48  ;;  %v6849_v24 = vpop.f32.mrb[29].mxu0 }
 0x14e   :  { %v6845_v34 = vsel %vm561_vm12, %v6466_v13, %v937_v7  ;;  %v960_v12 = vadd.f32 1.0, %v959_v36  ;;  %5347 = vlog2.f32 %v974_v47  ;;  %v977_v23 = vmul.f32 -0.5, %v6817_v45 }
 0x14f   :  { %10506 = vst [vmem:[#allocation77_spill] sm:$0xff] %v6845_v34  ;;  %v928_v11 = vsel %vm6794_vm14, %v925_v30, %v922_v37  ;;  %v983_v16 = vadd.f32 1.0, %v6831_v20  ;;  %v952_v60 = vmul.f32 %v6777_v6, %v951_v59  ;;  %vm6861_vm3 = vcmp.lt.f32.partialorder %v953_v62, 0.0004427343  ;;  %v10528_v34 = vld [vmem:[#allocation55_spill] sm:$0xff] }
 0x150   :  { %v5340_v38 = vpop.eup %5339  ;;  %v6858_v13 = vsel %vm560_vm13, %v6476_v51, %v928_v11  ;;  %vm6865_vm4 = vcmp.lt.f32.partialorder %v971_v53, 0.0004427343  ;;  %vm564_vm5 = vcmp.gt.f32.partialorder %v6697_v44, 20.0  ;;  %v962_v30 = vand.u32 2147483647, %v6800_v55 }
 0x151   :  { %10507 = vst [vmem:[#allocation78_spill] sm:$0xff] %v6858_v13  ;;  %v940_v36 = vmul.f32 0.6931472, %v5340_v38  ;;  %5349 = vlog2.f32 %v983_v16  ;;  %v717_v51 = vmul.f32 1.442695, %v632_v25  ;;  %v970_v6 = vmul.f32 %v6784_v52, %v969_v61 }
 0x152   :  { %v5342_v7 = vpop.eup %5341  ;;  %v961_v59 = vmul.f32 %v6800_v55, %v960_v12  ;;  %v980_v62 = vand.u32 2147483647, %v6817_v45  ;;  %5351 = vpow2.f32 %v719_v18  ;;  %v978_v38 = vadd.f32 1.0, %v977_v23  ;;  %v6886_v18 = vpop.f32.mrb[30].mxu0 }
 0x153   :  { %v5344_v53 = vpop.eup %5343  ;;  %v946_v37 = vsel %vm6825_vm0, %v943_v46, %v940_v36  ;;  %v949_v47 = vmul.f32 0.6931472, %v5342_v7  ;;  %5353 = vpow2.f32 %v717_v51  ;;  %vm566_vm6 = vcmp.gt.f32.partialorder %v6738_v31, 20.0  ;;  %v10513_v46 = vld [vmem:[#allocation50_spill] sm:$0xff] }
 0x154   :  { %v6881_v16 = vsel %vm562_vm15, %v6683_v0, %v946_v37  ;;  %v967_v25 = vmul.f32 0.6931472, %v5344_v53  ;;  %v986_v52 = vmul.f32 -0.5, %v6831_v20  ;;  %v634_v55 = vmin.f32 %v6810_v17, 20.0 }
 0x155   :  { %10512 = vst [vmem:[#allocation79_spill] sm:$0xff] %v6881_v16  ;;  %v955_v22 = vsel %vm6861_vm3, %v952_v60, %v949_v47  ;;  %v6892_v23 = vadd.f32 %v6496_v10, %v6386_v33  ;;  %v6896_v0 = vadd.f32 %v6500_v29, %v6389_v41  ;;  %v6900_v61 = vadd.f32 %v10513_v46, %v6392_v42  ;;  %v10515_v10 = vld [vmem:[#allocation51_spill] sm:$0xff] }
 0x156   :  { %v5346_v12 = vpop.eup %5345  ;;  %v6905_v11 = vsel %vm563_vm1, %v6689_v21, %v955_v22  ;;  %v973_v60 = vsel %vm6865_vm4, %v970_v6, %v967_v25  ;;  %v721_v48 = vmul.f32 1.442695, %v634_v55  ;;  %v6911_v36 = vadd.f32 %v10515_v10, %v6395_v43  ;;  %v6923_v22 = vpop.f32.mrb[30].mxu1 }
 0x157   :  { %10514 = vst [vmem:[#allocation50_spill] sm:$0xff] %v6905_v11  ;;  %v6916_v29 = vsel %vm565_vm2, %v6693_v35, %v973_v60  ;;  %v958_v51 = vmul.f32 0.6931472, %v5346_v12  ;;  %v989_v7 = vand.u32 2147483647, %v6831_v20  ;;  %v635_v53 = vmin.f32 %v6892_v23, 20.0 }
 0x158   :  { %10516 = vst [vmem:[#allocation51_spill] sm:$0xff] %v6916_v29  ;;  %vm963_vm7 = vcmp.lt.f32.partialorder %v962_v30, 0.0004427343  ;;  %v987_v21 = vadd.f32 1.0, %v986_v52  ;;  %5355 = vpow2.f32 %v721_v48  ;;  %v637_v27 = vmin.f32 %v6896_v0, 20.0  ;;  %v5348_v6 = vpop.eup %5347 }
 0x159   :  { %v964_v37 = vsel %vm963_vm7, %v961_v59, %v958_v51  ;;  %v979_v47 = vmul.f32 %v6817_v45, %v978_v38  ;;  %v723_v25 = vmul.f32 1.442695, %v635_v53  ;;  %v636_v55 = vmin.f32 %v6900_v61, 20.0 }
 0x15a   :  { %v6928_v35 = vsel %vm564_vm5, %v6697_v44, %v964_v37  ;;  %v976_v46 = vmul.f32 0.6931472, %v5348_v6  ;;  %v727_v30 = vmul.f32 1.442695, %v637_v27  ;;  %v638_v52 = vmin.f32 %v6911_v36, 20.0 }
 0x15b   :  { %10517 = vst [vmem:[#allocation80_spill] sm:$0xff] %v6928_v35  ;;  %v5350_v12 = vpop.eup %5349  ;;  %vm981_vm8 = vcmp.lt.f32.partialorder %v980_v62, 0.0004427343  ;;  %vm567_vm9 = vcmp.gt.f32.partialorder %v6745_v3, 20.0  ;;  %vm6932_vm10 = vcmp.lt.f32.partialorder %v989_v7, 0.0004427343  ;;  %5357 = vpow2.f32 %v723_v25 }
 0x15c   :  { %v5352_v59 = vpop.eup %5351  ;;  %v982_v38 = vsel %vm981_vm8, %v979_v47, %v976_v46  ;;  %v985_v60 = vmul.f32 0.6931472, %v5350_v12  ;;  %v988_v48 = vmul.f32 %v6831_v20, %v987_v21  ;;  %5359 = vpow2.f32 %v727_v30  ;;  %v10521_v7 = vld [vmem:[#allocation52_spill] sm:$0xff]  ;;  %v10522_v20 = vld [vmem:[#allocation53_spill] sm:$0xff]  ;;  %v6957_v47 = vpop.f32.mrb[31].mxu0  ;;  %v10524_v12 = vld [vmem:[#allocation54_spill] sm:$0xff] }
 0x15d   :  { %v5354_v44 = vpop.eup %5353  ;;  %v6940_v10 = vsel %vm566_vm6, %v6738_v31, %v982_v38  ;;  %v1001_v62 = vadd.f32 1.0, %v5352_v59  ;;  %v725_v51 = vmul.f32 1.442695, %v636_v55  ;;  %v6944_v53 = vadd.f32 %v10521_v7, %v6386_v33  ;;  %v6966_v7 = vpop.f32.mrb[31].mxu1 }
 0x15e   :  { %10520 = vst [vmem:[#allocation81_spill] sm:$0xff] %v6940_v10  ;;  %v991_v27 = vsel %vm6932_vm10, %v988_v48, %v985_v60  ;;  %v992_v6 = vadd.f32 1.0, %v5354_v44  ;;  %v729_v37 = vmul.f32 1.442695, %v638_v52  ;;  %v6950_v21 = vadd.f32 %v10522_v20, %v6389_v41  ;;  %10525 = vst [vmem:[#allocation53_spill] sm:$0xff] %v6966_v7 }
 0x15f   :  { %v6955_v31 = vsel %vm567_vm9, %v6745_v3, %v991_v27  ;;  %5361 = vlog2.f32 %v1001_v62  ;;  %v1004_v25 = vmul.f32 -0.5, %v5352_v59  ;;  %v995_v55 = vmul.f32 -0.5, %v5354_v44 }
 0x160   :  { %10523 = vst [vmem:[#allocation52_spill] sm:$0xff] %v6955_v31  ;;  %5363 = vlog2.f32 %v992_v6  ;;  %v639_v46 = vmin.f32 %v6944_v53, 20.0  ;;  %v641_v52 = vmin.f32 %v6950_v21, 20.0  ;;  %v6963_v45 = vadd.f32 %v10524_v12, %v6392_v42 }
 0x161   :  { %5365 = vpow2.f32 %v725_v51  ;;  %v1007_v38 = vand.u32 2147483647, %v5352_v59  ;;  %v998_v48 = vand.u32 2147483647, %v5354_v44  ;;  %vm569_vm11 = vcmp.gt.f32.partialorder %v6756_v56, 20.0 }
 0x162   :  { %v5356_v30 = vpop.eup %5355  ;;  %5367 = vpow2.f32 %v729_v37  ;;  %v731_v60 = vmul.f32 1.442695, %v639_v46  ;;  %v640_v62 = vmin.f32 %v6963_v45, 20.0  ;;  %v1005_v51 = vadd.f32 1.0, %v1004_v25 }
 0x163   :  { %v1010_v3 = vadd.f32 1.0, %v5356_v30  ;;  %v996_v6 = vadd.f32 1.0, %v995_v55  ;;  %v1013_v20 = vmul.f32 -0.5, %v5356_v30  ;;  %v735_v12 = vmul.f32 1.442695, %v641_v52 }
 0x164   :  { %vm6971_vm12 = vcmp.lt.f32.partialorder %v1007_v38, 0.0004427343  ;;  %vm568_vm13 = vcmp.gt.f32.partialorder %v6789_v39, 20.0  ;;  %v6979_v16 = vadd.f32 %v10528_v34, %v6395_v43  ;;  %vm6981_vm14 = vcmp.lt.f32.partialorder %v998_v48, 0.0004427343 }
 0x165   :  { %v5358_v27 = vpop.eup %5357  ;;  %5369 = vlog2.f32 %v1010_v3  ;;  %v733_v3 = vmul.f32 1.442695, %v640_v62  ;;  %v1006_v38 = vmul.f32 %v5352_v59, %v1005_v51  ;;  %vm570_vm15 = vcmp.gt.f32.partialorder %v6810_v17, 20.0 }
 0x166   :  { %v6969_v37 = vpop.eup %5359  ;;  %v1019_v29 = vadd.f32 1.0, %v5358_v27  ;;  %5371 = vpow2.f32 %v731_v60  ;;  %v1022_v55 = vmul.f32 -0.5, %v5358_v27  ;;  %v997_v60 = vmul.f32 %v5354_v44, %v996_v6 }
 0x167   :  { %v1037_v46 = vadd.f32 1.0, %v6969_v37  ;;  %v1040_v31 = vmul.f32 -0.5, %v6969_v37  ;;  %v1014_v13 = vadd.f32 1.0, %v1013_v20  ;;  %v1016_v34 = vand.u32 2147483647, %v5356_v30 }
 0x168   :  { %5373 = vlog2.f32 %v1019_v29  ;;  %v642_v29 = vmin.f32 %v6979_v16, 20.0  ;;  %v6992_v59 = vadd.f32 %v6557_v28, %v6386_v33  ;;  %v1023_v51 = vadd.f32 1.0, %v1022_v55 }
 0x169   :  { %v5362_v52 = vpop.eup %5361  ;;  %5375 = vlog2.f32 %v1037_v46  ;;  %v1025_v6 = vand.u32 2147483647, %v5358_v27  ;;  %vm571_vm0 = vcmp.gt.f32.partialorder %v6892_v23, 20.0  ;;  %v1041_v28 = vadd.f32 1.0, %v1040_v31 }
 0x16a   :  { %v5364_v11 = vpop.eup %5363  ;;  %v1003_v35 = vmul.f32 0.6931472, %v5362_v52  ;;  %5377 = vpow2.f32 %v735_v12  ;;  %vm7013_vm1 = vcmp.lt.f32.partialorder %v1016_v34, 0.0004427343  ;;  %vm573_vm2 = vcmp.gt.f32.partialorder %v6896_v0, 20.0 }
 0x16b   :  { %v6987_v48 = vpop.eup %5365  ;;  %v994_v7 = vmul.f32 0.6931472, %v5364_v11  ;;  %5379 = vpow2.f32 %v733_v3  ;;  %v1015_v25 = vmul.f32 %v5356_v30, %v1014_v13  ;;  %v737_v31 = vmul.f32 1.442695, %v642_v29 }
 0x16c   :  { %v6994_v44 = vpop.eup %5367  ;;  %v1009_v62 = vsel %vm6971_vm12, %v1006_v38, %v1003_v35  ;;  %v1028_v20 = vadd.f32 1.0, %v6987_v48  ;;  %v1043_v52 = vand.u32 2147483647, %v6969_v37  ;;  %v643_v38 = vmin.f32 %v6992_v59, 20.0 }
 0x16d   :  { %v7002_v11 = vsel %vm569_vm11, %v6756_v56, %v1009_v62  ;;  %v1000_v12 = vsel %vm6981_vm14, %v997_v60, %v994_v7  ;;  %v1046_v46 = vadd.f32 1.0, %v6994_v44  ;;  %v1031_v7 = vmul.f32 -0.5, %v6987_v48 }
 0x16e   :  { %v7011_v35 = vsel %vm568_vm13, %v6789_v39, %v1000_v12  ;;  %5381 = vlog2.f32 %v1028_v20  ;;  %v1049_v39 = vmul.f32 -0.5, %v6994_v44  ;;  %v1024_v60 = vmul.f32 %v5358_v27, %v1023_v51 }
 0x16f   :  { %v5370_v56 = vpop.eup %5369  ;;  %5383 = vlog2.f32 %v1046_v46  ;;  %vm7024_vm3 = vcmp.lt.f32.partialorder %v1025_v6, 0.0004427343  ;;  %v1042_v13 = vmul.f32 %v6969_v37, %v1041_v28  ;;  %v1034_v20 = vand.u32 2147483647, %v6987_v48 }
 0x170   :  { %v7019_v55 = vpop.eup %5371  ;;  %v1012_v3 = vmul.f32 0.6931472, %v5370_v56  ;;  %5385 = vpow2.f32 %v737_v31  ;;  %v739_v12 = vmul.f32 1.442695, %v643_v38  ;;  %vm572_vm4 = vcmp.gt.f32.partialorder %v6900_v61, 20.0 }
 0x171   :  { %v1055_v30 = vadd.f32 1.0, %v7019_v55  ;;  %v1032_v37 = vadd.f32 1.0, %v1031_v7  ;;  %v1050_v10 = vadd.f32 1.0, %v1049_v39  ;;  %v7043_v56 = vadd.f32 %v6563_v9, %v6389_v41 }
 0x172   :  { %v5374_v62 = vpop.eup %5373  ;;  %v1018_v29 = vsel %vm7013_vm1, %v1015_v25, %v1012_v3  ;;  %vm1044_vm5 = vcmp.lt.f32.partialorder %v1043_v52, 0.0004427343  ;;  %v1058_v31 = vmul.f32 -0.5, %v7019_v55  ;;  %vm574_vm6 = vcmp.gt.f32.partialorder %v6911_v36, 20.0 }
 0x173   :  { %v5376_v46 = vpop.eup %5375  ;;  %v7036_v27 = vsel %vm570_vm15, %v6810_v17, %v1018_v29  ;;  %v1021_v51 = vmul.f32 0.6931472, %v5374_v62  ;;  %5387 = vlog2.f32 %v1055_v30  ;;  %vm7063_vm7 = vcmp.lt.f32.partialorder %v1034_v20, 0.0004427343 }
 0x174   :  { %v7039_v6 = vpop.eup %5377  ;;  %v1039_v28 = vmul.f32 0.6931472, %v5376_v46  ;;  %5389 = vpow2.f32 %v739_v12  ;;  %vm575_vm8 = vcmp.gt.f32.partialorder %v6944_v53, 20.0  ;;  %v645_v30 = vmin.f32 %v7043_v56, 20.0 }
 0x175   :  { %v7045_v25 = vpop.eup %5379  ;;  %v1027_v17 = vsel %vm7024_vm3, %v1024_v60, %v1021_v51  ;;  %v1073_v7 = vadd.f32 1.0, %v7039_v6  ;;  %v1052_v60 = vand.u32 2147483647, %v6994_v44  ;;  %v1059_v29 = vadd.f32 1.0, %v1058_v31 }
 0x176   :  { %v7054_v3 = vsel %vm571_vm0, %v6892_v23, %v1027_v17  ;;  %v1045_v39 = vsel %vm1044_vm5, %v1042_v13, %v1039_v28  ;;  %v1064_v9 = vadd.f32 1.0, %v7045_v25  ;;  %v1033_v23 = vmul.f32 %v6987_v48, %v1032_v37 }
 0x177   :  { %v7061_v38 = vsel %vm573_vm2, %v6896_v0, %v1045_v39  ;;  %5391 = vlog2.f32 %v1073_v7  ;;  %v1051_v13 = vmul.f32 %v6994_v44, %v1050_v10  ;;  %v1076_v20 = vmul.f32 -0.5, %v7039_v6 }
 0x178   :  { %v5382_v34 = vpop.eup %5381  ;;  %5393 = vlog2.f32 %v1064_v9  ;;  %v7075_v12 = vadd.f32 %v6565_v4, %v6392_v42  ;;  %v1067_v51 = vmul.f32 -0.5, %v7045_v25  ;;  %v743_v48 = vmul.f32 1.442695, %v645_v30 }
 0x179   :  { %v5384_v62 = vpop.eup %5383  ;;  %v1030_v0 = vmul.f32 0.6931472, %v5382_v34  ;;  %v7080_v44 = vadd.f32 %v6577_v14, %v6395_v43  ;;  %vm1053_vm9 = vcmp.lt.f32.partialorder %v1052_v60, 0.0004427343  ;;  %v1061_v28 = vand.u32 2147483647, %v7019_v55 }
 0x17a   :  { %v1048_v46 = vmul.f32 0.6931472, %v5384_v62  ;;  %v644_v10 = vmin.f32 %v7075_v12, 20.0  ;;  %v7086_v17 = vpop.eup %5385  ;;  %vm577_vm10 = vcmp.gt.f32.partialorder %v6950_v21, 20.0  ;;  %v1079_v14 = vand.u32 2147483647, %v7039_v6 }
 0x17b   :  { %v1036_v37 = vsel %vm7063_vm7, %v1033_v23, %v1030_v0  ;;  %5395 = vpow2.f32 %v743_v48  ;;  %v1060_v9 = vmul.f32 %v7019_v55, %v1059_v29  ;;  %v1077_v52 = vadd.f32 1.0, %v1076_v20 }
 0x17c   :  { %v7091_v4 = vsel %vm572_vm4, %v6900_v61, %v1036_v37  ;;  %v1054_v31 = vsel %vm1053_vm9, %v1051_v13, %v1048_v46  ;;  %vm576_vm11 = vcmp.gt.f32.partialorder %v6963_v45, 20.0  ;;  %v1082_v61 = vadd.f32 1.0, %v7086_v17 }
 0x17d   :  { %v5388_v7 = vpop.eup %5387  ;;  %v7098_v39 = vsel %vm574_vm6, %v6911_v36, %v1054_v31  ;;  %v1068_v23 = vadd.f32 1.0, %v1067_v51  ;;  %v741_v13 = vmul.f32 1.442695, %v644_v10  ;;  %v646_v30 = vmin.f32 %v7080_v44, 20.0  ;;  %v10537_v36 = vld [vmem:[#allocation57_spill] sm:$0xff] }
 0x17e   :  { %v7103_v60 = vpop.eup %5389  ;;  %v1057_v34 = vmul.f32 0.6931472, %v5388_v7  ;;  %vm1062_vm12 = vcmp.lt.f32.partialorder %v1061_v28, 0.0004427343  ;;  %5397 = vlog2.f32 %v1082_v61  ;;  %v7109_v0 = vadd.f32 %v10537_v36, %v6386_v33 }
 0x17f   :  { %v1091_v62 = vadd.f32 1.0, %v7103_v60  ;;  %vm7111_vm13 = vcmp.lt.f32.partialorder %v1079_v14, 0.0004427343  ;;  %v1070_v20 = vand.u32 2147483647, %v7045_v25  ;;  %5399 = vpow2.f32 %v741_v13 }
 0x180   :  { %v1063_v55 = vsel %vm1062_vm12, %v1060_v9, %v1057_v34  ;;  %v1078_v48 = vmul.f32 %v7039_v6, %v1077_v52  ;;  %v745_v37 = vmul.f32 1.442695, %v646_v30  ;;  %v1069_v31 = vmul.f32 %v7045_v25, %v1068_v23 }
 0x181   :  { %v5392_v46 = vpop.eup %5391  ;;  %v7119_v51 = vsel %vm575_vm8, %v6944_v53, %v1063_v55  ;;  %5401 = vlog2.f32 %v1091_v62  ;;  %v1085_v14 = vmul.f32 -0.5, %v7086_v17  ;;  %v1094_v7 = vmul.f32 -0.5, %v7103_v60 }
 0x182   :  { %v5394_v28 = vpop.eup %5393  ;;  %v1075_v10 = vmul.f32 0.6931472, %v5392_v46  ;;  %5403 = vpow2.f32 %v745_v37  ;;  %v647_v61 = vmin.f32 %v7109_v0, 20.0  ;;  %v7128_v53 = vadd.f32 %v6590_v50, %v6389_v41 }
 0x183   :  { %v1066_v9 = vmul.f32 0.6931472, %v5394_v28  ;;  %vm1071_vm14 = vcmp.lt.f32.partialorder %v1070_v20, 0.0004427343  ;;  %v7134_v52 = vadd.f32 %v6592_v5, %v6392_v42  ;;  %v7138_v25 = vadd.f32 %v6606_v58, %v6395_v43 }
 0x184   :  { %v1081_v6 = vsel %vm7111_vm13, %v1078_v48, %v1075_v10  ;;  %v1088_v50 = vand.u32 2147483647, %v7086_v17  ;;  %v747_v13 = vmul.f32 1.442695, %v647_v61  ;;  %v1086_v5 = vadd.f32 1.0, %v1085_v14 }
 0x185   :  { %v7143_v34 = vsel %vm577_vm10, %v6950_v21, %v1081_v6  ;;  %v1072_v23 = vsel %vm1071_vm14, %v1069_v31, %v1066_v9  ;;  %v5396_v30 = vpop.eup %5395  ;;  %v649_v36 = vmin.f32 %v7128_v53, 20.0  ;;  %v648_v58 = vmin.f32 %v7134_v52, 20.0 }
 0x186   :  { %v7149_v62 = vsel %vm576_vm11, %v6963_v45, %v1072_v23  ;;  %v1095_v55 = vadd.f32 1.0, %v1094_v7  ;;  %v1109_v29 = vadd.f32 1.0, %v5396_v30  ;;  %5405 = vpow2.f32 %v747_v13 }
 0x187   :  { %v751_v21 = vmul.f32 1.442695, %v649_v36  ;;  %v749_v20 = vmul.f32 1.442695, %v648_v58  ;;  %v650_v46 = vmin.f32 %v7138_v25, 20.0  ;;  %vm578_vm15 = vcmp.gt.f32.partialorder %v6979_v16, 20.0 }
 0x188   :  { %v5398_v48 = vpop.eup %5397  ;;  %v1097_v37 = vand.u32 2147483647, %v7103_v60  ;;  %5407 = vlog2.f32 %v1109_v29  ;;  %v1087_v10 = vmul.f32 %v7086_v17, %v1086_v5  ;;  %vm1089_vm0 = vcmp.lt.f32.partialorder %v1088_v50, 0.0004427343 }
 0x189   :  { %v7156_v45 = vpop.eup %5399  ;;  %v1084_v28 = vmul.f32 0.6931472, %v5398_v48  ;;  %5409 = vpow2.f32 %v751_v21  ;;  %v1096_v14 = vmul.f32 %v7103_v60, %v1095_v55  ;;  %v753_v9 = vmul.f32 1.442695, %v650_v46 }
 0x18a   :  { %v1100_v7 = vadd.f32 1.0, %v7156_v45  ;;  %v7163_v61 = vadd.f32 %v6635_v19, %v6386_v33  ;;  %v1112_v13 = vmul.f32 -0.5, %v5396_v30  ;;  %5411 = vpow2.f32 %v749_v20 }
 0x18b   :  { %v5402_v31 = vpop.eup %5401  ;;  %v1090_v6 = vsel %vm1089_vm0, %v1087_v10, %v1084_v28  ;;  %vm1098_vm1 = vcmp.lt.f32.partialorder %v1097_v37, 0.0004427343  ;;  %v7174_v60 = vadd.f32 %v6642_v54, %v6389_v41  ;;  %vm579_vm2 = vcmp.gt.f32.partialorder %v6992_v59, 20.0 }
 0x18c   :  { %v1093_v23 = vmul.f32 0.6931472, %v5402_v31  ;;  %v7165_v36 = vpop.eup %5403  ;;  %v7170_v17 = vsel %vm578_vm15, %v6979_v16, %v1090_v6  ;;  %5413 = vlog2.f32 %v1100_v7  ;;  %v1115_v58 = vand.u32 2147483647, %v5396_v30 }
 0x18d   :  { %v1118_v50 = vadd.f32 1.0, %v7165_v36  ;;  %5415 = vpow2.f32 %v753_v9  ;;  %v651_v55 = vmin.f32 %v7163_v61, 20.0  ;;  %v1113_v16 = vadd.f32 1.0, %v1112_v13 }
 0x18e   :  { %v1099_v19 = vsel %vm1098_vm1, %v1096_v14, %v1093_v23  ;;  %v1103_v29 = vmul.f32 -0.5, %v7156_v45  ;;  %v653_v20 = vmin.f32 %v7174_v60, 20.0  ;;  %v7188_v46 = vadd.f32 %v6644_v26, %v6392_v42 }
 0x18f   :  { %v7179_v5 = vsel %vm579_vm2, %v6992_v59, %v1099_v19  ;;  %5417 = vlog2.f32 %v1118_v50  ;;  %v755_v54 = vmul.f32 1.442695, %v651_v55  ;;  %vm581_vm3 = vcmp.gt.f32.partialorder %v7043_v56, 20.0 }
 0x190   :  { %v7183_v21 = vpop.eup %5405  ;;  %vm580_vm4 = vcmp.gt.f32.partialorder %v7075_v12, 20.0  ;;  %v1121_v59 = vmul.f32 -0.5, %v7165_v36  ;;  %vm7194_vm5 = vcmp.lt.f32.partialorder %v1115_v58, 0.0004427343  ;;  %v759_v10 = vmul.f32 1.442695, %v653_v20 }
 0x191   :  { %v1127_v48 = vadd.f32 1.0, %v7183_v21  ;;  %5419 = vpow2.f32 %v755_v54  ;;  %v652_v31 = vmin.f32 %v7188_v46, 20.0  ;;  %v1114_v7 = vmul.f32 %v5396_v30, %v1113_v16 }
 0x192   :  { %v5408_v37 = vpop.eup %5407  ;;  %v1104_v9 = vadd.f32 1.0, %v1103_v29  ;;  %v1106_v6 = vand.u32 2147483647, %v7156_v45  ;;  %v7205_v13 = vadd.f32 %v6655_v49, %v6395_v43  ;;  %vm582_vm6 = vcmp.gt.f32.partialorder %v7080_v44, 20.0 }
 0x193   :  { %v7199_v14 = vpop.eup %5409  ;;  %v1111_v26 = vmul.f32 0.6931472, %v5408_v37  ;;  %5421 = vlog2.f32 %v1127_v48  ;;  %v1122_v58 = vadd.f32 1.0, %v1121_v59  ;;  %v757_v30 = vmul.f32 1.442695, %v652_v31 }
 0x194   :  { %v1145_v23 = vadd.f32 1.0, %v7199_v14  ;;  %5423 = vpow2.f32 %v759_v10  ;;  %v7207_v19 = vpop.eup %5411  ;;  %v1124_v29 = vand.u32 2147483647, %v7165_v36  ;;  %v1130_v49 = vmul.f32 -0.5, %v7183_v21 }
 0x195   :  { %v1117_v50 = vsel %vm7194_vm5, %v1114_v7, %v1111_v26  ;;  %v1105_v20 = vmul.f32 %v7156_v45, %v1104_v9  ;;  %v1148_v48 = vmul.f32 -0.5, %v7199_v14  ;;  %v1136_v37 = vadd.f32 1.0, %v7207_v19 }
 0x196   :  { %v5414_v55 = vpop.eup %5413  ;;  %v7215_v16 = vsel %vm581_vm3, %v7043_v56, %v1117_v50  ;;  %5425 = vlog2.f32 %v1145_v23  ;;  %vm1107_vm7 = vcmp.lt.f32.partialorder %v1106_v6, 0.0004427343  ;;  %vm583_vm8 = vcmp.gt.f32.partialorder %v7109_v0, 20.0 }
 0x197   :  { %10542 = vst [vmem:[#allocation54_spill] sm:$0xff] %v7215_v16  ;;  %v1102_v54 = vmul.f32 0.6931472, %v5414_v55  ;;  %v7222_v59 = vpop.eup %5415  ;;  %5427 = vpow2.f32 %v757_v30  ;;  %v654_v56 = vmin.f32 %v7205_v13, 20.0  ;;  %v7228_v28 = vadd.f32 %v6657_v40, %v6386_v33 }
 0x198   :  { %v1123_v45 = vmul.f32 %v7165_v36, %v1122_v58  ;;  %v1133_v26 = vand.u32 2147483647, %v7183_v21  ;;  %5429 = vlog2.f32 %v1136_v37  ;;  %v1131_v6 = vadd.f32 1.0, %v1130_v49 }
 0x199   :  { %v5418_v10 = vpop.eup %5417  ;;  %v1108_v31 = vsel %vm1107_vm7, %v1105_v20, %v1102_v54  ;;  %v1154_v23 = vadd.f32 1.0, %v7222_v59  ;;  %vm1125_vm9 = vcmp.lt.f32.partialorder %v1124_v29, 0.0004427343  ;;  %vm585_vm10 = vcmp.gt.f32.partialorder %v7128_v53, 20.0 }
 0x19a   :  { %v7235_v7 = vsel %vm580_vm4, %v7075_v12, %v1108_v31  ;;  %v1120_v9 = vmul.f32 0.6931472, %v5418_v10  ;;  %v1149_v40 = vadd.f32 1.0, %v1148_v48  ;;  %v1139_v50 = vmul.f32 -0.5, %v7207_v19 }
 0x19b   :  { %v761_v30 = vmul.f32 1.442695, %v654_v56  ;;  %v7240_v36 = vpop.eup %5419  ;;  %5431 = vlog2.f32 %v1154_v23  ;;  %v1157_v55 = vmul.f32 -0.5, %v7222_v59  ;;  %v655_v12 = vmin.f32 %v7228_v28, 20.0 }
 0x19c   :  { %v1126_v58 = vsel %vm1125_vm9, %v1123_v45, %v1120_v9  ;;  %vm7249_vm11 = vcmp.lt.f32.partialorder %v1133_v26, 0.0004427343  ;;  %v1151_v20 = vand.u32 2147483647, %v7199_v14  ;;  %v1163_v48 = vadd.f32 1.0, %v7240_v36 }
 0x19d   :  { %v5422_v54 = vpop.eup %5421  ;;  %v7247_v49 = vsel %vm582_vm6, %v7080_v44, %v1126_v58  ;;  %v1132_v10 = vmul.f32 %v7183_v21, %v1131_v6  ;;  %vm584_vm12 = vcmp.gt.f32.partialorder %v7134_v52, 20.0  ;;  %v1142_v31 = vand.u32 2147483647, %v7207_v19 }
 0x19e   :  { %10543 = vst [vmem:[#allocation55_spill] sm:$0xff] %v7247_v49  ;;  %v7255_v37 = vpop.eup %5423  ;;  %v1129_v56 = vmul.f32 0.6931472, %v5422_v54  ;;  %5433 = vpow2.f32 %v761_v30  ;;  %v1150_v44 = vmul.f32 %v7199_v14, %v1149_v40  ;;  %v1140_v45 = vadd.f32 1.0, %v1139_v50 }
 0x19f   :  { %5435 = vlog2.f32 %v1163_v48  ;;  %v1181_v26 = vadd.f32 1.0, %v7255_v37  ;;  %v1158_v58 = vadd.f32 1.0, %v1157_v55  ;;  %v1160_v54 = vand.u32 2147483647, %v7222_v59 }
 0x1a0   :  { %v5426_v9 = vpop.eup %5425  ;;  %v1135_v23 = vsel %vm7249_vm11, %v1132_v10, %v1129_v56  ;;  %v763_v16 = vmul.f32 1.442695, %v655_v12  ;;  %vm586_vm13 = vcmp.gt.f32.partialorder %v7138_v25, 20.0  ;;  %v1166_v14 = vmul.f32 -0.5, %v7240_v36 }
 0x1a1   :  { %v7268_v21 = vsel %vm583_vm8, %v7109_v0, %v1135_v23  ;;  %v1147_v6 = vmul.f32 0.6931472, %v5426_v9  ;;  %5437 = vlog2.f32 %v1181_v26  ;;  %v7272_v40 = vpop.eup %5427  ;;  %vm1152_vm14 = vcmp.lt.f32.partialorder %v1151_v20, 0.0004427343 }
 0x1a2   :  { %vm7274_vm15 = vcmp.lt.f32.partialorder %v1142_v31, 0.0004427343  ;;  %5439 = vpow2.f32 %v763_v16  ;;  %v7280_v30 = vadd.f32 %v6666_v8, %v6389_v41  ;;  %v5430_v0 = vpop.eup %5429  ;;  %v1141_v12 = vmul.f32 %v7207_v19, %v1140_v45 }
 0x1a3   :  { %v1153_v55 = vsel %vm1152_vm14, %v1150_v44, %v1147_v6  ;;  %v1184_v29 = vmul.f32 -0.5, %v7255_v37  ;;  %v1172_v48 = vadd.f32 1.0, %v7272_v40  ;;  %v1138_v56 = vmul.f32 0.6931472, %v5430_v0 }
 0x1a4   :  { %v7288_v20 = vsel %vm585_vm10, %v7128_v53, %v1153_v55  ;;  %vm7290_vm0 = vcmp.lt.f32.partialorder %v1160_v54, 0.0004427343  ;;  %vm587_vm1 = vcmp.gt.f32.partialorder %v7163_v61, 20.0  ;;  %v1169_v8 = vand.u32 2147483647, %v7240_v36 }
 0x1a5   :  { %10548 = vst [vmem:[#allocation57_spill] sm:$0xff] %v7288_v20  ;;  %v1159_v19 = vmul.f32 %v7222_v59, %v1158_v58  ;;  %v1167_v10 = vadd.f32 1.0, %v1166_v14  ;;  %5441 = vlog2.f32 %v1172_v48  ;;  %v657_v31 = vmin.f32 %v7280_v30, 20.0  ;;  %v5432_v44 = vpop.eup %5431 }
 0x1a6   :  { %v1144_v53 = vsel %vm7274_vm15, %v1141_v12, %v1138_v56  ;;  %v1187_v45 = vand.u32 2147483647, %v7255_v37  ;;  %v7303_v26 = vadd.f32 %v6668_v15, %v6392_v42  ;;  %v7307_v9 = vadd.f32 %v6673_v57, %v6395_v43 }
 0x1a7   :  { %v7312_v59 = vsel %vm584_vm12, %v7134_v52, %v1144_v53  ;;  %v1156_v23 = vmul.f32 0.6931472, %v5432_v44  ;;  %v1185_v58 = vadd.f32 1.0, %v1184_v29  ;;  %v767_v54 = vmul.f32 1.442695, %v657_v31 }
 0x1a8   :  { %v7314_v6 = vpop.eup %5433  ;;  %vm7316_vm2 = vcmp.lt.f32.partialorder %v1169_v8, 0.0004427343  ;;  %v1175_v15 = vmul.f32 -0.5, %v7272_v40  ;;  %v656_v50 = vmin.f32 %v7303_v26, 20.0  ;;  %v658_v57 = vmin.f32 %v7307_v9, 20.0 }
 0x1a9   :  { %v5436_v0 = vpop.eup %5435  ;;  %v1162_v52 = vsel %vm7290_vm0, %v1159_v19, %v1156_v23  ;;  %v1168_v55 = vmul.f32 %v7240_v36, %v1167_v10  ;;  %v1190_v12 = vadd.f32 1.0, %v7314_v6  ;;  %v7329_v29 = vadd.f32 %v6711_v2, %v6386_v33 }
 0x1aa   :  { %v7334_v48 = vsel %vm586_vm13, %v7138_v25, %v1162_v52  ;;  %v1165_v56 = vmul.f32 0.6931472, %v5436_v0  ;;  %5443 = vpow2.f32 %v767_v54  ;;  %v765_v8 = vmul.f32 1.442695, %v656_v50 }
 0x1ab   :  { %10553 = vst [vmem:[#allocation82_spill] sm:$0xff] %v7334_v48  ;;  %v5438_v31 = vpop.eup %5437  ;;  %v1186_v16 = vmul.f32 %v7255_v37, %v1185_v58  ;;  %vm7337_vm3 = vcmp.lt.f32.partialorder %v1187_v45, 0.0004427343  ;;  %5445 = vlog2.f32 %v1190_v12  ;;  %v769_v36 = vmul.f32 1.442695, %v658_v57  ;;  %v10557_v12 = vld [vmem:[#allocation66_spill] sm:$0xff] }
 0x1ac   :  { %v5440_v10 = vpop.eup %5439  ;;  %v1171_v2 = vsel %vm7316_vm2, %v1168_v55, %v1165_v56  ;;  %v1183_v44 = vmul.f32 0.6931472, %v5438_v31  ;;  %v1176_v53 = vadd.f32 1.0, %v1175_v15  ;;  %5447 = vpow2.f32 %v765_v8 }
 0x1ad   :  { %v7346_v25 = vsel %vm587_vm1, %v7163_v61, %v1171_v2  ;;  %v1178_v37 = vand.u32 2147483647, %v7272_v40  ;;  %v1193_v45 = vmul.f32 -0.5, %v7314_v6  ;;  %v1199_v23 = vadd.f32 1.0, %v5440_v10 }
 0x1ae   :  { %vm589_vm4 = vcmp.gt.f32.partialorder %v7174_v60, 20.0  ;;  %v1189_v58 = vsel %vm7337_vm3, %v1186_v16, %v1183_v44  ;;  %5449 = vpow2.f32 %v769_v36  ;;  %v659_v54 = vmin.f32 %v7329_v29, 20.0 }
 0x1af   :  { %v5442_v14 = vpop.eup %5441  ;;  %v7355_v15 = vsel %vm589_vm4, %v7174_v60, %v1189_v58  ;;  %vm588_vm5 = vcmp.gt.f32.partialorder %v7188_v46, 20.0  ;;  %5451 = vlog2.f32 %v1199_v23  ;;  %v7360_v61 = vadd.f32 %v6715_v32, %v6389_v41 }
 0x1b0   :  { %10556 = vst [vmem:[#allocation83_spill] sm:$0xff] %v7355_v15  ;;  %v1174_v50 = vmul.f32 0.6931472, %v5442_v14  ;;  %v1177_v57 = vmul.f32 %v7272_v40, %v1176_v53  ;;  %v771_v0 = vmul.f32 1.442695, %v659_v54  ;;  %v7365_v52 = vadd.f32 %v6717_v63, %v6392_v42 }
 0x1b1   :  { %vm1179_vm6 = vcmp.lt.f32.partialorder %v1178_v37, 0.0004427343  ;;  %v1194_v55 = vadd.f32 1.0, %v1193_v45  ;;  %v661_v60 = vmin.f32 %v7360_v61, 20.0  ;;  %v7370_v56 = vadd.f32 %v10557_v12, %v6395_v43 }
 0x1b2   :  { %v1180_v8 = vsel %vm1179_vm6, %v1177_v57, %v1174_v50  ;;  %v1202_v31 = vmul.f32 -0.5, %v5440_v10  ;;  %5453 = vpow2.f32 %v771_v0  ;;  %v660_v32 = vmin.f32 %v7365_v52, 20.0 }
 0x1b3   :  { %v7374_v40 = vsel %vm588_vm5, %v7188_v46, %v1180_v8  ;;  %v1196_v16 = vand.u32 2147483647, %v7314_v6  ;;  %v775_v63 = vmul.f32 1.442695, %v661_v60  ;;  %v662_v19 = vmin.f32 %v7370_v56, 20.0 }
 0x1b4   :  { %v5444_v36 = vpop.eup %5443  ;;  %vm590_vm7 = vcmp.gt.f32.partialorder %v7205_v13, 20.0  ;;  %v773_v2 = vmul.f32 1.442695, %v660_v32  ;;  %v1195_v53 = vmul.f32 %v7314_v6, %v1194_v55  ;;  %v1205_v37 = vand.u32 2147483647, %v5440_v10  ;;  %v10563_v55 = vld [vmem:[#allocation71_spill] sm:$0xff] }
 0x1b5   :  { %v5446_v44 = vpop.eup %5445  ;;  %v1217_v45 = vadd.f32 1.0, %v5444_v36  ;;  %5455 = vpow2.f32 %v775_v63  ;;  %v1203_v54 = vadd.f32 1.0, %v1202_v31  ;;  %v777_v46 = vmul.f32 1.442695, %v662_v19  ;;  %v10561_v63 = vld [vmem:[#allocation67_spill] sm:$0xff] }
 0x1b6   :  { %v5448_v23 = vpop.eup %5447  ;;  %v1192_v58 = vmul.f32 0.6931472, %v5446_v44  ;;  %5457 = vpow2.f32 %v773_v2  ;;  %vm1197_vm8 = vcmp.lt.f32.partialorder %v1196_v16, 0.0004427343  ;;  %v1220_v14 = vmul.f32 -0.5, %v5444_v36 }
 0x1b7   :  { %5459 = vlog2.f32 %v1217_v45  ;;  %v1208_v50 = vadd.f32 1.0, %v5448_v23  ;;  %vm591_vm9 = vcmp.gt.f32.partialorder %v7228_v28, 20.0  ;;  %v1211_v60 = vmul.f32 -0.5, %v5448_v23 }
 0x1b8   :  { %v5450_v57 = vpop.eup %5449  ;;  %v1198_v0 = vsel %vm1197_vm8, %v1195_v53, %v1192_v58  ;;  %5461 = vpow2.f32 %v777_v46  ;;  %vm7386_vm10 = vcmp.lt.f32.partialorder %v1205_v37, 0.0004427343  ;;  %v1204_v32 = vmul.f32 %v5440_v10, %v1203_v54  ;;  %v10562_v53 = vld [vmem:[#allocation70_spill] sm:$0xff] }
 0x1b9   :  { %v5452_v12 = vpop.eup %5451  ;;  %v7384_v6 = vsel %vm590_vm7, %v7205_v13, %v1198_v0  ;;  %5463 = vlog2.f32 %v1208_v50  ;;  %v1226_v8 = vadd.f32 1.0, %v5450_v57  ;;  %v1229_v16 = vmul.f32 -0.5, %v5450_v57 }
 0x1ba   :  { %10558 = vst [vmem:[#allocation66_spill] sm:$0xff] %v7384_v6  ;;  %v1201_v31 = vmul.f32 0.6931472, %v5452_v12  ;;  %v7392_v19 = vadd.f32 %v10561_v63, %v6386_v33  ;;  %v1221_v2 = vadd.f32 1.0, %v1220_v14  ;;  %v1223_v44 = vand.u32 2147483647, %v5444_v36 }
 0x1bb   :  { %5465 = vlog2.f32 %v1226_v8  ;;  %v7396_v13 = vadd.f32 %v10562_v53, %v6389_v41  ;;  %v1212_v58 = vadd.f32 1.0, %v1211_v60  ;;  %v1214_v46 = vand.u32 2147483647, %v5448_v23  ;;  %v10573_v53 = vld [vmem:[#allocation72_spill] sm:$0xff] }
 0x1bc   :  { %v5454_v37 = vpop.eup %5453  ;;  %v1207_v45 = vsel %vm7386_vm10, %v1204_v32, %v1201_v31  ;;  %v1232_v50 = vand.u32 2147483647, %v5450_v57  ;;  %v1230_v54 = vadd.f32 1.0, %v1229_v16  ;;  %vm593_vm11 = vcmp.gt.f32.partialorder %v7280_v30, 20.0 }
 0x1bd   :  { %v7403_v10 = vsel %vm591_vm9, %v7228_v28, %v1207_v45  ;;  %v1235_v14 = vadd.f32 1.0, %v5454_v37  ;;  %v1238_v0 = vmul.f32 -0.5, %v5454_v37  ;;  %vm592_vm12 = vcmp.gt.f32.partialorder %v7303_v26, 20.0 }
 0x1be   :  { %v663_v12 = vmin.f32 %v7392_v19, 20.0  ;;  %v7410_v8 = vadd.f32 %v10563_v55, %v6392_v42  ;;  %v1222_v31 = vmul.f32 %v5444_v36, %v1221_v2  ;;  %vm7412_vm13 = vcmp.lt.f32.partialorder %v1223_v44, 0.0004427343 }
 0x1bf   :  { %v5456_v60 = vpop.eup %5455  ;;  %5467 = vlog2.f32 %v1235_v14  ;;  %v665_v28 = vmin.f32 %v7396_v13, 20.0  ;;  %v1213_v63 = vmul.f32 %v5448_v23, %v1212_v58  ;;  %vm7419_vm14 = vcmp.lt.f32.partialorder %v1214_v46, 0.0004427343 }
 0x1c0   :  { %v7417_v16 = vpop.eup %5457  ;;  %vm594_vm15 = vcmp.gt.f32.partialorder %v7307_v9, 20.0  ;;  %v1241_v45 = vand.u32 2147483647, %v5454_v37  ;;  %v1253_v55 = vadd.f32 1.0, %v5456_v60  ;;  %v1231_v36 = vmul.f32 %v5450_v57, %v1230_v54 }
 0x1c1   :  { %v5460_v15 = vpop.eup %5459  ;;  %vm7424_vm0 = vcmp.lt.f32.partialorder %v1232_v50, 0.0004427343  ;;  %v1239_v44 = vadd.f32 1.0, %v1238_v0  ;;  %v1244_v14 = vadd.f32 1.0, %v7417_v16  ;;  %v1256_v58 = vmul.f32 -0.5, %v5456_v60 }
 0x1c2   :  { %v7429_v6 = vpop.eup %5461  ;;  %v1219_v23 = vmul.f32 0.6931472, %v5460_v15  ;;  %5469 = vlog2.f32 %v1253_v55  ;;  %v779_v46 = vmul.f32 1.442695, %v663_v12  ;;  %v783_v49 = vmul.f32 1.442695, %v665_v28 }
 0x1c3   :  { %v5464_v20 = vpop.eup %5463  ;;  %5471 = vlog2.f32 %v1244_v14  ;;  %v1262_v48 = vadd.f32 1.0, %v7429_v6  ;;  %v664_v57 = vmin.f32 %v7410_v8, 20.0  ;;  %vm595_vm1 = vcmp.gt.f32.partialorder %v7329_v29, 20.0 }
 0x1c4   :  { %v1225_v50 = vsel %vm7412_vm13, %v1222_v31, %v1219_v23  ;;  %v1210_v54 = vmul.f32 0.6931472, %v5464_v20  ;;  %vm7436_vm2 = vcmp.lt.f32.partialorder %v1241_v45, 0.0004427343  ;;  %v1259_v15 = vand.u32 2147483647, %v5456_v60 }
 0x1c5   :  { %v5466_v55 = vpop.eup %5465  ;;  %v7443_v12 = vsel %vm593_vm11, %v7280_v30, %v1225_v50  ;;  %v1240_v28 = vmul.f32 %v5454_v37, %v1239_v44  ;;  %v1247_v14 = vmul.f32 -0.5, %v7417_v16  ;;  %5473 = vlog2.f32 %v1262_v48 }
 0x1c6   :  { %10572 = vst [vmem:[#allocation67_spill] sm:$0xff] %v7443_v12  ;;  %v1216_v20 = vsel %vm7419_vm14, %v1213_v63, %v1210_v54  ;;  %v1228_v31 = vmul.f32 0.6931472, %v5466_v55  ;;  %v1257_v32 = vadd.f32 1.0, %v1256_v58  ;;  %5475 = vpow2.f32 %v779_v46 }
 0x1c7   :  { %v7451_v45 = vsel %vm592_vm12, %v7303_v26, %v1216_v20  ;;  %vm597_vm3 = vcmp.gt.f32.partialorder %v7360_v61, 20.0  ;;  %v1265_v30 = vmul.f32 -0.5, %v7429_v6  ;;  %5477 = vpow2.f32 %v783_v49  ;;  %v10574_v26 = vld [vmem:[#allocation75_spill] sm:$0xff] }
 0x1c8   :  { %v781_v37 = vmul.f32 1.442695, %v664_v57  ;;  %v1234_v48 = vsel %vm7424_vm0, %v1231_v36, %v1228_v31  ;;  %vm596_vm4 = vcmp.gt.f32.partialorder %v7365_v52, 20.0  ;;  %v1250_v63 = vand.u32 2147483647, %v7417_v16  ;;  %v10575_v36 = vld [vmem:[#allocation76_spill] sm:$0xff] }
 0x1c9   :  { %v7461_v44 = vadd.f32 %v10573_v53, %v6395_v43  ;;  %v7465_v23 = vadd.f32 %v10574_v26, %v6386_v33  ;;  %v5468_v58 = vpop.eup %5467  ;;  %v7470_v49 = vsel %vm594_vm15, %v7307_v9, %v1234_v48  ;;  %v7474_v2 = vadd.f32 %v10575_v36, %v6389_v41 }
 0x1ca   :  { %5479 = vpow2.f32 %v781_v37  ;;  %v7478_v46 = vadd.f32 %v6849_v24, %v6392_v42  ;;  %v1237_v57 = vmul.f32 0.6931472, %v5468_v58  ;;  %vm7480_vm5 = vcmp.lt.f32.partialorder %v1259_v15, 0.0004427343 }
 0x1cb   :  { %v1248_v54 = vadd.f32 1.0, %v1247_v14  ;;  %v666_v55 = vmin.f32 %v7461_v44, 20.0  ;;  %v1258_v20 = vmul.f32 %v5456_v60, %v1257_v32  ;;  %v1266_v9 = vadd.f32 1.0, %v1265_v30 }
 0x1cc   :  { %v667_v31 = vmin.f32 %v7465_v23, 20.0  ;;  %v669_v37 = vmin.f32 %v7474_v2, 20.0  ;;  %v5470_v48 = vpop.eup %5469  ;;  %v1243_v53 = vsel %vm7436_vm2, %v1240_v28, %v1237_v57  ;;  %v1268_v24 = vand.u32 2147483647, %v7429_v6 }
 0x1cd   :  { %v785_v26 = vmul.f32 1.442695, %v666_v55  ;;  %v668_v15 = vmin.f32 %v7478_v46, 20.0  ;;  %v5472_v58 = vpop.eup %5471  ;;  %v7494_v14 = vsel %vm595_vm1, %v7329_v29, %v1243_v53  ;;  %v1255_v60 = vmul.f32 0.6931472, %v5470_v48 }
 0x1ce   :  { %v787_v32 = vmul.f32 1.442695, %v667_v31  ;;  %v791_v30 = vmul.f32 1.442695, %v669_v37  ;;  %v1246_v36 = vmul.f32 0.6931472, %v5472_v58  ;;  %v1249_v12 = vmul.f32 %v7417_v16, %v1248_v54 }
 0x1cf   :  { %5481 = vpow2.f32 %v785_v26  ;;  %v7499_v0 = vadd.f32 %v6869_v1, %v6395_v43  ;;  %v5474_v28 = vpop.eup %5473  ;;  %v1261_v57 = vsel %vm7480_vm5, %v1258_v20, %v1255_v60  ;;  %vm1251_vm6 = vcmp.lt.f32.partialorder %v1250_v63, 0.0004427343 }
 0x1d0   :  { %v1267_v55 = vmul.f32 %v7429_v6, %v1266_v9  ;;  %5483 = vpow2.f32 %v787_v32  ;;  %v5476_v29 = vpop.eup %5475  ;;  %v7507_v31 = vsel %vm597_vm3, %v7360_v61, %v1261_v57  ;;  %v1252_v16 = vsel %vm1251_vm6, %v1249_v12, %v1246_v36 }
 0x1d1   :  { %v1264_v54 = vmul.f32 0.6931472, %v5474_v28  ;;  %5485 = vpow2.f32 %v791_v30  ;;  %v5478_v37 = vpop.eup %5477  ;;  %v7512_v1 = vsel %vm596_vm4, %v7365_v52, %v1252_v16  ;;  %vm1269_vm7 = vcmp.lt.f32.partialorder %v1268_v24, 0.0004427343 }
 0x1d2   :  { %v1271_v63 = vadd.f32 1.0, %v5476_v29  ;;  %v789_v50 = vmul.f32 1.442695, %v668_v15  ;;  %vm598_vm8 = vcmp.gt.f32.partialorder %v7370_v56, 20.0  ;;  %v1289_v20 = vadd.f32 1.0, %v5478_v37 }
 0x1d3   :  { %v1270_v6 = vsel %vm1269_vm7, %v1267_v55, %v1264_v54  ;;  %v670_v9 = vmin.f32 %v7499_v0, 20.0  ;;  %v7521_v48 = vadd.f32 %v6886_v18, %v6386_v33  ;;  %v1274_v52 = vmul.f32 -0.5, %v5476_v29 }
 0x1d4   :  { %v5480_v61 = vpop.eup %5479  ;;  %v7517_v12 = vsel %vm598_vm8, %v7370_v56, %v1270_v6  ;;  %5487 = vlog2.f32 %v1271_v63  ;;  %v1292_v53 = vmul.f32 -0.5, %v5478_v37  ;;  %v1277_v26 = vand.u32 2147483647, %v5476_v29 }
 0x1d5   :  { %5489 = vlog2.f32 %v1289_v20  ;;  %v1280_v24 = vadd.f32 1.0, %v5480_v61  ;;  %v793_v15 = vmul.f32 1.442695, %v670_v9  ;;  %v1283_v58 = vmul.f32 -0.5, %v5480_v61 }
 0x1d6   :  { %5491 = vpow2.f32 %v789_v50  ;;  %v671_v60 = vmin.f32 %v7521_v48, 20.0  ;;  %v1275_v56 = vadd.f32 1.0, %v1274_v52  ;;  %v1293_v30 = vadd.f32 1.0, %v1292_v53 }
 0x1d7   :  { %5493 = vlog2.f32 %v1280_v24  ;;  %v1295_v36 = vand.u32 2147483647, %v5478_v37  ;;  %vm599_vm9 = vcmp.gt.f32.partialorder %v7392_v19, 20.0  ;;  %v1286_v33 = vand.u32 2147483647, %v5480_v61 }
 0x1d8   :  { %5495 = vpow2.f32 %v793_v15  ;;  %vm7532_vm10 = vcmp.lt.f32.partialorder %v1277_v26, 0.0004427343  ;;  %vm601_vm11 = vcmp.gt.f32.partialorder %v7396_v13, 20.0  ;;  %v795_v54 = vmul.f32 1.442695, %v671_v60 }
 0x1d9   :  { %v7524_v32 = vpop.eup %5481  ;;  %vm600_vm12 = vcmp.gt.f32.partialorder %v7410_v8, 20.0  ;;  %v1284_v63 = vadd.f32 1.0, %v1283_v58  ;;  %v7542_v6 = vadd.f32 %v6923_v22, %v6389_v41  ;;  %v1276_v20 = vmul.f32 %v5476_v29, %v1275_v56 }
 0x1da   :  { %v7526_v28 = vpop.eup %5483  ;;  %v1298_v18 = vadd.f32 1.0, %v7524_v32  ;;  %v1294_v9 = vmul.f32 %v5478_v37, %v1293_v30  ;;  %vm7544_vm13 = vcmp.lt.f32.partialorder %v1295_v36, 0.0004427343  ;;  %vm7548_vm14 = vcmp.lt.f32.partialorder %v1286_v33, 0.0004427343  ;;  %v10584_v37 = vld [vmem:[#allocation53_spill] sm:$0xff] }
 0x1db   :  { %v7530_v57 = vpop.eup %5485  ;;  %v1307_v16 = vadd.f32 1.0, %v7526_v28  ;;  %v1301_v26 = vmul.f32 -0.5, %v7524_v32  ;;  %v7555_v15 = vadd.f32 %v6957_v47, %v6392_v42  ;;  %v1310_v29 = vmul.f32 -0.5, %v7526_v28 }
 0x1dc   :  { %5497 = vlog2.f32 %v1298_v18  ;;  %v1325_v50 = vadd.f32 1.0, %v7530_v57  ;;  %v7560_v58 = vadd.f32 %v10584_v37, %v6395_v43  ;;  %v1285_v30 = vmul.f32 %v5480_v61, %v1284_v63 }
 0x1dd   :  { %5499 = vlog2.f32 %v1307_v16  ;;  %v1328_v36 = vmul.f32 -0.5, %v7530_v57  ;;  %v673_v33 = vmin.f32 %v7542_v6, 20.0  ;;  %vm602_vm15 = vcmp.gt.f32.partialorder %v7461_v44, 20.0 }
 0x1de   :  { %v5488_v53 = vpop.eup %5487  ;;  %5501 = vlog2.f32 %v1325_v50  ;;  %v1304_v47 = vand.u32 2147483647, %v7524_v32  ;;  %v1313_v16 = vand.u32 2147483647, %v7526_v28  ;;  %v1302_v50 = vadd.f32 1.0, %v1301_v26 }
 0x1df   :  { %v5490_v41 = vpop.eup %5489  ;;  %v1273_v22 = vmul.f32 0.6931472, %v5488_v53  ;;  %5503 = vpow2.f32 %v795_v54  ;;  %vm603_vm0 = vcmp.gt.f32.partialorder %v7465_v23, 20.0  ;;  %v1311_v53 = vadd.f32 1.0, %v1310_v29 }
 0x1e0   :  { %v7562_v60 = vpop.eup %5491  ;;  %v1291_v56 = vmul.f32 0.6931472, %v5490_v41  ;;  %v799_v41 = vmul.f32 1.442695, %v673_v33  ;;  %v1331_v52 = vand.u32 2147483647, %v7530_v57 }
 0x1e1   :  { %v5494_v18 = vpop.eup %5493  ;;  %v1279_v42 = vsel %vm7532_vm10, %v1276_v20, %v1273_v22  ;;  %v1316_v43 = vadd.f32 1.0, %v7562_v60  ;;  %v1329_v22 = vadd.f32 1.0, %v1328_v36  ;;  %vm7593_vm1 = vcmp.lt.f32.partialorder %v1304_v47, 0.0004427343 }
 0x1e2   :  { %v7575_v61 = vsel %vm599_vm9, %v7392_v19, %v1279_v42  ;;  %v1297_v54 = vsel %vm7544_vm13, %v1294_v9, %v1291_v56  ;;  %v1282_v63 = vmul.f32 0.6931472, %v5494_v18  ;;  %v5496_v55 = vpop.eup %5495  ;;  %vm605_vm2 = vcmp.gt.f32.partialorder %v7474_v2, 20.0 }
 0x1e3   :  { %v7583_v20 = vsel %vm601_vm11, %v7396_v13, %v1297_v54  ;;  %5505 = vlog2.f32 %v1316_v43  ;;  %v1334_v9 = vadd.f32 1.0, %v5496_v55  ;;  %vm7598_vm3 = vcmp.lt.f32.partialorder %v1313_v16, 0.0004427343 }
 0x1e4   :  { %v1288_v19 = vsel %vm7548_vm14, %v1285_v30, %v1282_v63  ;;  %5507 = vpow2.f32 %v799_v41  ;;  %v1319_v29 = vmul.f32 -0.5, %v7562_v60  ;;  %v672_v56 = vmin.f32 %v7555_v15, 20.0 }
 0x1e5   :  { %v7591_v26 = vsel %vm600_vm12, %v7410_v8, %v1288_v19  ;;  %5509 = vlog2.f32 %v1334_v9  ;;  %v1303_v36 = vmul.f32 %v7524_v32, %v1302_v50  ;;  %v1312_v33 = vmul.f32 %v7526_v28, %v1311_v53 }
 0x1e6   :  { %v5498_v13 = vpop.eup %5497  ;;  %v674_v18 = vmin.f32 %v7560_v58, 20.0  ;;  %v1330_v16 = vmul.f32 %v7530_v57, %v1329_v22  ;;  %vm7608_vm4 = vcmp.lt.f32.partialorder %v1331_v52, 0.0004427343  ;;  %v797_v54 = vmul.f32 1.442695, %v672_v56 }
 0x1e7   :  { %v5500_v30 = vpop.eup %5499  ;;  %v1300_v8 = vmul.f32 0.6931472, %v5498_v13  ;;  %v1337_v9 = vmul.f32 -0.5, %v5496_v55  ;;  %v1320_v50 = vadd.f32 1.0, %v1319_v29  ;;  %v1322_v37 = vand.u32 2147483647, %v7562_v60 }
 0x1e8   :  { %v5502_v42 = vpop.eup %5501  ;;  %v1309_v47 = vmul.f32 0.6931472, %v5500_v30  ;;  %v801_v32 = vmul.f32 1.442695, %v674_v18  ;;  %5511 = vpow2.f32 %v797_v54  ;;  %vm604_vm6 = vcmp.gt.f32.partialorder %v7478_v46, 20.0 }
 0x1e9   :  { %v5504_v63 = vpop.eup %5503  ;;  %v1306_v41 = vsel %vm7593_vm1, %v1303_v36, %v1300_v8  ;;  %v1327_v19 = vmul.f32 0.6931472, %v5502_v42  ;;  %v1338_v24 = vadd.f32 1.0, %v1337_v9  ;;  %v1321_v56 = vmul.f32 %v7562_v60, %v1320_v50 }
 0x1ea   :  { %v7617_v28 = vsel %vm602_vm15, %v7461_v44, %v1306_v41  ;;  %v1315_v57 = vsel %vm7598_vm3, %v1312_v33, %v1309_v47  ;;  %v1343_v53 = vadd.f32 1.0, %v5504_v63  ;;  %vm1323_vm5 = vcmp.lt.f32.partialorder %v1322_v37, 0.0004427343 }
 0x1eb   :  { %v7624_v22 = vsel %vm603_vm0, %v7465_v23, %v1315_v57  ;;  %v1333_v52 = vsel %vm7608_vm4, %v1330_v16, %v1327_v19  ;;  %v1340_v23 = vand.u32 2147483647, %v5496_v55  ;;  %v1346_v8 = vmul.f32 -0.5, %v5504_v63 }
 0x1ec   :  { %v7632_v44 = vsel %vm605_vm2, %v7474_v2, %v1333_v52  ;;  %5513 = vlog2.f32 %v1343_v53  ;;  %v1339_v47 = vmul.f32 %v5496_v55, %v1338_v24  ;;  %vm606_vm8 = vcmp.gt.f32.partialorder %v7499_v0, 20.0 }
 0x1ed   :  { %v5506_v13 = vpop.eup %5505  ;;  %5515 = vpow2.f32 %v801_v32  ;;  %vm1341_vm7 = vcmp.lt.f32.partialorder %v1340_v23, 0.0004427343  ;;  %v1347_v60 = vadd.f32 1.0, %v1346_v8  ;;  %v1349_v54 = vand.u32 2147483647, %v5504_v63 }
 0x1ee   :  { %v1318_v29 = vmul.f32 0.6931472, %v5506_v13  ;;  %v5508_v30 = vpop.eup %5507  ;;  %vm607_vm10 = vcmp.gt.f32.partialorder %v7521_v48, 20.0  ;;  %vm609_vm12 = vcmp.gt.f32.partialorder %v7542_v6, 20.0  ;;  %vm608_vm14 = vcmp.gt.f32.partialorder %v7555_v15, 20.0 }
 0x1ef   :  { %v5510_v36 = vpop.eup %5509  ;;  %v1361_v18 = vadd.f32 1.0, %v5508_v30  ;;  %v1364_v19 = vmul.f32 -0.5, %v5508_v30  ;;  %vm1350_vm9 = vcmp.lt.f32.partialorder %v1349_v54, 0.0004427343  ;;  %vm610_vm0 = vcmp.gt.f32.partialorder %v7560_v58, 20.0 }
 0x1f0   :  { %v1324_v33 = vsel %vm1323_vm5, %v1321_v56, %v1318_v29  ;;  %v1336_v2 = vmul.f32 0.6931472, %v5510_v36 }
 0x1f1   :  { %v7637_v42 = vsel %vm604_vm6, %v7478_v46, %v1324_v33  ;;  %5517 = vlog2.f32 %v1361_v18  ;;  %v1348_v46 = vmul.f32 %v5504_v63, %v1347_v60  ;;  %v1365_v52 = vadd.f32 1.0, %v1364_v19 }
 0x1f2   :  { %v1342_v16 = vsel %vm1341_vm7, %v1339_v47, %v1336_v2  ;;  %v5512_v41 = vpop.eup %5511 }
 0x1f3   :  { %v7641_v43 = vsel %vm606_vm8, %v7499_v0, %v1342_v16  ;;  %v1352_v32 = vadd.f32 1.0, %v5512_v41  ;;  %v1367_v0 = vand.u32 2147483647, %v5508_v30  ;;  %v1355_v13 = vmul.f32 -0.5, %v5512_v41 }
 0x1f4   :  { %v1366_v56 = vmul.f32 %v5508_v30, %v1365_v52  ;;  %v1358_v33 = vand.u32 2147483647, %v5512_v41 }
 0x1f5   :  { %5519 = vlog2.f32 %v1352_v32  ;;  %vm1368_vm11 = vcmp.lt.f32.partialorder %v1367_v0, 0.0004427343  ;;  %v1356_v8 = vadd.f32 1.0, %v1355_v13 }
 0x1f6   :  { %v5514_v9 = vpop.eup %5513  ;;  %vm1359_vm13 = vcmp.lt.f32.partialorder %v1358_v33, 0.0004427343 }
 0x1f7   :  { %v5516_v57 = vpop.eup %5515  ;;  %v1345_v50 = vmul.f32 0.6931472, %v5514_v9  ;;  %v1357_v16 = vmul.f32 %v5512_v41, %v1356_v8 }
 0x1f8   :  { %v1370_v55 = vadd.f32 1.0, %v5516_v57  ;;  %v1373_v23 = vmul.f32 -0.5, %v5516_v57 }
 0x1f9   :  { %v1351_v53 = vsel %vm1350_vm9, %v1348_v46, %v1345_v50 }
 0x1fa   :  { %v7645_v37 = vsel %vm607_vm10, %v7521_v48, %v1351_v53  ;;  %5521 = vlog2.f32 %v1370_v55  ;;  %v1374_v18 = vadd.f32 1.0, %v1373_v23  ;;  %v1376_v48 = vand.u32 2147483647, %v5516_v57 }
 0x1fb   :  { %v5518_v24 = vpop.eup %5517 }
 0x1fc   :  { %v1363_v29 = vmul.f32 0.6931472, %v5518_v24  ;;  %v1375_v19 = vmul.f32 %v5516_v57, %v1374_v18  ;;  %vm1377_vm15 = vcmp.lt.f32.partialorder %v1376_v48, 0.0004427343 }
 0x1fe   :  { %v1369_v63 = vsel %vm1368_vm11, %v1366_v56, %v1363_v29 }
 0x1ff   :  { %v7649_v36 = vsel %vm609_vm12, %v7542_v6, %v1369_v63  ;;  %v5520_v2 = vpop.eup %5519 }
 0x200   :  { %v1354_v47 = vmul.f32 0.6931472, %v5520_v2 }
 0x202   :  { %v1360_v30 = vsel %vm1359_vm13, %v1357_v16, %v1354_v47 }
 0x203   :  { %v7653_v9 = vsel %vm608_vm14, %v7555_v15, %v1360_v30 }
 0x204   :  { %v5522_v60 = vpop.eup %5521 }
 0x205   :  { %v1372_v54 = vmul.f32 0.6931472, %v5522_v60 }
 0x207   :  { %v1378_v6 = vsel %vm1377_vm15, %v1375_v19, %v1372_v54 }
 0x208   :  { %v7657_v32 = vsel %vm610_vm0, %v7560_v58, %v1378_v6 }
 0x209   :  { %6035 = dma.done.wait [#allocation5], 16384 }
 0x20a   :  { %6036 = vsyncadd [#allocation5], 4294950912  ;;  %v10591_v41 = vld [vmem:[#allocation59_spill] sm:$0xff]  ;;  %v1482_v53 = vld [vmem:[#allocation2 + $0x18] sm:$0xff] }
 0x20b   :  { %v10592_v50 = vld [vmem:[#allocation63_spill] sm:$0xff]  ;;  %v1479_v57 = vld [vmem:[#allocation2] sm:$0xff]  ;;  %1855 = vmatprep.subr.bf16.mxu1 %v1482_v53  ;;  %v1481_v15 = vld [vmem:[#allocation2 + $0x10] sm:$0xff] }
 0x20c   :  { %v1448_v46 = vpack.c.bf16 %v10592_v50, %v10591_v41  ;;  %v1480_v55 = vld [vmem:[#allocation2 + $0x8] sm:$0xff]  ;;  %v1486_v0 = vld [vmem:[#allocation2 + $0x38] sm:$0xff]  ;;  %1856 = vmatpush1.bf16.msra.mxu1 %v1481_v15  ;;  %v1483_v58 = vld [vmem:[#allocation2 + $0x20] sm:$0xff] }
 0x20d   :  { %1629 = vmatprep.subr.bf16.mxu0 %v1480_v55  ;;  %v1484_v52 = vld [vmem:[#allocation2 + $0x28] sm:$0xff]  ;;  %1857 = vmatprep.subr.bf16.mxu1 %v1486_v0  ;;  %v1485_v13 = vld [vmem:[#allocation2 + $0x30] sm:$0xff]  ;;  %v1490_v29 = vld [vmem:[#allocation2 + $0x58] sm:$0xff] }
 0x20e   :  { %1661 = vmatprep.mubr.bf16.mxu0 %v1448_v46  ;;  %1887 = vmatprep.mubr.bf16.mxu1 %v1448_v46  ;;  %v1488_v24 = vld [vmem:[#allocation2 + $0x48] sm:$0xff]  ;;  %v1487_v56 = vld [vmem:[#allocation2 + $0x40] sm:$0xff]  ;;  %v1489_v23 = vld [vmem:[#allocation2 + $0x50] sm:$0xff] }
 0x20f   :  { %1630 = vmatpush1.bf16.msra.mxu0 %v1479_v57  ;;  %v1492_v63 = vld [vmem:[#allocation2 + $0x68] sm:$0xff]  ;;  %v1494_v8 = vld [vmem:[#allocation2 + $0x78] sm:$0xff]  ;;  %v1491_v33 = vld [vmem:[#allocation2 + $0x60] sm:$0xff] }
 0x210   :  { %1631 = vmatprep.subr.bf16.mxu0 %v1484_v52  ;;  %1858 = vmatpush1.bf16.msra.mxu1 %v1485_v13  ;;  %v1493_v18 = vld [vmem:[#allocation2 + $0x70] sm:$0xff]  ;;  %v1496_v2 = vld [vmem:[#allocation2 + $0x88] sm:$0xff]  ;;  %v1498_v48 = vld [vmem:[#allocation2 + $0x98] sm:$0xff] }
 0x211   :  { %1859 = vmatprep.subr.bf16.mxu1 %v1490_v29  ;;  %v1495_v47 = vld [vmem:[#allocation2 + $0x80] sm:$0xff]  ;;  %v1497_v16 = vld [vmem:[#allocation2 + $0x90] sm:$0xff]  ;;  %v1500_v60 = vld [vmem:[#allocation2 + $0xa8] sm:$0xff] }
 0x212   :  { %v1502_v30 = vld [vmem:[#allocation2 + $0xb8] sm:$0xff]  ;;  %v1499_v54 = vld [vmem:[#allocation2 + $0xa0] sm:$0xff]  ;;  %v1501_v19 = vld [vmem:[#allocation2 + $0xb0] sm:$0xff] }
 0x213   :  { %1632 = vmatpush1.bf16.msra.mxu0 %v1483_v58  ;;  %v1504_v6 = vld [vmem:[#allocation2 + $0xc8] sm:$0xff]  ;;  %v1506_v41 = vld [vmem:[#allocation2 + $0xd8] sm:$0xff]  ;;  %v1503_v50 = vld [vmem:[#allocation2 + $0xc0] sm:$0xff] }
 0x214   :  { %1633 = vmatprep.subr.bf16.mxu0 %v1488_v24  ;;  %1860 = vmatpush1.bf16.msra.mxu1 %v1489_v23  ;;  %v1505_v46 = vld [vmem:[#allocation2 + $0xd0] sm:$0xff]  ;;  %v1508_v55 = vld [vmem:[#allocation2 + $0xe8] sm:$0xff]  ;;  %v1510_v53 = vld [vmem:[#allocation2 + $0xf8] sm:$0xff] }
 0x215   :  { %1861 = vmatprep.subr.bf16.mxu1 %v1494_v8  ;;  %v1507_v57 = vld [vmem:[#allocation2 + $0xe0] sm:$0xff]  ;;  %v1509_v15 = vld [vmem:[#allocation2 + $0xf0] sm:$0xff]  ;;  %v1512_v52 = vld [vmem:[#allocation2 + $0x108] sm:$0xff] }
 0x216   :  { %v1514_v0 = vld [vmem:[#allocation2 + $0x118] sm:$0xff]  ;;  %v1511_v58 = vld [vmem:[#allocation2 + $0x100] sm:$0xff]  ;;  %v1513_v13 = vld [vmem:[#allocation2 + $0x110] sm:$0xff] }
 0x217   :  { %1634 = vmatpush1.bf16.msra.mxu0 %v1487_v56  ;;  %v1516_v24 = vld [vmem:[#allocation2 + $0x128] sm:$0xff]  ;;  %v1518_v29 = vld [vmem:[#allocation2 + $0x138] sm:$0xff]  ;;  %v1515_v56 = vld [vmem:[#allocation2 + $0x120] sm:$0xff] }
 0x218   :  { %1635 = vmatprep.subr.bf16.mxu0 %v1492_v63  ;;  %1862 = vmatpush1.bf16.msra.mxu1 %v1493_v18  ;;  %v1517_v23 = vld [vmem:[#allocation2 + $0x130] sm:$0xff]  ;;  %v1520_v63 = vld [vmem:[#allocation2 + $0x148] sm:$0xff]  ;;  %v1522_v8 = vld [vmem:[#allocation2 + $0x158] sm:$0xff] }
 0x219   :  { %1863 = vmatprep.subr.bf16.mxu1 %v1498_v48  ;;  %v1521_v18 = vld [vmem:[#allocation2 + $0x150] sm:$0xff]  ;;  %v1526_v48 = vld [vmem:[#allocation2 + $0x178] sm:$0xff] }
 0x21b   :  { %1636 = vmatpush1.bf16.msra.mxu0 %v1491_v33  ;;  %v1519_v33 = vld [vmem:[#allocation2 + $0x140] sm:$0xff] }
 0x21c   :  { %1637 = vmatprep.subr.bf16.mxu0 %v1496_v2  ;;  %1864 = vmatpush1.bf16.msra.mxu1 %v1497_v16  ;;  %v1524_v2 = vld [vmem:[#allocation2 + $0x168] sm:$0xff]  ;;  %v1525_v16 = vld [vmem:[#allocation2 + $0x170] sm:$0xff] }
 0x21d   :  { %1865 = vmatprep.subr.bf16.mxu1 %v1502_v30  ;;  %v1530_v30 = vld [vmem:[#allocation2 + $0x198] sm:$0xff] }
 0x21f   :  { %1638 = vmatpush1.bf16.msra.mxu0 %v1495_v47  ;;  %v1523_v47 = vld [vmem:[#allocation2 + $0x160] sm:$0xff] }
 0x220   :  { %1639 = vmatprep.subr.bf16.mxu0 %v1500_v60  ;;  %1866 = vmatpush1.bf16.msra.mxu1 %v1501_v19  ;;  %v1528_v60 = vld [vmem:[#allocation2 + $0x188] sm:$0xff]  ;;  %v1529_v19 = vld [vmem:[#allocation2 + $0x190] sm:$0xff] }
 0x221   :  { %1867 = vmatprep.subr.bf16.mxu1 %v1506_v41  ;;  %v1534_v41 = vld [vmem:[#allocation2 + $0x1b8] sm:$0xff] }
 0x223   :  { %1640 = vmatpush1.bf16.msra.mxu0 %v1499_v54  ;;  %v1527_v54 = vld [vmem:[#allocation2 + $0x180] sm:$0xff] }
 0x224   :  { %1641 = vmatprep.subr.bf16.mxu0 %v1504_v6  ;;  %1868 = vmatpush1.bf16.msra.mxu1 %v1505_v46  ;;  %v1532_v6 = vld [vmem:[#allocation2 + $0x1a8] sm:$0xff]  ;;  %v1533_v46 = vld [vmem:[#allocation2 + $0x1b0] sm:$0xff] }
 0x225   :  { %1869 = vmatprep.subr.bf16.mxu1 %v1510_v53  ;;  %v1538_v53 = vld [vmem:[#allocation2 + $0x1d8] sm:$0xff] }
 0x227   :  { %1642 = vmatpush1.bf16.msra.mxu0 %v1503_v50  ;;  %v1531_v50 = vld [vmem:[#allocation2 + $0x1a0] sm:$0xff] }
 0x228   :  { %1643 = vmatprep.subr.bf16.mxu0 %v1508_v55  ;;  %1870 = vmatpush1.bf16.msra.mxu1 %v1509_v15  ;;  %v1536_v55 = vld [vmem:[#allocation2 + $0x1c8] sm:$0xff]  ;;  %v1537_v15 = vld [vmem:[#allocation2 + $0x1d0] sm:$0xff] }
 0x229   :  { %1871 = vmatprep.subr.bf16.mxu1 %v1514_v0  ;;  %v1542_v0 = vld [vmem:[#allocation2 + $0x1f8] sm:$0xff] }
 0x22b   :  { %1644 = vmatpush1.bf16.msra.mxu0 %v1507_v57  ;;  %v1535_v57 = vld [vmem:[#allocation2 + $0x1c0] sm:$0xff] }
 0x22c   :  { %1645 = vmatprep.subr.bf16.mxu0 %v1512_v52  ;;  %1872 = vmatpush1.bf16.msra.mxu1 %v1513_v13  ;;  %v1540_v52 = vld [vmem:[#allocation2 + $0x1e8] sm:$0xff]  ;;  %v1541_v13 = vld [vmem:[#allocation2 + $0x1f0] sm:$0xff] }
 0x22d   :  { %1873 = vmatprep.subr.bf16.mxu1 %v1518_v29  ;;  %v1546_v29 = vld [vmem:[#allocation2 + $0x218] sm:$0xff] }
 0x22f   :  { %1646 = vmatpush1.bf16.msra.mxu0 %v1511_v58  ;;  %v1539_v58 = vld [vmem:[#allocation2 + $0x1e0] sm:$0xff] }
 0x230   :  { %1647 = vmatprep.subr.bf16.mxu0 %v1516_v24  ;;  %1874 = vmatpush1.bf16.msra.mxu1 %v1517_v23  ;;  %v1544_v24 = vld [vmem:[#allocation2 + $0x208] sm:$0xff]  ;;  %v10594_v23 = vld [vmem:[#allocation61_spill] sm:$0xff] }
 0x231   :  { %1875 = vmatprep.subr.bf16.mxu1 %v1522_v8  ;;  %v1543_v8 = vld [vmem:[#allocation2 + $0x200] sm:$0xff] }
 0x233   :  { %1648 = vmatpush1.bf16.msra.mxu0 %v1515_v56  ;;  %v10593_v56 = vld [vmem:[#allocation56_spill] sm:$0xff] }
 0x234   :  { %1649 = vmatprep.subr.bf16.mxu0 %v1520_v63  ;;  %1876 = vmatpush1.bf16.msra.mxu1 %v1521_v18  ;;  %v1447_v63 = vpack.c.bf16 %v10594_v23, %v10593_v56  ;;  %v1548_v18 = vld [vmem:[#allocation2 + $0x228] sm:$0xff]  ;;  %v10601_v56 = vld [vmem:[#allocation52_spill] sm:$0xff] }
 0x235   :  { %1877 = vmatprep.subr.bf16.mxu1 %v1526_v48  ;;  %v10595_v48 = vld [vmem:[#allocation69_spill] sm:$0xff] }
 0x237   :  { %1650 = vmatpush1.bf16.msra.mxu0 %v1519_v33  ;;  %v1545_v33 = vld [vmem:[#allocation2 + $0x210] sm:$0xff] }
 0x238   :  { %1651 = vmatprep.subr.bf16.mxu0 %v1524_v2  ;;  %1878 = vmatpush1.bf16.msra.mxu1 %v1525_v16  ;;  %v1550_v2 = vld [vmem:[#allocation2 + $0x238] sm:$0xff] }
 0x239   :  { %1879 = vmatprep.subr.bf16.mxu1 %v1530_v30  ;;  %v1549_v30 = vld [vmem:[#allocation2 + $0x230] sm:$0xff] }
 0x23b   :  { %1652 = vmatpush1.bf16.msra.mxu0 %v1523_v47  ;;  %v10596_v47 = vld [vmem:[#allocation78_spill] sm:$0xff] }
 0x23c   :  { %1653 = vmatprep.subr.bf16.mxu0 %v1528_v60  ;;  %1880 = vmatpush1.bf16.msra.mxu1 %v1529_v19  ;;  %v1452_v16 = vpack.c.bf16 %v10596_v47, %v10595_v48  ;;  %v1547_v60 = vld [vmem:[#allocation2 + $0x220] sm:$0xff]  ;;  %v1554_v19 = vld [vmem:[#allocation2 + $0x258] sm:$0xff]  ;;  %v1565_v48 = vld [vmem:[#allocation2 + $0x2b0] sm:$0xff] }
 0x23d   :  { %1881 = vmatprep.subr.bf16.mxu1 %v1534_v41  ;;  %v10598_v41 = vld [vmem:[#allocation74_spill] sm:$0xff]  ;;  %v1568_v47 = vld [vmem:[#allocation2 + $0x2c8] sm:$0xff] }
 0x23f   :  { %1654 = vmatpush1.bf16.msra.mxu0 %v1527_v54  ;;  %v1552_v54 = vld [vmem:[#allocation2 + $0x248] sm:$0xff] }
 0x240   :  { %1655 = vmatprep.subr.bf16.mxu0 %v1532_v6  ;;  %1882 = vmatpush1.bf16.msra.mxu1 %v1533_v46  ;;  %v10597_v6 = vld [vmem:[#allocation65_spill] sm:$0xff]  ;;  %v1551_v46 = vld [vmem:[#allocation2 + $0x240] sm:$0xff] }
 0x241   :  { %1883 = vmatprep.subr.bf16.mxu1 %v1538_v53  ;;  %v1556_v53 = vld [vmem:[#allocation2 + $0x268] sm:$0xff] }
 0x243   :  { %1656 = vmatpush1.bf16.msra.mxu0 %v1531_v50  ;;  %v1451_v50 = vpack.c.bf16 %v10598_v41, %v10597_v6  ;;  %v1571_v6 = vld [vmem:[#allocation2 + $0x2e0] sm:$0xff]  ;;  %v1573_v41 = vld [vmem:[#allocation2 + $0x2f0] sm:$0xff] }
 0x244   :  { %1657 = vmatprep.subr.bf16.mxu0 %v1536_v55  ;;  %1884 = vmatpush1.bf16.msra.mxu1 %v1537_v15  ;;  %v1553_v55 = vld [vmem:[#allocation2 + $0x250] sm:$0xff] }
 0x245   :  { %1885 = vmatprep.subr.bf16.mxu1 %v1542_v0  ;;  %v10599_v15 = vld [vmem:[#allocation80_spill] sm:$0xff]  ;;  %v1555_v0 = vld [vmem:[#allocation2 + $0x260] sm:$0xff] }
 0x247   :  { %1658 = vmatpush1.bf16.msra.mxu0 %v1535_v57  ;;  %v1558_v57 = vld [vmem:[#allocation2 + $0x278] sm:$0xff] }
 0x248   :  { %1659 = vmatprep.subr.bf16.mxu0 %v1540_v52  ;;  %1886 = vmatpush1.bf16.msra.mxu1 %v1541_v13  ;;  %v1456_v52 = vpack.c.bf16 %v7011_v35, %v10599_v15  ;;  %v1560_v13 = vld [vmem:[#allocation2 + $0x288] sm:$0xff]  ;;  %v1559_v35 = vld [vmem:[#allocation2 + $0x280] sm:$0xff]  ;;  %v1581_v15 = vld [vmem:[#allocation2 + $0x330] sm:$0xff] }
 0x249   :  { %1968 = vmatprep.subr.bf16.mxu1 %v1546_v29  ;;  %v10600_v29 = vld [vmem:[#allocation50_spill] sm:$0xff] }
 0x24a   :  { %v1455_v23 = vpack.c.bf16 %v10601_v56, %v10600_v29  ;;  %v1589_v29 = vld [vmem:[#allocation2 + $0x370] sm:$0xff]  ;;  %v1471_v56 = vpack.c.bf16 %v7575_v61, %v7494_v14  ;;  %v1600_v14 = vld [vmem:[#allocation2 + $0x3c8] sm:$0xff]  ;;  %v1602_v61 = vld [vmem:[#allocation2 + $0x3d8] sm:$0xff] }
 0x24b   :  { %1660 = vmatpush1.bf16.msra.mxu0 %v1539_v58  ;;  %1888 = vmatmul.mubr.bf16.vlgmr.msra.gmra.mrb[32].mxu1 %v1447_v63  ;;  %v1557_v58 = vld [vmem:[#allocation2 + $0x270] sm:$0xff] }
 0x24c   :  { %1742 = vmatprep.subr.bf16.mxu0 %v1544_v24  ;;  %1969 = vmatpush1.bf16.msra.mxu1 %v1545_v33  ;;  %v1562_v24 = vld [vmem:[#allocation2 + $0x298] sm:$0xff] }
 0x24d   :  { %1970 = vmatprep.subr.bf16.mxu1 %v1550_v2  ;;  %1897 = vmatprep.mubr.bf16.mxu1 %v1452_v16  ;;  %v1566_v33 = vld [vmem:[#allocation2 + $0x2b8] sm:$0xff]  ;;  %v1563_v2 = vld [vmem:[#allocation2 + $0x2a0] sm:$0xff] }
 0x24e   :  { %1662 = vmatmul.mubr.bf16.vlgmr.msra.gmra.mrb[32].mxu0 %v1447_v63  ;;  %v1561_v63 = vld [vmem:[#allocation2 + $0x290] sm:$0xff] }
 0x24f   :  { %1743 = vmatpush1.bf16.msra.mxu0 %v1543_v8  ;;  %1671 = vmatprep.mubr.bf16.mxu0 %v1452_v16  ;;  %v1564_v8 = vld [vmem:[#allocation2 + $0x2a8] sm:$0xff]  ;;  %v1570_v16 = vld [vmem:[#allocation2 + $0x2d8] sm:$0xff] }
 0x250   :  { %1744 = vmatprep.subr.bf16.mxu0 %v1548_v18  ;;  %1971 = vmatpush1.bf16.msra.mxu1 %v1549_v30  ;;  %v1460_v18 = vpack.c.bf16 %v7149_v62, %v7091_v4  ;;  %v1567_v4 = vld [vmem:[#allocation2 + $0x2c0] sm:$0xff]  ;;  %v1569_v62 = vld [vmem:[#allocation2 + $0x2d0] sm:$0xff]  ;;  %v1572_v30 = vld [vmem:[#allocation2 + $0x2e8] sm:$0xff] }
 0x251   :  { %1972 = vmatprep.subr.bf16.mxu1 %v1554_v19  ;;  %v1464_v19 = vpack.c.bf16 %v7312_v59, %v7235_v7  ;;  %v1575_v7 = vld [vmem:[#allocation2 + $0x300] sm:$0xff]  ;;  %v1577_v59 = vld [vmem:[#allocation2 + $0x310] sm:$0xff] }
 0x253   :  { %1745 = vmatpush1.bf16.msra.mxu0 %v1547_v60  ;;  %1898 = vmatmul.mubr.bf16.gmra.mrb[36].mxu1 %v1451_v50  ;;  %v1459_v60 = vpack.c.bf16 %v7119_v51, %v7054_v3  ;;  %v1576_v3 = vld [vmem:[#allocation2 + $0x308] sm:$0xff]  ;;  %v1578_v51 = vld [vmem:[#allocation2 + $0x318] sm:$0xff] }
 0x254   :  { %1746 = vmatprep.subr.bf16.mxu0 %v1552_v54  ;;  %1973 = vmatpush1.bf16.msra.mxu1 %v1553_v55  ;;  %v1574_v54 = vld [vmem:[#allocation2 + $0x2f8] sm:$0xff] }
 0x255   :  { %1974 = vmatprep.subr.bf16.mxu1 %v1558_v57  ;;  %1907 = vmatprep.mubr.bf16.mxu1 %v1456_v52  ;;  %v1582_v55 = vld [vmem:[#allocation2 + $0x338] sm:$0xff]  ;;  %v1579_v57 = vld [vmem:[#allocation2 + $0x320] sm:$0xff] }
 0x256   :  { %1672 = vmatmul.mubr.bf16.gmra.mrb[36].mxu0 %v1451_v50  ;;  %v1463_v50 = vpack.c.bf16 %v7268_v21, %v7179_v5  ;;  %v1584_v5 = vld [vmem:[#allocation2 + $0x348] sm:$0xff]  ;;  %v1586_v21 = vld [vmem:[#allocation2 + $0x358] sm:$0xff] }
 0x257   :  { %1747 = vmatpush1.bf16.msra.mxu0 %v1551_v46  ;;  %1681 = vmatprep.mubr.bf16.mxu0 %v1456_v52  ;;  %v1580_v46 = vld [vmem:[#allocation2 + $0x328] sm:$0xff]  ;;  %v1467_v52 = vpack.c.bf16 %v7403_v10, %v7346_v25  ;;  %v1594_v10 = vld [vmem:[#allocation2 + $0x398] sm:$0xff] }
 0x258   :  { %1748 = vmatprep.subr.bf16.mxu0 %v1556_v53  ;;  %1975 = vmatpush1.bf16.msra.mxu1 %v1557_v58  ;;  %v1468_v53 = vpack.c.bf16 %v7451_v45, %v7374_v40  ;;  %v1583_v40 = vld [vmem:[#allocation2 + $0x340] sm:$0xff]  ;;  %v1585_v45 = vld [vmem:[#allocation2 + $0x350] sm:$0xff]  ;;  %v1590_v58 = vld [vmem:[#allocation2 + $0x378] sm:$0xff] }
 0x259   :  { %1976 = vmatprep.subr.bf16.mxu1 %v1562_v24  ;;  %v1587_v24 = vld [vmem:[#allocation2 + $0x360] sm:$0xff]  ;;  %v1592_v25 = vld [vmem:[#allocation2 + $0x388] sm:$0xff] }
 0x25b   :  { %1749 = vmatpush1.bf16.msra.mxu0 %v1555_v0  ;;  %1908 = vmatmul.mubr.bf16.gmra.mrb[40].mxu1 %v1455_v23  ;;  %v1588_v0 = vld [vmem:[#allocation2 + $0x368] sm:$0xff] }
 0x25c   :  { %1750 = vmatprep.subr.bf16.mxu0 %v1560_v13  ;;  %1977 = vmatpush1.bf16.msra.mxu1 %v1561_v63  ;;  %v1472_v13 = vpack.c.bf16 %v7591_v26, %v7512_v1  ;;  %v1591_v1 = vld [vmem:[#allocation2 + $0x380] sm:$0xff]  ;;  %v1593_v26 = vld [vmem:[#allocation2 + $0x390] sm:$0xff]  ;;  %v1476_v63 = vpack.c.bf16 %v7653_v9, %v7637_v42 }
 0x25d   :  { %1978 = vmatprep.subr.bf16.mxu1 %v1566_v33  ;;  %1917 = vmatprep.mubr.bf16.mxu1 %v1460_v18  ;;  %v1597_v33 = vld [vmem:[#allocation2 + $0x3b0] sm:$0xff]  ;;  %v1599_v42 = vld [vmem:[#allocation2 + $0x3c0] sm:$0xff] }
 0x25e   :  { %1682 = vmatmul.mubr.bf16.gmra.mrb[40].mxu0 %v1455_v23  ;;  %v1596_v23 = vld [vmem:[#allocation2 + $0x3a8] sm:$0xff]  ;;  %v1601_v9 = vld [vmem:[#allocation2 + $0x3d0] sm:$0xff] }
 0x25f   :  { %1751 = vmatpush1.bf16.msra.mxu0 %v1559_v35  ;;  %1691 = vmatprep.mubr.bf16.mxu0 %v1460_v18  ;;  %v1598_v35 = vld [vmem:[#allocation2 + $0x3b8] sm:$0xff]  ;;  %v1475_v18 = vpack.c.bf16 %v7645_v37, %v7624_v22  ;;  %v10604_v22 = vld [vmem:[#allocation58_spill] sm:$0xff] }
 0x260   :  { %1752 = vmatprep.subr.bf16.mxu0 %v1564_v8  ;;  %1979 = vmatpush1.bf16.msra.mxu1 %v1565_v48  ;;  %v1595_v8 = vld [vmem:[#allocation2 + $0x3a0] sm:$0xff]  ;;  %v1606_v48 = vld [vmem:[#allocation2 + $0x3f8] sm:$0xff] }
 0x261   :  { %1980 = vmatprep.subr.bf16.mxu1 %v1570_v16  ;;  %v10603_v16 = vld [vmem:[#allocation64_spill] sm:$0xff]  ;;  %v10605_v37 = vld [vmem:[#allocation62_spill] sm:$0xff] }
 0x263   :  { %1753 = vmatpush1.bf16.msra.mxu0 %v1563_v2  ;;  %1918 = vmatmul.mubr.bf16.gmra.mrb[44].mxu1 %v1459_v60  ;;  %v1604_v2 = vld [vmem:[#allocation2 + $0x3e8] sm:$0xff] }
 0x264   :  { %1754 = vmatprep.subr.bf16.mxu0 %v1568_v47  ;;  %1981 = vmatpush1.bf16.msra.mxu1 %v1569_v62  ;;  %v10602_v47 = vld [vmem:[#allocation60_spill] sm:$0xff] }
 0x265   :  { %1982 = vmatprep.subr.bf16.mxu1 %v1574_v54  ;;  %1927 = vmatprep.mubr.bf16.mxu1 %v1464_v19  ;;  %v1605_v62 = vld [vmem:[#allocation2 + $0x3f0] sm:$0xff]  ;;  %v10606_v54 = vld [vmem:[#allocation73_spill] sm:$0xff] }
 0x266   :  { %1692 = vmatmul.mubr.bf16.gmra.mrb[44].mxu0 %v1459_v60  ;;  %v1450_v60 = vpack.c.bf16 %v10603_v16, %v10602_v47 }
 0x267   :  { %1755 = vmatpush1.bf16.msra.mxu0 %v1567_v4  ;;  %1701 = vmatprep.mubr.bf16.mxu0 %v1464_v19  ;;  %v1603_v4 = vld [vmem:[#allocation2 + $0x3e0] sm:$0xff]  ;;  %v10607_v19 = vld [vmem:[#allocation79_spill] sm:$0xff] }
 0x268   :  { %1756 = vmatprep.subr.bf16.mxu0 %v1572_v30  ;;  %1983 = vmatpush1.bf16.msra.mxu1 %v1573_v41  ;;  %v1449_v30 = vpack.c.bf16 %v10605_v37, %v10604_v22  ;;  %v10608_v41 = vld [vmem:[#allocation68_spill] sm:$0xff] }
 0x269   :  { %1984 = vmatprep.subr.bf16.mxu1 %v1578_v51 }
 0x26b   :  { %1757 = vmatpush1.bf16.msra.mxu0 %v1571_v6  ;;  %1928 = vmatmul.mubr.bf16.gmra.mrb[48].mxu1 %v1463_v50  ;;  %v1454_v6 = vpack.c.bf16 %v10607_v19, %v10606_v54 }
 0x26c   :  { %1758 = vmatprep.subr.bf16.mxu0 %v1576_v3  ;;  %1985 = vmatpush1.bf16.msra.mxu1 %v1577_v59  ;;  %v10609_v3 = vld [vmem:[#allocation77_spill] sm:$0xff]  ;;  %v10611_v59 = vld [vmem:[#allocation51_spill] sm:$0xff] }
 0x26d   :  { %1986 = vmatprep.subr.bf16.mxu1 %v1582_v55  ;;  %1937 = vmatprep.mubr.bf16.mxu1 %v1468_v53  ;;  %v1453_v51 = vpack.c.bf16 %v10609_v3, %v10608_v41  ;;  %v1462_v55 = vpack.c.bf16 %v7170_v17, %v7098_v39  ;;  %v10617_v17 = vld [vmem:[#allocation83_spill] sm:$0xff] }
 0x26e   :  { %1702 = vmatmul.mubr.bf16.gmra.mrb[48].mxu0 %v1463_v50  ;;  %v10610_v50 = vld [vmem:[#allocation81_spill] sm:$0xff] }
 0x26f   :  { %1759 = vmatpush1.bf16.msra.mxu0 %v1575_v7  ;;  %1711 = vmatprep.mubr.bf16.mxu0 %v1468_v53  ;;  %v1458_v7 = vpack.c.bf16 %v7036_v27, %v10610_v50  ;;  %v1461_v53 = vpack.c.bf16 %v7143_v34, %v7061_v38  ;;  %v1474_v34 = vpack.c.bf16 %v7617_v28, %v7517_v12  ;;  %v1607_v12 = vld [vmem:[%s10395_s3] sm:$0xf] }
 0x270   :  { %1760 = vmatprep.subr.bf16.mxu0 %v1580_v46  ;;  %1987 = vmatpush1.bf16.msra.mxu1 %v1581_v15  ;;  %v1457_v46 = vpack.c.bf16 %v7002_v11, %v10611_v59  ;;  %v10613_v15 = vld [vmem:[#allocation82_spill] sm:$0xff] }
 0x271   :  { %1988 = vmatprep.subr.bf16.mxu1 %v1586_v21  ;;  %v10615_v21 = vld [vmem:[#allocation57_spill] sm:$0xff]  ;;  %v10619_v28 = vld [vmem:[#allocation46_spill] sm:$0xff] }
 0x273   :  { %1761 = vmatpush1.bf16.msra.mxu0 %v1579_v57  ;;  %1938 = vmatmul.mubr.bf16.gmra.mrb[52].mxu1 %v1467_v52  ;;  %v10612_v57 = vld [vmem:[#allocation55_spill] sm:$0xff] }
 0x274   :  { %1762 = vmatprep.subr.bf16.mxu0 %v1584_v5  ;;  %1989 = vmatpush1.bf16.msra.mxu1 %v1585_v45  ;;  %v1466_v27 = vpack.c.bf16 %v10613_v15, %v10612_v57  ;;  %v10614_v5 = vld [vmem:[#allocation54_spill] sm:$0xff]  ;;  %v1473_v45 = vpack.c.bf16 %v7583_v20, %v7507_v31  ;;  %v10620_v31 = vld [vmem:[#allocation47_spill] sm:$0xff] }
 0x275   :  { %1990 = vmatprep.subr.bf16.mxu1 %v1590_v58  ;;  %1947 = vmatprep.mubr.bf16.mxu1 %v1472_v13  ;;  %v1465_v11 = vpack.c.bf16 %v10615_v21, %v10614_v5  ;;  %v7727_v58 = vrot.slane %v1607_v12, %v10619_v28  ;;  %v7730_v20 = vrot.slane %v1607_v12, %v10620_v31 }
 0x276   :  { %1712 = vmatmul.mubr.bf16.gmra.mrb[52].mxu0 %v1467_v52  ;;  %v10616_v52 = vld [vmem:[#allocation66_spill] sm:$0xff] }
 0x277   :  { %1763 = vmatpush1.bf16.msra.mxu0 %v1583_v40  ;;  %1721 = vmatprep.mubr.bf16.mxu0 %v1472_v13  ;;  %v1470_v39 = vpack.c.bf16 %v7470_v49, %v10616_v52  ;;  %v10618_v40 = vld [vmem:[#allocation67_spill] sm:$0xff]  ;;  %v1478_v49 = vpack.c.bf16 %v7657_v32, %v7641_v43  ;;  %v10621_v43 = vld [vmem:[#allocation48_spill] sm:$0xff]  ;;  %v10622_v13 = vld [vmem:[#allocation49_spill] sm:$0xff] }
 0x278   :  { %1764 = vmatprep.subr.bf16.mxu0 %v1588_v0  ;;  %1991 = vmatpush1.bf16.msra.mxu1 %v1589_v29  ;;  %v1469_v38 = vpack.c.bf16 %v10618_v40, %v10617_v17  ;;  %v1477_v0 = vpack.c.bf16 %v7649_v36, %v7632_v44  ;;  %v7733_v32 = vrot.slane %v1607_v12, %v10621_v43 }
 0x279   :  { %1992 = vmatprep.subr.bf16.mxu1 %v1594_v10 }
 0x27b   :  { %1765 = vmatpush1.bf16.msra.mxu0 %v1587_v24  ;;  %1948 = vmatmul.mubr.bf16.gmra.mrb[56].mxu1 %v1471_v56  ;;  %v7736_v24 = vrot.slane %v1607_v12, %v10622_v13 }
 0x27c   :  { %1766 = vmatprep.subr.bf16.mxu0 %v1592_v25  ;;  %1993 = vmatpush1.bf16.msra.mxu1 %v1593_v26 }
 0x27d   :  { %1994 = vmatprep.subr.bf16.mxu1 %v1598_v35  ;;  %1957 = vmatprep.mubr.bf16.mxu1 %v1476_v63 }
 0x27e   :  { %1722 = vmatmul.mubr.bf16.gmra.mrb[56].mxu0 %v1471_v56 }
 0x27f   :  { %1767 = vmatpush1.bf16.msra.mxu0 %v1591_v1  ;;  %1731 = vmatprep.mubr.bf16.mxu0 %v1476_v63 }
 0x280   :  { %1768 = vmatprep.subr.bf16.mxu0 %v1596_v23  ;;  %1995 = vmatpush1.bf16.msra.mxu1 %v1597_v33 }
 0x281   :  { %1996 = vmatprep.subr.bf16.mxu1 %v1602_v61 }
 0x283   :  { %1769 = vmatpush1.bf16.msra.mxu0 %v1595_v8  ;;  %1958 = vmatmul.mubr.bf16.gmra.mrb[60].mxu1 %v1475_v18 }
 0x284   :  { %1770 = vmatprep.subr.bf16.mxu0 %v1600_v14  ;;  %1997 = vmatpush1.bf16.msra.mxu1 %v1601_v9 }
 0x285   :  { %1998 = vmatprep.subr.bf16.mxu1 %v1606_v48  ;;  %2000 = vmatprep.mubr.bf16.mxu1 %v1450_v60 }
 0x286   :  { %1732 = vmatmul.mubr.bf16.gmra.mrb[60].mxu0 %v1475_v18 }
 0x287   :  { %1771 = vmatpush1.bf16.msra.mxu0 %v1599_v42  ;;  %1774 = vmatprep.mubr.bf16.mxu0 %v1450_v60 }
 0x288   :  { %1772 = vmatprep.subr.bf16.mxu0 %v1604_v2  ;;  %1999 = vmatpush1.bf16.msra.mxu1 %v1605_v62 }
 0x28b   :  { %1773 = vmatpush1.bf16.msra.mxu0 %v1603_v4  ;;  %2001 = vmatmul.mubr.bf16.vlgmr.msra.gmra.mrb[32].mxu1 %v1449_v30 }
 0x28c   :  { %2010 = vmatprep.mubr.bf16.mxu1 %v1454_v6 }
 0x28e   :  { %1775 = vmatmul.mubr.bf16.vlgmr.msra.gmra.mrb[32].mxu0 %v1449_v30 }
 0x28f   :  { %1784 = vmatprep.mubr.bf16.mxu0 %v1454_v6 }
 0x293   :  { %2011 = vmatmul.mubr.bf16.gmra.mrb[36].mxu1 %v1453_v51 }
 0x294   :  { %2020 = vmatprep.mubr.bf16.mxu1 %v1458_v7 }
 0x296   :  { %1785 = vmatmul.mubr.bf16.gmra.mrb[36].mxu0 %v1453_v51 }
 0x297   :  { %1794 = vmatprep.mubr.bf16.mxu0 %v1458_v7 }
 0x29b   :  { %2021 = vmatmul.mubr.bf16.gmra.mrb[40].mxu1 %v1457_v46 }
 0x29c   :  { %2030 = vmatprep.mubr.bf16.mxu1 %v1462_v55 }
 0x29e   :  { %1795 = vmatmul.mubr.bf16.gmra.mrb[40].mxu0 %v1457_v46 }
 0x29f   :  { %1804 = vmatprep.mubr.bf16.mxu0 %v1462_v55 }
 0x2a3   :  { %2031 = vmatmul.mubr.bf16.gmra.mrb[44].mxu1 %v1461_v53 }
 0x2a4   :  { %2040 = vmatprep.mubr.bf16.mxu1 %v1466_v27 }
 0x2a6   :  { %1805 = vmatmul.mubr.bf16.gmra.mrb[44].mxu0 %v1461_v53 }
 0x2a7   :  { %1814 = vmatprep.mubr.bf16.mxu0 %v1466_v27 }
 0x2ab   :  { %2041 = vmatmul.mubr.bf16.gmra.mrb[48].mxu1 %v1465_v11 }
 0x2ac   :  { %2050 = vmatprep.mubr.bf16.mxu1 %v1470_v39 }
 0x2ae   :  { %1815 = vmatmul.mubr.bf16.gmra.mrb[48].mxu0 %v1465_v11 }
 0x2af   :  { %1824 = vmatprep.mubr.bf16.mxu0 %v1470_v39 }
 0x2b3   :  { %2051 = vmatmul.mubr.bf16.gmra.mrb[52].mxu1 %v1469_v38 }
 0x2b4   :  { %2060 = vmatprep.mubr.bf16.mxu1 %v1474_v34 }
 0x2b6   :  { %1825 = vmatmul.mubr.bf16.gmra.mrb[52].mxu0 %v1469_v38 }
 0x2b7   :  { %1834 = vmatprep.mubr.bf16.mxu0 %v1474_v34 }
 0x2bb   :  { %2061 = vmatmul.mubr.bf16.gmra.mrb[56].mxu1 %v1473_v45 }
 0x2bc   :  { %2070 = vmatprep.mubr.bf16.mxu1 %v1478_v49 }
 0x2be   :  { %1835 = vmatmul.mubr.bf16.gmra.mrb[56].mxu0 %v1473_v45 }
 0x2bf   :  { %1844 = vmatprep.mubr.bf16.mxu0 %v1478_v49 }
 0x2c3   :  { %2071 = vmatmul.mubr.bf16.gmra.mrb[60].mxu1 %v1477_v0 }
 0x2c6   :  { %1845 = vmatmul.mubr.bf16.gmra.mrb[60].mxu0 %v1477_v0 }
 0x35e   :  { %v2002_v44 = vpop.f32.mrb[32].mxu1 }
 0x35f   :  { %v7742_v25 = vadd.f32 %v2002_v44, %v7730_v20  ;;  %v2004_v56 = vpop.f32.mrb[33].mxu1 }
 0x360   :  { %v7748_v26 = vadd.f32 %v2004_v56, %v7736_v24  ;;  %v2006_v35 = vpop.f32.mrb[34].mxu1 }
 0x361   :  { %v1776_v29 = vpop.f32.mrb[32].mxu0  ;;  %v2147_v8 = vmin.f32 %v7742_v25, 20.0  ;;  %v2008_v14 = vpop.f32.mrb[35].mxu1  ;;  %v7758_v48 = vadd.f32 %v2006_v35, %v7730_v20  ;;  %vm2083_vm4 = vcmp.gt.f32.partialorder %v7742_v25, 20.0 }
 0x362   :  { %v7739_v36 = vadd.f32 %v1776_v29, %v7727_v58  ;;  %v1778_v10 = vpop.f32.mrb[33].mxu0  ;;  %v2148_v18 = vmin.f32 %v7748_v26, 20.0  ;;  %v7764_v4 = vadd.f32 %v2008_v14, %v7736_v24  ;;  %vm2084_vm7 = vcmp.gt.f32.partialorder %v7748_v26, 20.0 }
 0x363   :  { %v7745_v1 = vadd.f32 %v1778_v10, %v7733_v32  ;;  %v1780_v23 = vpop.f32.mrb[34].mxu0  ;;  %v2213_v9 = vmul.f32 1.442695, %v2147_v8  ;;  %v2151_v22 = vmin.f32 %v7758_v48, 20.0  ;;  %vm2087_vm12 = vcmp.gt.f32.partialorder %v7758_v48, 20.0 }
 0x364   :  { %v2145_v63 = vmin.f32 %v7739_v36, 20.0  ;;  %v1782_v33 = vpop.f32.mrb[35].mxu0  ;;  %v7755_v2 = vadd.f32 %v1780_v23, %v7727_v58  ;;  %v2215_v16 = vmul.f32 1.442695, %v2148_v18  ;;  %v2152_v6 = vmin.f32 %v7764_v4, 20.0 }
 0x365   :  { %v2146_v61 = vmin.f32 %v7745_v1, 20.0  ;;  %v7761_v60 = vadd.f32 %v1782_v33, %v7733_v32  ;;  %v2221_v51 = vmul.f32 1.442695, %v2151_v22  ;;  %vm2081_vm2 = vcmp.gt.f32.partialorder %v7739_v36, 20.0 }
 0x366   :  { %v2209_v42 = vmul.f32 1.442695, %v2145_v63  ;;  %v2149_v62 = vmin.f32 %v7755_v2, 20.0  ;;  %v2012_v54 = vpop.f32.mrb[36].mxu1  ;;  %v2223_v27 = vmul.f32 1.442695, %v2152_v6 }
 0x367   :  { %v2211_v47 = vmul.f32 1.442695, %v2146_v61  ;;  %v2150_v37 = vmin.f32 %v7761_v60, 20.0  ;;  %v2014_v3 = vpop.f32.mrb[37].mxu1  ;;  %v7774_v55 = vadd.f32 %v2012_v54, %v7730_v20  ;;  %vm2082_vm5 = vcmp.gt.f32.partialorder %v7745_v1, 20.0 }
 0x368   :  { %5523 = vpow2.f32 %v2209_v42  ;;  %v2217_v19 = vmul.f32 1.442695, %v2149_v62  ;;  %v2016_v46 = vpop.f32.mrb[38].mxu1  ;;  %v7782_v11 = vadd.f32 %v2014_v3, %v7736_v24  ;;  %vm2085_vm9 = vcmp.gt.f32.partialorder %v7755_v2, 20.0 }
 0x369   :  { %5525 = vpow2.f32 %v2213_v9  ;;  %v1786_v30 = vpop.f32.mrb[36].mxu0  ;;  %v2219_v50 = vmul.f32 1.442695, %v2150_v37  ;;  %v2018_v15 = vpop.f32.mrb[39].mxu1  ;;  %v2155_v21 = vmin.f32 %v7774_v55, 20.0  ;;  %vm2086_vm13 = vcmp.gt.f32.partialorder %v7761_v60, 20.0 }
 0x36a   :  { %5527 = vpow2.f32 %v2211_v47  ;;  %v1788_v41 = vpop.f32.mrb[37].mxu0  ;;  %v7771_v7 = vadd.f32 %v1786_v30, %v7727_v58  ;;  %v2156_v45 = vmin.f32 %v7782_v11, 20.0  ;;  %v7811_v47 = vadd.f32 %v2016_v46, %v7730_v20 }
 0x36b   :  { %5529 = vpow2.f32 %v2215_v16  ;;  %v1790_v59 = vpop.f32.mrb[38].mxu0  ;;  %v7777_v53 = vadd.f32 %v1788_v41, %v7733_v32  ;;  %v2229_v17 = vmul.f32 1.442695, %v2155_v21  ;;  %vm2088_vm15 = vcmp.gt.f32.partialorder %v7764_v4, 20.0 }
 0x36c   :  { %5531 = vpow2.f32 %v2217_v19  ;;  %v1792_v57 = vpop.f32.mrb[39].mxu0  ;;  %v2153_v5 = vmin.f32 %v7771_v7, 20.0  ;;  %v7795_v10 = vadd.f32 %v1790_v59, %v7727_v58  ;;  %v2231_v37 = vmul.f32 1.442695, %v2156_v45 }
 0x36d   :  { %5533 = vpow2.f32 %v2221_v51  ;;  %v2154_v39 = vmin.f32 %v7777_v53, 20.0  ;;  %v7818_v54 = vadd.f32 %v1792_v57, %v7733_v32  ;;  %v7821_v19 = vadd.f32 %v2018_v15, %v7736_v24 }
 0x36e   :  { %5535 = vpow2.f32 %v2219_v50  ;;  %v2225_v52 = vmul.f32 1.442695, %v2153_v5  ;;  %v7787_v38 = vpop.f32.mrb[40].mxu1  ;;  %vm2089_vm0 = vcmp.gt.f32.partialorder %v7771_v7, 20.0 }
 0x36f   :  { %5537 = vpow2.f32 %v2223_v27  ;;  %v7792_v0 = vpop.f32.mrb[41].mxu1  ;;  %v2227_v44 = vmul.f32 1.442695, %v2154_v39 }
 0x370   :  { %5539 = vpow2.f32 %v2225_v52  ;;  %v7799_v23 = vpop.f32.mrb[42].mxu1 }
 0x371   :  { %v7785_v40 = vpop.f32.mrb[40].mxu0  ;;  %5541 = vpow2.f32 %v2229_v17  ;;  %v7805_v61 = vpop.f32.mrb[43].mxu1 }
 0x372   :  { %v5524_v34 = vpop.eup %5523  ;;  %v7790_v49 = vpop.f32.mrb[41].mxu0 }
 0x373   :  { %v5526_v12 = vpop.eup %5525  ;;  %v2337_v29 = vadd.f32 1.0, %v5524_v34  ;;  %v7797_v56 = vpop.f32.mrb[42].mxu0  ;;  %v2340_v63 = vmul.f32 -0.5, %v5524_v34  ;;  %v2343_v42 = vand.u32 2147483647, %v5524_v34 }
 0x374   :  { %v7801_v35 = vpop.eup %5527  ;;  %v2355_v8 = vadd.f32 1.0, %v5526_v12  ;;  %v2358_v33 = vmul.f32 -0.5, %v5526_v12  ;;  %v7803_v14 = vpop.f32.mrb[43].mxu0  ;;  %v2361_v62 = vand.u32 2147483647, %v5526_v12 }
 0x375   :  { %v7807_v18 = vpop.eup %5529  ;;  %5543 = vlog2.f32 %v2337_v29  ;;  %v2346_v9 = vadd.f32 1.0, %v7801_v35  ;;  %v2349_v22 = vmul.f32 -0.5, %v7801_v35  ;;  %v2341_v41 = vadd.f32 1.0, %v2340_v63 }
 0x376   :  { %v7813_v16 = vpop.eup %5531  ;;  %5545 = vlog2.f32 %v2355_v8  ;;  %v2364_v30 = vadd.f32 1.0, %v7807_v18  ;;  %v2359_v3 = vadd.f32 1.0, %v2358_v33  ;;  %vm7828_vm1 = vcmp.lt.f32.partialorder %v2343_v42, 0.0004427343  ;;  %v7837_v5 = vpop.f32.mrb[44].mxu1 }
 0x377   :  { %5547 = vlog2.f32 %v2346_v9  ;;  %v7823_v6 = vpop.eup %5533  ;;  %v2367_v46 = vmul.f32 -0.5, %v7807_v18  ;;  %v2373_v57 = vadd.f32 1.0, %v7813_v16  ;;  %v2376_v15 = vmul.f32 -0.5, %v7813_v16  ;;  %v7853_v8 = vpop.f32.mrb[45].mxu1 }
 0x378   :  { %5549 = vpow2.f32 %v2227_v44  ;;  %v7826_v50 = vpop.eup %5535  ;;  %vm7840_vm3 = vcmp.lt.f32.partialorder %v2361_v62, 0.0004427343  ;;  %v2350_v52 = vadd.f32 1.0, %v2349_v22  ;;  %v2352_v39 = vand.u32 2147483647, %v7801_v35  ;;  %10628 = vst [vmem:[#allocation71_spill] sm:$0xff] %v7853_v8 }
 0x379   :  { %5551 = vlog2.f32 %v2364_v30  ;;  %v7835_v27 = vpop.f32.mrb[44].mxu0  ;;  %v7847_v45 = vpop.eup %5537  ;;  %v2370_v29 = vand.u32 2147483647, %v7807_v18  ;;  %v2391_v44 = vadd.f32 1.0, %v7823_v6  ;;  %v2394_v63 = vmul.f32 -0.5, %v7823_v6 }
 0x37a   :  { %5553 = vpow2.f32 %v2231_v37  ;;  %v7845_v17 = vpop.f32.mrb[45].mxu0  ;;  %v2342_v42 = vmul.f32 %v5524_v34, %v2341_v41  ;;  %v2360_v9 = vmul.f32 %v5526_v12, %v2359_v3  ;;  %v2379_v62 = vand.u32 2147483647, %v7813_v16  ;;  %v7860_v37 = vpop.f32.mrb[46].mxu1 }
 0x37b   :  { %10627 = vst [vmem:[#allocation70_spill] sm:$0xff] %v7845_v17  ;;  %5555 = vlog2.f32 %v2373_v57  ;;  %v7855_v33 = vpop.f32.mrb[46].mxu0  ;;  %v2382_v22 = vadd.f32 1.0, %v7826_v50  ;;  %10630 = vst [vmem:[#allocation75_spill] sm:$0xff] %v7860_v37  ;;  %v7862_v30 = vpop.eup %5539  ;;  %v2368_v57 = vadd.f32 1.0, %v2367_v46  ;;  %v2377_v51 = vadd.f32 1.0, %v2376_v15 }
 0x37c   :  { %10629 = vst [vmem:[#allocation72_spill] sm:$0xff] %v7855_v33  ;;  %5557 = vlog2.f32 %v2391_v44  ;;  %v2397_v13 = vand.u32 2147483647, %v7823_v6  ;;  %v7865_v43 = vpop.f32.mrb[47].mxu0  ;;  %v7867_v31 = vpop.f32.mrb[47].mxu1  ;;  %v2385_v41 = vmul.f32 -0.5, %v7826_v50  ;;  %v2351_v15 = vmul.f32 %v7801_v35, %v2350_v52 }
 0x37d   :  { %10631 = vst [vmem:[#allocation76_spill] sm:$0xff] %v7865_v43  ;;  %10632 = vst [vmem:[#allocation53_spill] sm:$0xff] %v7867_v31  ;;  %v7869_v34 = vpop.eup %5541  ;;  %vm7871_vm6 = vcmp.lt.f32.partialorder %v2352_v39, 0.0004427343  ;;  %5559 = vlog2.f32 %v2382_v22  ;;  %v2400_v3 = vadd.f32 1.0, %v7847_v45  ;;  %v2395_v28 = vadd.f32 1.0, %v2394_v63 }
 0x37e   :  { %vm7879_vm8 = vcmp.lt.f32.partialorder %v2370_v29, 0.0004427343  ;;  %v2403_v39 = vmul.f32 -0.5, %v7847_v45  ;;  %vm7885_vm10 = vcmp.lt.f32.partialorder %v2379_v62, 0.0004427343  ;;  %v2409_v37 = vadd.f32 1.0, %v7862_v30 }
 0x37f   :  { %v5544_v46 = vpop.eup %5543  ;;  %5561 = vlog2.f32 %v2400_v3  ;;  %v2369_v52 = vmul.f32 %v7807_v18, %v2368_v57  ;;  %v2378_v29 = vmul.f32 %v7813_v16, %v2377_v51  ;;  %vm7892_vm11 = vcmp.lt.f32.partialorder %v2397_v13, 0.0004427343  ;;  %v7904_v18 = vpop.f32.mrb[48].mxu1 }
 0x380   :  { %v5546_v31 = vpop.eup %5545  ;;  %v2339_v43 = vmul.f32 0.6931472, %v5544_v46  ;;  %v2388_v46 = vand.u32 2147483647, %v7826_v50  ;;  %5563 = vlog2.f32 %v2409_v37  ;;  %v2404_v59 = vadd.f32 1.0, %v2403_v39 }
 0x381   :  { %v5548_v33 = vpop.eup %5547  ;;  %v2357_v35 = vmul.f32 0.6931472, %v5546_v31  ;;  %v7897_v8 = vpop.f32.mrb[48].mxu0  ;;  %v2386_v31 = vadd.f32 1.0, %v2385_v41 }
 0x382   :  { %v7899_v62 = vpop.eup %5549  ;;  %v2345_v3 = vsel %vm7828_vm1, %v2342_v42, %v2339_v43  ;;  %v2348_v17 = vmul.f32 0.6931472, %v5548_v33  ;;  %v7906_v13 = vpop.f32.mrb[49].mxu0  ;;  %v2396_v43 = vmul.f32 %v7823_v6, %v2395_v28  ;;  %v2412_v28 = vmul.f32 -0.5, %v7862_v30 }
 0x383   :  { %v5552_v16 = vpop.eup %5551  ;;  %v7911_v51 = vsel %vm2081_vm2, %v7739_v36, %v2345_v3  ;;  %v2363_v57 = vsel %vm7840_vm3, %v2360_v9, %v2357_v35  ;;  %v7917_v33 = vpop.f32.mrb[49].mxu1  ;;  %vm7940_vm14 = vcmp.lt.f32.partialorder %v2388_v46, 0.0004427343  ;;  %v2424_v63 = vand.u32 2147483647, %v7899_v62 }
 0x384   :  { %10641 = vst [vmem:[#allocation59_spill] sm:$0xff] %v7911_v51  ;;  %v7919_v42 = vpop.f32.mrb[50].mxu0  ;;  %v7921_v37 = vpop.eup %5553  ;;  %v7926_v41 = vsel %vm2083_vm4, %v7742_v25, %v2363_v57  ;;  %v2354_v36 = vsel %vm7871_vm6, %v2351_v15, %v2348_v17  ;;  %v2366_v21 = vmul.f32 0.6931472, %v5552_v16  ;;  %v2406_v25 = vand.u32 2147483647, %v7847_v45 }
 0x385   :  { %10642 = vst [vmem:[#allocation63_spill] sm:$0xff] %v7926_v41  ;;  %v7931_v6 = vpop.f32.mrb[50].mxu1  ;;  %v7933_v9 = vpop.f32.mrb[51].mxu0  ;;  %v7938_v35 = vsel %vm2082_vm5, %v7745_v1, %v2354_v36  ;;  %v2427_v17 = vadd.f32 1.0, %v7869_v34  ;;  %v2387_v57 = vmul.f32 %v7826_v50, %v2386_v31  ;;  %v2430_v1 = vmul.f32 -0.5, %v7869_v34 }
 0x386   :  { %v5556_v39 = vpop.eup %5555  ;;  %10643 = vst [vmem:[#allocation56_spill] sm:$0xff] %v7938_v35  ;;  %v7947_v12 = vpop.f32.mrb[51].mxu1  ;;  %v2372_v15 = vsel %vm7879_vm8, %v2369_v52, %v2366_v21  ;;  %v2405_v41 = vmul.f32 %v7847_v45, %v2404_v59  ;;  %v2418_v51 = vadd.f32 1.0, %v7899_v62  ;;  %v2413_v31 = vadd.f32 1.0, %v2412_v28 }
 0x387   :  { %v2375_v16 = vmul.f32 0.6931472, %v5556_v39  ;;  %v5558_v46 = vpop.eup %5557  ;;  %v7956_v36 = vsel %vm2084_vm7, %v7748_v26, %v2372_v15  ;;  %5565 = vlog2.f32 %v2427_v17  ;;  %v2415_v21 = vand.u32 2147483647, %v7862_v30  ;;  %v7972_v17 = vpop.f32.mrb[52].mxu1 }
 0x388   :  { %10646 = vst [vmem:[#allocation61_spill] sm:$0xff] %v7956_v36  ;;  %v5560_v44 = vpop.eup %5559  ;;  %v2393_v50 = vmul.f32 0.6931472, %v5558_v46  ;;  %v2433_v45 = vand.u32 2147483647, %v7869_v34  ;;  %5567 = vlog2.f32 %v2418_v51  ;;  %v2421_v28 = vmul.f32 -0.5, %v7899_v62 }
 0x389   :  { %v2381_v52 = vsel %vm7885_vm10, %v2378_v29, %v2375_v16  ;;  %v2384_v39 = vmul.f32 0.6931472, %v5560_v44  ;;  %v7970_v59 = vpop.f32.mrb[52].mxu0  ;;  %v5562_v15 = vpop.eup %5561  ;;  %v2431_v29 = vadd.f32 1.0, %v2430_v1  ;;  %v2436_v16 = vadd.f32 1.0, %v7921_v37 }
 0x38a   :  { %v7967_v26 = vsel %vm2085_vm9, %v7755_v2, %v2381_v52  ;;  %v2399_v22 = vsel %vm7892_vm11, %v2396_v43, %v2393_v50  ;;  %v7978_v46 = vpop.f32.mrb[53].mxu0  ;;  %v7980_v2 = vpop.f32.mrb[53].mxu1  ;;  %v2402_v52 = vmul.f32 0.6931472, %v5562_v15  ;;  %vm2407_vm1 = vcmp.lt.f32.partialorder %v2406_v25, 0.0004427343 }
 0x38b   :  { %10647 = vst [vmem:[#allocation69_spill] sm:$0xff] %v7967_v26  ;;  %v7985_v51 = vsel %vm2087_vm12, %v7758_v48, %v2399_v22  ;;  %v2390_v44 = vsel %vm7940_vm14, %v2387_v57, %v2384_v39  ;;  %v7990_v43 = vpop.f32.mrb[54].mxu0  ;;  %v7992_v1 = vpop.f32.mrb[54].mxu1  ;;  %vm7999_vm2 = vcmp.lt.f32.partialorder %v2415_v21, 0.0004427343  ;;  %vm2091_vm3 = vcmp.gt.f32.partialorder %v7774_v55, 20.0 }
 0x38c   :  { %10648 = vst [vmem:[#allocation78_spill] sm:$0xff] %v7985_v51  ;;  %v5564_v50 = vpop.eup %5563  ;;  %v7997_v36 = vsel %vm2086_vm13, %v7761_v60, %v2390_v44  ;;  %5569 = vlog2.f32 %v2436_v16  ;;  %v8004_v3 = vpop.f32.mrb[55].mxu0  ;;  %v2408_v39 = vsel %vm2407_vm1, %v2405_v41, %v2402_v52  ;;  %v2414_v22 = vmul.f32 %v7862_v30, %v2413_v31 }
 0x38d   :  { %10649 = vst [vmem:[#allocation65_spill] sm:$0xff] %v7997_v36  ;;  %10652 = vst [vmem:[#allocation74_spill] sm:$0xff] %v8004_v3  ;;  %v8006_v57 = vpop.f32.mrb[55].mxu1  ;;  %v2411_v15 = vmul.f32 0.6931472, %v5564_v50  ;;  %v2439_v51 = vmul.f32 -0.5, %v7921_v37  ;;  %v8013_v60 = vsel %vm2088_vm15, %v7764_v4, %v2408_v39  ;;  %v2432_v31 = vmul.f32 %v7869_v34, %v2431_v29 }
 0x38e   :  { %10653 = vst [vmem:[#allocation80_spill] sm:$0xff] %v8006_v57  ;;  %10654 = vst [vmem:[#allocation50_spill] sm:$0xff] %v8013_v60  ;;  %vm8015_vm4 = vcmp.lt.f32.partialorder %v2433_v45, 0.0004427343  ;;  %vm2090_vm5 = vcmp.gt.f32.partialorder %v7777_v53, 20.0  ;;  %v10657_v21 = vmin.f32 %v7795_v10, 20.0  ;;  %v8039_v34 = vadd.f32 %v7785_v40, %v7727_v58 }
 0x38f   :  { %v2159_v41 = vmin.f32 %v7811_v47, 20.0  ;;  %v2417_v30 = vsel %vm7999_vm2, %v2414_v22, %v2411_v15  ;;  %v2422_v44 = vadd.f32 1.0, %v2421_v28  ;;  %vm8026_vm6 = vcmp.lt.f32.partialorder %v2424_v63, 0.0004427343 }
 0x390   :  { %v2233_v16 = vmul.f32 1.442695, %v10657_v21  ;;  %v8033_v45 = vsel %vm2089_vm0, %v7771_v7, %v2417_v30  ;;  %v2158_v50 = vmin.f32 %v7818_v54, 20.0  ;;  %v2440_v21 = vadd.f32 1.0, %v2439_v51  ;;  %v8047_v7 = vpop.f32.mrb[56].mxu1 }
 0x391   :  { %10660 = vst [vmem:[#allocation52_spill] sm:$0xff] %v8033_v45  ;;  %v2237_v52 = vmul.f32 1.442695, %v2159_v41  ;;  %v5566_v39 = vpop.eup %5565  ;;  %v2160_v48 = vmin.f32 %v7821_v19, 20.0  ;;  %v8043_v29 = vadd.f32 %v7787_v38, %v7730_v20  ;;  %v8045_v28 = vpop.f32.mrb[56].mxu0  ;;  %10662 = vst [vmem:[#allocation64_spill] sm:$0xff] %v8047_v7  ;;  %v8051_v51 = vadd.f32 %v7790_v49, %v7733_v32 }
 0x392   :  { %5571 = vpow2.f32 %v2233_v16  ;;  %10661 = vst [vmem:[#allocation60_spill] sm:$0xff] %v8045_v28  ;;  %v2429_v63 = vmul.f32 0.6931472, %v5566_v39  ;;  %v2235_v15 = vmul.f32 1.442695, %v2158_v50  ;;  %v8053_v22 = vpop.f32.mrb[57].mxu0  ;;  %v5568_v40 = vpop.eup %5567  ;;  %v2423_v41 = vmul.f32 %v7899_v62, %v2422_v44 }
 0x393   :  { %5573 = vpow2.f32 %v2237_v52  ;;  %10663 = vst [vmem:[#allocation58_spill] sm:$0xff] %v8053_v22  ;;  %v8055_v16 = vpop.f32.mrb[57].mxu1  ;;  %v2442_v38 = vand.u32 2147483647, %v7921_v37  ;;  %v2239_v30 = vmul.f32 1.442695, %v2160_v48  ;;  %v2441_v45 = vmul.f32 %v7921_v37, %v2440_v21 }
 0x394   :  { %10664 = vst [vmem:[#allocation62_spill] sm:$0xff] %v8055_v16  ;;  %v2161_v60 = vmin.f32 %v8039_v34, 20.0  ;;  %v2435_v52 = vsel %vm8015_vm4, %v2432_v31, %v2429_v63  ;;  %v2420_v50 = vmul.f32 0.6931472, %v5568_v40  ;;  %5575 = vpow2.f32 %v2235_v15  ;;  %v8076_v63 = vpop.f32.mrb[58].mxu0  ;;  %v8094_v40 = vpop.f32.mrb[58].mxu1 }
 0x395   :  { %v2163_v49 = vmin.f32 %v8043_v29, 20.0  ;;  %v8066_v39 = vsel %vm2091_vm3, %v7774_v55, %v2435_v52  ;;  %5577 = vpow2.f32 %v2239_v30  ;;  %v2162_v25 = vmin.f32 %v8051_v51, 20.0  ;;  %10666 = vst [vmem:[#allocation79_spill] sm:$0xff] %v8076_v63  ;;  %10668 = vst [vmem:[#allocation77_spill] sm:$0xff] %v8094_v40 }
 0x396   :  { %10665 = vst [vmem:[#allocation73_spill] sm:$0xff] %v8066_v39  ;;  %v2241_v62 = vmul.f32 1.442695, %v2161_v60  ;;  %v5570_v44 = vpop.eup %5569  ;;  %v2426_v48 = vsel %vm8026_vm6, %v2423_v41, %v2420_v50  ;;  %v8074_v31 = vadd.f32 %v7792_v0, %v7736_v24  ;;  %v8085_v60 = vadd.f32 %v7797_v56, %v7727_v58 }
 0x397   :  { %v2245_v26 = vmul.f32 1.442695, %v2163_v49  ;;  %v8081_v55 = vsel %vm2090_vm5, %v7777_v53, %v2426_v48  ;;  %v2438_v37 = vmul.f32 0.6931472, %v5570_v44  ;;  %vm2443_vm7 = vcmp.lt.f32.partialorder %v2442_v38, 0.0004427343 }
 0x398   :  { %10667 = vst [vmem:[#allocation68_spill] sm:$0xff] %v8081_v55  ;;  %5579 = vpow2.f32 %v2241_v62  ;;  %v2243_v4 = vmul.f32 1.442695, %v2162_v25  ;;  %v2164_v21 = vmin.f32 %v8074_v31, 20.0  ;;  %vm2092_vm8 = vcmp.gt.f32.partialorder %v7782_v11, 20.0 }
 0x399   :  { %5581 = vpow2.f32 %v2245_v26  ;;  %v2444_v0 = vsel %vm2443_vm7, %v2441_v45, %v2438_v37  ;;  %v2165_v15 = vmin.f32 %v8085_v60, 20.0  ;;  %v8092_v53 = vadd.f32 %v7799_v23, %v7730_v20  ;;  %v8100_v23 = vpop.f32.mrb[59].mxu0 }
 0x39a   :  { %v8097_v56 = vsel %vm2092_vm8, %v7782_v11, %v2444_v0  ;;  %5583 = vpow2.f32 %v2243_v4  ;;  %v2247_v26 = vmul.f32 1.442695, %v2164_v21  ;;  %10670 = vst [vmem:[#allocation51_spill] sm:$0xff] %v8100_v23  ;;  %v8102_v0 = vpop.f32.mrb[59].mxu1  ;;  %vm2093_vm10 = vcmp.gt.f32.partialorder %v7795_v10, 20.0 }
 0x39b   :  { %10669 = vst [vmem:[#allocation81_spill] sm:$0xff] %v8097_v56  ;;  %v2249_v52 = vmul.f32 1.442695, %v2165_v15  ;;  %v2167_v62 = vmin.f32 %v8092_v53, 20.0  ;;  %10671 = vst [vmem:[#allocation55_spill] sm:$0xff] %v8102_v0  ;;  %vm2095_vm12 = vcmp.gt.f32.partialorder %v7811_v47, 20.0 }
 0x39c   :  { %v5572_v41 = vpop.eup %5571  ;;  %5585 = vpow2.f32 %v2247_v26  ;;  %v8106_v26 = vadd.f32 %v7803_v14, %v7733_v32  ;;  %vm2094_vm13 = vcmp.gt.f32.partialorder %v7818_v54, 20.0  ;;  %vm2096_vm0 = vcmp.gt.f32.partialorder %v7821_v19, 20.0 }
 0x39d   :  { %v2445_v38 = vadd.f32 1.0, %v5572_v41  ;;  %v2448_v30 = vmul.f32 -0.5, %v5572_v41  ;;  %v5574_v50 = vpop.eup %5573  ;;  %v2451_v45 = vand.u32 2147483647, %v5572_v41  ;;  %v8112_v56 = vmul.f32 1.442695, %v2167_v62 }
 0x39e   :  { %v2463_v49 = vadd.f32 1.0, %v5574_v50  ;;  %v5576_v44 = vpop.eup %5575  ;;  %v2466_v25 = vmul.f32 -0.5, %v5574_v50  ;;  %v2469_v37 = vand.u32 2147483647, %v5574_v50  ;;  %vm2097_vm1 = vcmp.gt.f32.partialorder %v8039_v34, 20.0 }
 0x39f   :  { %5587 = vlog2.f32 %v2445_v38  ;;  %v2449_v48 = vadd.f32 1.0, %v2448_v30  ;;  %v5578_v11 = vpop.eup %5577  ;;  %v2454_v4 = vadd.f32 1.0, %v5576_v44  ;;  %v2457_v21 = vmul.f32 -0.5, %v5576_v44 }
 0x3a0   :  { %5589 = vpow2.f32 %v2249_v52  ;;  %v2472_v15 = vadd.f32 1.0, %v5578_v11  ;;  %vm8108_vm9 = vcmp.lt.f32.partialorder %v2451_v45, 0.0004427343  ;;  %v2467_v30 = vadd.f32 1.0, %v2466_v25 }
 0x3a1   :  { %5591 = vlog2.f32 %v2463_v49  ;;  %v2475_v52 = vmul.f32 -0.5, %v5578_v11  ;;  %v2460_v55 = vand.u32 2147483647, %v5576_v44  ;;  %v2478_v36 = vand.u32 2147483647, %v5578_v11 }
 0x3a2   :  { %v5580_v38 = vpop.eup %5579  ;;  %5593 = vlog2.f32 %v2454_v4  ;;  %v2450_v0 = vmul.f32 %v5572_v41, %v2449_v48  ;;  %vm8115_vm11 = vcmp.lt.f32.partialorder %v2469_v37, 0.0004427343  ;;  %v2458_v45 = vadd.f32 1.0, %v2457_v21 }
 0x3a3   :  { %v5582_v49 = vpop.eup %5581  ;;  %5595 = vlog2.f32 %v2472_v15  ;;  %v2481_v35 = vadd.f32 1.0, %v5580_v38  ;;  %v2484_v23 = vmul.f32 -0.5, %v5580_v38  ;;  %v2476_v25 = vadd.f32 1.0, %v2475_v52  ;;  %v8134_v52 = vpop.f32.mrb[60].mxu1 }
 0x3a4   :  { %v5584_v40 = vpop.eup %5583  ;;  %v2499_v62 = vadd.f32 1.0, %v5582_v49  ;;  %v2502_v4 = vmul.f32 -0.5, %v5582_v49  ;;  %v2468_v63 = vmul.f32 %v5574_v50, %v2467_v30  ;;  %v2487_v22 = vand.u32 2147483647, %v5580_v38  ;;  %v8132_v30 = vpop.f32.mrb[60].mxu0  ;;  %10681 = vst [vmem:[#allocation54_spill] sm:$0xff] %v8134_v52 }
 0x3a5   :  { %5597 = vlog2.f32 %v2481_v35  ;;  %v2485_v16 = vadd.f32 1.0, %v2484_v23  ;;  %v2490_v15 = vadd.f32 1.0, %v5584_v40  ;;  %vm8123_vm14 = vcmp.lt.f32.partialorder %v2460_v55, 0.0004427343  ;;  %10680 = vst [vmem:[#allocation82_spill] sm:$0xff] %v8132_v30  ;;  %v8174_v14 = vpop.f32.mrb[61].mxu1 }
 0x3a6   :  { %v8120_v7 = vpop.eup %5585  ;;  %vm8127_vm15 = vcmp.lt.f32.partialorder %v2478_v36, 0.0004427343  ;;  %5599 = vlog2.f32 %v2499_v62  ;;  %v2493_v35 = vmul.f32 -0.5, %v5584_v40  ;;  %v2459_v21 = vmul.f32 %v5576_v44, %v2458_v45 }
 0x3a7   :  { %v2503_v50 = vadd.f32 1.0, %v2502_v4  ;;  %v2505_v23 = vand.u32 2147483647, %v5582_v49  ;;  %5601 = vlog2.f32 %v2490_v15  ;;  %v2477_v36 = vmul.f32 %v5578_v11, %v2476_v25  ;;  %v8148_v25 = vpop.f32.mrb[61].mxu0 }
 0x3a8   :  { %v2496_v57 = vand.u32 2147483647, %v5584_v40  ;;  %v2508_v3 = vadd.f32 1.0, %v8120_v7  ;;  %v2486_v44 = vmul.f32 %v5580_v38, %v2485_v16  ;;  %vm8140_vm2 = vcmp.lt.f32.partialorder %v2487_v22, 0.0004427343 }
 0x3a9   :  { %v5588_v37 = vpop.eup %5587  ;;  %v2494_v4 = vadd.f32 1.0, %v2493_v35  ;;  %v2511_v11 = vmul.f32 -0.5, %v8120_v7  ;;  %vm2099_vm3 = vcmp.gt.f32.partialorder %v8043_v29, 20.0  ;;  %v2504_v16 = vmul.f32 %v5582_v49, %v2503_v50 }
 0x3aa   :  { %v8136_v55 = vpop.eup %5589  ;;  %v2447_v28 = vmul.f32 0.6931472, %v5588_v37  ;;  %5603 = vlog2.f32 %v2508_v3  ;;  %vm8156_vm4 = vcmp.lt.f32.partialorder %v2505_v23, 0.0004427343  ;;  %vm2098_vm5 = vcmp.gt.f32.partialorder %v8051_v51, 20.0 }
 0x3ab   :  { %v5592_v62 = vpop.eup %5591  ;;  %v2517_v15 = vadd.f32 1.0, %v8136_v55  ;;  %vm8163_vm6 = vcmp.lt.f32.partialorder %v2496_v57, 0.0004427343  ;;  %v2495_v50 = vmul.f32 %v5584_v40, %v2494_v4  ;;  %v2512_v23 = vadd.f32 1.0, %v2511_v11 }
 0x3ac   :  { %v2453_v52 = vsel %vm8108_vm9, %v2450_v0, %v2447_v28  ;;  %v2465_v30 = vmul.f32 0.6931472, %v5592_v62  ;;  %v5594_v37 = vpop.eup %5593  ;;  %vm2100_vm7 = vcmp.gt.f32.partialorder %v8074_v31, 20.0  ;;  %v8190_v41 = vadd.f32 %v7805_v61, %v7736_v24 }
 0x3ad   :  { %v8153_v22 = vsel %vm2093_vm10, %v7795_v10, %v2453_v52  ;;  %5605 = vlog2.f32 %v2517_v15  ;;  %v5596_v28 = vpop.eup %5595  ;;  %v2456_v39 = vmul.f32 0.6931472, %v5594_v37  ;;  %v2514_v10 = vand.u32 2147483647, %v8120_v7 }
 0x3ae   :  { %10684 = vst [vmem:[#allocation57_spill] sm:$0xff] %v8153_v22  ;;  %v2471_v3 = vsel %vm8115_vm11, %v2468_v63, %v2465_v30  ;;  %v2474_v35 = vmul.f32 0.6931472, %v5596_v28  ;;  %5607 = vpow2.f32 %v8112_v56  ;;  %v2520_v30 = vmul.f32 -0.5, %v8136_v55 }
 0x3af   :  { %v8171_v49 = vsel %vm2095_vm12, %v7811_v47, %v2471_v3  ;;  %v5598_v63 = vpop.eup %5597  ;;  %v2462_v57 = vsel %vm8123_vm14, %v2459_v21, %v2456_v39  ;;  %v2166_v52 = vmin.f32 %v8106_v26, 20.0  ;;  %vm8197_vm8 = vcmp.lt.f32.partialorder %v2514_v10, 0.0004427343  ;;  %v8214_v39 = vpop.f32.mrb[62].mxu0 }
 0x3b0   :  { %10689 = vst [vmem:[#allocation66_spill] sm:$0xff] %v8171_v49  ;;  %v8183_v47 = vsel %vm2094_vm13, %v7818_v54, %v2462_v57  ;;  %v2480_v40 = vsel %vm8127_vm15, %v2477_v36, %v2474_v35  ;;  %v2483_v56 = vmul.f32 0.6931472, %v5598_v63  ;;  %v5600_v21 = vpop.eup %5599  ;;  %v8203_v48 = vadd.f32 %v7835_v27, %v7727_v58 }
 0x3b1   :  { %v8195_v62 = vsel %vm2096_vm0, %v7821_v19, %v2480_v40  ;;  %v2251_v54 = vmul.f32 1.442695, %v2166_v52  ;;  %v5602_v36 = vpop.eup %5601  ;;  %v2501_v15 = vmul.f32 0.6931472, %v5600_v21  ;;  %v2523_v11 = vand.u32 2147483647, %v8136_v55 }
 0x3b2   :  { %10690 = vst [vmem:[#allocation83_spill] sm:$0xff] %v8195_v62  ;;  %v2489_v61 = vsel %vm8140_vm2, %v2486_v44, %v2483_v56  ;;  %v2168_v37 = vmin.f32 %v8190_v41, 20.0  ;;  %v2492_v28 = vmul.f32 0.6931472, %v5602_v36  ;;  %v2521_v3 = vadd.f32 1.0, %v2520_v30 }
 0x3b3   :  { %v8212_v19 = vsel %vm2097_vm1, %v8039_v34, %v2489_v61  ;;  %5609 = vpow2.f32 %v2251_v54  ;;  %v2507_v27 = vsel %vm8156_vm4, %v2504_v16, %v2501_v15  ;;  %v2169_v44 = vmin.f32 %v8203_v48, 20.0  ;;  %v10695_v16 = vld [vmem:[#allocation70_spill] sm:$0xff] }
 0x3b4   :  { %10693 = vst [vmem:[#allocation67_spill] sm:$0xff] %v8212_v19  ;;  %v2255_v45 = vmul.f32 1.442695, %v2168_v37  ;;  %v8221_v10 = vadd.f32 %v7837_v5, %v7730_v20  ;;  %v5604_v35 = vpop.eup %5603  ;;  %v8226_v34 = vsel %vm2099_vm3, %v8043_v29, %v2507_v27  ;;  %v2498_v63 = vsel %vm8163_vm6, %v2495_v50, %v2492_v28 }
 0x3b5   :  { %10694 = vst [vmem:[#allocation84_spill] sm:$0xff] %v8226_v34  ;;  %v2513_v57 = vmul.f32 %v8120_v7, %v2512_v23  ;;  %v8233_v38 = vadd.f32 %v10695_v16, %v7733_v32  ;;  %v8238_v5 = vsel %vm2098_vm5, %v8051_v51, %v2498_v63  ;;  %v2510_v52 = vmul.f32 0.6931472, %v5604_v35  ;;  %v10697_v7 = vld [vmem:[#allocation71_spill] sm:$0xff]  ;;  %v8246_v23 = vpop.f32.mrb[62].mxu1 }
 0x3b6   :  { %10696 = vst [vmem:[#allocation70_spill] sm:$0xff] %v8238_v5  ;;  %5611 = vpow2.f32 %v2255_v45  ;;  %v2257_v40 = vmul.f32 1.442695, %v2169_v44  ;;  %v2522_v56 = vmul.f32 %v8136_v55, %v2521_v3  ;;  %v2171_v0 = vmin.f32 %v8221_v10, 20.0 }
 0x3b7   :  { %v5606_v30 = vpop.eup %5605  ;;  %v8244_v50 = vadd.f32 %v10697_v7, %v7736_v24  ;;  %v2516_v54 = vsel %vm8197_vm8, %v2513_v57, %v2510_v52  ;;  %vm2524_vm9 = vcmp.lt.f32.partialorder %v2523_v11, 0.0004427343  ;;  %v2170_v51 = vmin.f32 %v8233_v38, 20.0  ;;  %v10700_v11 = vld [vmem:[#allocation72_spill] sm:$0xff] }
 0x3b8   :  { %v2519_v29 = vmul.f32 0.6931472, %v5606_v30  ;;  %v5608_v21 = vpop.eup %5607  ;;  %5613 = vpow2.f32 %v2257_v40  ;;  %v8254_v55 = vsel %vm2100_vm7, %v8074_v31, %v2516_v54  ;;  %vm2101_vm10 = vcmp.gt.f32.partialorder %v8085_v60, 20.0  ;;  %v10701_v31 = vld [vmem:[#allocation75_spill] sm:$0xff]  ;;  %v10702_v57 = vld [vmem:[#allocation76_spill] sm:$0xff]  ;;  %v8274_v30 = vpop.f32.mrb[63].mxu0 }
 0x3b9   :  { %10698 = vst [vmem:[#allocation71_spill] sm:$0xff] %v8254_v55  ;;  %v2535_v61 = vadd.f32 1.0, %v5608_v21  ;;  %v2261_v37 = vmul.f32 1.442695, %v2171_v0  ;;  %v2259_v28 = vmul.f32 1.442695, %v2170_v51  ;;  %v8263_v3 = vadd.f32 %v10700_v11, %v7727_v58 }
 0x3ba   :  { %v2525_v36 = vsel %vm2524_vm9, %v2522_v56, %v2519_v29  ;;  %v2172_v4 = vmin.f32 %v8244_v50, 20.0  ;;  %v8267_v27 = vadd.f32 %v10701_v31, %v7730_v20  ;;  %v2538_v44 = vmul.f32 -0.5, %v5608_v21  ;;  %v8277_v40 = vpop.f32.mrb[63].mxu1  ;;  %v10703_v31 = vld [vmem:[#allocation53_spill] sm:$0xff] }
 0x3bb   :  { %v8258_v15 = vsel %vm2101_vm10, %v8085_v60, %v2525_v36  ;;  %5615 = vlog2.f32 %v2535_v61  ;;  %v2173_v63 = vmin.f32 %v8263_v3, 20.0  ;;  %v8272_v16 = vadd.f32 %v10702_v57, %v7733_v32 }
 0x3bc   :  { %10699 = vst [vmem:[#allocation85_spill] sm:$0xff] %v8258_v15  ;;  %5617 = vpow2.f32 %v2261_v37  ;;  %v2263_v35 = vmul.f32 1.442695, %v2172_v4  ;;  %v2175_v52 = vmin.f32 %v8267_v27, 20.0  ;;  %v2541_v56 = vand.u32 2147483647, %v5608_v21 }
 0x3bd   :  { %v5610_v45 = vpop.eup %5609  ;;  %5619 = vpow2.f32 %v2259_v28  ;;  %v2265_v0 = vmul.f32 1.442695, %v2173_v63  ;;  %v2539_v7 = vadd.f32 1.0, %v2538_v44  ;;  %v2174_v28 = vmin.f32 %v8272_v16, 20.0 }
 0x3be   :  { %v2526_v60 = vadd.f32 1.0, %v5610_v45  ;;  %5621 = vpow2.f32 %v2263_v35  ;;  %v2529_v54 = vmul.f32 -0.5, %v5610_v45  ;;  %v2269_v36 = vmul.f32 1.442695, %v2175_v52 }
 0x3bf   :  { %v2532_v37 = vand.u32 2147483647, %v5610_v45  ;;  %v8282_v35 = vadd.f32 %v10703_v31, %v7736_v24  ;;  %vm2103_vm11 = vcmp.gt.f32.partialorder %v8092_v53, 20.0  ;;  %v2267_v44 = vmul.f32 1.442695, %v2174_v28 }
 0x3c0   :  { %v5612_v29 = vpop.eup %5611  ;;  %5623 = vlog2.f32 %v2526_v60  ;;  %v2540_v57 = vmul.f32 %v5608_v21, %v2539_v7  ;;  %vm8285_vm12 = vcmp.lt.f32.partialorder %v2541_v56, 0.0004427343  ;;  %vm2102_vm13 = vcmp.gt.f32.partialorder %v8106_v26, 20.0 }
 0x3c1   :  { %v2544_v51 = vadd.f32 1.0, %v5612_v29  ;;  %5625 = vpow2.f32 %v2265_v0  ;;  %v2547_v4 = vmul.f32 -0.5, %v5612_v29  ;;  %v2530_v0 = vadd.f32 1.0, %v2529_v54 }
 0x3c2   :  { %v5614_v61 = vpop.eup %5613  ;;  %vm8290_vm14 = vcmp.lt.f32.partialorder %v2532_v37, 0.0004427343  ;;  %v2550_v55 = vand.u32 2147483647, %v5612_v29  ;;  %v2176_v56 = vmin.f32 %v8282_v35, 20.0  ;;  %vm2104_vm15 = vcmp.gt.f32.partialorder %v8190_v41, 20.0 }
 0x3c3   :  { %5627 = vlog2.f32 %v2544_v51  ;;  %v2553_v11 = vadd.f32 1.0, %v5614_v61  ;;  %v2556_v60 = vmul.f32 -0.5, %v5614_v61  ;;  %v2548_v28 = vadd.f32 1.0, %v2547_v4 }
 0x3c4   :  { %5629 = vpow2.f32 %v2269_v36  ;;  %v2559_v49 = vand.u32 2147483647, %v5614_v61  ;;  %v2531_v19 = vmul.f32 %v5610_v45, %v2530_v0  ;;  %vm8303_vm0 = vcmp.lt.f32.partialorder %v2550_v55, 0.0004427343 }
 0x3c5   :  { %v5616_v63 = vpop.eup %5615  ;;  %5631 = vlog2.f32 %v2553_v11  ;;  %v2557_v54 = vadd.f32 1.0, %v2556_v60  ;;  %vm2105_vm1 = vcmp.gt.f32.partialorder %v8203_v48, 20.0  ;;  %v2271_v45 = vmul.f32 1.442695, %v2176_v56 }
 0x3c6   :  { %v5618_v51 = vpop.eup %5617  ;;  %v2537_v34 = vmul.f32 0.6931472, %v5616_v63  ;;  %5633 = vpow2.f32 %v2267_v44  ;;  %vm8308_vm2 = vcmp.lt.f32.partialorder %v2559_v49, 0.0004427343  ;;  %vm2107_vm4 = vcmp.gt.f32.partialorder %v8221_v10, 20.0 }
 0x3c7   :  { %v5620_v36 = vpop.eup %5619  ;;  %v2571_v21 = vadd.f32 1.0, %v5618_v51  ;;  %v2574_v11 = vmul.f32 -0.5, %v5618_v51  ;;  %v2577_v4 = vand.u32 2147483647, %v5618_v51  ;;  %vm2106_vm5 = vcmp.gt.f32.partialorder %v8233_v38, 20.0 }
 0x3c8   :  { %v2543_v7 = vsel %vm8285_vm12, %v2540_v57, %v2537_v34  ;;  %v2562_v63 = vadd.f32 1.0, %v5620_v36  ;;  %v5622_v37 = vpop.eup %5621  ;;  %v2565_v44 = vmul.f32 -0.5, %v5620_v36  ;;  %v2549_v57 = vmul.f32 %v5612_v29, %v2548_v28 }
 0x3c9   :  { %v8301_v62 = vsel %vm2103_vm11, %v8092_v53, %v2543_v7  ;;  %5635 = vlog2.f32 %v2571_v21  ;;  %v2580_v34 = vadd.f32 1.0, %v5622_v37  ;;  %v2583_v53 = vmul.f32 -0.5, %v5622_v37 }
 0x3ca   :  { %10708 = vst [vmem:[#allocation72_spill] sm:$0xff] %v8301_v62  ;;  %v5624_v15 = vpop.eup %5623  ;;  %5637 = vlog2.f32 %v2562_v63  ;;  %v2558_v7 = vmul.f32 %v5614_v61, %v2557_v54  ;;  %v2575_v62 = vadd.f32 1.0, %v2574_v11  ;;  %vm8314_vm3 = vcmp.lt.f32.partialorder %v2577_v4, 0.0004427343 }
 0x3cb   :  { %v2528_v60 = vmul.f32 0.6931472, %v5624_v15  ;;  %v5626_v21 = vpop.eup %5625  ;;  %5639 = vlog2.f32 %v2580_v34  ;;  %v2566_v15 = vadd.f32 1.0, %v2565_v44  ;;  %v2568_v29 = vand.u32 2147483647, %v5620_v36 }
 0x3cc   :  { %v2589_v49 = vadd.f32 1.0, %v5626_v21  ;;  %v2586_v56 = vand.u32 2147483647, %v5622_v37  ;;  %v2592_v31 = vmul.f32 -0.5, %v5626_v21  ;;  %v2584_v11 = vadd.f32 1.0, %v2583_v53 }
 0x3cd   :  { %v5628_v55 = vpop.eup %5627  ;;  %v2534_v0 = vsel %vm8290_vm14, %v2531_v19, %v2528_v60  ;;  %v2595_v63 = vand.u32 2147483647, %v5626_v21  ;;  %v2576_v60 = vmul.f32 %v5618_v51, %v2575_v62  ;;  %vm2108_vm6 = vcmp.gt.f32.partialorder %v8244_v50, 20.0 }
 0x3ce   :  { %v8318_v28 = vpop.eup %5629  ;;  %v8323_v61 = vsel %vm2102_vm13, %v8106_v26, %v2534_v0  ;;  %v2546_v54 = vmul.f32 0.6931472, %v5628_v55  ;;  %5641 = vlog2.f32 %v2589_v49  ;;  %v8341_v53 = vadd.f32 %v7897_v8, %v7727_v58 }
 0x3cf   :  { %10715 = vst [vmem:[#allocation75_spill] sm:$0xff] %v8323_v61  ;;  %v5632_v19 = vpop.eup %5631  ;;  %v2607_v4 = vadd.f32 1.0, %v8318_v28  ;;  %v2610_v55 = vmul.f32 -0.5, %v8318_v28  ;;  %v2567_v61 = vmul.f32 %v5620_v36, %v2566_v15  ;;  %vm8345_vm7 = vcmp.lt.f32.partialorder %v2568_v29, 0.0004427343 }
 0x3d0   :  { %v8328_v44 = vpop.eup %5633  ;;  %v2552_v34 = vsel %vm8303_vm0, %v2549_v57, %v2546_v54  ;;  %v2555_v26 = vmul.f32 0.6931472, %v5632_v19  ;;  %v2593_v51 = vadd.f32 1.0, %v2592_v31  ;;  %v2585_v15 = vmul.f32 %v5622_v37, %v2584_v11 }
 0x3d1   :  { %v8336_v0 = vsel %vm2104_vm15, %v8190_v41, %v2552_v34  ;;  %5643 = vlog2.f32 %v2607_v4  ;;  %v2598_v57 = vadd.f32 1.0, %v8328_v44  ;;  %vm8355_vm8 = vcmp.lt.f32.partialorder %v2586_v56, 0.0004427343 }
 0x3d2   :  { %v2561_v5 = vsel %vm8308_vm2, %v2558_v7, %v2555_v26  ;;  %vm8359_vm9 = vcmp.lt.f32.partialorder %v2595_v63, 0.0004427343  ;;  %vm2109_vm10 = vcmp.gt.f32.partialorder %v8263_v3, 20.0  ;;  %v2611_v49 = vadd.f32 1.0, %v2610_v55 }
 0x3d3   :  { %v5636_v41 = vpop.eup %5635  ;;  %v8353_v36 = vsel %vm2105_vm1, %v8203_v48, %v2561_v5  ;;  %5645 = vlog2.f32 %v2598_v57  ;;  %v2601_v54 = vmul.f32 -0.5, %v8328_v44  ;;  %v2613_v48 = vand.u32 2147483647, %v8318_v28 }
 0x3d4   :  { %v5638_v7 = vpop.eup %5637  ;;  %v2573_v29 = vmul.f32 0.6931472, %v5636_v41  ;;  %5647 = vpow2.f32 %v2271_v45  ;;  %v2177_v37 = vmin.f32 %v8341_v53, 20.0  ;;  %v2594_v11 = vmul.f32 %v5626_v21, %v2593_v51 }
 0x3d5   :  { %v2564_v31 = vmul.f32 0.6931472, %v5638_v7  ;;  %v5640_v56 = vpop.eup %5639  ;;  %vm2111_vm11 = vcmp.gt.f32.partialorder %v8267_v27, 20.0  ;;  %v8372_v63 = vadd.f32 %v7904_v18, %v7730_v20  ;;  %v8376_v4 = vadd.f32 %v7906_v13, %v7733_v32 }
 0x3d6   :  { %v2579_v19 = vsel %vm8314_vm3, %v2576_v60, %v2573_v29  ;;  %v2582_v34 = vmul.f32 0.6931472, %v5640_v56  ;;  %v2273_v21 = vmul.f32 1.442695, %v2177_v37  ;;  %v2612_v18 = vmul.f32 %v8318_v28, %v2611_v49 }
 0x3d7   :  { %v8381_v45 = vsel %vm2107_vm4, %v8221_v10, %v2579_v19  ;;  %v2570_v22 = vsel %vm8345_vm7, %v2567_v61, %v2564_v31  ;;  %v2602_v60 = vadd.f32 1.0, %v2601_v54  ;;  %v2179_v13 = vmin.f32 %v8372_v63, 20.0 }
 0x3d8   :  { %10722 = vst [vmem:[#allocation76_spill] sm:$0xff] %v8381_v45  ;;  %v8388_v26 = vsel %vm2106_vm5, %v8233_v38, %v2570_v22  ;;  %v5642_v55 = vpop.eup %5641  ;;  %v2588_v10 = vsel %vm8355_vm8, %v2585_v15, %v2582_v34  ;;  %5649 = vpow2.f32 %v2273_v21  ;;  %v2178_v5 = vmin.f32 %v8376_v4, 20.0 }
 0x3d9   :  { %v8397_v61 = vadd.f32 %v7917_v33, %v7736_v24  ;;  %v8402_v38 = vsel %vm2108_vm6, %v8244_v50, %v2588_v10  ;;  %v2591_v28 = vmul.f32 0.6931472, %v5642_v55  ;;  %v2277_v62 = vmul.f32 1.442695, %v2179_v13 }
 0x3da   :  { %v8406_v51 = vadd.f32 %v7919_v42, %v7727_v58  ;;  %vm8408_vm12 = vcmp.lt.f32.partialorder %v2613_v48, 0.0004427343  ;;  %v2275_v15 = vmul.f32 1.442695, %v2178_v5  ;;  %v8415_v8 = vadd.f32 %v7931_v6, %v7730_v20 }
 0x3db   :  { %v5644_v57 = vpop.eup %5643  ;;  %v2180_v33 = vmin.f32 %v8397_v61, 20.0  ;;  %v2597_v50 = vsel %vm8359_vm9, %v2594_v11, %v2591_v28  ;;  %v2604_v29 = vand.u32 2147483647, %v8328_v44  ;;  %5651 = vpow2.f32 %v2277_v62 }
 0x3dc   :  { %v2609_v7 = vmul.f32 0.6931472, %v5644_v57  ;;  %v8423_v42 = vsel %vm2109_vm10, %v8263_v3, %v2597_v50  ;;  %5653 = vpow2.f32 %v2275_v15  ;;  %v2181_v54 = vmin.f32 %v8406_v51, 20.0 }
 0x3dd   :  { %v2279_v49 = vmul.f32 1.442695, %v2180_v33  ;;  %v5646_v31 = vpop.eup %5645  ;;  %v2603_v52 = vmul.f32 %v8328_v44, %v2602_v60  ;;  %v2183_v48 = vmin.f32 %v8415_v8, 20.0  ;;  %v8432_v37 = vadd.f32 %v7933_v9, %v7733_v32 }
 0x3de   :  { %v2615_v6 = vsel %vm8408_vm12, %v2612_v18, %v2609_v7  ;;  %v5648_v56 = vpop.eup %5647  ;;  %v2600_v19 = vmul.f32 0.6931472, %v5646_v31  ;;  %v2281_v11 = vmul.f32 1.442695, %v2181_v54  ;;  %vm2605_vm13 = vcmp.lt.f32.partialorder %v2604_v29, 0.0004427343 }
 0x3df   :  { %v8437_v3 = vsel %vm2111_vm11, %v8267_v27, %v2615_v6  ;;  %5655 = vpow2.f32 %v2279_v49  ;;  %v2616_v22 = vadd.f32 1.0, %v5648_v56  ;;  %v2285_v34 = vmul.f32 1.442695, %v2183_v48 }
 0x3e0   :  { %10725 = vst [vmem:[#allocation53_spill] sm:$0xff] %v8437_v3  ;;  %vm2110_vm14 = vcmp.gt.f32.partialorder %v8272_v16, 20.0  ;;  %v2606_v44 = vsel %vm2605_vm13, %v2603_v52, %v2600_v19  ;;  %5657 = vpow2.f32 %v2281_v11  ;;  %v2182_v21 = vmin.f32 %v8432_v37, 20.0 }
 0x3e1   :  { %v8442_v9 = vsel %vm2110_vm14, %v8272_v16, %v2606_v44  ;;  %5659 = vlog2.f32 %v2616_v22  ;;  %v2619_v18 = vmul.f32 -0.5, %v5648_v56  ;;  %v8446_v13 = vadd.f32 %v7947_v12, %v7736_v24 }
 0x3e2   :  { %v5650_v60 = vpop.eup %5649  ;;  %5661 = vpow2.f32 %v2285_v34  ;;  %v2283_v27 = vmul.f32 1.442695, %v2182_v21  ;;  %v8450_v55 = vadd.f32 %v7970_v59, %v7727_v58  ;;  %v2622_v5 = vand.u32 2147483647, %v5648_v56 }
 0x3e3   :  { %v2625_v10 = vadd.f32 1.0, %v5650_v60  ;;  %v2628_v28 = vmul.f32 -0.5, %v5650_v60  ;;  %v2184_v16 = vmin.f32 %v8446_v13, 20.0  ;;  %v2620_v15 = vadd.f32 1.0, %v2619_v18 }
 0x3e4   :  { %5663 = vpow2.f32 %v2283_v27  ;;  %v2185_v57 = vmin.f32 %v8450_v55, 20.0  ;;  %vm2112_vm15 = vcmp.gt.f32.partialorder %v8282_v35, 20.0  ;;  %v2631_v12 = vand.u32 2147483647, %v5650_v60 }
 0x3e5   :  { %v5652_v62 = vpop.eup %5651  ;;  %5665 = vlog2.f32 %v2625_v10  ;;  %v2287_v50 = vmul.f32 1.442695, %v2184_v16  ;;  %vm8455_vm0 = vcmp.lt.f32.partialorder %v2622_v5, 0.0004427343  ;;  %v2629_v49 = vadd.f32 1.0, %v2628_v28 }
 0x3e6   :  { %v5654_v41 = vpop.eup %5653  ;;  %v2643_v33 = vadd.f32 1.0, %v5652_v62  ;;  %v2289_v54 = vmul.f32 1.442695, %v2185_v57  ;;  %v2646_v31 = vmul.f32 -0.5, %v5652_v62  ;;  %v2621_v19 = vmul.f32 %v5648_v56, %v2620_v15 }
 0x3e7   :  { %v2634_v7 = vadd.f32 1.0, %v5654_v41  ;;  %v2637_v6 = vmul.f32 -0.5, %v5654_v41  ;;  %vm2113_vm1 = vcmp.gt.f32.partialorder %v8341_v53, 20.0  ;;  %v2649_v11 = vand.u32 2147483647, %v5652_v62 }
 0x3e8   :  { %5667 = vlog2.f32 %v2643_v33  ;;  %vm8460_vm2 = vcmp.lt.f32.partialorder %v2631_v12, 0.0004427343  ;;  %v2630_v5 = vmul.f32 %v5650_v60, %v2629_v49  ;;  %v2640_v28 = vand.u32 2147483647, %v5654_v41 }
 0x3e9   :  { %v5656_v59 = vpop.eup %5655  ;;  %5669 = vlog2.f32 %v2634_v7  ;;  %vm2115_vm3 = vcmp.gt.f32.partialorder %v8372_v63, 20.0  ;;  %v2647_v56 = vadd.f32 1.0, %v2646_v31  ;;  %v2638_v16 = vadd.f32 1.0, %v2637_v6 }
 0x3ea   :  { %v2652_v52 = vadd.f32 1.0, %v5656_v59  ;;  %v5658_v48 = vpop.eup %5657  ;;  %v2655_v22 = vmul.f32 -0.5, %v5656_v59  ;;  %5671 = vpow2.f32 %v2287_v50  ;;  %vm8472_vm4 = vcmp.lt.f32.partialorder %v2649_v11, 0.0004427343 }
 0x3eb   :  { %v5660_v34 = vpop.eup %5659  ;;  %v2661_v21 = vadd.f32 1.0, %v5658_v48  ;;  %v2664_v18 = vmul.f32 -0.5, %v5658_v48  ;;  %vm2114_vm5 = vcmp.gt.f32.partialorder %v8376_v4, 20.0  ;;  %v2658_v12 = vand.u32 2147483647, %v5656_v59 }
 0x3ec   :  { %5673 = vlog2.f32 %v2652_v52  ;;  %v8464_v27 = vpop.eup %5661  ;;  %v2618_v10 = vmul.f32 0.6931472, %v5660_v34  ;;  %v2656_v60 = vadd.f32 1.0, %v2655_v22  ;;  %v2667_v31 = vand.u32 2147483647, %v5658_v48 }
 0x3ed   :  { %5675 = vpow2.f32 %v2289_v54  ;;  %v2679_v57 = vadd.f32 1.0, %v8464_v27  ;;  %v2665_v54 = vadd.f32 1.0, %v2664_v18  ;;  %vm2116_vm6 = vcmp.gt.f32.partialorder %v8397_v61, 20.0 }
 0x3ee   :  { %5677 = vlog2.f32 %v2661_v21  ;;  %v8468_v15 = vpop.eup %5663  ;;  %v2624_v33 = vsel %vm8455_vm0, %v2621_v19, %v2618_v10  ;;  %v2682_v29 = vmul.f32 -0.5, %v8464_v27  ;;  %v2685_v52 = vand.u32 2147483647, %v8464_v27 }
 0x3ef   :  { %v5666_v7 = vpop.eup %5665  ;;  %v8480_v49 = vsel %vm2112_vm15, %v8282_v35, %v2624_v33  ;;  %5679 = vlog2.f32 %v2679_v57  ;;  %v2670_v19 = vadd.f32 1.0, %v8468_v15  ;;  %v2648_v11 = vmul.f32 %v5652_v62, %v2647_v56 }
 0x3f0   :  { %10732 = vst [vmem:[#allocation86_spill] sm:$0xff] %v8480_v49  ;;  %v2627_v6 = vmul.f32 0.6931472, %v5666_v7  ;;  %v2639_v22 = vmul.f32 %v5654_v41, %v2638_v16  ;;  %vm8486_vm7 = vcmp.lt.f32.partialorder %v2640_v28, 0.0004427343  ;;  %v2673_v35 = vmul.f32 -0.5, %v8468_v15 }
 0x3f1   :  { %vm8493_vm8 = vcmp.lt.f32.partialorder %v2658_v12, 0.0004427343  ;;  %vm2117_vm9 = vcmp.gt.f32.partialorder %v8406_v51, 20.0  ;;  %5681 = vlog2.f32 %v2670_v19  ;;  %v8500_v62 = vadd.f32 %v7972_v17, %v7730_v20 }
 0x3f2   :  { %v5668_v21 = vpop.eup %5667  ;;  %v2633_v18 = vsel %vm8460_vm2, %v2630_v5, %v2627_v6  ;;  %v2657_v44 = vmul.f32 %v5656_v59, %v2656_v60  ;;  %vm8507_vm10 = vcmp.lt.f32.partialorder %v2667_v31, 0.0004427343  ;;  %v2666_v33 = vmul.f32 %v5658_v48, %v2665_v54 }
 0x3f3   :  { %v5670_v41 = vpop.eup %5669  ;;  %v8505_v28 = vsel %vm2113_vm1, %v8341_v53, %v2633_v18  ;;  %v2645_v56 = vmul.f32 0.6931472, %v5668_v21  ;;  %vm2119_vm11 = vcmp.gt.f32.partialorder %v8415_v8, 20.0  ;;  %v2683_v12 = vadd.f32 1.0, %v2682_v29 }
 0x3f4   :  { %v5672_v16 = vpop.eup %5671  ;;  %v2636_v57 = vmul.f32 0.6931472, %v5670_v41  ;;  %vm8512_vm12 = vcmp.lt.f32.partialorder %v2685_v52, 0.0004427343  ;;  %v2674_v6 = vadd.f32 1.0, %v2673_v35  ;;  %v2187_v52 = vmin.f32 %v8500_v62, 20.0 }
 0x3f5   :  { %v2651_v53 = vsel %vm8472_vm4, %v2648_v11, %v2645_v56  ;;  %v2676_v59 = vand.u32 2147483647, %v8468_v15  ;;  %v2688_v60 = vadd.f32 1.0, %v5672_v16  ;;  %vm2118_vm13 = vcmp.gt.f32.partialorder %v8432_v37, 20.0 }
 0x3f6   :  { %v5674_v7 = vpop.eup %5673  ;;  %v8524_v48 = vsel %vm2115_vm3, %v8372_v63, %v2651_v53  ;;  %v2642_v54 = vsel %vm8486_vm7, %v2639_v22, %v2636_v57  ;;  %v8538_v63 = vadd.f32 %v7978_v46, %v7733_v32  ;;  %v2691_v35 = vmul.f32 -0.5, %v5672_v16 }
 0x3f7   :  { %v8519_v31 = vpop.eup %5675  ;;  %10741 = vst [vmem:[#allocation87_spill] sm:$0xff] %v8524_v48  ;;  %v2654_v29 = vmul.f32 0.6931472, %v5674_v7  ;;  %v8532_v50 = vsel %vm2114_vm5, %v8376_v4, %v2642_v54  ;;  %5683 = vlog2.f32 %v2688_v60  ;;  %v8544_v21 = vadd.f32 %v7980_v2, %v7736_v24  ;;  %v10746_v54 = vld [vmem:[#allocation74_spill] sm:$0xff] }
 0x3f8   :  { %v5678_v19 = vpop.eup %5677  ;;  %v2697_v11 = vadd.f32 1.0, %v8519_v31  ;;  %v2684_v41 = vmul.f32 %v8464_v27, %v2683_v12  ;;  %vm8552_vm14 = vcmp.lt.f32.partialorder %v2676_v59, 0.0004427343  ;;  %v2675_v2 = vmul.f32 %v8468_v15, %v2674_v6 }
 0x3f9   :  { %v2660_v22 = vsel %vm8493_vm8, %v2657_v44, %v2654_v29  ;;  %v2663_v34 = vmul.f32 0.6931472, %v5678_v19  ;;  %v5680_v4 = vpop.eup %5679  ;;  %v2293_v44 = vmul.f32 1.442695, %v2187_v52  ;;  %v2700_v27 = vmul.f32 -0.5, %v8519_v31  ;;  %v10747_v52 = vld [vmem:[#allocation80_spill] sm:$0xff] }
 0x3fa   :  { %v8549_v18 = vsel %vm2116_vm6, %v8397_v61, %v2660_v22  ;;  %5685 = vlog2.f32 %v2697_v11  ;;  %v2681_v56 = vmul.f32 0.6931472, %v5680_v4  ;;  %v2694_v61 = vand.u32 2147483647, %v5672_v16 }
 0x3fb   :  { %10742 = vst [vmem:[#allocation88_spill] sm:$0xff] %v8549_v18  ;;  %v2669_v10 = vsel %vm8507_vm10, %v2666_v33, %v2663_v34  ;;  %v2186_v12 = vmin.f32 %v8538_v63, 20.0  ;;  %v5682_v7 = vpop.eup %5681  ;;  %vm2120_vm15 = vcmp.gt.f32.partialorder %v8446_v13, 20.0  ;;  %v2692_v5 = vadd.f32 1.0, %v2691_v35 }
 0x3fc   :  { %v8562_v57 = vsel %vm2117_vm9, %v8406_v51, %v2669_v10  ;;  %v2687_v53 = vsel %vm8512_vm12, %v2684_v41, %v2681_v56  ;;  %5687 = vpow2.f32 %v2293_v44  ;;  %v2188_v15 = vmin.f32 %v8544_v21, 20.0 }
 0x3fd   :  { %v8573_v51 = vsel %vm2119_vm11, %v8415_v8, %v2687_v53  ;;  %v2672_v33 = vmul.f32 0.6931472, %v5682_v7  ;;  %v2291_v6 = vmul.f32 1.442695, %v2186_v12  ;;  %v8577_v59 = vadd.f32 %v7990_v43, %v7727_v58 }
 0x3fe   :  { %10745 = vst [vmem:[#allocation89_spill] sm:$0xff] %v8573_v51  ;;  %v2295_v60 = vmul.f32 1.442695, %v2188_v15  ;;  %v8581_v17 = vadd.f32 %v7992_v1, %v7730_v20  ;;  %v8585_v29 = vadd.f32 %v10746_v54, %v7733_v32  ;;  %v8589_v19 = vadd.f32 %v10747_v52, %v7736_v24 }
 0x3ff   :  { %v2678_v8 = vsel %vm8552_vm14, %v2675_v2, %v2672_v33  ;;  %v2701_v11 = vadd.f32 1.0, %v2700_v27  ;;  %5689 = vpow2.f32 %v2291_v6  ;;  %v2189_v43 = vmin.f32 %v8577_v59, 20.0 }
 0x400   :  { %v8597_v1 = vsel %vm2118_vm13, %v8432_v37, %v2678_v8  ;;  %vm8599_vm0 = vcmp.lt.f32.partialorder %v2694_v61, 0.0004427343  ;;  %5691 = vpow2.f32 %v2295_v60  ;;  %v2191_v34 = vmin.f32 %v8581_v17, 20.0  ;;  %v10750_v37 = vld [vmem:[#allocation60_spill] sm:$0xff] }
 0x401   :  { %v5684_v35 = vpop.eup %5683  ;;  %v2693_v4 = vmul.f32 %v5672_v16, %v2692_v5  ;;  %v2703_v41 = vand.u32 2147483647, %v8519_v31  ;;  %v2297_v46 = vmul.f32 1.442695, %v2189_v43  ;;  %v2190_v10 = vmin.f32 %v8585_v29, 20.0  ;;  %v10751_v16 = vld [vmem:[#allocation64_spill] sm:$0xff] }
 0x402   :  { %v2690_v56 = vmul.f32 0.6931472, %v5684_v35  ;;  %v2301_v2 = vmul.f32 1.442695, %v2191_v34  ;;  %v2192_v44 = vmin.f32 %v8589_v19, 20.0  ;;  %v8609_v61 = vadd.f32 %v10750_v37, %v7727_v58  ;;  %v10753_v35 = vld [vmem:[#allocation58_spill] sm:$0xff] }
 0x403   :  { %v2702_v12 = vmul.f32 %v8519_v31, %v2701_v11  ;;  %5693 = vpow2.f32 %v2297_v46  ;;  %v2299_v7 = vmul.f32 1.442695, %v2190_v10  ;;  %v8614_v53 = vadd.f32 %v10751_v16, %v7730_v20 }
 0x404   :  { %v5686_v27 = vpop.eup %5685  ;;  %v2696_v5 = vsel %vm8599_vm0, %v2693_v4, %v2690_v56  ;;  %5695 = vpow2.f32 %v2301_v2  ;;  %v2303_v33 = vmul.f32 1.442695, %v2192_v44  ;;  %vm2704_vm1 = vcmp.lt.f32.partialorder %v2703_v41, 0.0004427343 }
 0x405   :  { %v2699_v15 = vmul.f32 0.6931472, %v5686_v27  ;;  %v8621_v6 = vsel %vm2120_vm15, %v8446_v13, %v2696_v5  ;;  %5697 = vpow2.f32 %v2299_v7  ;;  %v2193_v31 = vmin.f32 %v8609_v61, 20.0  ;;  %v10756_v7 = vld [vmem:[#allocation62_spill] sm:$0xff] }
 0x406   :  { %10752 = vst [vmem:[#allocation74_spill] sm:$0xff] %v8621_v6  ;;  %v5688_v60 = vpop.eup %5687  ;;  %vm2121_vm2 = vcmp.gt.f32.partialorder %v8450_v55, 20.0  ;;  %5699 = vpow2.f32 %v2303_v33  ;;  %v2195_v22 = vmin.f32 %v8614_v53, 20.0  ;;  %v8631_v4 = vadd.f32 %v10753_v35, %v7733_v32 }
 0x407   :  { %v2705_v54 = vsel %vm2704_vm1, %v2702_v12, %v2699_v15  ;;  %v2715_v8 = vadd.f32 1.0, %v5688_v60  ;;  %v2718_v11 = vmul.f32 -0.5, %v5688_v60  ;;  %v2305_v43 = vmul.f32 1.442695, %v2193_v31 }
 0x408   :  { %v8626_v52 = vsel %vm2121_vm2, %v8450_v55, %v2705_v54  ;;  %v2721_v13 = vand.u32 2147483647, %v5688_v60  ;;  %v2309_v44 = vmul.f32 1.442695, %v2195_v22  ;;  %v2194_v12 = vmin.f32 %v8631_v4, 20.0 }
 0x409   :  { %v5690_v34 = vpop.eup %5689  ;;  %5701 = vlog2.f32 %v2715_v8  ;;  %v2719_v55 = vadd.f32 1.0, %v2718_v11  ;;  %v8640_v16 = vadd.f32 %v10756_v7, %v7736_v24  ;;  %vm2123_vm4 = vcmp.gt.f32.partialorder %v8500_v62, 20.0 }
 0x40a   :  { %v5692_v41 = vpop.eup %5691  ;;  %v2706_v46 = vadd.f32 1.0, %v5690_v34  ;;  %5703 = vpow2.f32 %v2305_v43  ;;  %v2709_v10 = vmul.f32 -0.5, %v5690_v34  ;;  %vm8633_vm3 = vcmp.lt.f32.partialorder %v2721_v13, 0.0004427343 }
 0x40b   :  { %v2724_v56 = vadd.f32 1.0, %v5692_v41  ;;  %v2727_v2 = vmul.f32 -0.5, %v5692_v41  ;;  %v2712_v15 = vand.u32 2147483647, %v5690_v34  ;;  %v2730_v33 = vand.u32 2147483647, %v5692_v41 }
 0x40c   :  { %5705 = vlog2.f32 %v2706_v46  ;;  %v2710_v11 = vadd.f32 1.0, %v2709_v10  ;;  %v2720_v46 = vmul.f32 %v5688_v60, %v2719_v55  ;;  %vm2122_vm5 = vcmp.gt.f32.partialorder %v8538_v63, 20.0 }
 0x40d   :  { %v5694_v37 = vpop.eup %5693  ;;  %5707 = vlog2.f32 %v2724_v56  ;;  %v2728_v43 = vadd.f32 1.0, %v2727_v2  ;;  %vm8646_vm6 = vcmp.lt.f32.partialorder %v2712_v15, 0.0004427343  ;;  %vm2124_vm7 = vcmp.gt.f32.partialorder %v8544_v21, 20.0 }
 0x40e   :  { %v5696_v5 = vpop.eup %5695  ;;  %v2733_v31 = vadd.f32 1.0, %v5694_v37  ;;  %v2736_v54 = vmul.f32 -0.5, %v5694_v37  ;;  %v2739_v56 = vand.u32 2147483647, %v5694_v37  ;;  %v2711_v55 = vmul.f32 %v5690_v34, %v2710_v11 }
 0x40f   :  { %v5698_v8 = vpop.eup %5697  ;;  %v2751_v22 = vadd.f32 1.0, %v5696_v5  ;;  %v2754_v13 = vmul.f32 -0.5, %v5696_v5  ;;  %v2757_v6 = vand.u32 2147483647, %v5696_v5  ;;  %vm8652_vm8 = vcmp.lt.f32.partialorder %v2730_v33, 0.0004427343 }
 0x410   :  { %v8643_v35 = vpop.eup %5699  ;;  %5709 = vlog2.f32 %v2733_v31  ;;  %v2742_v51 = vadd.f32 1.0, %v5698_v8  ;;  %v2737_v7 = vadd.f32 1.0, %v2736_v54  ;;  %v2745_v10 = vmul.f32 -0.5, %v5698_v8 }
 0x411   :  { %5711 = vlog2.f32 %v2751_v22  ;;  %v2755_v48 = vadd.f32 1.0, %v2754_v13  ;;  %v2760_v2 = vadd.f32 1.0, %v8643_v35  ;;  %v2729_v31 = vmul.f32 %v5692_v41, %v2728_v43 }
 0x412   :  { %5713 = vlog2.f32 %v2742_v51  ;;  %v2307_v54 = vmul.f32 1.442695, %v2194_v12  ;;  %vm8658_vm9 = vcmp.lt.f32.partialorder %v2739_v56, 0.0004427343  ;;  %v2748_v45 = vand.u32 2147483647, %v5698_v8 }
 0x413   :  { %v5702_v60 = vpop.eup %5701  ;;  %5715 = vlog2.f32 %v2760_v2  ;;  %vm2125_vm10 = vcmp.gt.f32.partialorder %v8577_v59, 20.0  ;;  %v2738_v51 = vmul.f32 %v5694_v37, %v2737_v7  ;;  %v2756_v49 = vmul.f32 %v5696_v5, %v2755_v48 }
 0x414   :  { %v8656_v22 = vpop.eup %5703  ;;  %v2717_v15 = vmul.f32 0.6931472, %v5702_v60  ;;  %vm8663_vm11 = vcmp.lt.f32.partialorder %v2757_v6, 0.0004427343  ;;  %v2196_v12 = vmin.f32 %v8640_v16, 20.0  ;;  %vm2127_vm12 = vcmp.gt.f32.partialorder %v8581_v17, 20.0 }
 0x415   :  { %v2769_v41 = vadd.f32 1.0, %v8656_v22  ;;  %v2746_v43 = vadd.f32 1.0, %v2745_v10  ;;  %v2763_v56 = vmul.f32 -0.5, %v8643_v35  ;;  %5717 = vpow2.f32 %v2309_v44  ;;  %v10768_v60 = vld [vmem:[#allocation77_spill] sm:$0xff] }
 0x416   :  { %v5706_v33 = vpop.eup %5705  ;;  %v2723_v11 = vsel %vm8633_vm3, %v2720_v46, %v2717_v15  ;;  %vm2126_vm13 = vcmp.gt.f32.partialorder %v8585_v29, 20.0  ;;  %v2766_v5 = vand.u32 2147483647, %v8643_v35  ;;  %vm8680_vm14 = vcmp.lt.f32.partialorder %v2748_v45, 0.0004427343  ;;  %v10770_v46 = vld [vmem:[#allocation55_spill] sm:$0xff] }
 0x417   :  { %v5708_v37 = vpop.eup %5707  ;;  %v8676_v48 = vsel %vm2123_vm4, %v8500_v62, %v2723_v11  ;;  %v2708_v6 = vmul.f32 0.6931472, %v5706_v33  ;;  %5719 = vlog2.f32 %v2769_v41  ;;  %v2772_v7 = vmul.f32 -0.5, %v8656_v22  ;;  %v10767_v62 = vld [vmem:[#allocation79_spill] sm:$0xff] }
 0x418   :  { %v2726_v27 = vmul.f32 0.6931472, %v5708_v37  ;;  %5721 = vpow2.f32 %v2307_v54  ;;  %v2311_v10 = vmul.f32 1.442695, %v2196_v12  ;;  %v8689_v2 = vadd.f32 %v10767_v62, %v7727_v58 }
 0x419   :  { %v2714_v44 = vsel %vm8646_vm6, %v2711_v55, %v2708_v6  ;;  %v8693_v15 = vadd.f32 %v10768_v60, %v7730_v20  ;;  %v2747_v18 = vmul.f32 %v5698_v8, %v2746_v43  ;;  %v10769_v55 = vld [vmem:[#allocation51_spill] sm:$0xff]  ;;  %v2764_v6 = vadd.f32 1.0, %v2763_v56 }
 0x41a   :  { %v5710_v41 = vpop.eup %5709  ;;  %v8698_v45 = vsel %vm2122_vm5, %v8538_v63, %v2714_v44  ;;  %v2732_v54 = vsel %vm8652_vm8, %v2729_v31, %v2726_v27  ;;  %v8704_v12 = vadd.f32 %v10769_v55, %v7733_v32  ;;  %5723 = vpow2.f32 %v2311_v10 }
 0x41b   :  { %v5712_v33 = vpop.eup %5711  ;;  %v8709_v11 = vsel %vm2124_vm7, %v8544_v21, %v2732_v54  ;;  %v2735_v37 = vmul.f32 0.6931472, %v5710_v41  ;;  %v2775_v44 = vand.u32 2147483647, %v8656_v22  ;;  %v2197_v3 = vmin.f32 %v8689_v2, 20.0 }
 0x41c   :  { %v5714_v62 = vpop.eup %5713  ;;  %v2753_v63 = vmul.f32 0.6931472, %v5712_v33  ;;  %v2199_v8 = vmin.f32 %v8693_v15, 20.0  ;;  %v2773_v27 = vadd.f32 1.0, %v2772_v7  ;;  %v2198_v60 = vmin.f32 %v8704_v12, 20.0 }
 0x41d   :  { %v2741_v31 = vsel %vm8658_vm9, %v2738_v51, %v2735_v37  ;;  %v2744_v43 = vmul.f32 0.6931472, %v5714_v62  ;;  %v5716_v21 = vpop.eup %5715  ;;  %v2313_v41 = vmul.f32 1.442695, %v2197_v3  ;;  %v2765_v55 = vmul.f32 %v8643_v35, %v2764_v6 }
 0x41e   :  { %v8720_v56 = vsel %vm2125_vm10, %v8577_v59, %v2741_v31  ;;  %v2759_v10 = vsel %vm8663_vm11, %v2756_v49, %v2753_v63  ;;  %v2317_v54 = vmul.f32 1.442695, %v2199_v8  ;;  %v2762_v7 = vmul.f32 0.6931472, %v5716_v21  ;;  %v10771_v63 = vld [vmem:[#allocation82_spill] sm:$0xff] }
 0x41f   :  { %v8727_v13 = vsel %vm2127_vm12, %v8581_v17, %v2759_v10  ;;  %v2750_v51 = vsel %vm8680_vm14, %v2747_v18, %v2744_v43  ;;  %v5718_v33 = vpop.eup %5717  ;;  %vm2767_vm15 = vcmp.lt.f32.partialorder %v2766_v5, 0.0004427343  ;;  %5725 = vpow2.f32 %v2313_v41  ;;  %v10772_v41 = vld [vmem:[#allocation54_spill] sm:$0xff] }
 0x420   :  { %v8735_v59 = vsel %vm2126_vm13, %v8585_v29, %v2750_v51  ;;  %v2315_v49 = vmul.f32 1.442695, %v2198_v60  ;;  %vm2128_vm0 = vcmp.gt.f32.partialorder %v8589_v19, 20.0  ;;  %v2768_v17 = vsel %vm2767_vm15, %v2765_v55, %v2762_v7 }
 0x421   :  { %v5720_v34 = vpop.eup %5719  ;;  %v2787_v37 = vadd.f32 1.0, %v5718_v33  ;;  %v8740_v18 = vadd.f32 %v10770_v46, %v7736_v24  ;;  %v8743_v35 = vsel %vm2128_vm0, %v8589_v19, %v2768_v17  ;;  %v2774_v29 = vmul.f32 %v8656_v22, %v2773_v27 }
 0x422   :  { %v5722_v62 = vpop.eup %5721  ;;  %v2771_v6 = vmul.f32 0.6931472, %v5720_v34  ;;  %5727 = vpow2.f32 %v2317_v54  ;;  %vm2776_vm1 = vcmp.lt.f32.partialorder %v2775_v44, 0.0004427343  ;;  %v8748_v3 = vadd.f32 %v10771_v63, %v7727_v58 }
 0x423   :  { %5729 = vlog2.f32 %v2787_v37  ;;  %v2778_v5 = vadd.f32 1.0, %v5722_v62  ;;  %vm2129_vm2 = vcmp.gt.f32.partialorder %v8609_v61, 20.0  ;;  %v2790_v43 = vmul.f32 -0.5, %v5718_v33 }
 0x424   :  { %v2777_v8 = vsel %vm2776_vm1, %v2774_v29, %v2771_v6  ;;  %5731 = vpow2.f32 %v2315_v49  ;;  %v8751_v31 = vpop.eup %5723  ;;  %v2200_v22 = vmin.f32 %v8740_v18, 20.0  ;;  %v2201_v60 = vmin.f32 %v8748_v3, 20.0 }
 0x425   :  { %v8754_v19 = vsel %vm2129_vm2, %v8609_v61, %v2777_v8  ;;  %5733 = vlog2.f32 %v2778_v5  ;;  %v2796_v44 = vadd.f32 1.0, %v8751_v31  ;;  %v2793_v21 = vand.u32 2147483647, %v5718_v33 }
 0x426   :  { %v2319_v27 = vmul.f32 1.442695, %v2200_v22  ;;  %v2781_v10 = vmul.f32 -0.5, %v5722_v62  ;;  %v8761_v54 = vadd.f32 %v10772_v41, %v7730_v20  ;;  %v2791_v51 = vadd.f32 1.0, %v2790_v43 }
 0x427   :  { %5735 = vlog2.f32 %v2796_v44  ;;  %v2799_v61 = vmul.f32 -0.5, %v8751_v31  ;;  %v2321_v7 = vmul.f32 1.442695, %v2201_v60  ;;  %v8769_v34 = vadd.f32 %v8148_v25, %v7733_v32 }
 0x428   :  { %5737 = vpow2.f32 %v2319_v27  ;;  %v2203_v49 = vmin.f32 %v8761_v54, 20.0  ;;  %vm2131_vm3 = vcmp.gt.f32.partialorder %v8614_v53, 20.0  ;;  %v2784_v17 = vand.u32 2147483647, %v5722_v62 }
 0x429   :  { %v8764_v55 = vpop.eup %5725  ;;  %5739 = vpow2.f32 %v2321_v7  ;;  %vm8775_vm4 = vcmp.lt.f32.partialorder %v2793_v21, 0.0004427343  ;;  %vm2130_vm5 = vcmp.gt.f32.partialorder %v8631_v4, 20.0  ;;  %v2782_v29 = vadd.f32 1.0, %v2781_v10 }
 0x42a   :  { %v2805_v37 = vadd.f32 1.0, %v8764_v55  ;;  %v2325_v5 = vmul.f32 1.442695, %v2203_v49  ;;  %v2792_v8 = vmul.f32 %v5718_v33, %v2791_v51  ;;  %vm2132_vm6 = vcmp.gt.f32.partialorder %v8640_v16, 20.0 }
 0x42b   :  { %v2800_v25 = vadd.f32 1.0, %v2799_v61  ;;  %v2202_v27 = vmin.f32 %v8769_v34, 20.0  ;;  %v8787_v60 = vadd.f32 %v8174_v14, %v7736_v24  ;;  %vm8789_vm7 = vcmp.lt.f32.partialorder %v2784_v17, 0.0004427343 }
 0x42c   :  { %v8773_v46 = vpop.eup %5727  ;;  %5741 = vlog2.f32 %v2805_v37  ;;  %v2802_v33 = vand.u32 2147483647, %v8751_v31  ;;  %v2783_v7 = vmul.f32 %v5722_v62, %v2782_v29  ;;  %v2808_v49 = vmul.f32 -0.5, %v8764_v55 }
 0x42d   :  { %v5730_v63 = vpop.eup %5729  ;;  %v2823_v43 = vadd.f32 1.0, %v8773_v46  ;;  %5743 = vpow2.f32 %v2325_v5  ;;  %v2801_v17 = vmul.f32 %v8751_v31, %v2800_v25  ;;  %v2826_v37 = vmul.f32 -0.5, %v8773_v46 }
 0x42e   :  { %v8782_v22 = vpop.eup %5731  ;;  %v2789_v44 = vmul.f32 0.6931472, %v5730_v63  ;;  %vm2133_vm8 = vcmp.gt.f32.partialorder %v8689_v2, 20.0  ;;  %v2323_v6 = vmul.f32 1.442695, %v2202_v27  ;;  %v2204_v29 = vmin.f32 %v8787_v60, 20.0 }
 0x42f   :  { %v5734_v21 = vpop.eup %5733  ;;  %5745 = vlog2.f32 %v2823_v43  ;;  %v2814_v41 = vadd.f32 1.0, %v8782_v22  ;;  %v2817_v62 = vmul.f32 -0.5, %v8782_v22  ;;  %v2811_v25 = vand.u32 2147483647, %v8764_v55 }
 0x430   :  { %v2795_v51 = vsel %vm8775_vm4, %v2792_v8, %v2789_v44  ;;  %v2780_v61 = vmul.f32 0.6931472, %v5734_v21  ;;  %v2829_v43 = vand.u32 2147483647, %v8773_v46  ;;  %vm2803_vm9 = vcmp.lt.f32.partialorder %v2802_v33, 0.0004427343 }
 0x431   :  { %v8801_v14 = vsel %vm2131_vm3, %v8614_v53, %v2795_v51  ;;  %5747 = vlog2.f32 %v2814_v41  ;;  %v5736_v5 = vpop.eup %5735  ;;  %v2809_v44 = vadd.f32 1.0, %v2808_v49  ;;  %vm2135_vm10 = vcmp.gt.f32.partialorder %v8693_v15, 20.0 }
 0x432   :  { %v2786_v63 = vsel %vm8789_vm7, %v2783_v7, %v2780_v61  ;;  %v8810_v8 = vpop.eup %5737  ;;  %v2798_v31 = vmul.f32 0.6931472, %v5736_v5  ;;  %5749 = vpow2.f32 %v2323_v6  ;;  %v2327_v41 = vmul.f32 1.442695, %v2204_v29 }
 0x433   :  { %v8815_v53 = vsel %vm2130_vm5, %v8631_v4, %v2786_v63  ;;  %v2832_v21 = vadd.f32 1.0, %v8810_v8  ;;  %v8820_v27 = vpop.eup %5739  ;;  %v8825_v4 = vadd.f32 %v8214_v39, %v7727_v58  ;;  %v2827_v33 = vadd.f32 1.0, %v2826_v37 }
 0x434   :  { %v2804_v10 = vsel %vm2803_vm9, %v2801_v17, %v2798_v31  ;;  %v2818_v61 = vadd.f32 1.0, %v2817_v62  ;;  %vm8832_vm11 = vcmp.lt.f32.partialorder %v2811_v25, 0.0004427343  ;;  %vm8836_vm12 = vcmp.lt.f32.partialorder %v2829_v43, 0.0004427343 }
 0x435   :  { %v8830_v51 = vsel %vm2132_vm6, %v8640_v16, %v2804_v10  ;;  %5751 = vlog2.f32 %v2832_v21  ;;  %v2841_v58 = vadd.f32 1.0, %v8820_v27  ;;  %v2810_v16 = vmul.f32 %v8764_v55, %v2809_v44 }
 0x436   :  { %v5742_v7 = vpop.eup %5741  ;;  %5753 = vpow2.f32 %v2327_v41  ;;  %v2820_v37 = vand.u32 2147483647, %v8782_v22  ;;  %v2205_v63 = vmin.f32 %v8825_v4, 20.0  ;;  %v2835_v6 = vmul.f32 -0.5, %v8810_v8 }
 0x437   :  { %v8841_v39 = vpop.eup %5743  ;;  %v2807_v5 = vmul.f32 0.6931472, %v5742_v7  ;;  %5755 = vlog2.f32 %v2841_v58  ;;  %v8850_v31 = vadd.f32 %v8246_v23, %v7730_v20  ;;  %v2828_v55 = vmul.f32 %v8773_v46, %v2827_v33 }
 0x438   :  { %v2859_v29 = vadd.f32 1.0, %v8841_v39  ;;  %v2819_v44 = vmul.f32 %v8782_v22, %v2818_v61  ;;  %v2844_v41 = vmul.f32 -0.5, %v8820_v27  ;;  %v2329_v7 = vmul.f32 1.442695, %v2205_v63 }
 0x439   :  { %v5746_v62 = vpop.eup %5745  ;;  %v2813_v25 = vsel %vm8832_vm11, %v2810_v16, %v2807_v5  ;;  %vm2821_vm13 = vcmp.lt.f32.partialorder %v2820_v37, 0.0004427343  ;;  %v2838_v49 = vand.u32 2147483647, %v8810_v8  ;;  %v2836_v22 = vadd.f32 1.0, %v2835_v6 }
 0x43a   :  { %v2825_v43 = vmul.f32 0.6931472, %v5746_v62  ;;  %v8859_v10 = vsel %vm2133_vm8, %v8689_v2, %v2813_v25  ;;  %5757 = vlog2.f32 %v2859_v29  ;;  %v2207_v2 = vmin.f32 %v8850_v31, 20.0 }
 0x43b   :  { %v5748_v21 = vpop.eup %5747  ;;  %5759 = vpow2.f32 %v2329_v7  ;;  %vm2134_vm14 = vcmp.gt.f32.partialorder %v8704_v12, 20.0  ;;  %v2862_v17 = vmul.f32 -0.5, %v8841_v39  ;;  %v8875_v58 = vadd.f32 %v8274_v30, %v7733_v32 }
 0x43c   :  { %v2831_v20 = vsel %vm8836_vm12, %v2828_v55, %v2825_v43  ;;  %v2816_v23 = vmul.f32 0.6931472, %v5748_v21  ;;  %v5750_v33 = vpop.eup %5749  ;;  %v2845_v16 = vadd.f32 1.0, %v2844_v41  ;;  %v8882_v37 = vadd.f32 %v8277_v40, %v7736_v24 }
 0x43d   :  { %v8868_v46 = vsel %vm2135_vm10, %v8693_v15, %v2831_v20  ;;  %v2850_v15 = vadd.f32 1.0, %v5750_v33  ;;  %vm2136_vm15 = vcmp.gt.f32.partialorder %v8740_v18, 20.0  ;;  %vm8885_vm0 = vcmp.lt.f32.partialorder %v2838_v49, 0.0004427343 }
 0x43e   :  { %v2822_v61 = vsel %vm2821_vm13, %v2819_v44, %v2816_v23  ;;  %v2333_v6 = vmul.f32 1.442695, %v2207_v2  ;;  %v2206_v32 = vmin.f32 %v8875_v58, 20.0  ;;  %v2847_v25 = vand.u32 2147483647, %v8820_v27 }
 0x43f   :  { %v8878_v5 = vsel %vm2134_vm14, %v8704_v12, %v2822_v61  ;;  %v5752_v63 = vpop.eup %5751  ;;  %v2837_v12 = vmul.f32 %v8810_v8, %v2836_v22  ;;  %5761 = vlog2.f32 %v2850_v15  ;;  %v2863_v43 = vadd.f32 1.0, %v2862_v17 }
 0x440   :  { %v5754_v30 = vpop.eup %5753  ;;  %v2834_v29 = vmul.f32 0.6931472, %v5752_v63  ;;  %v2865_v24 = vand.u32 2147483647, %v8841_v39  ;;  %5763 = vpow2.f32 %v2333_v6  ;;  %v2846_v21 = vmul.f32 %v8820_v27, %v2845_v16 }
 0x441   :  { %v2868_v40 = vadd.f32 1.0, %v5754_v30  ;;  %v5756_v55 = vpop.eup %5755  ;;  %v2331_v41 = vmul.f32 1.442695, %v2206_v32  ;;  %v2208_v7 = vmin.f32 %v8882_v37, 20.0  ;;  %v2853_v23 = vmul.f32 -0.5, %v5750_v33 }
 0x442   :  { %v2840_v44 = vsel %vm8885_vm0, %v2837_v12, %v2834_v29  ;;  %v2843_v20 = vmul.f32 0.6931472, %v5756_v55  ;;  %vm2848_vm1 = vcmp.lt.f32.partialorder %v2847_v25, 0.0004427343  ;;  %vm2137_vm2 = vcmp.gt.f32.partialorder %v8748_v3, 20.0 }
 0x443   :  { %v8900_v8 = vsel %vm2136_vm15, %v8740_v18, %v2840_v44  ;;  %5765 = vlog2.f32 %v2868_v40  ;;  %v2335_v22 = vmul.f32 1.442695, %v2208_v7  ;;  %v2864_v27 = vmul.f32 %v8841_v39, %v2863_v43 }
 0x444   :  { %v5758_v49 = vpop.eup %5757  ;;  %5767 = vpow2.f32 %v2331_v41  ;;  %v2849_v2 = vsel %vm2848_vm1, %v2846_v21, %v2843_v20  ;;  %vm2866_vm3 = vcmp.lt.f32.partialorder %v2865_v24, 0.0004427343  ;;  %v2871_v18 = vmul.f32 -0.5, %v5754_v30 }
 0x445   :  { %v2861_v61 = vmul.f32 0.6931472, %v5758_v49  ;;  %v5760_v17 = vpop.eup %5759  ;;  %v8905_v16 = vsel %vm2137_vm2, %v8748_v3, %v2849_v2  ;;  %5769 = vpow2.f32 %v2335_v22  ;;  %vm2139_vm4 = vcmp.gt.f32.partialorder %v8761_v54, 20.0 }
 0x446   :  { %v2854_v63 = vadd.f32 1.0, %v2853_v23  ;;  %v2877_v62 = vadd.f32 1.0, %v5760_v17  ;;  %v2856_v32 = vand.u32 2147483647, %v5750_v33  ;;  %v2872_v12 = vadd.f32 1.0, %v2871_v18 }
 0x447   :  { %v2867_v15 = vsel %vm2866_vm3, %v2864_v27, %v2861_v61  ;;  %v2874_v3 = vand.u32 2147483647, %v5754_v30  ;;  %v2880_v24 = vmul.f32 -0.5, %v5760_v17  ;;  %vm2138_vm6 = vcmp.gt.f32.partialorder %v8769_v34, 20.0 }
 0x448   :  { %v8909_v6 = vsel %vm2139_vm4, %v8761_v54, %v2867_v15  ;;  %5771 = vlog2.f32 %v2877_v62  ;;  %v2855_v43 = vmul.f32 %v5750_v33, %v2854_v63  ;;  %vm2857_vm5 = vcmp.lt.f32.partialorder %v2856_v32, 0.0004427343 }
 0x449   :  { %v5762_v29 = vpop.eup %5761  ;;  %v2873_v7 = vmul.f32 %v5754_v30, %v2872_v12  ;;  %vm2875_vm7 = vcmp.lt.f32.partialorder %v2874_v3, 0.0004427343  ;;  %vm2140_vm8 = vcmp.gt.f32.partialorder %v8787_v60, 20.0  ;;  %v2881_v49 = vadd.f32 1.0, %v2880_v24 }
 0x44a   :  { %v5764_v39 = vpop.eup %5763  ;;  %v2852_v25 = vmul.f32 0.6931472, %v5762_v29  ;;  %v2883_v2 = vand.u32 2147483647, %v5760_v17  ;;  %vm2141_vm10 = vcmp.gt.f32.partialorder %v8825_v4, 20.0  ;;  %vm2143_vm12 = vcmp.gt.f32.partialorder %v8850_v31, 20.0 }
 0x44b   :  { %v2895_v40 = vadd.f32 1.0, %v5764_v39  ;;  %v2898_v61 = vmul.f32 -0.5, %v5764_v39  ;;  %v2882_v15 = vmul.f32 %v5760_v17, %v2881_v49  ;;  %v2901_v32 = vand.u32 2147483647, %v5764_v39 }
 0x44c   :  { %v2858_v44 = vsel %vm2857_vm5, %v2855_v43, %v2852_v25  ;;  %vm2884_vm9 = vcmp.lt.f32.partialorder %v2883_v2, 0.0004427343  ;;  %vm2142_vm14 = vcmp.gt.f32.partialorder %v8875_v58, 20.0  ;;  %vm2144_vm0 = vcmp.gt.f32.partialorder %v8882_v37, 20.0 }
 0x44d   :  { %v5766_v55 = vpop.eup %5765  ;;  %v8913_v41 = vsel %vm2138_vm6, %v8769_v34, %v2858_v44  ;;  %5773 = vlog2.f32 %v2895_v40  ;;  %v2899_v30 = vadd.f32 1.0, %v2898_v61  ;;  %vm2902_vm11 = vcmp.lt.f32.partialorder %v2901_v32, 0.0004427343 }
 0x44e   :  { %v5768_v21 = vpop.eup %5767  ;;  %v2870_v54 = vmul.f32 0.6931472, %v5766_v55 }
 0x44f   :  { %v2886_v20 = vadd.f32 1.0, %v5768_v21  ;;  %v5770_v23 = vpop.eup %5769  ;;  %v2889_v63 = vmul.f32 -0.5, %v5768_v21  ;;  %v2900_v3 = vmul.f32 %v5764_v39, %v2899_v30  ;;  %v2892_v24 = vand.u32 2147483647, %v5768_v21 }
 0x450   :  { %v2876_v33 = vsel %vm2875_vm7, %v2873_v7, %v2870_v54  ;;  %v2904_v27 = vadd.f32 1.0, %v5770_v23 }
 0x451   :  { %v8917_v22 = vsel %vm2140_vm8, %v8787_v60, %v2876_v33  ;;  %5775 = vlog2.f32 %v2886_v20  ;;  %v2907_v60 = vmul.f32 -0.5, %v5770_v23  ;;  %v2890_v25 = vadd.f32 1.0, %v2889_v63 }
 0x452   :  { %v5772_v18 = vpop.eup %5771  ;;  %5777 = vlog2.f32 %v2904_v27  ;;  %v2910_v20 = vand.u32 2147483647, %v5770_v23  ;;  %vm2893_vm13 = vcmp.lt.f32.partialorder %v2892_v24, 0.0004427343 }
 0x453   :  { %v2879_v34 = vmul.f32 0.6931472, %v5772_v18  ;;  %v2908_v55 = vadd.f32 1.0, %v2907_v60  ;;  %v2891_v7 = vmul.f32 %v5768_v21, %v2890_v25 }
 0x454   :  { %vm2911_vm15 = vcmp.lt.f32.partialorder %v2910_v20, 0.0004427343 }
 0x455   :  { %v2885_v62 = vsel %vm2884_vm9, %v2882_v15, %v2879_v34  ;;  %v2909_v2 = vmul.f32 %v5770_v23, %v2908_v55 }
 0x456   :  { %v8921_v29 = vsel %vm2141_vm10, %v8825_v4, %v2885_v62 }
 0x457   :  { %v5774_v12 = vpop.eup %5773 }
 0x458   :  { %v2897_v43 = vmul.f32 0.6931472, %v5774_v12 }
 0x45a   :  { %v2903_v17 = vsel %vm2902_vm11, %v2900_v3, %v2897_v43 }
 0x45b   :  { %v5776_v40 = vpop.eup %5775  ;;  %v8925_v44 = vsel %vm2143_vm12, %v8850_v31, %v2903_v17 }
 0x45c   :  { %v2888_v54 = vmul.f32 0.6931472, %v5776_v40  ;;  %v5778_v4 = vpop.eup %5777 }
 0x45d   :  { %v2906_v49 = vmul.f32 0.6931472, %v5778_v4 }
 0x45e   :  { %v2894_v33 = vsel %vm2893_vm13, %v2891_v7, %v2888_v54 }
 0x45f   :  { %v8929_v39 = vsel %vm2142_vm14, %v8875_v58, %v2894_v33  ;;  %v2912_v61 = vsel %vm2911_vm15, %v2909_v2, %v2906_v49 }
 0x460   :  { %v8933_v31 = vsel %vm2144_vm0, %v8882_v37, %v2912_v61 }
 0x461   :  { %6037 = dma.done.wait [#allocation5 + $0x1], 16384 }
 0x462   :  { %6038 = vsyncadd [#allocation5 + $0x1], 4294950912  ;;  %v10783_v21 = vld [vmem:[#allocation56_spill] sm:$0xff]  ;;  %v10784_v27 = vld [vmem:[#allocation65_spill] sm:$0xff] }
 0x463   :  { %v2980_v18 = vpack.c.bf16 %v10784_v27, %v10783_v21  ;;  %v3012_v34 = vld [vmem:[#allocation3 + $0x8] sm:$0xff]  ;;  %v3014_v15 = vld [vmem:[#allocation3 + $0x18] sm:$0xff]  ;;  %v3011_v58 = vld [vmem:[#allocation3] sm:$0xff] }
 0x464   :  { %3161 = vmatprep.subr.bf16.mxu0 %v3012_v34  ;;  %3387 = vmatprep.subr.bf16.mxu1 %v3014_v15  ;;  %v3013_v23 = vld [vmem:[#allocation3 + $0x10] sm:$0xff]  ;;  %v3016_v63 = vld [vmem:[#allocation3 + $0x28] sm:$0xff]  ;;  %v3018_v30 = vld [vmem:[#allocation3 + $0x38] sm:$0xff] }
 0x465   :  { %3193 = vmatprep.mubr.bf16.mxu0 %v2980_v18  ;;  %3419 = vmatprep.mubr.bf16.mxu1 %v2980_v18  ;;  %v3015_v37 = vld [vmem:[#allocation3 + $0x20] sm:$0xff]  ;;  %v3017_v62 = vld [vmem:[#allocation3 + $0x30] sm:$0xff]  ;;  %v3020_v32 = vld [vmem:[#allocation3 + $0x48] sm:$0xff] }
 0x466   :  { %3162 = vmatpush1.bf16.msra.mxu0 %v3011_v58  ;;  %3388 = vmatpush1.bf16.msra.mxu1 %v3013_v23  ;;  %v3022_v60 = vld [vmem:[#allocation3 + $0x58] sm:$0xff]  ;;  %v3019_v12 = vld [vmem:[#allocation3 + $0x40] sm:$0xff]  ;;  %v3021_v25 = vld [vmem:[#allocation3 + $0x50] sm:$0xff] }
 0x467   :  { %3163 = vmatprep.subr.bf16.mxu0 %v3016_v63  ;;  %3389 = vmatprep.subr.bf16.mxu1 %v3018_v30  ;;  %v3024_v43 = vld [vmem:[#allocation3 + $0x68] sm:$0xff]  ;;  %v3026_v3 = vld [vmem:[#allocation3 + $0x78] sm:$0xff]  ;;  %v3023_v24 = vld [vmem:[#allocation3 + $0x60] sm:$0xff] }
 0x468   :  { %v3025_v40 = vld [vmem:[#allocation3 + $0x70] sm:$0xff]  ;;  %v3028_v17 = vld [vmem:[#allocation3 + $0x88] sm:$0xff]  ;;  %v3030_v55 = vld [vmem:[#allocation3 + $0x98] sm:$0xff] }
 0x469   :  { %v3027_v54 = vld [vmem:[#allocation3 + $0x80] sm:$0xff]  ;;  %v3029_v7 = vld [vmem:[#allocation3 + $0x90] sm:$0xff]  ;;  %v3032_v20 = vld [vmem:[#allocation3 + $0xa8] sm:$0xff] }
 0x46a   :  { %3164 = vmatpush1.bf16.msra.mxu0 %v3015_v37  ;;  %3390 = vmatpush1.bf16.msra.mxu1 %v3017_v62  ;;  %v3034_v4 = vld [vmem:[#allocation3 + $0xb8] sm:$0xff]  ;;  %v3031_v33 = vld [vmem:[#allocation3 + $0xa0] sm:$0xff]  ;;  %v3033_v49 = vld [vmem:[#allocation3 + $0xb0] sm:$0xff] }
 0x46b   :  { %3165 = vmatprep.subr.bf16.mxu0 %v3020_v32  ;;  %3391 = vmatprep.subr.bf16.mxu1 %v3022_v60  ;;  %v3036_v2 = vld [vmem:[#allocation3 + $0xc8] sm:$0xff]  ;;  %v3038_v61 = vld [vmem:[#allocation3 + $0xd8] sm:$0xff]  ;;  %v3035_v21 = vld [vmem:[#allocation3 + $0xc0] sm:$0xff] }
 0x46c   :  { %v3037_v27 = vld [vmem:[#allocation3 + $0xd0] sm:$0xff]  ;;  %v3040_v18 = vld [vmem:[#allocation3 + $0xe8] sm:$0xff]  ;;  %v3042_v34 = vld [vmem:[#allocation3 + $0xf8] sm:$0xff] }
 0x46d   :  { %v3039_v15 = vld [vmem:[#allocation3 + $0xe0] sm:$0xff]  ;;  %v3041_v58 = vld [vmem:[#allocation3 + $0xf0] sm:$0xff]  ;;  %v3044_v23 = vld [vmem:[#allocation3 + $0x108] sm:$0xff] }
 0x46e   :  { %3166 = vmatpush1.bf16.msra.mxu0 %v3019_v12  ;;  %3392 = vmatpush1.bf16.msra.mxu1 %v3021_v25  ;;  %v3046_v63 = vld [vmem:[#allocation3 + $0x118] sm:$0xff]  ;;  %v3043_v30 = vld [vmem:[#allocation3 + $0x100] sm:$0xff]  ;;  %v3045_v37 = vld [vmem:[#allocation3 + $0x110] sm:$0xff] }
 0x46f   :  { %3167 = vmatprep.subr.bf16.mxu0 %v3024_v43  ;;  %3393 = vmatprep.subr.bf16.mxu1 %v3026_v3  ;;  %v3048_v62 = vld [vmem:[#allocation3 + $0x128] sm:$0xff]  ;;  %v3050_v32 = vld [vmem:[#allocation3 + $0x138] sm:$0xff]  ;;  %v3047_v60 = vld [vmem:[#allocation3 + $0x120] sm:$0xff] }
 0x470   :  { %v3049_v12 = vld [vmem:[#allocation3 + $0x130] sm:$0xff]  ;;  %v3052_v25 = vld [vmem:[#allocation3 + $0x148] sm:$0xff]  ;;  %v3054_v43 = vld [vmem:[#allocation3 + $0x158] sm:$0xff] }
 0x471   :  { %v3051_v3 = vld [vmem:[#allocation3 + $0x140] sm:$0xff] }
 0x472   :  { %3168 = vmatpush1.bf16.msra.mxu0 %v3023_v24  ;;  %3394 = vmatpush1.bf16.msra.mxu1 %v3025_v40  ;;  %v3053_v24 = vld [vmem:[#allocation3 + $0x150] sm:$0xff]  ;;  %v3056_v40 = vld [vmem:[#allocation3 + $0x168] sm:$0xff] }
 0x473   :  { %3169 = vmatprep.subr.bf16.mxu0 %v3028_v17  ;;  %3395 = vmatprep.subr.bf16.mxu1 %v3030_v55  ;;  %v3058_v17 = vld [vmem:[#allocation3 + $0x178] sm:$0xff]  ;;  %v3055_v55 = vld [vmem:[#allocation3 + $0x160] sm:$0xff] }
 0x476   :  { %3170 = vmatpush1.bf16.msra.mxu0 %v3027_v54  ;;  %3396 = vmatpush1.bf16.msra.mxu1 %v3029_v7  ;;  %v3057_v54 = vld [vmem:[#allocation3 + $0x170] sm:$0xff]  ;;  %v3060_v7 = vld [vmem:[#allocation3 + $0x188] sm:$0xff] }
 0x477   :  { %3171 = vmatprep.subr.bf16.mxu0 %v3032_v20  ;;  %3397 = vmatprep.subr.bf16.mxu1 %v3034_v4  ;;  %v3062_v20 = vld [vmem:[#allocation3 + $0x198] sm:$0xff]  ;;  %v3059_v4 = vld [vmem:[#allocation3 + $0x180] sm:$0xff] }
 0x47a   :  { %3172 = vmatpush1.bf16.msra.mxu0 %v3031_v33  ;;  %3398 = vmatpush1.bf16.msra.mxu1 %v3033_v49  ;;  %v3061_v33 = vld [vmem:[#allocation3 + $0x190] sm:$0xff]  ;;  %v3064_v49 = vld [vmem:[#allocation3 + $0x1a8] sm:$0xff] }
 0x47b   :  { %3173 = vmatprep.subr.bf16.mxu0 %v3036_v2  ;;  %3399 = vmatprep.subr.bf16.mxu1 %v3038_v61  ;;  %v3066_v2 = vld [vmem:[#allocation3 + $0x1b8] sm:$0xff]  ;;  %v3063_v61 = vld [vmem:[#allocation3 + $0x1a0] sm:$0xff] }
 0x47e   :  { %3174 = vmatpush1.bf16.msra.mxu0 %v3035_v21  ;;  %3400 = vmatpush1.bf16.msra.mxu1 %v3037_v27  ;;  %v3065_v21 = vld [vmem:[#allocation3 + $0x1b0] sm:$0xff]  ;;  %v3068_v27 = vld [vmem:[#allocation3 + $0x1c8] sm:$0xff] }
 0x47f   :  { %3175 = vmatprep.subr.bf16.mxu0 %v3040_v18  ;;  %3401 = vmatprep.subr.bf16.mxu1 %v3042_v34  ;;  %v3070_v18 = vld [vmem:[#allocation3 + $0x1d8] sm:$0xff]  ;;  %v3067_v34 = vld [vmem:[#allocation3 + $0x1c0] sm:$0xff] }
 0x482   :  { %3176 = vmatpush1.bf16.msra.mxu0 %v3039_v15  ;;  %3402 = vmatpush1.bf16.msra.mxu1 %v3041_v58  ;;  %v3069_v15 = vld [vmem:[#allocation3 + $0x1d0] sm:$0xff]  ;;  %v3072_v58 = vld [vmem:[#allocation3 + $0x1e8] sm:$0xff] }
 0x483   :  { %3177 = vmatprep.subr.bf16.mxu0 %v3044_v23  ;;  %3403 = vmatprep.subr.bf16.mxu1 %v3046_v63  ;;  %v3074_v23 = vld [vmem:[#allocation3 + $0x1f8] sm:$0xff]  ;;  %v3071_v63 = vld [vmem:[#allocation3 + $0x1e0] sm:$0xff] }
 0x486   :  { %3178 = vmatpush1.bf16.msra.mxu0 %v3043_v30  ;;  %3404 = vmatpush1.bf16.msra.mxu1 %v3045_v37  ;;  %v3073_v30 = vld [vmem:[#allocation3 + $0x1f0] sm:$0xff]  ;;  %v3076_v37 = vld [vmem:[#allocation3 + $0x208] sm:$0xff] }
 0x487   :  { %3179 = vmatprep.subr.bf16.mxu0 %v3048_v62  ;;  %3405 = vmatprep.subr.bf16.mxu1 %v3050_v32  ;;  %v3078_v62 = vld [vmem:[#allocation3 + $0x218] sm:$0xff]  ;;  %v10785_v32 = vld [vmem:[#allocation59_spill] sm:$0xff] }
 0x48a   :  { %3180 = vmatpush1.bf16.msra.mxu0 %v3047_v60  ;;  %3406 = vmatpush1.bf16.msra.mxu1 %v3049_v12  ;;  %v10786_v60 = vld [vmem:[#allocation69_spill] sm:$0xff] }
 0x48b   :  { %3181 = vmatprep.subr.bf16.mxu0 %v3052_v25  ;;  %3407 = vmatprep.subr.bf16.mxu1 %v3054_v43  ;;  %v2979_v12 = vpack.c.bf16 %v10786_v60, %v10785_v32  ;;  %v3075_v25 = vld [vmem:[#allocation3 + $0x200] sm:$0xff]  ;;  %v3077_v43 = vld [vmem:[#allocation3 + $0x210] sm:$0xff] }
 0x48c   :  { %v3091_v32 = vld [vmem:[#allocation3 + $0x280] sm:$0xff]  ;;  %v3093_v60 = vld [vmem:[#allocation3 + $0x290] sm:$0xff] }
 0x48e   :  { %3182 = vmatpush1.bf16.msra.mxu0 %v3051_v3  ;;  %3408 = vmatpush1.bf16.msra.mxu1 %v3053_v24  ;;  %v3080_v3 = vld [vmem:[#allocation3 + $0x228] sm:$0xff]  ;;  %v3082_v24 = vld [vmem:[#allocation3 + $0x238] sm:$0xff] }
 0x48f   :  { %3183 = vmatprep.subr.bf16.mxu0 %v3056_v40  ;;  %3409 = vmatprep.subr.bf16.mxu1 %v3058_v17  ;;  %v10787_v40 = vld [vmem:[#allocation68_spill] sm:$0xff] }
 0x490   :  { %v2984_v17 = vpack.c.bf16 %v8183_v47, %v10787_v40  ;;  %v3083_v47 = vld [vmem:[#allocation3 + $0x240] sm:$0xff]  ;;  %v3100_v40 = vld [vmem:[#allocation3 + $0x2c8] sm:$0xff] }
 0x492   :  { %3184 = vmatpush1.bf16.msra.mxu0 %v3055_v55  ;;  %3410 = vmatpush1.bf16.msra.mxu1 %v3057_v54  ;;  %v3079_v55 = vld [vmem:[#allocation3 + $0x220] sm:$0xff]  ;;  %v3081_v54 = vld [vmem:[#allocation3 + $0x230] sm:$0xff] }
 0x493   :  { %3185 = vmatprep.subr.bf16.mxu0 %v3060_v7  ;;  %3411 = vmatprep.subr.bf16.mxu1 %v3062_v20  ;;  %v3084_v7 = vld [vmem:[#allocation3 + $0x248] sm:$0xff]  ;;  %v3086_v20 = vld [vmem:[#allocation3 + $0x258] sm:$0xff] }
 0x496   :  { %3186 = vmatpush1.bf16.msra.mxu0 %v3059_v4  ;;  %3412 = vmatpush1.bf16.msra.mxu1 %v3061_v33  ;;  %v10788_v4 = vld [vmem:[#allocation52_spill] sm:$0xff]  ;;  %v10789_v33 = vld [vmem:[#allocation57_spill] sm:$0xff] }
 0x497   :  { %3187 = vmatprep.subr.bf16.mxu0 %v3064_v49  ;;  %3413 = vmatprep.subr.bf16.mxu1 %v3066_v2  ;;  %v2983_v49 = vpack.c.bf16 %v10789_v33, %v10788_v4  ;;  %v3085_v2 = vld [vmem:[#allocation3 + $0x250] sm:$0xff]  ;;  %v3103_v4 = vld [vmem:[#allocation3 + $0x2e0] sm:$0xff] }
 0x498   :  { %v3105_v33 = vld [vmem:[#allocation3 + $0x2f0] sm:$0xff] }
 0x49a   :  { %3188 = vmatpush1.bf16.msra.mxu0 %v3063_v61  ;;  %3414 = vmatpush1.bf16.msra.mxu1 %v3065_v21  ;;  %v3088_v61 = vld [vmem:[#allocation3 + $0x268] sm:$0xff]  ;;  %v3090_v21 = vld [vmem:[#allocation3 + $0x278] sm:$0xff] }
 0x49b   :  { %3189 = vmatprep.subr.bf16.mxu0 %v3068_v27  ;;  %3415 = vmatprep.subr.bf16.mxu1 %v3070_v18  ;;  %v10790_v27 = vld [vmem:[#allocation70_spill] sm:$0xff]  ;;  %v10791_v18 = vld [vmem:[#allocation75_spill] sm:$0xff] }
 0x49e   :  { %3190 = vmatpush1.bf16.msra.mxu0 %v3067_v34  ;;  %3416 = vmatpush1.bf16.msra.mxu1 %v3069_v15  ;;  %v2988_v34 = vpack.c.bf16 %v10791_v18, %v10790_v27  ;;  %v3087_v15 = vld [vmem:[#allocation3 + $0x260] sm:$0xff]  ;;  %v3113_v27 = vld [vmem:[#allocation3 + $0x330] sm:$0xff]  ;;  %v2999_v18 = vpack.c.bf16 %v8720_v56, %v8626_v52  ;;  %v3124_v52 = vld [vmem:[#allocation3 + $0x388] sm:$0xff] }
 0x49f   :  { %3191 = vmatprep.subr.bf16.mxu0 %v3072_v58  ;;  %3417 = vmatprep.subr.bf16.mxu1 %v3074_v23  ;;  %v3089_v58 = vld [vmem:[#allocation3 + $0x270] sm:$0xff]  ;;  %v3092_v23 = vld [vmem:[#allocation3 + $0x288] sm:$0xff]  ;;  %v3126_v56 = vld [vmem:[#allocation3 + $0x398] sm:$0xff] }
 0x4a2   :  { %3192 = vmatpush1.bf16.msra.mxu0 %v3071_v63  ;;  %3418 = vmatpush1.bf16.msra.mxu1 %v3073_v30  ;;  %v3094_v63 = vld [vmem:[#allocation3 + $0x298] sm:$0xff]  ;;  %v10792_v30 = vld [vmem:[#allocation67_spill] sm:$0xff] }
 0x4a3   :  { %3274 = vmatprep.subr.bf16.mxu0 %v3076_v37  ;;  %3500 = vmatprep.subr.bf16.mxu1 %v3078_v62  ;;  %v10793_v37 = vld [vmem:[#allocation85_spill] sm:$0xff] }
 0x4a4   :  { %v2987_v62 = vpack.c.bf16 %v10793_v37, %v10792_v30  ;;  %v3003_v30 = vpack.c.bf16 %v8859_v10, %v8754_v19  ;;  %v3128_v37 = vld [vmem:[#allocation3 + $0x3a8] sm:$0xff]  ;;  %v3134_v10 = vld [vmem:[#allocation3 + $0x3d8] sm:$0xff] }
 0x4a5   :  { %3194 = vmatmul.mubr.bf16.vlgmr.msra.gmra.mrb[64].mxu0 %v2979_v12  ;;  %3420 = vmatmul.mubr.bf16.vlgmr.msra.gmra.mrb[64].mxu1 %v2979_v12  ;;  %v3096_v12 = vld [vmem:[#allocation3 + $0x2a8] sm:$0xff] }
 0x4a6   :  { %3275 = vmatpush1.bf16.msra.mxu0 %v3075_v25  ;;  %3501 = vmatpush1.bf16.msra.mxu1 %v3077_v43  ;;  %v3098_v25 = vld [vmem:[#allocation3 + $0x2b8] sm:$0xff]  ;;  %v2992_v43 = vpack.c.bf16 %v8442_v9, %v8388_v26  ;;  %v3099_v26 = vld [vmem:[#allocation3 + $0x2c0] sm:$0xff]  ;;  %v3101_v9 = vld [vmem:[#allocation3 + $0x2d0] sm:$0xff] }
 0x4a7   :  { %3276 = vmatprep.subr.bf16.mxu0 %v3080_v3  ;;  %3502 = vmatprep.subr.bf16.mxu1 %v3082_v24  ;;  %v3095_v3 = vld [vmem:[#allocation3 + $0x2a0] sm:$0xff]  ;;  %v3097_v24 = vld [vmem:[#allocation3 + $0x2b0] sm:$0xff]  ;;  %v3132_v19 = vld [vmem:[#allocation3 + $0x3c8] sm:$0xff] }
 0x4a8   :  { %3203 = vmatprep.mubr.bf16.mxu0 %v2984_v17  ;;  %3429 = vmatprep.mubr.bf16.mxu1 %v2984_v17  ;;  %v3102_v17 = vld [vmem:[#allocation3 + $0x2d8] sm:$0xff] }
 0x4aa   :  { %3277 = vmatpush1.bf16.msra.mxu0 %v3079_v55  ;;  %3503 = vmatpush1.bf16.msra.mxu1 %v3081_v54  ;;  %v2991_v55 = vpack.c.bf16 %v8423_v42, %v8353_v36  ;;  %v3104_v54 = vld [vmem:[#allocation3 + $0x2e8] sm:$0xff]  ;;  %v3110_v42 = vld [vmem:[#allocation3 + $0x318] sm:$0xff] }
 0x4ab   :  { %3278 = vmatprep.subr.bf16.mxu0 %v3084_v7  ;;  %3504 = vmatprep.subr.bf16.mxu1 %v3086_v20  ;;  %v3106_v7 = vld [vmem:[#allocation3 + $0x2f8] sm:$0xff]  ;;  %v2996_v20 = vpack.c.bf16 %v8597_v1, %v8532_v50  ;;  %v3108_v36 = vld [vmem:[#allocation3 + $0x308] sm:$0xff]  ;;  %v3107_v50 = vld [vmem:[#allocation3 + $0x300] sm:$0xff] }
 0x4ac   :  { %v3109_v1 = vld [vmem:[#allocation3 + $0x310] sm:$0xff] }
 0x4ad   :  { %3204 = vmatmul.mubr.bf16.gmra.mrb[68].mxu0 %v2983_v49  ;;  %3430 = vmatmul.mubr.bf16.gmra.mrb[68].mxu1 %v2983_v49  ;;  %v2995_v49 = vpack.c.bf16 %v8562_v57, %v8505_v28  ;;  %v3116_v28 = vld [vmem:[#allocation3 + $0x348] sm:$0xff]  ;;  %v3118_v57 = vld [vmem:[#allocation3 + $0x358] sm:$0xff] }
 0x4ae   :  { %3279 = vmatpush1.bf16.msra.mxu0 %v3083_v47  ;;  %3505 = vmatpush1.bf16.msra.mxu1 %v3085_v2  ;;  %v3112_v47 = vld [vmem:[#allocation3 + $0x328] sm:$0xff]  ;;  %v3114_v2 = vld [vmem:[#allocation3 + $0x338] sm:$0xff] }
 0x4af   :  { %3280 = vmatprep.subr.bf16.mxu0 %v3088_v61  ;;  %3506 = vmatprep.subr.bf16.mxu1 %v3090_v21  ;;  %v3000_v61 = vpack.c.bf16 %v8735_v59, %v8698_v45  ;;  %v3111_v21 = vld [vmem:[#allocation3 + $0x320] sm:$0xff]  ;;  %v3117_v59 = vld [vmem:[#allocation3 + $0x350] sm:$0xff] }
 0x4b0   :  { %3213 = vmatprep.mubr.bf16.mxu0 %v2988_v34  ;;  %3439 = vmatprep.mubr.bf16.mxu1 %v2988_v34  ;;  %v3115_v45 = vld [vmem:[#allocation3 + $0x340] sm:$0xff]  ;;  %v3120_v34 = vld [vmem:[#allocation3 + $0x368] sm:$0xff] }
 0x4b2   :  { %3281 = vmatpush1.bf16.msra.mxu0 %v3087_v15  ;;  %3507 = vmatpush1.bf16.msra.mxu1 %v3089_v58  ;;  %v3122_v15 = vld [vmem:[#allocation3 + $0x378] sm:$0xff]  ;;  %v3004_v58 = vpack.c.bf16 %v8878_v5, %v8815_v53  ;;  %v3123_v53 = vld [vmem:[#allocation3 + $0x380] sm:$0xff]  ;;  %v3125_v5 = vld [vmem:[#allocation3 + $0x390] sm:$0xff] }
 0x4b3   :  { %3282 = vmatprep.subr.bf16.mxu0 %v3092_v23  ;;  %3508 = vmatprep.subr.bf16.mxu1 %v3094_v63  ;;  %v3119_v23 = vld [vmem:[#allocation3 + $0x360] sm:$0xff]  ;;  %v3121_v63 = vld [vmem:[#allocation3 + $0x370] sm:$0xff] }
 0x4b5   :  { %3214 = vmatmul.mubr.bf16.gmra.mrb[72].mxu0 %v2987_v62  ;;  %3440 = vmatmul.mubr.bf16.gmra.mrb[72].mxu1 %v2987_v62  ;;  %v3130_v62 = vld [vmem:[#allocation3 + $0x3b8] sm:$0xff] }
 0x4b6   :  { %3283 = vmatpush1.bf16.msra.mxu0 %v3091_v32  ;;  %3509 = vmatpush1.bf16.msra.mxu1 %v3093_v60  ;;  %v3008_v32 = vpack.c.bf16 %v8929_v39, %v8913_v41  ;;  %v3127_v60 = vld [vmem:[#allocation3 + $0x3a0] sm:$0xff]  ;;  %v3133_v39 = vld [vmem:[#allocation3 + $0x3d0] sm:$0xff] }
 0x4b7   :  { %3284 = vmatprep.subr.bf16.mxu0 %v3096_v12  ;;  %3510 = vmatprep.subr.bf16.mxu1 %v3098_v25  ;;  %v3129_v12 = vld [vmem:[#allocation3 + $0x3b0] sm:$0xff]  ;;  %v3007_v25 = vpack.c.bf16 %v8921_v29, %v8905_v16  ;;  %v3131_v41 = vld [vmem:[#allocation3 + $0x3c0] sm:$0xff]  ;;  %v10796_v16 = vld [vmem:[#allocation63_spill] sm:$0xff] }
 0x4b8   :  { %3223 = vmatprep.mubr.bf16.mxu0 %v2992_v43  ;;  %3449 = vmatprep.mubr.bf16.mxu1 %v2992_v43  ;;  %v3136_v43 = vld [vmem:[#allocation3 + $0x3e8] sm:$0xff]  ;;  %v10797_v29 = vld [vmem:[#allocation78_spill] sm:$0xff] }
 0x4ba   :  { %3285 = vmatpush1.bf16.msra.mxu0 %v3095_v3  ;;  %3511 = vmatpush1.bf16.msra.mxu1 %v3097_v24  ;;  %v3138_v3 = vld [vmem:[#allocation3 + $0x3f8] sm:$0xff] }
 0x4bb   :  { %3286 = vmatprep.subr.bf16.mxu0 %v3100_v40  ;;  %3512 = vmatprep.subr.bf16.mxu1 %v3102_v17  ;;  %v10794_v24 = vld [vmem:[#allocation61_spill] sm:$0xff]  ;;  %v10795_v40 = vld [vmem:[#allocation50_spill] sm:$0xff] }
 0x4bc   :  { %v2982_v17 = vpack.c.bf16 %v10795_v40, %v10794_v24 }
 0x4bd   :  { %3224 = vmatmul.mubr.bf16.gmra.mrb[76].mxu0 %v2991_v55  ;;  %3450 = vmatmul.mubr.bf16.gmra.mrb[76].mxu1 %v2991_v55  ;;  %v3135_v55 = vld [vmem:[#allocation3 + $0x3e0] sm:$0xff] }
 0x4be   :  { %3287 = vmatpush1.bf16.msra.mxu0 %v3099_v26  ;;  %3513 = vmatpush1.bf16.msra.mxu1 %v3101_v9  ;;  %v3137_v26 = vld [vmem:[#allocation3 + $0x3f0] sm:$0xff]  ;;  %v2981_v9 = vpack.c.bf16 %v10797_v29, %v10796_v16 }
 0x4bf   :  { %3288 = vmatprep.subr.bf16.mxu0 %v3104_v54  ;;  %3514 = vmatprep.subr.bf16.mxu1 %v3106_v7  ;;  %v10798_v54 = vld [vmem:[#allocation81_spill] sm:$0xff]  ;;  %v10799_v7 = vld [vmem:[#allocation83_spill] sm:$0xff] }
 0x4c0   :  { %3233 = vmatprep.mubr.bf16.mxu0 %v2996_v20  ;;  %3459 = vmatprep.mubr.bf16.mxu1 %v2996_v20  ;;  %v2986_v20 = vpack.c.bf16 %v10799_v7, %v10798_v54 }
 0x4c2   :  { %3289 = vmatpush1.bf16.msra.mxu0 %v3103_v4  ;;  %3515 = vmatpush1.bf16.msra.mxu1 %v3105_v33  ;;  %v10800_v4 = vld [vmem:[#allocation73_spill] sm:$0xff]  ;;  %v10801_v33 = vld [vmem:[#allocation66_spill] sm:$0xff] }
 0x4c3   :  { %3290 = vmatprep.subr.bf16.mxu0 %v3108_v36  ;;  %3516 = vmatprep.subr.bf16.mxu1 %v3110_v42  ;;  %v2985_v36 = vpack.c.bf16 %v10801_v33, %v10800_v4  ;;  %v10802_v42 = vld [vmem:[#allocation71_spill] sm:$0xff] }
 0x4c5   :  { %3234 = vmatmul.mubr.bf16.gmra.mrb[80].mxu0 %v2995_v49  ;;  %3460 = vmatmul.mubr.bf16.gmra.mrb[80].mxu1 %v2995_v49  ;;  %v2990_v49 = vpack.c.bf16 %v8336_v0, %v10802_v42 }
 0x4c6   :  { %3291 = vmatpush1.bf16.msra.mxu0 %v3107_v50  ;;  %3517 = vmatpush1.bf16.msra.mxu1 %v3109_v1  ;;  %v10803_v50 = vld [vmem:[#allocation84_spill] sm:$0xff] }
 0x4c7   :  { %3292 = vmatprep.subr.bf16.mxu0 %v3112_v47  ;;  %3518 = vmatprep.subr.bf16.mxu1 %v3114_v2  ;;  %v10804_v1 = vld [vmem:[#allocation72_spill] sm:$0xff]  ;;  %v10805_v2 = vld [vmem:[#allocation86_spill] sm:$0xff] }
 0x4c8   :  { %3243 = vmatprep.mubr.bf16.mxu0 %v3000_v61  ;;  %3469 = vmatprep.mubr.bf16.mxu1 %v3000_v61  ;;  %v2989_v47 = vpack.c.bf16 %v10804_v1, %v10803_v50  ;;  %v2994_v61 = vpack.c.bf16 %v10805_v2, %v8402_v38  ;;  %v3002_v38 = vpack.c.bf16 %v8743_v35, %v8709_v11  ;;  %v10812_v35 = vld [vmem:[#allocation46_spill] sm:$0xff] }
 0x4c9   :  { %v3010_v11 = vpack.c.bf16 %v8933_v31, %v8917_v22  ;;  %v10815_v31 = vld [vmem:[#allocation49_spill] sm:$0xff] }
 0x4ca   :  { %3293 = vmatpush1.bf16.msra.mxu0 %v3111_v21  ;;  %3519 = vmatpush1.bf16.msra.mxu1 %v3113_v27  ;;  %v10806_v21 = vld [vmem:[#allocation76_spill] sm:$0xff]  ;;  %v10807_v27 = vld [vmem:[#allocation53_spill] sm:$0xff] }
 0x4cb   :  { %3294 = vmatprep.subr.bf16.mxu0 %v3116_v28  ;;  %3520 = vmatprep.subr.bf16.mxu1 %v3118_v57  ;;  %v2993_v28 = vpack.c.bf16 %v10807_v27, %v10806_v21  ;;  %v10808_v57 = vld [vmem:[#allocation88_spill] sm:$0xff] }
 0x4cd   :  { %3244 = vmatmul.mubr.bf16.gmra.mrb[84].mxu0 %v2999_v18  ;;  %3470 = vmatmul.mubr.bf16.gmra.mrb[84].mxu1 %v2999_v18  ;;  %v10809_v18 = vld [vmem:[#allocation74_spill] sm:$0xff] }
 0x4ce   :  { %3295 = vmatpush1.bf16.msra.mxu0 %v3115_v45  ;;  %3521 = vmatpush1.bf16.msra.mxu1 %v3117_v59  ;;  %v2998_v0 = vpack.c.bf16 %v10809_v18, %v10808_v57  ;;  %v10810_v45 = vld [vmem:[#allocation87_spill] sm:$0xff]  ;;  %v10811_v59 = vld [vmem:[#allocation89_spill] sm:$0xff] }
 0x4cf   :  { %3296 = vmatprep.subr.bf16.mxu0 %v3120_v34  ;;  %3522 = vmatprep.subr.bf16.mxu1 %v3122_v15  ;;  %v2997_v34 = vpack.c.bf16 %v10811_v59, %v10810_v45  ;;  %v3001_v15 = vpack.c.bf16 %v8727_v13, %v8676_v48  ;;  %v3009_v48 = vpack.c.bf16 %v8925_v44, %v8909_v6  ;;  %v3139_v13 = vld [vmem:[%s10396_s4] sm:$0xf] }
 0x4d0   :  { %3253 = vmatprep.mubr.bf16.mxu0 %v3004_v58  ;;  %3479 = vmatprep.mubr.bf16.mxu1 %v3004_v58  ;;  %v3006_v58 = vpack.c.bf16 %v8900_v8, %v8830_v51  ;;  %v9003_v51 = vrot.slane %v3139_v13, %v10812_v35  ;;  %v10814_v8 = vld [vmem:[#allocation48_spill] sm:$0xff] }
 0x4d1   :  { %v9009_v22 = vrot.slane %v3139_v13, %v10814_v8 }
 0x4d2   :  { %3297 = vmatpush1.bf16.msra.mxu0 %v3119_v23  ;;  %3523 = vmatpush1.bf16.msra.mxu1 %v3121_v63  ;;  %v3005_v23 = vpack.c.bf16 %v8868_v46, %v8801_v14  ;;  %v10813_v14 = vld [vmem:[#allocation47_spill] sm:$0xff]  ;;  %v9012_v63 = vrot.slane %v3139_v13, %v10815_v31 }
 0x4d3   :  { %3298 = vmatprep.subr.bf16.mxu0 %v3124_v52  ;;  %3524 = vmatprep.subr.bf16.mxu1 %v3126_v56  ;;  %v9006_v46 = vrot.slane %v3139_v13, %v10813_v14 }
 0x4d5   :  { %3254 = vmatmul.mubr.bf16.gmra.mrb[88].mxu0 %v3003_v30  ;;  %3480 = vmatmul.mubr.bf16.gmra.mrb[88].mxu1 %v3003_v30 }
 0x4d6   :  { %3299 = vmatpush1.bf16.msra.mxu0 %v3123_v53  ;;  %3525 = vmatpush1.bf16.msra.mxu1 %v3125_v5 }
 0x4d7   :  { %3300 = vmatprep.subr.bf16.mxu0 %v3128_v37  ;;  %3526 = vmatprep.subr.bf16.mxu1 %v3130_v62 }
 0x4d8   :  { %3263 = vmatprep.mubr.bf16.mxu0 %v3008_v32  ;;  %3489 = vmatprep.mubr.bf16.mxu1 %v3008_v32 }
 0x4da   :  { %3301 = vmatpush1.bf16.msra.mxu0 %v3127_v60  ;;  %3527 = vmatpush1.bf16.msra.mxu1 %v3129_v12 }
 0x4db   :  { %3302 = vmatprep.subr.bf16.mxu0 %v3132_v19  ;;  %3528 = vmatprep.subr.bf16.mxu1 %v3134_v10 }
 0x4dd   :  { %3264 = vmatmul.mubr.bf16.gmra.mrb[92].mxu0 %v3007_v25  ;;  %3490 = vmatmul.mubr.bf16.gmra.mrb[92].mxu1 %v3007_v25 }
 0x4de   :  { %3303 = vmatpush1.bf16.msra.mxu0 %v3131_v41  ;;  %3529 = vmatpush1.bf16.msra.mxu1 %v3133_v39 }
 0x4df   :  { %3304 = vmatprep.subr.bf16.mxu0 %v3136_v43  ;;  %3530 = vmatprep.subr.bf16.mxu1 %v3138_v3 }
 0x4e0   :  { %3306 = vmatprep.mubr.bf16.mxu0 %v2982_v17  ;;  %3532 = vmatprep.mubr.bf16.mxu1 %v2982_v17 }
 0x4e2   :  { %3305 = vmatpush1.bf16.msra.mxu0 %v3135_v55  ;;  %3531 = vmatpush1.bf16.msra.mxu1 %v3137_v26 }
 0x4e5   :  { %3307 = vmatmul.mubr.bf16.vlgmr.msra.gmra.mrb[64].mxu0 %v2981_v9  ;;  %3533 = vmatmul.mubr.bf16.vlgmr.msra.gmra.mrb[64].mxu1 %v2981_v9 }
 0x4e6   :  { %3316 = vmatprep.mubr.bf16.mxu0 %v2986_v20  ;;  %3542 = vmatprep.mubr.bf16.mxu1 %v2986_v20 }
 0x4ed   :  { %3317 = vmatmul.mubr.bf16.gmra.mrb[68].mxu0 %v2985_v36  ;;  %3543 = vmatmul.mubr.bf16.gmra.mrb[68].mxu1 %v2985_v36 }
 0x4ee   :  { %3326 = vmatprep.mubr.bf16.mxu0 %v2990_v49  ;;  %3552 = vmatprep.mubr.bf16.mxu1 %v2990_v49 }
 0x4f5   :  { %3327 = vmatmul.mubr.bf16.gmra.mrb[72].mxu0 %v2989_v47  ;;  %3553 = vmatmul.mubr.bf16.gmra.mrb[72].mxu1 %v2989_v47 }
 0x4f6   :  { %3336 = vmatprep.mubr.bf16.mxu0 %v2994_v61  ;;  %3562 = vmatprep.mubr.bf16.mxu1 %v2994_v61 }
 0x4fd   :  { %3337 = vmatmul.mubr.bf16.gmra.mrb[76].mxu0 %v2993_v28  ;;  %3563 = vmatmul.mubr.bf16.gmra.mrb[76].mxu1 %v2993_v28 }
 0x4fe   :  { %3346 = vmatprep.mubr.bf16.mxu0 %v2998_v0  ;;  %3572 = vmatprep.mubr.bf16.mxu1 %v2998_v0 }
 0x505   :  { %3347 = vmatmul.mubr.bf16.gmra.mrb[80].mxu0 %v2997_v34  ;;  %3573 = vmatmul.mubr.bf16.gmra.mrb[80].mxu1 %v2997_v34 }
 0x506   :  { %3356 = vmatprep.mubr.bf16.mxu0 %v3002_v38  ;;  %3582 = vmatprep.mubr.bf16.mxu1 %v3002_v38 }
 0x50d   :  { %3357 = vmatmul.mubr.bf16.gmra.mrb[84].mxu0 %v3001_v15  ;;  %3583 = vmatmul.mubr.bf16.gmra.mrb[84].mxu1 %v3001_v15 }
 0x50e   :  { %3366 = vmatprep.mubr.bf16.mxu0 %v3006_v58  ;;  %3592 = vmatprep.mubr.bf16.mxu1 %v3006_v58 }
 0x515   :  { %3367 = vmatmul.mubr.bf16.gmra.mrb[88].mxu0 %v3005_v23  ;;  %3593 = vmatmul.mubr.bf16.gmra.mrb[88].mxu1 %v3005_v23 }
 0x516   :  { %3376 = vmatprep.mubr.bf16.mxu0 %v3010_v11  ;;  %3602 = vmatprep.mubr.bf16.mxu1 %v3010_v11 }
 0x51d   :  { %3377 = vmatmul.mubr.bf16.gmra.mrb[92].mxu0 %v3009_v48  ;;  %3603 = vmatmul.mubr.bf16.gmra.mrb[92].mxu1 %v3009_v48 }
 0x5b8   :  { %v3308_v52 = vpop.f32.mrb[64].mxu0  ;;  %v3534_v6 = vpop.f32.mrb[64].mxu1 }
 0x5b9   :  { %v9015_v44 = vadd.f32 %v3308_v52, %v9003_v51  ;;  %v9018_v56 = vadd.f32 %v3534_v6, %v9006_v46  ;;  %v3310_v30 = vpop.f32.mrb[65].mxu0  ;;  %v3536_v53 = vpop.f32.mrb[65].mxu1 }
 0x5ba   :  { %v9021_v5 = vadd.f32 %v3310_v30, %v9009_v22  ;;  %v9024_v37 = vadd.f32 %v3536_v53, %v9012_v63  ;;  %v3312_v62 = vpop.f32.mrb[66].mxu0  ;;  %v3538_v32 = vpop.f32.mrb[66].mxu1 }
 0x5bb   :  { %v3677_v60 = vmin.f32 %v9015_v44, 20.0  ;;  %v3679_v12 = vmin.f32 %v9018_v56, 20.0  ;;  %v3314_v19 = vpop.f32.mrb[67].mxu0  ;;  %v3540_v10 = vpop.f32.mrb[67].mxu1  ;;  %v9031_v3 = vadd.f32 %v3312_v62, %v9003_v51  ;;  %v9034_v24 = vadd.f32 %v3538_v32, %v9006_v46 }
 0x5bc   :  { %v3678_v25 = vmin.f32 %v9021_v5, 20.0  ;;  %v3680_v41 = vmin.f32 %v9024_v37, 20.0  ;;  %v9037_v55 = vadd.f32 %v3314_v19, %v9009_v22  ;;  %v9040_v26 = vadd.f32 %v3540_v10, %v9012_v63 }
 0x5bd   :  { %v3741_v39 = vmul.f32 1.442695, %v3677_v60  ;;  %v3745_v43 = vmul.f32 1.442695, %v3679_v12  ;;  %v3681_v16 = vmin.f32 %v9031_v3, 20.0  ;;  %v3683_v29 = vmin.f32 %v9034_v24, 20.0 }
 0x5be   :  { %v3743_v40 = vmul.f32 1.442695, %v3678_v25  ;;  %v3747_v17 = vmul.f32 1.442695, %v3680_v41  ;;  %v3682_v9 = vmin.f32 %v9037_v55, 20.0  ;;  %v3684_v4 = vmin.f32 %v9040_v26, 20.0 }
 0x5bf   :  { %5779 = vpow2.f32 %v3741_v39  ;;  %v3749_v20 = vmul.f32 1.442695, %v3681_v16  ;;  %v3753_v42 = vmul.f32 1.442695, %v3683_v29  ;;  %vm3613_vm2 = vcmp.gt.f32.partialorder %v9015_v44, 20.0 }
 0x5c0   :  { %5781 = vpow2.f32 %v3745_v43  ;;  %v3318_v54 = vpop.f32.mrb[68].mxu0  ;;  %v3544_v7 = vpop.f32.mrb[68].mxu1  ;;  %v3751_v49 = vmul.f32 1.442695, %v3682_v9  ;;  %v3755_v28 = vmul.f32 1.442695, %v3684_v4 }
 0x5c1   :  { %5783 = vpow2.f32 %v3743_v40  ;;  %v3320_v33 = vpop.f32.mrb[69].mxu0  ;;  %v3546_v36 = vpop.f32.mrb[69].mxu1  ;;  %v9047_v50 = vadd.f32 %v3318_v54, %v9003_v51  ;;  %v9050_v2 = vadd.f32 %v3544_v7, %v9006_v46  ;;  %vm3615_vm4 = vcmp.gt.f32.partialorder %v9018_v56, 20.0 }
 0x5c2   :  { %5785 = vpow2.f32 %v3747_v17  ;;  %v3322_v1 = vpop.f32.mrb[70].mxu0  ;;  %v3548_v47 = vpop.f32.mrb[70].mxu1  ;;  %v9053_v61 = vadd.f32 %v3320_v33, %v9009_v22  ;;  %v9058_v0 = vadd.f32 %v3546_v36, %v9012_v63  ;;  %vm3614_vm5 = vcmp.gt.f32.partialorder %v9021_v5, 20.0 }
 0x5c3   :  { %5787 = vpow2.f32 %v3749_v20  ;;  %v3324_v21 = vpop.f32.mrb[71].mxu0  ;;  %v3550_v27 = vpop.f32.mrb[71].mxu1  ;;  %v3685_v57 = vmin.f32 %v9047_v50, 20.0  ;;  %v3687_v18 = vmin.f32 %v9050_v2, 20.0  ;;  %v9071_v8 = vadd.f32 %v3322_v1, %v9003_v51 }
 0x5c4   :  { %5789 = vpow2.f32 %v3753_v42  ;;  %v3686_v59 = vmin.f32 %v9053_v61, 20.0  ;;  %v3688_v23 = vmin.f32 %v9058_v0, 20.0  ;;  %v9087_v25 = vadd.f32 %v3548_v47, %v9006_v46 }
 0x5c5   :  { %5791 = vpow2.f32 %v3751_v49  ;;  %v3757_v45 = vmul.f32 1.442695, %v3685_v57  ;;  %v3761_v34 = vmul.f32 1.442695, %v3687_v18  ;;  %v9094_v16 = vadd.f32 %v3324_v21, %v9009_v22 }
 0x5c6   :  { %5793 = vpow2.f32 %v3755_v28  ;;  %v3759_v14 = vmul.f32 1.442695, %v3686_v59  ;;  %v3763_v40 = vmul.f32 1.442695, %v3688_v23  ;;  %v9097_v29 = vadd.f32 %v3550_v27, %v9012_v63 }
 0x5c7   :  { %5795 = vpow2.f32 %v3757_v45  ;;  %vm3616_vm7 = vcmp.gt.f32.partialorder %v9024_v37, 20.0  ;;  %vm3617_vm9 = vcmp.gt.f32.partialorder %v9031_v3, 20.0  ;;  %vm3619_vm12 = vcmp.gt.f32.partialorder %v9034_v24, 20.0 }
 0x5c8   :  { %v9061_v38 = vpop.f32.mrb[72].mxu0  ;;  %v9063_v15 = vpop.f32.mrb[72].mxu1  ;;  %5797 = vpow2.f32 %v3761_v34  ;;  %vm3618_vm13 = vcmp.gt.f32.partialorder %v9037_v55, 20.0  ;;  %vm3620_vm15 = vcmp.gt.f32.partialorder %v9040_v26, 20.0  ;;  %vm3621_vm0 = vcmp.gt.f32.partialorder %v9047_v50, 20.0 }
 0x5c9   :  { %v5780_v58 = vpop.eup %5779  ;;  %v9066_v11 = vpop.f32.mrb[73].mxu0 }
 0x5ca   :  { %v9068_v48 = vpop.f32.mrb[73].mxu1  ;;  %v5782_v13 = vpop.eup %5781  ;;  %v3869_v35 = vadd.f32 1.0, %v5780_v58  ;;  %v3872_v30 = vmul.f32 -0.5, %v5780_v58  ;;  %v3875_v19 = vand.u32 2147483647, %v5780_v58 }
 0x5cb   :  { %v9073_v31 = vpop.f32.mrb[74].mxu0  ;;  %v9075_v52 = vpop.f32.mrb[74].mxu1  ;;  %v3887_v53 = vadd.f32 1.0, %v5782_v13  ;;  %v3890_v62 = vmul.f32 -0.5, %v5782_v13  ;;  %v3893_v39 = vand.u32 2147483647, %v5782_v13 }
 0x5cc   :  { %v9077_v6 = vpop.eup %5783  ;;  %v9079_v32 = vpop.f32.mrb[75].mxu0  ;;  %5799 = vlog2.f32 %v3869_v35  ;;  %v3873_v54 = vadd.f32 1.0, %v3872_v30  ;;  %vm9104_vm1 = vcmp.lt.f32.partialorder %v3875_v19, 0.0004427343 }
 0x5cd   :  { %v9081_v60 = vpop.f32.mrb[75].mxu1  ;;  %v9083_v12 = vpop.eup %5785  ;;  %v3878_v10 = vadd.f32 1.0, %v9077_v6  ;;  %5801 = vlog2.f32 %v3887_v53  ;;  %v3881_v43 = vmul.f32 -0.5, %v9077_v6  ;;  %v3891_v7 = vadd.f32 1.0, %v3890_v62 }
 0x5ce   :  { %v9089_v41 = vpop.eup %5787  ;;  %v3896_v17 = vadd.f32 1.0, %v9083_v12  ;;  %v3899_v36 = vmul.f32 -0.5, %v9083_v12  ;;  %vm9116_vm3 = vcmp.lt.f32.partialorder %v3893_v39, 0.0004427343  ;;  %v3884_v28 = vand.u32 2147483647, %v9077_v6 }
 0x5cf   :  { %5803 = vlog2.f32 %v3878_v10  ;;  %v9099_v9 = vpop.eup %5789  ;;  %v3905_v42 = vadd.f32 1.0, %v9089_v41  ;;  %v3908_v49 = vmul.f32 -0.5, %v9089_v41  ;;  %v3882_v27 = vadd.f32 1.0, %v3881_v43 }
 0x5d0   :  { %5805 = vpow2.f32 %v3759_v14  ;;  %v9102_v4 = vpop.eup %5791  ;;  %v9111_v1 = vpop.f32.mrb[76].mxu0  ;;  %v3902_v45 = vand.u32 2147483647, %v9083_v12  ;;  %v3923_v59 = vadd.f32 1.0, %v9099_v9  ;;  %v3926_v34 = vmul.f32 -0.5, %v9099_v9 }
 0x5d1   :  { %5807 = vlog2.f32 %v3896_v17  ;;  %v9113_v47 = vpop.f32.mrb[76].mxu1  ;;  %v9121_v57 = vpop.f32.mrb[77].mxu0  ;;  %v3874_v14 = vmul.f32 %v5780_v58, %v3873_v54  ;;  %v3892_v30 = vmul.f32 %v5782_v13, %v3891_v7  ;;  %v3911_v53 = vand.u32 2147483647, %v9089_v41 }
 0x5d2   :  { %5809 = vpow2.f32 %v3763_v40  ;;  %10820 = vst [vmem:[#allocation80_spill] sm:$0xff] %v9121_v57  ;;  %v9123_v18 = vpop.eup %5793  ;;  %v9129_v23 = vpop.f32.mrb[77].mxu1  ;;  %v3914_v62 = vadd.f32 1.0, %v9102_v4  ;;  %v3900_v39 = vadd.f32 1.0, %v3899_v36  ;;  %v3909_v43 = vadd.f32 1.0, %v3908_v49 }
 0x5d3   :  { %5811 = vlog2.f32 %v3905_v42  ;;  %10821 = vst [vmem:[#allocation60_spill] sm:$0xff] %v9129_v23  ;;  %v9131_v35 = vpop.f32.mrb[78].mxu0  ;;  %v9136_v19 = vpop.f32.mrb[78].mxu1  ;;  %v3929_v40 = vand.u32 2147483647, %v9099_v9  ;;  %v3917_v54 = vmul.f32 -0.5, %v9102_v4  ;;  %v3883_v49 = vmul.f32 %v9077_v6, %v3882_v27 }
 0x5d4   :  { %10822 = vst [vmem:[#allocation64_spill] sm:$0xff] %v9131_v35  ;;  %10823 = vst [vmem:[#allocation58_spill] sm:$0xff] %v9136_v19  ;;  %v9138_v10 = vpop.eup %5795  ;;  %5813 = vlog2.f32 %v3923_v59  ;;  %v9141_v17 = vpop.f32.mrb[79].mxu0  ;;  %vm9147_vm6 = vcmp.lt.f32.partialorder %v3884_v28, 0.0004427343  ;;  %v3932_v7 = vadd.f32 1.0, %v9123_v18  ;;  %v3901_v27 = vmul.f32 %v9083_v12, %v3900_v39 }
 0x5d5   :  { %10824 = vst [vmem:[#allocation62_spill] sm:$0xff] %v9141_v17  ;;  %v9143_v42 = vpop.f32.mrb[79].mxu1  ;;  %v9145_v58 = vpop.eup %5797  ;;  %5815 = vlog2.f32 %v3914_v62  ;;  %vm9155_vm8 = vcmp.lt.f32.partialorder %v3902_v45, 0.0004427343  ;;  %v3927_v20 = vadd.f32 1.0, %v3926_v34  ;;  %v3935_v28 = vmul.f32 -0.5, %v9123_v18 }
 0x5d6   :  { %10825 = vst [vmem:[#allocation79_spill] sm:$0xff] %v9143_v42  ;;  %v5800_v36 = vpop.eup %5799  ;;  %vm9161_vm10 = vcmp.lt.f32.partialorder %v3911_v53, 0.0004427343  ;;  %5817 = vlog2.f32 %v3932_v7  ;;  %v3941_v19 = vadd.f32 1.0, %v9138_v10  ;;  %v3910_v45 = vmul.f32 %v9089_v41, %v3909_v43 }
 0x5d7   :  { %v5802_v42 = vpop.eup %5801  ;;  %v3871_v17 = vmul.f32 0.6931472, %v5800_v36  ;;  %vm9168_vm11 = vcmp.lt.f32.partialorder %v3929_v40, 0.0004427343  ;;  %v3920_v36 = vand.u32 2147483647, %v9102_v4  ;;  %v3928_v33 = vmul.f32 %v9099_v9, %v3927_v20 }
 0x5d8   :  { %v3889_v6 = vmul.f32 0.6931472, %v5802_v42  ;;  %v9173_v23 = vpop.f32.mrb[80].mxu0  ;;  %v3918_v42 = vadd.f32 1.0, %v3917_v54  ;;  %5819 = vlog2.f32 %v3941_v19  ;;  %v9180_v12 = vpop.f32.mrb[80].mxu1  ;;  %v3944_v9 = vmul.f32 -0.5, %v9138_v10 }
 0x5d9   :  { %v5804_v35 = vpop.eup %5803  ;;  %v3877_v7 = vsel %vm9104_vm1, %v3874_v14, %v3871_v17  ;;  %v9182_v41 = vpop.f32.mrb[81].mxu0  ;;  %vm9216_vm14 = vcmp.lt.f32.partialorder %v3920_v36, 0.0004427343 }
 0x5da   :  { %v9175_v53 = vpop.eup %5805  ;;  %v3880_v57 = vmul.f32 0.6931472, %v5804_v35  ;;  %v9187_v43 = vsel %vm3613_vm2, %v9015_v44, %v3877_v7  ;;  %v3895_v40 = vsel %vm9116_vm3, %v3892_v30, %v3889_v6  ;;  %v3936_v35 = vadd.f32 1.0, %v3935_v28  ;;  %v9193_v14 = vpop.f32.mrb[81].mxu1 }
 0x5db   :  { %v5808_v39 = vpop.eup %5807  ;;  %10834 = vst [vmem:[#allocation77_spill] sm:$0xff] %v9187_v43  ;;  %v9195_v19 = vpop.f32.mrb[82].mxu0  ;;  %v9202_v54 = vsel %vm3615_vm4, %v9018_v56, %v3895_v40  ;;  %v3938_v56 = vand.u32 2147483647, %v9123_v18  ;;  %v3919_v40 = vmul.f32 %v9102_v4, %v3918_v42  ;;  %v3950_v43 = vadd.f32 1.0, %v9175_v53 }
 0x5dc   :  { %v9197_v17 = vpop.eup %5809  ;;  %10835 = vst [vmem:[#allocation51_spill] sm:$0xff] %v9202_v54  ;;  %v3886_v44 = vsel %vm9147_vm6, %v3883_v49, %v3880_v57  ;;  %v3898_v21 = vmul.f32 0.6931472, %v5808_v39  ;;  %v9207_v20 = vpop.f32.mrb[82].mxu1  ;;  %v3959_v57 = vadd.f32 1.0, %v9145_v58  ;;  %v3937_v54 = vmul.f32 %v9123_v18, %v3936_v35 }
 0x5dd   :  { %v9209_v30 = vpop.f32.mrb[83].mxu0  ;;  %v5812_v28 = vpop.eup %5811  ;;  %v9214_v6 = vsel %vm3614_vm5, %v9021_v5, %v3886_v44  ;;  %v3962_v5 = vmul.f32 -0.5, %v9145_v58  ;;  %v3945_v42 = vadd.f32 1.0, %v3944_v9  ;;  %v3965_v18 = vand.u32 2147483647, %v9145_v58 }
 0x5de   :  { %10836 = vst [vmem:[#allocation55_spill] sm:$0xff] %v9214_v6  ;;  %v9223_v13 = vpop.f32.mrb[83].mxu1  ;;  %v3904_v49 = vsel %vm9155_vm8, %v3901_v27, %v3898_v21  ;;  %v3907_v39 = vmul.f32 0.6931472, %v5812_v28  ;;  %v5814_v36 = vpop.eup %5813  ;;  %5821 = vlog2.f32 %v3959_v57  ;;  %v3947_v21 = vand.u32 2147483647, %v9138_v10 }
 0x5df   :  { %v9232_v44 = vsel %vm3616_vm7, %v9024_v37, %v3904_v49  ;;  %v5816_v59 = vpop.eup %5815  ;;  %v3925_v4 = vmul.f32 0.6931472, %v5814_v36  ;;  %5823 = vlog2.f32 %v3950_v43  ;;  %v3953_v9 = vmul.f32 -0.5, %v9175_v53 }
 0x5e0   :  { %10839 = vst [vmem:[#allocation82_spill] sm:$0xff] %v9232_v44  ;;  %v3913_v27 = vsel %vm9161_vm10, %v3910_v45, %v3907_v39  ;;  %v3916_v28 = vmul.f32 0.6931472, %v5816_v59  ;;  %v9246_v35 = vpop.f32.mrb[84].mxu0  ;;  %v9248_v57 = vpop.f32.mrb[84].mxu1  ;;  %v3963_v45 = vadd.f32 1.0, %v3962_v5 }
 0x5e1   :  { %v9243_v37 = vsel %vm3617_vm9, %v9031_v3, %v3913_v27  ;;  %v5818_v49 = vpop.eup %5817  ;;  %v3931_v62 = vsel %vm9168_vm11, %v3928_v33, %v3925_v4  ;;  %v3968_v39 = vadd.f32 1.0, %v9197_v17  ;;  %v9254_v36 = vpop.f32.mrb[85].mxu0  ;;  %v3956_v34 = vand.u32 2147483647, %v9175_v53 }
 0x5e2   :  { %10840 = vst [vmem:[#allocation54_spill] sm:$0xff] %v9243_v37  ;;  %v9256_v3 = vpop.f32.mrb[85].mxu1  ;;  %v9261_v43 = vsel %vm3619_vm12, %v9034_v24, %v3931_v62  ;;  %v3922_v59 = vsel %vm9216_vm14, %v3919_v40, %v3916_v28  ;;  %v3934_v27 = vmul.f32 0.6931472, %v5818_v49  ;;  %v9266_v33 = vpop.f32.mrb[86].mxu0  ;;  %vm3623_vm3 = vcmp.gt.f32.partialorder %v9050_v2, 20.0 }
 0x5e3   :  { %10841 = vst [vmem:[#allocation56_spill] sm:$0xff] %v9261_v43  ;;  %v9268_v5 = vpop.f32.mrb[86].mxu1  ;;  %v5820_v4 = vpop.eup %5819  ;;  %v9273_v37 = vsel %vm3618_vm13, %v9037_v55, %v3922_v59  ;;  %vm3939_vm1 = vcmp.lt.f32.partialorder %v3938_v56, 0.0004427343  ;;  %vm9275_vm2 = vcmp.lt.f32.partialorder %v3947_v21, 0.0004427343  ;;  %5825 = vlog2.f32 %v3968_v39 }
 0x5e4   :  { %10842 = vst [vmem:[#allocation65_spill] sm:$0xff] %v9273_v37  ;;  %v9280_v7 = vpop.f32.mrb[87].mxu0  ;;  %v9282_v40 = vpop.f32.mrb[87].mxu1  ;;  %v3940_v28 = vsel %vm3939_vm1, %v3937_v54, %v3934_v27  ;;  %v3943_v49 = vmul.f32 0.6931472, %v5820_v4  ;;  %v3946_v62 = vmul.f32 %v9138_v10, %v3945_v42  ;;  %v3971_v43 = vmul.f32 -0.5, %v9197_v17 }
 0x5e5   :  { %10845 = vst [vmem:[#allocation59_spill] sm:$0xff] %v9280_v7  ;;  %10846 = vst [vmem:[#allocation69_spill] sm:$0xff] %v9282_v40  ;;  %v9289_v55 = vsel %vm3620_vm15, %v9040_v26, %v3940_v28  ;;  %vm9291_vm4 = vcmp.lt.f32.partialorder %v3965_v18, 0.0004427343  ;;  %vm3622_vm5 = vcmp.gt.f32.partialorder %v9053_v61, 20.0  ;;  %v10850_v21 = vmin.f32 %v9071_v8, 20.0 }
 0x5e6   :  { %10847 = vst [vmem:[#allocation68_spill] sm:$0xff] %v9289_v55  ;;  %v3691_v54 = vmin.f32 %v9087_v25, 20.0  ;;  %v3949_v10 = vsel %vm9275_vm2, %v3946_v62, %v3943_v49  ;;  %v3964_v42 = vmul.f32 %v9145_v58, %v3963_v45  ;;  %v3954_v59 = vadd.f32 1.0, %v3953_v9 }
 0x5e7   :  { %v3765_v39 = vmul.f32 1.442695, %v10850_v21  ;;  %vm9302_vm6 = vcmp.lt.f32.partialorder %v3956_v34, 0.0004427343  ;;  %v9309_v18 = vsel %vm3621_vm0, %v9047_v50, %v3949_v10  ;;  %v3690_v4 = vmin.f32 %v9094_v16, 20.0 }
 0x5e8   :  { %10853 = vst [vmem:[#allocation52_spill] sm:$0xff] %v9309_v18  ;;  %v3769_v27 = vmul.f32 1.442695, %v3691_v54  ;;  %v5822_v28 = vpop.eup %5821  ;;  %v3972_v21 = vadd.f32 1.0, %v3971_v43  ;;  %v3692_v24 = vmin.f32 %v9097_v29, 20.0  ;;  %v9315_v58 = vadd.f32 %v9061_v38, %v9003_v51  ;;  %v9321_v9 = vpop.f32.mrb[88].mxu0 }
 0x5e9   :  { %5827 = vpow2.f32 %v3765_v39  ;;  %v9319_v45 = vadd.f32 %v9063_v15, %v9006_v46  ;;  %10854 = vst [vmem:[#allocation57_spill] sm:$0xff] %v9321_v9  ;;  %v9323_v50 = vpop.f32.mrb[88].mxu1  ;;  %v3961_v34 = vmul.f32 0.6931472, %v5822_v28  ;;  %v3767_v49 = vmul.f32 1.442695, %v3690_v4  ;;  %v5824_v38 = vpop.eup %5823 }
 0x5ea   :  { %10855 = vst [vmem:[#allocation70_spill] sm:$0xff] %v9323_v50  ;;  %5829 = vpow2.f32 %v3769_v27  ;;  %v9327_v43 = vadd.f32 %v9066_v11, %v9009_v22  ;;  %v9329_v62 = vpop.f32.mrb[89].mxu0  ;;  %v9331_v39 = vpop.f32.mrb[89].mxu1  ;;  %v3955_v54 = vmul.f32 %v9175_v53, %v3954_v59  ;;  %v3974_v15 = vand.u32 2147483647, %v9197_v17 }
 0x5eb   :  { %10856 = vst [vmem:[#allocation75_spill] sm:$0xff] %v9329_v62  ;;  %10857 = vst [vmem:[#allocation67_spill] sm:$0xff] %v9331_v39  ;;  %v3771_v10 = vmul.f32 1.442695, %v3692_v24  ;;  %v3693_v18 = vmin.f32 %v9315_v58, 20.0  ;;  %v3967_v27 = vsel %vm9291_vm4, %v3964_v42, %v3961_v34  ;;  %5831 = vpow2.f32 %v3767_v49  ;;  %v9352_v34 = vpop.f32.mrb[90].mxu0 }
 0x5ec   :  { %v3952_v4 = vmul.f32 0.6931472, %v5824_v38  ;;  %v3695_v11 = vmin.f32 %v9319_v45, 20.0  ;;  %v9342_v28 = vsel %vm3623_vm3, %v9050_v2, %v3967_v27  ;;  %v3973_v55 = vmul.f32 %v9197_v17, %v3972_v21  ;;  %10859 = vst [vmem:[#allocation61_spill] sm:$0xff] %v9352_v34  ;;  %v9370_v38 = vpop.f32.mrb[90].mxu1 }
 0x5ed   :  { %10858 = vst [vmem:[#allocation85_spill] sm:$0xff] %v9342_v28  ;;  %5833 = vpow2.f32 %v3771_v10  ;;  %v3773_v53 = vmul.f32 1.442695, %v3693_v18  ;;  %v5826_v59 = vpop.eup %5825  ;;  %v3694_v56 = vmin.f32 %v9327_v43, 20.0  ;;  %v9350_v42 = vadd.f32 %v9068_v48, %v9012_v63  ;;  %10861 = vst [vmem:[#allocation63_spill] sm:$0xff] %v9370_v38 }
 0x5ee   :  { %v3958_v24 = vsel %vm9302_vm6, %v3955_v54, %v3952_v4  ;;  %v3777_v44 = vmul.f32 1.442695, %v3695_v11  ;;  %v3970_v17 = vmul.f32 0.6931472, %v5826_v59  ;;  %v9361_v26 = vadd.f32 %v9073_v31, %v9003_v51 }
 0x5ef   :  { %v9357_v2 = vsel %vm3622_vm5, %v9053_v61, %v3958_v24  ;;  %5835 = vpow2.f32 %v3773_v53  ;;  %vm3975_vm7 = vcmp.lt.f32.partialorder %v3974_v15, 0.0004427343  ;;  %v3775_v18 = vmul.f32 1.442695, %v3694_v56 }
 0x5f0   :  { %10860 = vst [vmem:[#allocation50_spill] sm:$0xff] %v9357_v2  ;;  %5837 = vpow2.f32 %v3777_v44  ;;  %v3696_v21 = vmin.f32 %v9350_v42, 20.0  ;;  %vm3624_vm8 = vcmp.gt.f32.partialorder %v9058_v0, 20.0  ;;  %v3976_v48 = vsel %vm3975_vm7, %v3973_v55, %v3970_v17 }
 0x5f1   :  { %v3697_v49 = vmin.f32 %v9361_v26, 20.0  ;;  %v9368_v61 = vadd.f32 %v9075_v52, %v9006_v46  ;;  %v9373_v31 = vsel %vm3624_vm8, %v9058_v0, %v3976_v48  ;;  %5839 = vpow2.f32 %v3775_v18  ;;  %v9376_v52 = vpop.f32.mrb[91].mxu0  ;;  %v9378_v48 = vpop.f32.mrb[91].mxu1 }
 0x5f2   :  { %10862 = vst [vmem:[#allocation78_spill] sm:$0xff] %v9373_v31  ;;  %v3779_v44 = vmul.f32 1.442695, %v3696_v21  ;;  %10863 = vst [vmem:[#allocation81_spill] sm:$0xff] %v9376_v52  ;;  %vm3625_vm10 = vcmp.gt.f32.partialorder %v9071_v8, 20.0  ;;  %vm3627_vm12 = vcmp.gt.f32.partialorder %v9087_v25, 20.0 }
 0x5f3   :  { %v5828_v54 = vpop.eup %5827  ;;  %v3781_v27 = vmul.f32 1.442695, %v3697_v49  ;;  %v3699_v53 = vmin.f32 %v9368_v61, 20.0  ;;  %10864 = vst [vmem:[#allocation83_spill] sm:$0xff] %v9378_v48  ;;  %vm3626_vm13 = vcmp.gt.f32.partialorder %v9094_v16, 20.0  ;;  %vm3628_vm0 = vcmp.gt.f32.partialorder %v9097_v29, 20.0 }
 0x5f4   :  { %v3977_v15 = vadd.f32 1.0, %v5828_v54  ;;  %v3980_v10 = vmul.f32 -0.5, %v5828_v54  ;;  %v5830_v4 = vpop.eup %5829  ;;  %5841 = vpow2.f32 %v3779_v44  ;;  %v3983_v55 = vand.u32 2147483647, %v5828_v54 }
 0x5f5   :  { %v3995_v11 = vadd.f32 1.0, %v5830_v4  ;;  %v5832_v59 = vpop.eup %5831  ;;  %v3998_v56 = vmul.f32 -0.5, %v5830_v4  ;;  %v4001_v17 = vand.u32 2147483647, %v5830_v4  ;;  %v9382_v44 = vadd.f32 %v9079_v32, %v9009_v22 }
 0x5f6   :  { %5843 = vlog2.f32 %v3977_v15  ;;  %v3981_v24 = vadd.f32 1.0, %v3980_v10  ;;  %v3986_v18 = vadd.f32 1.0, %v5832_v59  ;;  %v3989_v21 = vmul.f32 -0.5, %v5832_v59 }
 0x5f7   :  { %5845 = vpow2.f32 %v3781_v27  ;;  %v5834_v0 = vpop.eup %5833  ;;  %vm9384_vm9 = vcmp.lt.f32.partialorder %v3983_v55, 0.0004427343  ;;  %v3999_v10 = vadd.f32 1.0, %v3998_v56  ;;  %v9388_v31 = vmul.f32 1.442695, %v3699_v53 }
 0x5f8   :  { %5847 = vlog2.f32 %v3995_v11  ;;  %v4004_v49 = vadd.f32 1.0, %v5834_v0  ;;  %v4007_v27 = vmul.f32 -0.5, %v5834_v0  ;;  %v3992_v2 = vand.u32 2147483647, %v5832_v59 }
 0x5f9   :  { %v5836_v15 = vpop.eup %5835  ;;  %5849 = vlog2.f32 %v3986_v18  ;;  %v4010_v37 = vand.u32 2147483647, %v5834_v0  ;;  %v3982_v48 = vmul.f32 %v5828_v54, %v3981_v24  ;;  %vm9391_vm11 = vcmp.lt.f32.partialorder %v4001_v17, 0.0004427343 }
 0x5fa   :  { %v5838_v11 = vpop.eup %5837  ;;  %5851 = vlog2.f32 %v4004_v49  ;;  %v4013_v6 = vadd.f32 1.0, %v5836_v15  ;;  %v3990_v55 = vadd.f32 1.0, %v3989_v21  ;;  %v4016_v52 = vmul.f32 -0.5, %v5836_v15 }
 0x5fb   :  { %v5840_v38 = vpop.eup %5839  ;;  %v4008_v56 = vadd.f32 1.0, %v4007_v27  ;;  %v4031_v53 = vadd.f32 1.0, %v5838_v11  ;;  %v4034_v18 = vmul.f32 -0.5, %v5838_v11  ;;  %v4000_v34 = vmul.f32 %v5830_v4, %v3999_v10  ;;  %v9408_v10 = vpop.f32.mrb[92].mxu0 }
 0x5fc   :  { %5853 = vlog2.f32 %v4013_v6  ;;  %v4017_v39 = vadd.f32 1.0, %v4016_v52  ;;  %v4019_v62 = vand.u32 2147483647, %v5836_v15  ;;  %v4022_v49 = vadd.f32 1.0, %v5840_v38  ;;  %10873 = vst [vmem:[#allocation73_spill] sm:$0xff] %v9408_v10  ;;  %v9410_v27 = vpop.f32.mrb[92].mxu1 }
 0x5fd   :  { %vm9399_vm14 = vcmp.lt.f32.partialorder %v3992_v2, 0.0004427343  ;;  %vm9403_vm15 = vcmp.lt.f32.partialorder %v4010_v37, 0.0004427343  ;;  %5855 = vlog2.f32 %v4031_v53  ;;  %v4025_v6 = vmul.f32 -0.5, %v5840_v38  ;;  %10874 = vst [vmem:[#allocation66_spill] sm:$0xff] %v9410_v27 }
 0x5fe   :  { %v9396_v50 = vpop.eup %5841  ;;  %v3991_v21 = vmul.f32 %v5832_v59, %v3990_v55  ;;  %v4035_v4 = vadd.f32 1.0, %v4034_v18  ;;  %v4037_v52 = vand.u32 2147483647, %v5838_v11  ;;  %5857 = vlog2.f32 %v4022_v49  ;;  %v9450_v32 = vpop.f32.mrb[93].mxu1 }
 0x5ff   :  { %v4009_v37 = vmul.f32 %v5834_v0, %v4008_v56  ;;  %v4028_v40 = vand.u32 2147483647, %v5840_v38  ;;  %v4040_v7 = vadd.f32 1.0, %v9396_v50  ;;  %vm3629_vm1 = vcmp.gt.f32.partialorder %v9315_v58, 20.0  ;;  %v9424_v56 = vpop.f32.mrb[93].mxu0 }
 0x600   :  { %v5844_v17 = vpop.eup %5843  ;;  %v4018_v59 = vmul.f32 %v5836_v15, %v4017_v39  ;;  %vm9416_vm2 = vcmp.lt.f32.partialorder %v4019_v62, 0.0004427343  ;;  %v4026_v18 = vadd.f32 1.0, %v4025_v6  ;;  %v4043_v0 = vmul.f32 -0.5, %v9396_v50 }
 0x601   :  { %v9412_v2 = vpop.eup %5845  ;;  %v3979_v9 = vmul.f32 0.6931472, %v5844_v17  ;;  %5859 = vlog2.f32 %v4040_v7  ;;  %vm3631_vm3 = vcmp.gt.f32.partialorder %v9319_v45, 20.0  ;;  %v4036_v39 = vmul.f32 %v5838_v11, %v4035_v4 }
 0x602   :  { %v5848_v53 = vpop.eup %5847  ;;  %v4049_v49 = vadd.f32 1.0, %v9412_v2  ;;  %vm9432_vm4 = vcmp.lt.f32.partialorder %v4037_v52, 0.0004427343  ;;  %vm3630_vm5 = vcmp.gt.f32.partialorder %v9327_v43, 20.0  ;;  %vm9439_vm6 = vcmp.lt.f32.partialorder %v4028_v40, 0.0004427343 }
 0x603   :  { %v3985_v27 = vsel %vm9384_vm9, %v3982_v48, %v3979_v9  ;;  %v3997_v10 = vmul.f32 0.6931472, %v5848_v53  ;;  %v5850_v17 = vpop.eup %5849  ;;  %v4027_v4 = vmul.f32 %v5840_v38, %v4026_v18  ;;  %v4044_v52 = vadd.f32 1.0, %v4043_v0 }
 0x604   :  { %v9429_v62 = vsel %vm3625_vm10, %v9071_v8, %v3985_v27  ;;  %5861 = vlog2.f32 %v4049_v49  ;;  %v5852_v9 = vpop.eup %5851  ;;  %v3988_v28 = vmul.f32 0.6931472, %v5850_v17  ;;  %v4046_v8 = vand.u32 2147483647, %v9396_v50 }
 0x605   :  { %10877 = vst [vmem:[#allocation71_spill] sm:$0xff] %v9429_v62  ;;  %v4003_v7 = vsel %vm9391_vm11, %v4000_v34, %v3997_v10  ;;  %v4006_v6 = vmul.f32 0.6931472, %v5852_v9  ;;  %5863 = vpow2.f32 %v9388_v31  ;;  %v4052_v10 = vmul.f32 -0.5, %v9412_v2 }
 0x606   :  { %v9447_v11 = vsel %vm3627_vm12, %v9087_v25, %v4003_v7  ;;  %v5854_v34 = vpop.eup %5853  ;;  %v3994_v40 = vsel %vm9399_vm14, %v3991_v21, %v3988_v28  ;;  %v3698_v27 = vmin.f32 %v9382_v44, 20.0  ;;  %vm3632_vm7 = vcmp.gt.f32.partialorder %v9350_v42, 20.0  ;;  %v9490_v28 = vpop.f32.mrb[94].mxu0 }
 0x607   :  { %10882 = vst [vmem:[#allocation84_spill] sm:$0xff] %v9447_v11  ;;  %v9459_v25 = vsel %vm3626_vm13, %v9094_v16, %v3994_v40  ;;  %v4012_v38 = vsel %vm9403_vm15, %v4009_v37, %v4006_v6  ;;  %v4015_v31 = vmul.f32 0.6931472, %v5854_v34  ;;  %v9466_v54 = vadd.f32 %v9081_v60, %v9012_v63  ;;  %v5856_v21 = vpop.eup %5855 }
 0x608   :  { %v9471_v53 = vsel %vm3628_vm0, %v9097_v29, %v4012_v38  ;;  %vm9473_vm8 = vcmp.lt.f32.partialorder %v4046_v8, 0.0004427343  ;;  %v3783_v16 = vmul.f32 1.442695, %v3698_v27  ;;  %v9479_v24 = vadd.f32 %v9111_v1, %v9003_v51  ;;  %v5858_v37 = vpop.eup %5857 }
 0x609   :  { %10883 = vst [vmem:[#allocation72_spill] sm:$0xff] %v9471_v53  ;;  %v4021_v60 = vsel %vm9416_vm2, %v4018_v59, %v4015_v31  ;;  %v4033_v49 = vmul.f32 0.6931472, %v5856_v21  ;;  %v4055_v0 = vand.u32 2147483647, %v9412_v2  ;;  %v3700_v17 = vmin.f32 %v9466_v54, 20.0 }
 0x60a   :  { %v9488_v29 = vsel %vm3629_vm1, %v9315_v58, %v4021_v60  ;;  %v4024_v9 = vmul.f32 0.6931472, %v5858_v37  ;;  %v4053_v7 = vadd.f32 1.0, %v4052_v10  ;;  %5865 = vpow2.f32 %v3783_v16 }
 0x60b   :  { %10886 = vst [vmem:[#allocation86_spill] sm:$0xff] %v9488_v29  ;;  %v4039_v1 = vsel %vm9432_vm4, %v4036_v39, %v4033_v49  ;;  %v3787_v55 = vmul.f32 1.442695, %v3700_v17  ;;  %v3701_v59 = vmin.f32 %v9479_v24, 20.0  ;;  %v9497_v8 = vadd.f32 %v9113_v47, %v9006_v46  ;;  %v5860_v6 = vpop.eup %5859  ;;  %v10888_v39 = vld [vmem:[#allocation80_spill] sm:$0xff] }
 0x60c   :  { %v9502_v58 = vsel %vm3631_vm3, %v9319_v45, %v4039_v1  ;;  %v4030_v34 = vsel %vm9439_vm6, %v4027_v4, %v4024_v9  ;;  %v4045_v40 = vmul.f32 %v9396_v50, %v4044_v52  ;;  %v9509_v15 = vadd.f32 %v10888_v39, %v9009_v22  ;;  %v10890_v50 = vld [vmem:[#allocation60_spill] sm:$0xff]  ;;  %v9522_v52 = vpop.f32.mrb[94].mxu1 }
 0x60d   :  { %10887 = vst [vmem:[#allocation76_spill] sm:$0xff] %v9502_v58  ;;  %v9514_v47 = vsel %vm3630_vm5, %v9327_v43, %v4030_v34  ;;  %v4042_v27 = vmul.f32 0.6931472, %v5860_v6  ;;  %5867 = vpow2.f32 %v3787_v55  ;;  %v3789_v38 = vmul.f32 1.442695, %v3701_v59 }
 0x60e   :  { %v5862_v10 = vpop.eup %5861  ;;  %10889 = vst [vmem:[#allocation53_spill] sm:$0xff] %v9514_v47  ;;  %v4054_v31 = vmul.f32 %v9412_v2, %v4053_v7  ;;  %v3703_v48 = vmin.f32 %v9497_v8, 20.0  ;;  %v9520_v4 = vadd.f32 %v10890_v50, %v9012_v63  ;;  %vm4056_vm9 = vcmp.lt.f32.partialorder %v4055_v0, 0.0004427343  ;;  %v10893_v0 = vld [vmem:[#allocation64_spill] sm:$0xff] }
 0x60f   :  { %v4051_v45 = vmul.f32 0.6931472, %v5862_v10  ;;  %v5864_v21 = vpop.eup %5863  ;;  %v4048_v16 = vsel %vm9473_vm8, %v4045_v40, %v4042_v27  ;;  %5869 = vpow2.f32 %v3789_v38  ;;  %v3702_v43 = vmin.f32 %v9509_v15, 20.0  ;;  %v10895_v40 = vld [vmem:[#allocation62_spill] sm:$0xff]  ;;  %v9550_v10 = vpop.f32.mrb[95].mxu0 }
 0x610   :  { %v9530_v2 = vsel %vm3632_vm7, %v9350_v42, %v4048_v16  ;;  %vm3633_vm10 = vcmp.gt.f32.partialorder %v9361_v26, 20.0  ;;  %v4067_v60 = vadd.f32 1.0, %v5864_v21  ;;  %v3793_v17 = vmul.f32 1.442695, %v3703_v48  ;;  %v10894_v42 = vld [vmem:[#allocation58_spill] sm:$0xff]  ;;  %v9553_v38 = vpop.f32.mrb[95].mxu1 }
 0x611   :  { %10891 = vst [vmem:[#allocation88_spill] sm:$0xff] %v9530_v2  ;;  %v4057_v37 = vsel %vm4056_vm9, %v4054_v31, %v4051_v45  ;;  %v3791_v9 = vmul.f32 1.442695, %v3702_v43  ;;  %v3704_v18 = vmin.f32 %v9520_v4, 20.0  ;;  %v9539_v7 = vadd.f32 %v10893_v0, %v9003_v51 }
 0x612   :  { %v9534_v49 = vsel %vm3633_vm10, %v9361_v26, %v4057_v37  ;;  %5871 = vlog2.f32 %v4067_v60  ;;  %v9543_v1 = vadd.f32 %v10894_v42, %v9006_v46  ;;  %v4070_v59 = vmul.f32 -0.5, %v5864_v21  ;;  %v10896_v42 = vld [vmem:[#allocation79_spill] sm:$0xff] }
 0x613   :  { %10892 = vst [vmem:[#allocation74_spill] sm:$0xff] %v9534_v49  ;;  %5873 = vpow2.f32 %v3793_v17  ;;  %v3795_v6 = vmul.f32 1.442695, %v3704_v18  ;;  %v3705_v34 = vmin.f32 %v9539_v7, 20.0  ;;  %v9548_v39 = vadd.f32 %v10895_v40, %v9009_v22 }
 0x614   :  { %v5866_v55 = vpop.eup %5865  ;;  %5875 = vpow2.f32 %v3791_v9  ;;  %v3707_v27 = vmin.f32 %v9543_v1, 20.0  ;;  %v4073_v31 = vand.u32 2147483647, %v5864_v21  ;;  %v4071_v50 = vadd.f32 1.0, %v4070_v59 }
 0x615   :  { %v4058_v26 = vadd.f32 1.0, %v5866_v55  ;;  %5877 = vpow2.f32 %v3795_v6  ;;  %v3797_v48 = vmul.f32 1.442695, %v3705_v34  ;;  %v4061_v16 = vmul.f32 -0.5, %v5866_v55 }
 0x616   :  { %v3801_v37 = vmul.f32 1.442695, %v3707_v27  ;;  %v4064_v17 = vand.u32 2147483647, %v5866_v55  ;;  %v3706_v9 = vmin.f32 %v9548_v39, 20.0  ;;  %v9558_v6 = vadd.f32 %v10896_v42, %v9012_v63 }
 0x617   :  { %v5868_v45 = vpop.eup %5867  ;;  %5879 = vlog2.f32 %v4058_v26  ;;  %vm3635_vm11 = vcmp.gt.f32.partialorder %v9368_v61, 20.0  ;;  %v4072_v40 = vmul.f32 %v5864_v21, %v4071_v50  ;;  %vm9561_vm12 = vcmp.lt.f32.partialorder %v4073_v31, 0.0004427343 }
 0x618   :  { %v4076_v43 = vadd.f32 1.0, %v5868_v45  ;;  %5881 = vpow2.f32 %v3797_v48  ;;  %v4079_v18 = vmul.f32 -0.5, %v5868_v45  ;;  %v3799_v59 = vmul.f32 1.442695, %v3706_v9 }
 0x619   :  { %v5870_v60 = vpop.eup %5869  ;;  %vm3634_vm13 = vcmp.gt.f32.partialorder %v9382_v44, 20.0  ;;  %v4062_v48 = vadd.f32 1.0, %v4061_v16  ;;  %vm9566_vm14 = vcmp.lt.f32.partialorder %v4064_v17, 0.0004427343  ;;  %v4082_v49 = vand.u32 2147483647, %v5868_v45 }
 0x61a   :  { %5883 = vlog2.f32 %v4076_v43  ;;  %v4085_v0 = vadd.f32 1.0, %v5870_v60  ;;  %v4088_v26 = vmul.f32 -0.5, %v5870_v60  ;;  %v4080_v9 = vadd.f32 1.0, %v4079_v18 }
 0x61b   :  { %5885 = vpow2.f32 %v3801_v37  ;;  %v4091_v29 = vand.u32 2147483647, %v5870_v60  ;;  %v3708_v31 = vmin.f32 %v9558_v6, 20.0  ;;  %vm3636_vm15 = vcmp.gt.f32.partialorder %v9466_v54, 20.0 }
 0x61c   :  { %v5872_v34 = vpop.eup %5871  ;;  %5887 = vlog2.f32 %v4085_v0  ;;  %v4089_v16 = vadd.f32 1.0, %v4088_v26  ;;  %v4063_v11 = vmul.f32 %v5866_v55, %v4062_v48  ;;  %vm9579_vm0 = vcmp.lt.f32.partialorder %v4082_v49, 0.0004427343 }
 0x61d   :  { %v5874_v43 = vpop.eup %5873  ;;  %v4069_v58 = vmul.f32 0.6931472, %v5872_v34  ;;  %5889 = vpow2.f32 %v3799_v59  ;;  %vm3637_vm1 = vcmp.gt.f32.partialorder %v9479_v24, 20.0  ;;  %vm9584_vm2 = vcmp.lt.f32.partialorder %v4091_v29, 0.0004427343 }
 0x61e   :  { %v5876_v37 = vpop.eup %5875  ;;  %v4103_v21 = vadd.f32 1.0, %v5874_v43  ;;  %v4106_v0 = vmul.f32 -0.5, %v5874_v43  ;;  %v4109_v18 = vand.u32 2147483647, %v5874_v43  ;;  %v3803_v55 = vmul.f32 1.442695, %v3708_v31 }
 0x61f   :  { %v4075_v50 = vsel %vm9561_vm12, %v4072_v40, %v4069_v58  ;;  %v4094_v34 = vadd.f32 1.0, %v5876_v37  ;;  %v5878_v17 = vpop.eup %5877  ;;  %v4097_v59 = vmul.f32 -0.5, %v5876_v37  ;;  %v4081_v40 = vmul.f32 %v5868_v45, %v4080_v9 }
 0x620   :  { %v9577_v2 = vsel %vm3635_vm11, %v9368_v61, %v4075_v50  ;;  %5891 = vlog2.f32 %v4103_v21  ;;  %v4112_v58 = vadd.f32 1.0, %v5878_v17  ;;  %v4115_v61 = vmul.f32 -0.5, %v5878_v17 }
 0x621   :  { %10901 = vst [vmem:[#allocation87_spill] sm:$0xff] %v9577_v2  ;;  %v5880_v47 = vpop.eup %5879  ;;  %5893 = vlog2.f32 %v4094_v34  ;;  %v4090_v50 = vmul.f32 %v5870_v60, %v4089_v16  ;;  %v4107_v2 = vadd.f32 1.0, %v4106_v0  ;;  %vm9590_vm3 = vcmp.lt.f32.partialorder %v4109_v18, 0.0004427343 }
 0x622   :  { %v4060_v26 = vmul.f32 0.6931472, %v5880_v47  ;;  %v5882_v21 = vpop.eup %5881  ;;  %5895 = vlog2.f32 %v4112_v58  ;;  %v4098_v47 = vadd.f32 1.0, %v4097_v59  ;;  %v4100_v45 = vand.u32 2147483647, %v5876_v37 }
 0x623   :  { %v4121_v29 = vadd.f32 1.0, %v5882_v21  ;;  %vm3639_vm4 = vcmp.gt.f32.partialorder %v9497_v8, 20.0  ;;  %v4118_v31 = vand.u32 2147483647, %v5878_v17  ;;  %v4124_v42 = vmul.f32 -0.5, %v5882_v21 }
 0x624   :  { %v5884_v49 = vpop.eup %5883  ;;  %v4066_v48 = vsel %vm9566_vm14, %v4063_v11, %v4060_v26  ;;  %vm3638_vm5 = vcmp.gt.f32.partialorder %v9509_v15, 20.0  ;;  %v4116_v0 = vadd.f32 1.0, %v4115_v61  ;;  %v4127_v34 = vand.u32 2147483647, %v5882_v21 }
 0x625   :  { %v9594_v9 = vpop.eup %5885  ;;  %v9599_v60 = vsel %vm3634_vm13, %v9382_v44, %v4066_v48  ;;  %v4078_v16 = vmul.f32 0.6931472, %v5884_v49  ;;  %5897 = vlog2.f32 %v4121_v29  ;;  %v4108_v26 = vmul.f32 %v5874_v43, %v4107_v2 }
 0x626   :  { %10908 = vst [vmem:[#allocation89_spill] sm:$0xff] %v9599_v60  ;;  %v5888_v11 = vpop.eup %5887  ;;  %v4139_v18 = vadd.f32 1.0, %v9594_v9  ;;  %v4142_v49 = vmul.f32 -0.5, %v9594_v9  ;;  %v4099_v60 = vmul.f32 %v5876_v37, %v4098_v47  ;;  %vm3640_vm6 = vcmp.gt.f32.partialorder %v9520_v4, 20.0 }
 0x627   :  { %v9604_v59 = vpop.eup %5889  ;;  %v4084_v58 = vsel %vm9579_vm0, %v4081_v40, %v4078_v16  ;;  %v4087_v44 = vmul.f32 0.6931472, %v5888_v11  ;;  %v9617_v61 = vadd.f32 %v9173_v23, %v9003_v51  ;;  %vm9621_vm7 = vcmp.lt.f32.partialorder %v4100_v45, 0.0004427343 }
 0x628   :  { %v9612_v48 = vsel %vm3636_vm15, %v9466_v54, %v4084_v58  ;;  %5899 = vlog2.f32 %v4139_v18  ;;  %v4125_v43 = vadd.f32 1.0, %v4124_v42  ;;  %v4130_v40 = vadd.f32 1.0, %v9604_v59 }
 0x629   :  { %v4093_v62 = vsel %vm9584_vm2, %v4090_v50, %v4087_v44  ;;  %v4117_v47 = vmul.f32 %v5878_v17, %v4116_v0  ;;  %vm9631_vm8 = vcmp.lt.f32.partialorder %v4118_v31, 0.0004427343  ;;  %vm9635_vm9 = vcmp.lt.f32.partialorder %v4127_v34, 0.0004427343 }
 0x62a   :  { %v5892_v54 = vpop.eup %5891  ;;  %v9629_v37 = vsel %vm3637_vm1, %v9479_v24, %v4093_v62  ;;  %vm3641_vm10 = vcmp.gt.f32.partialorder %v9539_v7, 20.0  ;;  %v4143_v29 = vadd.f32 1.0, %v4142_v49  ;;  %5901 = vlog2.f32 %v4130_v40 }
 0x62b   :  { %v5894_v50 = vpop.eup %5893  ;;  %v4105_v45 = vmul.f32 0.6931472, %v5892_v54  ;;  %v4133_v16 = vmul.f32 -0.5, %v9604_v59  ;;  %v4145_v24 = vand.u32 2147483647, %v9594_v9  ;;  %5903 = vpow2.f32 %v3803_v55 }
 0x62c   :  { %v4096_v42 = vmul.f32 0.6931472, %v5894_v50  ;;  %v3709_v17 = vmin.f32 %v9617_v61, 20.0  ;;  %v5896_v31 = vpop.eup %5895  ;;  %v4126_v0 = vmul.f32 %v5882_v21, %v4125_v43  ;;  %vm3643_vm11 = vcmp.gt.f32.partialorder %v9543_v1, 20.0 }
 0x62d   :  { %v4111_v11 = vsel %vm9590_vm3, %v4108_v26, %v4105_v45  ;;  %v9648_v34 = vadd.f32 %v9180_v12, %v9006_v46  ;;  %v9652_v18 = vadd.f32 %v9182_v41, %v9009_v22  ;;  %v4114_v58 = vmul.f32 0.6931472, %v5896_v31 }
 0x62e   :  { %v9657_v55 = vsel %vm3639_vm4, %v9497_v8, %v4111_v11  ;;  %v4102_v53 = vsel %vm9621_vm7, %v4099_v60, %v4096_v42  ;;  %v3805_v21 = vmul.f32 1.442695, %v3709_v17  ;;  %v4144_v12 = vmul.f32 %v9594_v9, %v4143_v29 }
 0x62f   :  { %v9664_v44 = vsel %vm3638_vm5, %v9509_v15, %v4102_v53  ;;  %v4134_v26 = vadd.f32 1.0, %v4133_v16  ;;  %v3711_v41 = vmin.f32 %v9648_v34, 20.0  ;;  %v5898_v49 = vpop.eup %5897  ;;  %v4120_v8 = vsel %vm9631_vm8, %v4117_v47, %v4114_v58 }
 0x630   :  { %5905 = vpow2.f32 %v3805_v21  ;;  %v3710_v62 = vmin.f32 %v9652_v18, 20.0  ;;  %v9673_v60 = vadd.f32 %v9193_v14, %v9012_v63  ;;  %v9678_v15 = vsel %vm3640_vm6, %v9520_v4, %v4120_v8 }
 0x631   :  { %v4123_v9 = vmul.f32 0.6931472, %v5898_v49  ;;  %v3809_v2 = vmul.f32 1.442695, %v3711_v41  ;;  %v9682_v43 = vadd.f32 %v9195_v19, %v9003_v51  ;;  %vm9684_vm12 = vcmp.lt.f32.partialorder %v4145_v24, 0.0004427343 }
 0x632   :  { %v5900_v40 = vpop.eup %5899  ;;  %v3807_v47 = vmul.f32 1.442695, %v3710_v62  ;;  %v3712_v14 = vmin.f32 %v9673_v60, 20.0  ;;  %v9691_v23 = vadd.f32 %v9207_v20, %v9006_v46  ;;  %v4136_v45 = vand.u32 2147483647, %v9604_v59 }
 0x633   :  { %v4129_v4 = vsel %vm9635_vm9, %v4126_v0, %v4123_v9  ;;  %v4141_v50 = vmul.f32 0.6931472, %v5900_v40  ;;  %5907 = vpow2.f32 %v3809_v2  ;;  %v3713_v16 = vmin.f32 %v9682_v43, 20.0 }
 0x634   :  { %v9699_v19 = vsel %vm3641_vm10, %v9539_v7, %v4129_v4  ;;  %5909 = vpow2.f32 %v3807_v47  ;;  %v3811_v29 = vmul.f32 1.442695, %v3712_v14  ;;  %v5902_v42 = vpop.eup %5901  ;;  %v4135_v27 = vmul.f32 %v9604_v59, %v4134_v26 }
 0x635   :  { %v4147_v20 = vsel %vm9684_vm12, %v4144_v12, %v4141_v50  ;;  %v3715_v24 = vmin.f32 %v9691_v23, 20.0  ;;  %v9708_v17 = vadd.f32 %v9209_v30, %v9009_v22  ;;  %v5904_v31 = vpop.eup %5903  ;;  %v4132_v11 = vmul.f32 0.6931472, %v5902_v42 }
 0x636   :  { %v9713_v7 = vsel %vm3643_vm11, %v9543_v1, %v4147_v20  ;;  %5911 = vpow2.f32 %v3811_v29  ;;  %v3813_v0 = vmul.f32 1.442695, %v3713_v16  ;;  %vm4137_vm13 = vcmp.lt.f32.partialorder %v4136_v45, 0.0004427343 }
 0x637   :  { %v4148_v53 = vadd.f32 1.0, %v5904_v31  ;;  %v3817_v58 = vmul.f32 1.442695, %v3715_v24  ;;  %vm3642_vm14 = vcmp.gt.f32.partialorder %v9548_v39, 20.0  ;;  %v4138_v59 = vsel %vm4137_vm13, %v4135_v27, %v4132_v11 }
 0x638   :  { %5913 = vpow2.f32 %v3813_v0  ;;  %v3714_v21 = vmin.f32 %v9708_v17, 20.0  ;;  %v9718_v30 = vsel %vm3642_vm14, %v9548_v39, %v4138_v59  ;;  %v4151_v12 = vmul.f32 -0.5, %v5904_v31 }
 0x639   :  { %5915 = vlog2.f32 %v4148_v53  ;;  %v9722_v41 = vadd.f32 %v9223_v13, %v9012_v63  ;;  %v9726_v49 = vadd.f32 %v9246_v35, %v9003_v51  ;;  %v4154_v62 = vand.u32 2147483647, %v5904_v31 }
 0x63a   :  { %v5906_v26 = vpop.eup %5905  ;;  %5917 = vpow2.f32 %v3817_v58  ;;  %v3815_v1 = vmul.f32 1.442695, %v3714_v21  ;;  %v4152_v47 = vadd.f32 1.0, %v4151_v12  ;;  %vm3644_vm15 = vcmp.gt.f32.partialorder %v9558_v6, 20.0 }
 0x63b   :  { %v4157_v8 = vadd.f32 1.0, %v5906_v26  ;;  %v4160_v9 = vmul.f32 -0.5, %v5906_v26  ;;  %v3716_v39 = vmin.f32 %v9722_v41, 20.0  ;;  %v3717_v40 = vmin.f32 %v9726_v49, 20.0 }
 0x63c   :  { %5919 = vpow2.f32 %v3815_v1  ;;  %v4163_v13 = vand.u32 2147483647, %v5906_v26  ;;  %vm9731_vm0 = vcmp.lt.f32.partialorder %v4154_v62, 0.0004427343  ;;  %v4153_v11 = vmul.f32 %v5904_v31, %v4152_v47 }
 0x63d   :  { %v5908_v2 = vpop.eup %5907  ;;  %5921 = vlog2.f32 %v4157_v8  ;;  %v3819_v4 = vmul.f32 1.442695, %v3716_v39  ;;  %v4161_v29 = vadd.f32 1.0, %v4160_v9  ;;  %v3821_v16 = vmul.f32 1.442695, %v3717_v40 }
 0x63e   :  { %v5910_v54 = vpop.eup %5909  ;;  %v4175_v14 = vadd.f32 1.0, %v5908_v2  ;;  %v4178_v42 = vmul.f32 -0.5, %v5908_v2  ;;  %vm3645_vm1 = vcmp.gt.f32.partialorder %v9617_v61, 20.0  ;;  %v4181_v0 = vand.u32 2147483647, %v5908_v2 }
 0x63f   :  { %v4166_v50 = vadd.f32 1.0, %v5910_v54  ;;  %v4169_v20 = vmul.f32 -0.5, %v5910_v54  ;;  %vm9736_vm2 = vcmp.lt.f32.partialorder %v4163_v13, 0.0004427343  ;;  %v4162_v62 = vmul.f32 %v5906_v26, %v4161_v29 }
 0x640   :  { %v5912_v35 = vpop.eup %5911  ;;  %5923 = vlog2.f32 %v4175_v14  ;;  %v4172_v9 = vand.u32 2147483647, %v5910_v54  ;;  %vm3647_vm3 = vcmp.gt.f32.partialorder %v9648_v34, 20.0  ;;  %v4179_v31 = vadd.f32 1.0, %v4178_v42 }
 0x641   :  { %5925 = vlog2.f32 %v4166_v50  ;;  %v4184_v27 = vadd.f32 1.0, %v5912_v35  ;;  %v4187_v53 = vmul.f32 -0.5, %v5912_v35  ;;  %v4170_v39 = vadd.f32 1.0, %v4169_v20 }
 0x642   :  { %v5914_v24 = vpop.eup %5913  ;;  %5927 = vpow2.f32 %v3819_v4  ;;  %vm9748_vm4 = vcmp.lt.f32.partialorder %v4181_v0, 0.0004427343  ;;  %vm3646_vm5 = vcmp.gt.f32.partialorder %v9652_v18, 20.0  ;;  %v4190_v13 = vand.u32 2147483647, %v5912_v35 }
 0x643   :  { %v5916_v58 = vpop.eup %5915  ;;  %5929 = vlog2.f32 %v4184_v27  ;;  %v4193_v21 = vadd.f32 1.0, %v5914_v24  ;;  %v4196_v12 = vmul.f32 -0.5, %v5914_v24  ;;  %v4188_v26 = vadd.f32 1.0, %v4187_v53 }
 0x644   :  { %v9740_v1 = vpop.eup %5917  ;;  %v4150_v8 = vmul.f32 0.6931472, %v5916_v58  ;;  %5931 = vpow2.f32 %v3821_v16  ;;  %v4199_v42 = vand.u32 2147483647, %v5914_v24  ;;  %vm3648_vm6 = vcmp.gt.f32.partialorder %v9673_v60, 20.0 }
 0x645   :  { %5933 = vlog2.f32 %v4193_v21  ;;  %v4211_v40 = vadd.f32 1.0, %v9740_v1  ;;  %v4197_v16 = vadd.f32 1.0, %v4196_v12  ;;  %v4214_v45 = vmul.f32 -0.5, %v9740_v1 }
 0x646   :  { %v9744_v47 = vpop.eup %5919  ;;  %v4156_v14 = vsel %vm9731_vm0, %v4153_v11, %v4150_v8  ;;  %v4217_v27 = vand.u32 2147483647, %v9740_v1  ;;  %v4180_v0 = vmul.f32 %v5908_v2, %v4179_v31  ;;  %v4171_v53 = vmul.f32 %v5910_v54, %v4170_v39 }
 0x647   :  { %v5922_v50 = vpop.eup %5921  ;;  %v9756_v29 = vsel %vm3644_vm15, %v9558_v6, %v4156_v14  ;;  %5935 = vlog2.f32 %v4211_v40  ;;  %v4202_v11 = vadd.f32 1.0, %v9744_v47  ;;  %vm9762_vm7 = vcmp.lt.f32.partialorder %v4172_v9, 0.0004427343 }
 0x648   :  { %v4159_v20 = vmul.f32 0.6931472, %v5922_v50  ;;  %v4205_v6 = vmul.f32 -0.5, %v9744_v47  ;;  %vm9769_vm8 = vcmp.lt.f32.partialorder %v4190_v13, 0.0004427343  ;;  %vm3649_vm9 = vcmp.gt.f32.partialorder %v9682_v43, 20.0 }
 0x649   :  { %5937 = vlog2.f32 %v4202_v11  ;;  %v9776_v2 = vadd.f32 %v9248_v57, %v9006_v46  ;;  %v4189_v59 = vmul.f32 %v5912_v35, %v4188_v26  ;;  %vm9783_vm10 = vcmp.lt.f32.partialorder %v4199_v42, 0.0004427343 }
 0x64a   :  { %v5924_v21 = vpop.eup %5923  ;;  %v4165_v12 = vsel %vm9736_vm2, %v4162_v62, %v4159_v20  ;;  %v4198_v14 = vmul.f32 %v5914_v24, %v4197_v16  ;;  %vm3651_vm11 = vcmp.gt.f32.partialorder %v9691_v23, 20.0  ;;  %v4215_v13 = vadd.f32 1.0, %v4214_v45 }
 0x64b   :  { %v5926_v54 = vpop.eup %5925  ;;  %v9781_v9 = vsel %vm3645_vm1, %v9617_v61, %v4165_v12  ;;  %v4177_v31 = vmul.f32 0.6931472, %v5924_v21  ;;  %vm9788_vm12 = vcmp.lt.f32.partialorder %v4217_v27, 0.0004427343  ;;  %v4206_v20 = vadd.f32 1.0, %v4205_v6 }
 0x64c   :  { %10927 = vst [vmem:[#allocation46_spill] sm:$0xff] %v9781_v9  ;;  %v5928_v39 = vpop.eup %5927  ;;  %v4168_v40 = vmul.f32 0.6931472, %v5926_v54  ;;  %v4208_v35 = vand.u32 2147483647, %v9744_v47  ;;  %v3719_v27 = vmin.f32 %v9776_v2, 20.0  ;;  %v9820_v21 = vadd.f32 %v9256_v3, %v9012_v63 }
 0x64d   :  { %v5930_v50 = vpop.eup %5929  ;;  %v4183_v61 = vsel %vm9748_vm4, %v4180_v0, %v4177_v31  ;;  %v4220_v26 = vadd.f32 1.0, %v5928_v39  ;;  %vm3650_vm13 = vcmp.gt.f32.partialorder %v9708_v17, 20.0  ;;  %v4223_v6 = vmul.f32 -0.5, %v5928_v39 }
 0x64e   :  { %v9795_v42 = vpop.eup %5931  ;;  %v9800_v24 = vsel %vm3647_vm3, %v9648_v34, %v4183_v61  ;;  %v4174_v16 = vsel %vm9762_vm7, %v4171_v53, %v4168_v40  ;;  %v4186_v45 = vmul.f32 0.6931472, %v5930_v50  ;;  %v9814_v34 = vadd.f32 %v9254_v36, %v9009_v22 }
 0x64f   :  { %10932 = vst [vmem:[#allocation47_spill] sm:$0xff] %v9800_v24  ;;  %v5934_v11 = vpop.eup %5933  ;;  %v9808_v4 = vsel %vm3646_vm5, %v9652_v18, %v4174_v16  ;;  %5939 = vlog2.f32 %v4220_v26  ;;  %v4229_v0 = vadd.f32 1.0, %v9795_v42  ;;  %v4216_v54 = vmul.f32 %v9740_v1, %v4215_v13  ;;  %v10938_v16 = vld [vmem:[#allocation59_spill] sm:$0xff] }
 0x650   :  { %v4192_v53 = vsel %vm9769_vm8, %v4189_v59, %v4186_v45  ;;  %v4195_v58 = vmul.f32 0.6931472, %v5934_v11  ;;  %vm9828_vm14 = vcmp.lt.f32.partialorder %v4208_v35, 0.0004427343  ;;  %v4207_v3 = vmul.f32 %v9744_v47, %v4206_v20 }
 0x651   :  { %v5936_v18 = vpop.eup %5935  ;;  %v9825_v12 = vsel %vm3648_vm6, %v9673_v60, %v4192_v53  ;;  %5941 = vlog2.f32 %v4229_v0  ;;  %v3825_v59 = vmul.f32 1.442695, %v3719_v27  ;;  %v4226_v60 = vand.u32 2147483647, %v5928_v39  ;;  %v10939_v27 = vld [vmem:[#allocation69_spill] sm:$0xff] }
 0x652   :  { %10933 = vst [vmem:[#allocation48_spill] sm:$0xff] %v9825_v12  ;;  %v4201_v8 = vsel %vm9783_vm10, %v4198_v14, %v4195_v58  ;;  %v4213_v31 = vmul.f32 0.6931472, %v5936_v18  ;;  %v4232_v1 = vmul.f32 -0.5, %v9795_v42  ;;  %v3718_v13 = vmin.f32 %v9814_v34, 20.0 }
 0x653   :  { %v9838_v40 = vsel %vm3649_vm9, %v9682_v43, %v4201_v8  ;;  %v5938_v50 = vpop.eup %5937  ;;  %vm3652_vm15 = vcmp.gt.f32.partialorder %v9722_v41, 20.0  ;;  %v4224_v62 = vadd.f32 1.0, %v4223_v6  ;;  %5943 = vpow2.f32 %v3825_v59 }
 0x654   :  { %10936 = vst [vmem:[#allocation49_spill] sm:$0xff] %v9838_v40  ;;  %v4219_v61 = vsel %vm9788_vm12, %v4216_v54, %v4213_v31  ;;  %v3720_v47 = vmin.f32 %v9820_v21, 20.0  ;;  %v4204_v14 = vmul.f32 0.6931472, %v5938_v50  ;;  %v3823_v20 = vmul.f32 1.442695, %v3718_v13 }
 0x655   :  { %v9849_v43 = vsel %vm3651_vm11, %v9691_v23, %v4219_v61  ;;  %v9853_v35 = vadd.f32 %v9266_v33, %v9003_v51  ;;  %v9857_v57 = vadd.f32 %v9268_v5, %v9006_v46  ;;  %v9861_v45 = vadd.f32 %v10938_v16, %v9009_v22 }
 0x656   :  { %10937 = vst [vmem:[#allocation80_spill] sm:$0xff] %v9849_v43  ;;  %v3827_v26 = vmul.f32 1.442695, %v3720_v47  ;;  %v9865_v11 = vadd.f32 %v10939_v27, %v9012_v63  ;;  %v4210_v23 = vsel %vm9828_vm14, %v4207_v3, %v4204_v14  ;;  %v4233_v0 = vadd.f32 1.0, %v4232_v1 }
 0x657   :  { %5945 = vpow2.f32 %v3823_v20  ;;  %v3721_v33 = vmin.f32 %v9853_v35, 20.0  ;;  %v9873_v5 = vsel %vm3650_vm13, %v9708_v17, %v4210_v23  ;;  %vm9875_vm0 = vcmp.lt.f32.partialorder %v4226_v60, 0.0004427343  ;;  %v10942_v17 = vld [vmem:[#allocation57_spill] sm:$0xff] }
 0x658   :  { %5947 = vpow2.f32 %v3827_v26  ;;  %v3723_v58 = vmin.f32 %v9857_v57, 20.0  ;;  %v4225_v18 = vmul.f32 %v5928_v39, %v4224_v62  ;;  %v4235_v54 = vand.u32 2147483647, %v9795_v42  ;;  %v10943_v39 = vld [vmem:[#allocation70_spill] sm:$0xff] }
 0x659   :  { %v5940_v6 = vpop.eup %5939  ;;  %v3829_v36 = vmul.f32 1.442695, %v3721_v33  ;;  %v3722_v8 = vmin.f32 %v9861_v45, 20.0  ;;  %v3724_v59 = vmin.f32 %v9865_v11, 20.0  ;;  %v9885_v60 = vadd.f32 %v10942_v17, %v9003_v51 }
 0x65a   :  { %v4222_v31 = vmul.f32 0.6931472, %v5940_v6  ;;  %v3833_v3 = vmul.f32 1.442695, %v3723_v58  ;;  %v4234_v13 = vmul.f32 %v9795_v42, %v4233_v0  ;;  %v9890_v61 = vadd.f32 %v10943_v39, %v9006_v46  ;;  %v10946_v6 = vld [vmem:[#allocation75_spill] sm:$0xff] }
 0x65b   :  { %v5942_v1 = vpop.eup %5941  ;;  %5949 = vpow2.f32 %v3829_v36  ;;  %v3831_v50 = vmul.f32 1.442695, %v3722_v8  ;;  %v3835_v14 = vmul.f32 1.442695, %v3724_v59  ;;  %vm4236_vm1 = vcmp.lt.f32.partialorder %v4235_v54, 0.0004427343 }
 0x65c   :  { %v4228_v62 = vsel %vm9875_vm0, %v4225_v18, %v4222_v31  ;;  %v4231_v47 = vmul.f32 0.6931472, %v5942_v1  ;;  %5951 = vpow2.f32 %v3833_v3  ;;  %v3725_v42 = vmin.f32 %v9885_v60, 20.0 }
 0x65d   :  { %v9897_v20 = vsel %vm3652_vm15, %v9722_v41, %v4228_v62  ;;  %5953 = vpow2.f32 %v3831_v50  ;;  %v5944_v26 = vpop.eup %5943  ;;  %vm3653_vm2 = vcmp.gt.f32.partialorder %v9726_v49, 20.0  ;;  %v3727_v53 = vmin.f32 %v9890_v61, 20.0  ;;  %v10949_v50 = vld [vmem:[#allocation67_spill] sm:$0xff] }
 0x65e   :  { %10944 = vst [vmem:[#allocation60_spill] sm:$0xff] %v9897_v20  ;;  %v4237_v16 = vsel %vm4236_vm1, %v4234_v13, %v4231_v47  ;;  %5955 = vpow2.f32 %v3835_v14  ;;  %v4247_v23 = vadd.f32 1.0, %v5944_v26  ;;  %v4250_v0 = vmul.f32 -0.5, %v5944_v26 }
 0x65f   :  { %v9902_v27 = vsel %vm3653_vm2, %v9726_v49, %v4237_v16  ;;  %v3837_v33 = vmul.f32 1.442695, %v3725_v42  ;;  %v4253_v41 = vand.u32 2147483647, %v5944_v26  ;;  %v9907_v18 = vadd.f32 %v10946_v6, %v9009_v22 }
 0x660   :  { %10945 = vst [vmem:[#allocation64_spill] sm:$0xff] %v9902_v27  ;;  %5957 = vlog2.f32 %v4247_v23  ;;  %v4251_v49 = vadd.f32 1.0, %v4250_v0  ;;  %v3841_v59 = vmul.f32 1.442695, %v3727_v53  ;;  %v9916_v39 = vadd.f32 %v10949_v50, %v9012_v63 }
 0x661   :  { %v5946_v58 = vpop.eup %5945  ;;  %5959 = vpow2.f32 %v3837_v33  ;;  %vm9909_vm3 = vcmp.lt.f32.partialorder %v4253_v41, 0.0004427343  ;;  %v3726_v13 = vmin.f32 %v9907_v18, 20.0  ;;  %vm3655_vm4 = vcmp.gt.f32.partialorder %v9776_v2, 20.0 }
 0x662   :  { %v5948_v54 = vpop.eup %5947  ;;  %v4238_v36 = vadd.f32 1.0, %v5946_v58  ;;  %v4241_v8 = vmul.f32 -0.5, %v5946_v58  ;;  %v4244_v47 = vand.u32 2147483647, %v5946_v58  ;;  %vm3654_vm5 = vcmp.gt.f32.partialorder %v9814_v34, 20.0 }
 0x663   :  { %v4256_v31 = vadd.f32 1.0, %v5948_v54  ;;  %v4259_v3 = vmul.f32 -0.5, %v5948_v54  ;;  %v4262_v14 = vand.u32 2147483647, %v5948_v54  ;;  %vm3656_vm7 = vcmp.gt.f32.partialorder %v9820_v21, 20.0 }
 0x664   :  { %5961 = vlog2.f32 %v4238_v36  ;;  %v4242_v0 = vadd.f32 1.0, %v4241_v8  ;;  %v4252_v36 = vmul.f32 %v5944_v26, %v4251_v49  ;;  %vm9922_vm6 = vcmp.lt.f32.partialorder %v4244_v47, 0.0004427343 }
 0x665   :  { %v5950_v17 = vpop.eup %5949  ;;  %5963 = vlog2.f32 %v4256_v31  ;;  %v4260_v33 = vadd.f32 1.0, %v4259_v3  ;;  %vm9928_vm8 = vcmp.lt.f32.partialorder %v4262_v14, 0.0004427343  ;;  %vm3657_vm10 = vcmp.gt.f32.partialorder %v9853_v35, 20.0 }
 0x666   :  { %v5952_v62 = vpop.eup %5951  ;;  %v4265_v42 = vadd.f32 1.0, %v5950_v17  ;;  %v4268_v16 = vmul.f32 -0.5, %v5950_v17  ;;  %v4271_v31 = vand.u32 2147483647, %v5950_v17  ;;  %v4243_v49 = vmul.f32 %v5946_v58, %v4242_v0 }
 0x667   :  { %v5954_v23 = vpop.eup %5953  ;;  %v4283_v53 = vadd.f32 1.0, %v5952_v62  ;;  %v4286_v41 = vmul.f32 -0.5, %v5952_v62  ;;  %v4289_v24 = vand.u32 2147483647, %v5952_v62  ;;  %vm3659_vm12 = vcmp.gt.f32.partialorder %v9857_v57, 20.0 }
 0x668   :  { %v9919_v6 = vpop.eup %5955  ;;  %5965 = vlog2.f32 %v4265_v42  ;;  %v4274_v27 = vadd.f32 1.0, %v5954_v23  ;;  %v4269_v50 = vadd.f32 1.0, %v4268_v16  ;;  %v4277_v8 = vmul.f32 -0.5, %v5954_v23 }
 0x669   :  { %5967 = vlog2.f32 %v4283_v53  ;;  %v4287_v43 = vadd.f32 1.0, %v4286_v41  ;;  %v4292_v3 = vadd.f32 1.0, %v9919_v6  ;;  %v4261_v42 = vmul.f32 %v5948_v54, %v4260_v33 }
 0x66a   :  { %5969 = vlog2.f32 %v4274_v27  ;;  %v5958_v26 = vpop.eup %5957  ;;  %v3839_v16 = vmul.f32 1.442695, %v3726_v13  ;;  %vm9934_vm9 = vcmp.lt.f32.partialorder %v4271_v31, 0.0004427343  ;;  %v4280_v20 = vand.u32 2147483647, %v5954_v23 }
 0x66b   :  { %v9932_v53 = vpop.eup %5959  ;;  %v4249_v47 = vmul.f32 0.6931472, %v5958_v26  ;;  %5971 = vlog2.f32 %v4292_v3  ;;  %v4270_v27 = vmul.f32 %v5950_v17, %v4269_v50  ;;  %v4288_v12 = vmul.f32 %v5952_v62, %v4287_v43  ;;  %v10961_v26 = vld [vmem:[#allocation63_spill] sm:$0xff] }
 0x66c   :  { %vm9939_vm11 = vcmp.lt.f32.partialorder %v4289_v24, 0.0004427343  ;;  %v4301_v54 = vadd.f32 1.0, %v9932_v53  ;;  %v3728_v13 = vmin.f32 %v9916_v39, 20.0  ;;  %v4278_v33 = vadd.f32 1.0, %v4277_v8 }
 0x66d   :  { %v4255_v0 = vsel %vm9909_vm3, %v4252_v36, %v4249_v47  ;;  %v4295_v31 = vmul.f32 -0.5, %v9919_v6  ;;  %5973 = vpow2.f32 %v3841_v59  ;;  %vm3658_vm13 = vcmp.gt.f32.partialorder %v9861_v45, 20.0  ;;  %v10963_v36 = vld [vmem:[#allocation83_spill] sm:$0xff] }
 0x66e   :  { %v5962_v14 = vpop.eup %5961  ;;  %v9952_v24 = vsel %vm3655_vm4, %v9776_v2, %v4255_v0  ;;  %v4298_v62 = vand.u32 2147483647, %v9919_v6  ;;  %5975 = vlog2.f32 %v4301_v54  ;;  %vm9956_vm14 = vcmp.lt.f32.partialorder %v4280_v20, 0.0004427343  ;;  %v10960_v2 = vld [vmem:[#allocation61_spill] sm:$0xff] }
 0x66f   :  { %v5964_v17 = vpop.eup %5963  ;;  %v4240_v43 = vmul.f32 0.6931472, %v5962_v14  ;;  %v4304_v50 = vmul.f32 -0.5, %v9932_v53  ;;  %5977 = vpow2.f32 %v3839_v16  ;;  %v3843_v8 = vmul.f32 1.442695, %v3728_v13 }
 0x670   :  { %v4258_v1 = vmul.f32 0.6931472, %v5964_v17  ;;  %v9965_v3 = vadd.f32 %v10960_v2, %v9003_v51  ;;  %v9969_v47 = vadd.f32 %v10961_v26, %v9006_v46  ;;  %v4279_v40 = vmul.f32 %v5954_v23, %v4278_v33 }
 0x671   :  { %v4246_v59 = vsel %vm9922_vm6, %v4243_v49, %v4240_v43  ;;  %v10962_v49 = vld [vmem:[#allocation81_spill] sm:$0xff]  ;;  %v4296_v43 = vadd.f32 1.0, %v4295_v31  ;;  %5979 = vpow2.f32 %v3843_v8  ;;  %vm4299_vm15 = vcmp.lt.f32.partialorder %v4298_v62, 0.0004427343 }
 0x672   :  { %v5966_v54 = vpop.eup %5965  ;;  %v9974_v20 = vsel %vm3654_vm5, %v9814_v34, %v4246_v59  ;;  %v4264_v16 = vsel %vm9928_vm8, %v4261_v42, %v4258_v1  ;;  %v9980_v13 = vadd.f32 %v10962_v49, %v9009_v22  ;;  %v4307_v59 = vand.u32 2147483647, %v9932_v53 }
 0x673   :  { %v5968_v14 = vpop.eup %5967  ;;  %v9985_v0 = vsel %vm3656_vm7, %v9820_v21, %v4264_v16  ;;  %v4267_v17 = vmul.f32 0.6931472, %v5966_v54  ;;  %v3729_v9 = vmin.f32 %v9965_v3, 20.0  ;;  %v3731_v23 = vmin.f32 %v9969_v47, 20.0 }
 0x674   :  { %v5970_v2 = vpop.eup %5969  ;;  %v4285_v34 = vmul.f32 0.6931472, %v5968_v14  ;;  %v4305_v1 = vadd.f32 1.0, %v4304_v50  ;;  %v3730_v26 = vmin.f32 %v9980_v13, 20.0  ;;  %v4297_v49 = vmul.f32 %v9919_v6, %v4296_v43 }
 0x675   :  { %v4273_v42 = vsel %vm9934_vm9, %v4270_v27, %v4267_v17  ;;  %v4276_v33 = vmul.f32 0.6931472, %v5970_v2  ;;  %v5972_v21 = vpop.eup %5971  ;;  %v3845_v54 = vmul.f32 1.442695, %v3729_v9  ;;  %v3849_v16 = vmul.f32 1.442695, %v3731_v23 }
 0x676   :  { %v9996_v31 = vsel %vm3657_vm10, %v9853_v35, %v4273_v42  ;;  %v4291_v8 = vsel %vm9939_vm11, %v4288_v12, %v4285_v34  ;;  %v4294_v50 = vmul.f32 0.6931472, %v5972_v21  ;;  %v3847_v12 = vmul.f32 1.442695, %v3730_v26  ;;  %v10964_v34 = vld [vmem:[#allocation73_spill] sm:$0xff] }
 0x677   :  { %v10003_v41 = vsel %vm3659_vm12, %v9857_v57, %v4291_v8  ;;  %v4282_v27 = vsel %vm9956_vm14, %v4279_v40, %v4276_v33  ;;  %v5974_v14 = vpop.eup %5973  ;;  %5981 = vpow2.f32 %v3845_v54  ;;  %vm3660_vm0 = vcmp.gt.f32.partialorder %v9865_v11, 20.0  ;;  %v10965_v54 = vld [vmem:[#allocation66_spill] sm:$0xff] }
 0x678   :  { %v10011_v35 = vsel %vm3658_vm13, %v9861_v45, %v4282_v27  ;;  %v5976_v58 = vpop.eup %5975  ;;  %v4300_v57 = vsel %vm4299_vm15, %v4297_v49, %v4294_v50  ;;  %v4319_v17 = vadd.f32 1.0, %v5974_v14  ;;  %v10016_v40 = vadd.f32 %v10963_v36, %v9012_v63 }
 0x679   :  { %v5978_v2 = vpop.eup %5977  ;;  %v10019_v6 = vsel %vm3660_vm0, %v9865_v11, %v4300_v57  ;;  %v4303_v43 = vmul.f32 0.6931472, %v5976_v58  ;;  %v4306_v45 = vmul.f32 %v9932_v53, %v4305_v1  ;;  %5983 = vpow2.f32 %v3849_v16 }
 0x67a   :  { %vm4308_vm1 = vcmp.lt.f32.partialorder %v4307_v59, 0.0004427343  ;;  %5985 = vlog2.f32 %v4319_v17  ;;  %v4310_v62 = vadd.f32 1.0, %v5978_v2  ;;  %v10024_v9 = vadd.f32 %v10964_v34, %v9003_v51 }
 0x67b   :  { %vm3661_vm2 = vcmp.gt.f32.partialorder %v9885_v60, 20.0  ;;  %v4309_v23 = vsel %vm4308_vm1, %v4306_v45, %v4303_v43  ;;  %5987 = vpow2.f32 %v3847_v12  ;;  %v10027_v42 = vpop.eup %5979  ;;  %v4322_v33 = vmul.f32 -0.5, %v5974_v14 }
 0x67c   :  { %v10030_v11 = vsel %vm3661_vm2, %v9885_v60, %v4309_v23  ;;  %5989 = vlog2.f32 %v4310_v62  ;;  %v3732_v53 = vmin.f32 %v10016_v40, 20.0  ;;  %v4328_v59 = vadd.f32 1.0, %v10027_v42 }
 0x67d   :  { %v3733_v26 = vmin.f32 %v10024_v9, 20.0  ;;  %v4325_v21 = vand.u32 2147483647, %v5974_v14  ;;  %v4313_v8 = vmul.f32 -0.5, %v5978_v2  ;;  %v10037_v16 = vadd.f32 %v10965_v54, %v9006_v46 }
 0x67e   :  { %v3851_v1 = vmul.f32 1.442695, %v3732_v53  ;;  %5991 = vlog2.f32 %v4328_v59  ;;  %v4323_v27 = vadd.f32 1.0, %v4322_v33  ;;  %v4331_v60 = vmul.f32 -0.5, %v10027_v42 }
 0x67f   :  { %v3853_v50 = vmul.f32 1.442695, %v3733_v26  ;;  %v3735_v12 = vmin.f32 %v10037_v16, 20.0  ;;  %v10045_v58 = vadd.f32 %v9424_v56, %v9009_v22  ;;  %vm3663_vm3 = vcmp.gt.f32.partialorder %v9890_v61, 20.0 }
 0x680   :  { %5993 = vpow2.f32 %v3851_v1  ;;  %v4316_v57 = vand.u32 2147483647, %v5978_v2  ;;  %vm10051_vm4 = vcmp.lt.f32.partialorder %v4325_v21, 0.0004427343  ;;  %vm3662_vm5 = vcmp.gt.f32.partialorder %v9907_v18, 20.0 }
 0x681   :  { %v10040_v49 = vpop.eup %5981  ;;  %5995 = vpow2.f32 %v3853_v50  ;;  %v4314_v45 = vadd.f32 1.0, %v4313_v8  ;;  %v3857_v62 = vmul.f32 1.442695, %v3735_v12  ;;  %v4324_v23 = vmul.f32 %v5974_v14, %v4323_v27 }
 0x682   :  { %v4337_v17 = vadd.f32 1.0, %v10040_v49  ;;  %vm3664_vm6 = vcmp.gt.f32.partialorder %v9916_v39, 20.0  ;;  %v4332_v56 = vadd.f32 1.0, %v4331_v60  ;;  %v3734_v1 = vmin.f32 %v10045_v58, 20.0 }
 0x683   :  { %v10049_v36 = vpop.eup %5983  ;;  %v10063_v26 = vadd.f32 %v9450_v32, %v9012_v63  ;;  %vm10065_vm7 = vcmp.lt.f32.partialorder %v4316_v57, 0.0004427343  ;;  %v4334_v14 = vand.u32 2147483647, %v10027_v42  ;;  %v4315_v50 = vmul.f32 %v5978_v2, %v4314_v45 }
 0x684   :  { %v5986_v34 = vpop.eup %5985  ;;  %5997 = vlog2.f32 %v4337_v17  ;;  %v4355_v33 = vadd.f32 1.0, %v10049_v36  ;;  %v4340_v12 = vmul.f32 -0.5, %v10040_v49  ;;  %v4333_v57 = vmul.f32 %v10027_v42, %v4332_v56 }
 0x685   :  { %v10058_v53 = vpop.eup %5987  ;;  %v4321_v59 = vmul.f32 0.6931472, %v5986_v34  ;;  %5999 = vpow2.f32 %v3857_v62  ;;  %v4358_v17 = vmul.f32 -0.5, %v10049_v36  ;;  %vm3665_vm8 = vcmp.gt.f32.partialorder %v9965_v3, 20.0 }
 0x686   :  { %v5990_v21 = vpop.eup %5989  ;;  %6001 = vlog2.f32 %v4355_v33  ;;  %v4346_v54 = vadd.f32 1.0, %v10058_v53  ;;  %v4349_v2 = vmul.f32 -0.5, %v10058_v53  ;;  %v3855_v43 = vmul.f32 1.442695, %v3734_v1 }
 0x687   :  { %v4327_v27 = vsel %vm10051_vm4, %v4324_v23, %v4321_v59  ;;  %v4312_v60 = vmul.f32 0.6931472, %v5990_v21  ;;  %v3736_v45 = vmin.f32 %v10063_v26, 20.0  ;;  %v4343_v56 = vand.u32 2147483647, %v10040_v49 }
 0x688   :  { %v10077_v32 = vsel %vm3663_vm3, %v9890_v61, %v4327_v27  ;;  %6003 = vlog2.f32 %v4346_v54  ;;  %v5992_v62 = vpop.eup %5991  ;;  %v4361_v33 = vand.u32 2147483647, %v10049_v36  ;;  %vm4335_vm9 = vcmp.lt.f32.partialorder %v4334_v14, 0.0004427343 }
 0x689   :  { %v4318_v34 = vsel %vm10065_vm7, %v4315_v50, %v4312_v60  ;;  %v4330_v42 = vmul.f32 0.6931472, %v5992_v62  ;;  %v4341_v59 = vadd.f32 1.0, %v4340_v12  ;;  %6005 = vpow2.f32 %v3855_v43 }
 0x68a   :  { %v10086_v23 = vpop.eup %5993  ;;  %v10091_v61 = vsel %vm3662_vm5, %v9907_v18, %v4318_v34  ;;  %vm3667_vm10 = vcmp.gt.f32.partialorder %v9969_v47, 20.0  ;;  %v3859_v54 = vmul.f32 1.442695, %v3736_v45  ;;  %v10101_v18 = vadd.f32 %v9490_v28, %v9003_v51 }
 0x68b   :  { %v4364_v21 = vadd.f32 1.0, %v10086_v23  ;;  %v10096_v1 = vpop.eup %5995  ;;  %v4336_v8 = vsel %vm4335_vm9, %v4333_v57, %v4330_v42  ;;  %v4359_v14 = vadd.f32 1.0, %v4358_v17  ;;  %v4350_v60 = vadd.f32 1.0, %v4349_v2 }
 0x68c   :  { %v10106_v27 = vsel %vm3664_vm6, %v9916_v39, %v4336_v8  ;;  %vm10108_vm11 = vcmp.lt.f32.partialorder %v4343_v56, 0.0004427343  ;;  %vm10112_vm12 = vcmp.lt.f32.partialorder %v4361_v33, 0.0004427343  ;;  %v4373_v51 = vadd.f32 1.0, %v10096_v1 }
 0x68d   :  { %6007 = vlog2.f32 %v4364_v21  ;;  %v4342_v39 = vmul.f32 %v10040_v49, %v4341_v59  ;;  %v4352_v17 = vand.u32 2147483647, %v10058_v53  ;;  %v3737_v34 = vmin.f32 %v10101_v18, 20.0 }
 0x68e   :  { %v5998_v50 = vpop.eup %5997  ;;  %6009 = vpow2.f32 %v3859_v54  ;;  %v4367_v43 = vmul.f32 -0.5, %v10086_v23  ;;  %v10126_v42 = vadd.f32 %v9522_v52, %v9006_v46  ;;  %v4360_v49 = vmul.f32 %v10049_v36, %v4359_v14 }
 0x68f   :  { %v10117_v28 = vpop.eup %5999  ;;  %v4339_v62 = vmul.f32 0.6931472, %v5998_v50  ;;  %6011 = vlog2.f32 %v4373_v51  ;;  %v4351_v59 = vmul.f32 %v10058_v53, %v4350_v60  ;;  %v4376_v54 = vmul.f32 -0.5, %v10096_v1 }
 0x690   :  { %v6002_v2 = vpop.eup %6001  ;;  %v4391_v45 = vadd.f32 1.0, %v10117_v28  ;;  %v3861_v50 = vmul.f32 1.442695, %v3737_v34  ;;  %vm4353_vm13 = vcmp.lt.f32.partialorder %v4352_v17, 0.0004427343  ;;  %v4368_v53 = vadd.f32 1.0, %v4367_v43 }
 0x691   :  { %v4345_v56 = vsel %vm10108_vm11, %v4342_v39, %v4339_v62  ;;  %v4357_v33 = vmul.f32 0.6931472, %v6002_v2  ;;  %v4370_v12 = vand.u32 2147483647, %v10086_v23  ;;  %vm3666_vm14 = vcmp.gt.f32.partialorder %v9980_v13, 20.0 }
 0x692   :  { %v6004_v21 = vpop.eup %6003  ;;  %v10135_v8 = vsel %vm3665_vm8, %v9965_v3, %v4345_v56  ;;  %6013 = vlog2.f32 %v4391_v45  ;;  %v3739_v3 = vmin.f32 %v10126_v42, 20.0  ;;  %v4394_v57 = vmul.f32 -0.5, %v10117_v28 }
 0x693   :  { %v4363_v46 = vsel %vm10112_vm12, %v4360_v49, %v4357_v33  ;;  %v4348_v52 = vmul.f32 0.6931472, %v6004_v21  ;;  %6015 = vpow2.f32 %v3861_v50  ;;  %v6006_v14 = vpop.eup %6005  ;;  %v10151_v51 = vadd.f32 %v9550_v10, %v9009_v22 }
 0x694   :  { %v10144_v36 = vsel %vm3667_vm10, %v9969_v47, %v4363_v46  ;;  %v4377_v39 = vadd.f32 1.0, %v4376_v54  ;;  %v4382_v47 = vadd.f32 1.0, %v6006_v14  ;;  %v10158_v17 = vadd.f32 %v9553_v38, %v9012_v63 }
 0x695   :  { %v4354_v60 = vsel %vm4353_vm13, %v4351_v59, %v4348_v52  ;;  %vm3668_vm15 = vcmp.gt.f32.partialorder %v10016_v40, 20.0  ;;  %vm10161_vm0 = vcmp.lt.f32.partialorder %v4370_v12, 0.0004427343  ;;  %v3865_v43 = vmul.f32 1.442695, %v3739_v3 }
 0x696   :  { %v10154_v62 = vsel %vm3666_vm14, %v9980_v13, %v4354_v60  ;;  %v3738_v22 = vmin.f32 %v10151_v51, 20.0  ;;  %v4369_v13 = vmul.f32 %v10086_v23, %v4368_v53  ;;  %v4379_v56 = vand.u32 2147483647, %v10096_v1 }
 0x697   :  { %v6008_v34 = vpop.eup %6007  ;;  %6017 = vlog2.f32 %v4382_v47  ;;  %v4395_v33 = vadd.f32 1.0, %v4394_v57  ;;  %v4397_v63 = vand.u32 2147483647, %v10117_v28  ;;  %v4378_v21 = vmul.f32 %v10096_v1, %v4377_v39 }
 0x698   :  { %v6010_v10 = vpop.eup %6009  ;;  %v4366_v45 = vmul.f32 0.6931472, %v6008_v34  ;;  %6019 = vpow2.f32 %v3865_v43  ;;  %v3863_v54 = vmul.f32 1.442695, %v3738_v22  ;;  %v3740_v50 = vmin.f32 %v10158_v17, 20.0 }
 0x699   :  { %v4400_v38 = vadd.f32 1.0, %v6010_v10  ;;  %v6012_v49 = vpop.eup %6011  ;;  %v4385_v52 = vmul.f32 -0.5, %v6006_v14  ;;  %vm4380_vm1 = vcmp.lt.f32.partialorder %v4379_v56, 0.0004427343  ;;  %vm3669_vm2 = vcmp.gt.f32.partialorder %v10024_v9, 20.0 }
 0x69a   :  { %v4372_v59 = vsel %vm10161_vm0, %v4369_v13, %v4366_v45  ;;  %v4375_v46 = vmul.f32 0.6931472, %v6012_v49  ;;  %v3867_v53 = vmul.f32 1.442695, %v3740_v50  ;;  %v4396_v1 = vmul.f32 %v10117_v28, %v4395_v33 }
 0x69b   :  { %v10176_v23 = vsel %vm3668_vm15, %v10016_v40, %v4372_v59  ;;  %6021 = vlog2.f32 %v4400_v38  ;;  %vm4398_vm3 = vcmp.lt.f32.partialorder %v4397_v63, 0.0004427343  ;;  %v4403_v40 = vmul.f32 -0.5, %v6010_v10 }
 0x69c   :  { %v6014_v12 = vpop.eup %6013  ;;  %6023 = vpow2.f32 %v3863_v54  ;;  %v4381_v3 = vsel %vm4380_vm1, %v4378_v21, %v4375_v46  ;;  %vm3671_vm4 = vcmp.gt.f32.partialorder %v10037_v16, 20.0  ;;  %v4386_v34 = vadd.f32 1.0, %v4385_v52 }
 0x69d   :  { %v4393_v60 = vmul.f32 0.6931472, %v6014_v12  ;;  %v6016_v57 = vpop.eup %6015  ;;  %v10181_v39 = vsel %vm3669_vm2, %v10024_v9, %v4381_v3  ;;  %6025 = vpow2.f32 %v3867_v53  ;;  %v4388_v22 = vand.u32 2147483647, %v6006_v14 }
 0x69e   :  { %v4409_v2 = vadd.f32 1.0, %v6016_v57  ;;  %v4404_v13 = vadd.f32 1.0, %v4403_v40  ;;  %v4387_v33 = vmul.f32 %v6006_v14, %v4386_v34  ;;  %v4406_v9 = vand.u32 2147483647, %v6010_v10 }
 0x69f   :  { %v4399_v47 = vsel %vm4398_vm3, %v4396_v1, %v4393_v60  ;;  %vm4389_vm5 = vcmp.lt.f32.partialorder %v4388_v22, 0.0004427343  ;;  %v4412_v63 = vmul.f32 -0.5, %v6016_v57  ;;  %vm3670_vm6 = vcmp.gt.f32.partialorder %v10045_v58, 20.0 }
 0x6a0   :  { %v10185_v43 = vsel %vm3671_vm4, %v10037_v16, %v4399_v47  ;;  %6027 = vlog2.f32 %v4409_v2  ;;  %v4405_v50 = vmul.f32 %v6010_v10, %v4404_v13  ;;  %vm4407_vm7 = vcmp.lt.f32.partialorder %v4406_v9, 0.0004427343 }
 0x6a1   :  { %v6018_v45 = vpop.eup %6017  ;;  %vm3672_vm8 = vcmp.gt.f32.partialorder %v10063_v26, 20.0  ;;  %v4413_v12 = vadd.f32 1.0, %v4412_v63  ;;  %v4415_v3 = vand.u32 2147483647, %v6016_v57  ;;  %vm3673_vm10 = vcmp.gt.f32.partialorder %v10101_v18, 20.0 }
 0x6a2   :  { %v6020_v28 = vpop.eup %6019  ;;  %v4384_v56 = vmul.f32 0.6931472, %v6018_v45  ;;  %vm3675_vm12 = vcmp.gt.f32.partialorder %v10126_v42, 20.0  ;;  %vm3674_vm14 = vcmp.gt.f32.partialorder %v10151_v51, 20.0  ;;  %vm3676_vm0 = vcmp.gt.f32.partialorder %v10158_v17, 20.0 }
 0x6a3   :  { %v4427_v38 = vadd.f32 1.0, %v6020_v28  ;;  %v4430_v60 = vmul.f32 -0.5, %v6020_v28  ;;  %v4414_v47 = vmul.f32 %v6016_v57, %v4413_v12  ;;  %vm4416_vm9 = vcmp.lt.f32.partialorder %v4415_v3, 0.0004427343 }
 0x6a4   :  { %v4390_v59 = vsel %vm4389_vm5, %v4387_v33, %v4384_v56  ;;  %v4433_v22 = vand.u32 2147483647, %v6020_v28 }
 0x6a5   :  { %v6022_v49 = vpop.eup %6021  ;;  %v10189_v54 = vsel %vm3670_vm6, %v10045_v58, %v4390_v59  ;;  %6029 = vlog2.f32 %v4427_v38  ;;  %v4431_v10 = vadd.f32 1.0, %v4430_v60 }
 0x6a6   :  { %v6024_v21 = vpop.eup %6023  ;;  %v4402_v16 = vmul.f32 0.6931472, %v6022_v49  ;;  %vm4434_vm11 = vcmp.lt.f32.partialorder %v4433_v22, 0.0004427343 }
 0x6a7   :  { %v4418_v46 = vadd.f32 1.0, %v6024_v21  ;;  %v6026_v52 = vpop.eup %6025  ;;  %v4421_v34 = vmul.f32 -0.5, %v6024_v21  ;;  %v4432_v9 = vmul.f32 %v6020_v28, %v4431_v10  ;;  %v4424_v63 = vand.u32 2147483647, %v6024_v21  ;;  %v10981_v10 = vld [vmem:[#allocation68_spill] sm:$0xff] }
 0x6a8   :  { %v4408_v14 = vsel %vm4407_vm7, %v4405_v50, %v4402_v16  ;;  %v4436_v1 = vadd.f32 1.0, %v6026_v52 }
 0x6a9   :  { %v10193_v53 = vsel %vm3672_vm8, %v10063_v26, %v4408_v14  ;;  %6031 = vlog2.f32 %v4418_v46  ;;  %v4439_v26 = vmul.f32 -0.5, %v6026_v52  ;;  %v4422_v56 = vadd.f32 1.0, %v4421_v34  ;;  %v10980_v34 = vld [vmem:[#allocation82_spill] sm:$0xff] }
 0x6aa   :  { %v6028_v40 = vpop.eup %6027  ;;  %6033 = vlog2.f32 %v4436_v1  ;;  %v4442_v46 = vand.u32 2147483647, %v6026_v52  ;;  %vm4425_vm13 = vcmp.lt.f32.partialorder %v4424_v63, 0.0004427343  ;;  %v10976_v1 = vld [vmem:[#allocation22_spill] sm:$0xff] }
 0x6ab   :  { %v4411_v58 = vmul.f32 0.6931472, %v6028_v40  ;;  %v4440_v49 = vadd.f32 1.0, %v4439_v26  ;;  %v4423_v50 = vmul.f32 %v6024_v21, %v4422_v56  ;;  %4858 = vmatprep.subr.bf16.mxu0 %v10976_v1  ;;  %v10977_v21 = vld [vmem:[#allocation38_spill] sm:$0xff]  ;;  %v10978_v40 = vld [vmem:[#allocation55_spill] sm:$0xff] }
 0x6ac   :  { %vm4443_vm15 = vcmp.lt.f32.partialorder %v4442_v46, 0.0004427343  ;;  %4922 = vmatprep.subr.bf16.mxu1 %v10977_v21 }
 0x6ad   :  { %v4417_v2 = vsel %vm4416_vm9, %v4414_v47, %v4411_v58  ;;  %v4441_v3 = vmul.f32 %v6026_v52, %v4440_v49  ;;  %v10979_v58 = vld [vmem:[#allocation65_spill] sm:$0xff] }
 0x6ae   :  { %v10197_v45 = vsel %vm3673_vm10, %v10101_v18, %v4417_v2  ;;  %v4513_v47 = vpack.c.bf16 %v10979_v58, %v10978_v40 }
 0x6af   :  { %v6030_v13 = vpop.eup %6029 }
 0x6b0   :  { %v4429_v33 = vmul.f32 0.6931472, %v6030_v13 }
 0x6b2   :  { %v4435_v57 = vsel %vm4434_vm11, %v4432_v9, %v4429_v33 }
 0x6b3   :  { %v6032_v38 = vpop.eup %6031  ;;  %v10201_v59 = vsel %vm3675_vm12, %v10126_v42, %v4435_v57 }
 0x6b4   :  { %v4420_v16 = vmul.f32 0.6931472, %v6032_v38  ;;  %v6034_v18 = vpop.eup %6033 }
 0x6b5   :  { %v4438_v12 = vmul.f32 0.6931472, %v6034_v18 }
 0x6b6   :  { %v4426_v14 = vsel %vm4425_vm13, %v4423_v50, %v4420_v16 }
 0x6b7   :  { %v10205_v28 = vsel %vm3674_vm14, %v10151_v51, %v4426_v14  ;;  %v4444_v60 = vsel %vm4443_vm15, %v4441_v3, %v4438_v12  ;;  %v4515_v51 = vpack.c.bf16 %v10981_v10, %v10980_v34 }
 0x6b8   :  { %v10209_v42 = vsel %vm3676_vm0, %v10158_v17, %v4444_v60 }
 0x6b9   :  { %6039 = dma.done.wait [#allocation5 + $0x2], 4096 }
 0x6ba   :  { %6040 = vsyncadd [#allocation5 + $0x2], 4294963200  ;;  %v10982_v52 = vld [vmem:[#allocation14_spill] sm:$0xff]  ;;  %v10984_v22 = vld [vmem:[#allocation23_spill] sm:$0xff]  ;;  %4615 = vmatprep.mubr.bf16.mxu0 %v4513_v47  ;;  %4712 = vmatprep.mubr.bf16.mxu1 %v4515_v51  ;;  %vm4777_vm1 = vcmask 130048  }
 0x6bb   :  { %4859 = vmatpush3.bf16.msra.mxu0 %v10982_v52  ;;  %v10983_v2 = vld [vmem:[#allocation30_spill] sm:$0xff]  ;;  %v10985_v17 = vld [vmem:[#allocation39_spill] sm:$0xff]  ;;  %v10988_v56 = vld [vmem:[#allocation24_spill] sm:$0xff] }
 0x6bc   :  { %4923 = vmatpush3.bf16.msra.mxu1 %v10983_v2  ;;  %4860 = vmatprep.subr.bf16.mxu0 %v10984_v22  ;;  %v10986_v26 = vld [vmem:[#allocation15_spill] sm:$0xff]  ;;  %v10989_v33 = vld [vmem:[#allocation40_spill] sm:$0xff]  ;;  %v10992_v38 = vld [vmem:[#allocation25_spill] sm:$0xff] }
 0x6bd   :  { %4924 = vmatprep.subr.bf16.mxu1 %v10985_v17  ;;  %v10987_v13 = vld [vmem:[#allocation31_spill] sm:$0xff]  ;;  %v10990_v9 = vld [vmem:[#allocation16_spill] sm:$0xff]  ;;  %v10993_v57 = vld [vmem:[#allocation41_spill] sm:$0xff] }
 0x6be   :  { %v10991_v63 = vld [vmem:[#allocation32_spill] sm:$0xff]  ;;  %v10994_v49 = vld [vmem:[#allocation17_spill] sm:$0xff]  ;;  %v10996_v50 = vld [vmem:[#allocation26_spill] sm:$0xff] }
 0x6bf   :  { %4861 = vmatpush3.bf16.msra.mxu0 %v10986_v26  ;;  %v10995_v16 = vld [vmem:[#allocation33_spill] sm:$0xff]  ;;  %v10997_v46 = vld [vmem:[#allocation42_spill] sm:$0xff]  ;;  %v11000_v12 = vld [vmem:[#allocation27_spill] sm:$0xff] }
 0x6c0   :  { %4925 = vmatpush3.bf16.msra.mxu1 %v10987_v13  ;;  %4862 = vmatprep.subr.bf16.mxu0 %v10988_v56  ;;  %v10998_v18 = vld [vmem:[#allocation18_spill] sm:$0xff]  ;;  %v11001_v3 = vld [vmem:[#allocation43_spill] sm:$0xff]  ;;  %v11004_v21 = vld [vmem:[#allocation28_spill] sm:$0xff] }
 0x6c1   :  { %4926 = vmatprep.subr.bf16.mxu1 %v10989_v33  ;;  %v10999_v14 = vld [vmem:[#allocation34_spill] sm:$0xff]  ;;  %v11002_v60 = vld [vmem:[#allocation19_spill] sm:$0xff]  ;;  %v11005_v40 = vld [vmem:[#allocation44_spill] sm:$0xff] }
 0x6c2   :  { %v11003_v1 = vld [vmem:[#allocation35_spill] sm:$0xff]  ;;  %v11006_v58 = vld [vmem:[#allocation20_spill] sm:$0xff]  ;;  %v11008_v34 = vld [vmem:[#allocation29_spill] sm:$0xff] }
 0x6c3   :  { %4863 = vmatpush3.bf16.msra.mxu0 %v10990_v9  ;;  %v11007_v47 = vld [vmem:[#allocation36_spill] sm:$0xff]  ;;  %v11009_v10 = vld [vmem:[#allocation45_spill] sm:$0xff]  ;;  %v11011_v52 = vld [vmem:[#allocation54_spill] sm:$0xff] }
 0x6c4   :  { %4927 = vmatpush3.bf16.msra.mxu1 %v10991_v63  ;;  %4864 = vmatprep.subr.bf16.mxu0 %v10992_v38  ;;  %v11010_v51 = vld [vmem:[#allocation77_spill] sm:$0xff]  ;;  %v11012_v22 = vld [vmem:[#allocation51_spill] sm:$0xff]  ;;  %v11013_v17 = vld [vmem:[#allocation56_spill] sm:$0xff] }
 0x6c5   :  { %4928 = vmatprep.subr.bf16.mxu1 %v10993_v57  ;;  %v4512_v2 = vpack.c.bf16 %v11011_v52, %v11010_v51  ;;  %v4514_v26 = vpack.c.bf16 %v11013_v17, %v11012_v22  ;;  %v11014_v13 = vld [vmem:[#allocation21_spill] sm:$0xff]  ;;  %v11016_v33 = vld [vmem:[#allocation50_spill] sm:$0xff]  ;;  %v11018_v38 = vld [vmem:[#allocation72_spill] sm:$0xff]  ;;  %v4525_v51 = vpack.c.bf16 %v9718_v30, %v9664_v44  ;;  %v4527_v52 = vpack.c.bf16 %v9756_v29, %v9678_v15 }
 0x6c6   :  { %v11015_v56 = vld [vmem:[#allocation37_spill] sm:$0xff]  ;;  %v4517_v9 = vpack.c.bf16 %v9459_v25, %v11016_v33  ;;  %v11017_v63 = vld [vmem:[#allocation78_spill] sm:$0xff]  ;;  %v4529_v22 = vpack.c.bf16 %v9873_v5, %v9808_v4  ;;  %v11030_v17 = vld [vmem:[#allocation48_spill] sm:$0xff]  ;;  %v4534_v4 = vpack.c.bf16 %v10003_v41, %v9952_v24  ;;  %v4537_v5 = vpack.c.bf16 %v10154_v62, %v10091_v61 }
 0x6c7   :  { %4865 = vmatpush3.bf16.msra.mxu0 %v10994_v49  ;;  %v4519_v57 = vpack.c.bf16 %v11018_v38, %v11017_v63  ;;  %v11019_v49 = vld [vmem:[#allocation52_spill] sm:$0xff]  ;;  %v11026_v25 = vld [vmem:[#allocation86_spill] sm:$0xff]  ;;  %v11033_v15 = vld [vmem:[#allocation49_spill] sm:$0xff]  ;;  %v4543_v24 = vpack.c.bf16 %v10209_v42, %v10193_v53  ;;  %v4540_v41 = vpack.c.bf16 %v10197_v45, %v10181_v39 }
 0x6c8   :  { %4929 = vmatpush3.bf16.msra.mxu1 %v10995_v16  ;;  %4866 = vmatprep.subr.bf16.mxu0 %v10996_v50  ;;  %v11020_v16 = vld [vmem:[#allocation71_spill] sm:$0xff]  ;;  %v11032_v44 = vld [vmem:[#allocation46_spill] sm:$0xff] }
 0x6c9   :  { %4930 = vmatprep.subr.bf16.mxu1 %v10997_v46  ;;  %v4516_v50 = vpack.c.bf16 %v11020_v16, %v11019_v49  ;;  %v11021_v46 = vld [vmem:[#allocation85_spill] sm:$0xff]  ;;  %v4528_v30 = vpack.c.bf16 %v11033_v15, %v11032_v44  ;;  %v11034_v29 = vld [vmem:[#allocation47_spill] sm:$0xff] }
 0x6cb   :  { %4867 = vmatpush3.bf16.msra.mxu0 %v10998_v18  ;;  %v11022_v18 = vld [vmem:[#allocation84_spill] sm:$0xff] }
 0x6cc   :  { %4931 = vmatpush3.bf16.msra.mxu1 %v10999_v14  ;;  %4868 = vmatprep.subr.bf16.mxu0 %v11000_v12  ;;  %v4518_v14 = vpack.c.bf16 %v11022_v18, %v11021_v46  ;;  %v11023_v12 = vld [vmem:[#allocation53_spill] sm:$0xff] }
 0x6cd   :  { %4932 = vmatprep.subr.bf16.mxu1 %v11001_v3  ;;  %v11024_v3 = vld [vmem:[#allocation89_spill] sm:$0xff] }
 0x6cf   :  { %4869 = vmatpush3.bf16.msra.mxu0 %v11002_v60  ;;  %v4521_v60 = vpack.c.bf16 %v11024_v3, %v11023_v12 }
 0x6d0   :  { %4933 = vmatpush3.bf16.msra.mxu1 %v11003_v1  ;;  %4870 = vmatprep.subr.bf16.mxu0 %v11004_v21  ;;  %v11025_v1 = vld [vmem:[#allocation88_spill] sm:$0xff] }
 0x6d1   :  { %4934 = vmatprep.subr.bf16.mxu1 %v11005_v40  ;;  %v4523_v21 = vpack.c.bf16 %v9612_v48, %v11025_v1  ;;  %v11027_v40 = vld [vmem:[#allocation74_spill] sm:$0xff]  ;;  %v4524_v48 = vpack.c.bf16 %v9699_v19, %v9629_v37  ;;  %v4533_v37 = vpack.c.bf16 %v10011_v35, %v9974_v20  ;;  %v11036_v19 = vld [vmem:[#allocation64_spill] sm:$0xff]  ;;  %v4536_v20 = vpack.c.bf16 %v10135_v8, %v10030_v11 }
 0x6d2   :  { %v4542_v35 = vpack.c.bf16 %v10201_v59, %v10185_v43 }
 0x6d3   :  { %4871 = vmatpush3.bf16.msra.mxu0 %v11006_v58  ;;  %v4520_v58 = vpack.c.bf16 %v11027_v40, %v11026_v25 }
 0x6d4   :  { %4935 = vmatpush3.bf16.msra.mxu1 %v11007_v47  ;;  %4872 = vmatprep.subr.bf16.mxu0 %v11008_v34  ;;  %v11028_v47 = vld [vmem:[#allocation76_spill] sm:$0xff]  ;;  %v11029_v34 = vld [vmem:[#allocation87_spill] sm:$0xff] }
 0x6d5   :  { %4936 = vmatprep.subr.bf16.mxu1 %v11009_v10  ;;  %v4522_v10 = vpack.c.bf16 %v11029_v34, %v11028_v47 }
 0x6d7   :  { %4873 = vmatpush3.bf16.msra.mxu0 %v11014_v13 }
 0x6d8   :  { %4937 = vmatpush3.bf16.msra.mxu1 %v11015_v56  ;;  %v11035_v56 = vld [vmem:[#allocation80_spill] sm:$0xff] }
 0x6d9   :  { %v4530_v33 = vpack.c.bf16 %v11035_v56, %v11034_v29 }
 0x6da   :  { %4616 = vmatmul.mubr.bf16.vlgmr.msra.gmra.mrb[96].mxu0 %v4512_v2  ;;  %v4526_v2 = vpack.c.bf16 %v9713_v7, %v9657_v55  ;;  %v4535_v55 = vpack.c.bf16 %v10019_v6, %v9985_v0  ;;  %v4532_v7 = vpack.c.bf16 %v9996_v31, %v11036_v19  ;;  %v4538_v0 = vpack.c.bf16 %v10144_v36, %v10077_v32  ;;  %v10310_v32 = vld [vmem:[%s10397_s5] ss:$0 sm:$0xff] }
 0x6db   :  { %4713 = vmatmul.mubr.bf16.vlgmr.msra.gmra.mrb[96].mxu1 %v4514_v26  ;;  %4623 = vmatprep.mubr.bf16.mxu0 %v4517_v9  ;;  %v11031_v26 = vld [vmem:[#allocation60_spill] sm:$0xff]  ;;  %v4539_v9 = vpack.c.bf16 %v10176_v23, %v10106_v27  ;;  %v4541_v31 = vpack.c.bf16 %v10205_v28, %v10189_v54 }
 0x6dc   :  { %4720 = vmatprep.mubr.bf16.mxu1 %v4519_v57  ;;  %v4531_v13 = vpack.c.bf16 %v11031_v26, %v11030_v17 }
 0x6e2   :  { %4624 = vmatmul.mubr.bf16.gmra.mrb[100].mxu0 %v4516_v50 }
 0x6e3   :  { %4721 = vmatmul.mubr.bf16.gmra.mrb[100].mxu1 %v4518_v14  ;;  %4631 = vmatprep.mubr.bf16.mxu0 %v4521_v60 }
 0x6e4   :  { %4728 = vmatprep.mubr.bf16.mxu1 %v4523_v21 }
 0x6ea   :  { %4632 = vmatmul.mubr.bf16.gmra.mrb[104].mxu0 %v4520_v58 }
 0x6eb   :  { %4729 = vmatmul.mubr.bf16.gmra.mrb[104].mxu1 %v4522_v10  ;;  %4639 = vmatprep.mubr.bf16.mxu0 %v4525_v51 }
 0x6ec   :  { %4736 = vmatprep.mubr.bf16.mxu1 %v4527_v52 }
 0x6f2   :  { %4640 = vmatmul.mubr.bf16.gmra.mrb[108].mxu0 %v4524_v48 }
 0x6f3   :  { %4737 = vmatmul.mubr.bf16.gmra.mrb[108].mxu1 %v4526_v2  ;;  %4647 = vmatprep.mubr.bf16.mxu0 %v4529_v22 }
 0x6f4   :  { %4744 = vmatprep.mubr.bf16.mxu1 %v4531_v13 }
 0x6fa   :  { %4648 = vmatmul.mubr.bf16.gmra.mrb[112].mxu0 %v4528_v30 }
 0x6fb   :  { %4745 = vmatmul.mubr.bf16.gmra.mrb[112].mxu1 %v4530_v33  ;;  %4655 = vmatprep.mubr.bf16.mxu0 %v4533_v37 }
 0x6fc   :  { %4752 = vmatprep.mubr.bf16.mxu1 %v4535_v55 }
 0x702   :  { %4656 = vmatmul.mubr.bf16.gmra.mrb[116].mxu0 %v4532_v7 }
 0x703   :  { %4753 = vmatmul.mubr.bf16.gmra.mrb[116].mxu1 %v4534_v4  ;;  %4663 = vmatprep.mubr.bf16.mxu0 %v4537_v5 }
 0x704   :  { %4760 = vmatprep.mubr.bf16.mxu1 %v4539_v9 }
 0x70a   :  { %4664 = vmatmul.mubr.bf16.gmra.mrb[120].mxu0 %v4536_v20 }
 0x70b   :  { %4761 = vmatmul.mubr.bf16.gmra.mrb[120].mxu1 %v4538_v0  ;;  %4671 = vmatprep.mubr.bf16.mxu0 %v4541_v31 }
 0x70c   :  { %4768 = vmatprep.mubr.bf16.mxu1 %v4543_v24 }
 0x712   :  { %4672 = vmatmul.mubr.bf16.gmra.mrb[124].mxu0 %v4540_v41 }
 0x713   :  { %4769 = vmatmul.mubr.bf16.gmra.mrb[124].mxu1 %v4542_v35 }
 0x7ad   :  { %v4874_v6 = vpop.f32.mrb[96].mxu0 }
 0x7ae   :  { %v4938_v11 = vpop.f32.mrb[96].mxu1  ;;  %v4875_v61 = vpop.f32.mrb[97].mxu0 }
 0x7af   :  { %v4939_v27 = vpop.f32.mrb[97].mxu1  ;;  %v4876_v8 = vadd.f32 %v4875_v61, %v4874_v6  ;;  %v4877_v62 = vpop.f32.mrb[98].mxu0 }
 0x7b0   :  { %v4940_v36 = vadd.f32 %v4939_v27, %v4938_v11  ;;  %v4941_v23 = vpop.f32.mrb[98].mxu1  ;;  %v4878_v54 = vpop.f32.mrb[99].mxu0 }
 0x7b1   :  { %v4942_v39 = vpop.f32.mrb[99].mxu1  ;;  %v4618_v53 = vadd.f32 %v4876_v8, %v10310_v32  ;;  %v4879_v43 = vadd.f32 %v4878_v54, %v4877_v62 }
 0x7b2   :  { %v4943_v45 = vadd.f32 %v4942_v39, %v4941_v23 }
 0x7b3   :  { %v4715_v59 = vadd.f32 %v4940_v36, %v4618_v53  ;;  %v4621_v28 = vadd.f32 %v4879_v43, %v10310_v32 }
 0x7b5   :  { %4778 = vst.msk [vmem:[%s10401_s9] sm:$0xff] %vm4777_vm1, %v4715_v59  ;;  %v4718_v42 = vadd.f32 %v4943_v45, %v4621_v28  ;;  %v4880_v63 = vpop.f32.mrb[100].mxu0 }
 0x7b6   :  { %v4944_v38 = vpop.f32.mrb[100].mxu1  ;;  %v4881_v57 = vpop.f32.mrb[101].mxu0 }
 0x7b7   :  { %v4945_v49 = vpop.f32.mrb[101].mxu1  ;;  %4779 = vst.msk [vmem:[%s10401_s9 + $0x8] sm:$0xff] %vm4777_vm1, %v4718_v42  ;;  %v4882_v16 = vadd.f32 %v4881_v57, %v4880_v63  ;;  %v4883_v46 = vpop.f32.mrb[102].mxu0 }
 0x7b8   :  { %v4946_v50 = vadd.f32 %v4945_v49, %v4944_v38  ;;  %v4947_v18 = vpop.f32.mrb[102].mxu1  ;;  %v4884_v14 = vpop.f32.mrb[103].mxu0 }
 0x7b9   :  { %v4948_v12 = vpop.f32.mrb[103].mxu1  ;;  %v4626_v3 = vadd.f32 %v4882_v16, %v10310_v32  ;;  %v4885_v60 = vadd.f32 %v4884_v14, %v4883_v46 }
 0x7ba   :  { %v4949_v1 = vadd.f32 %v4948_v12, %v4947_v18 }
 0x7bb   :  { %v4723_v21 = vadd.f32 %v4946_v50, %v4626_v3  ;;  %v4629_v25 = vadd.f32 %v4885_v60, %v10310_v32 }
 0x7bd   :  { %4780 = vst.msk [vmem:[%s10401_s9 + $0x10] sm:$0xff] %vm4777_vm1, %v4723_v21  ;;  %v4726_v40 = vadd.f32 %v4949_v1, %v4629_v25  ;;  %v4886_v58 = vpop.f32.mrb[104].mxu0 }
 0x7be   :  { %v4950_v47 = vpop.f32.mrb[104].mxu1  ;;  %v4887_v34 = vpop.f32.mrb[105].mxu0 }
 0x7bf   :  { %v4951_v10 = vpop.f32.mrb[105].mxu1  ;;  %4781 = vst.msk [vmem:[%s10401_s9 + $0x18] sm:$0xff] %vm4777_vm1, %v4726_v40  ;;  %v4888_v51 = vadd.f32 %v4887_v34, %v4886_v58  ;;  %v4889_v48 = vpop.f32.mrb[106].mxu0 }
 0x7c0   :  { %v4952_v52 = vadd.f32 %v4951_v10, %v4950_v47  ;;  %v4953_v2 = vpop.f32.mrb[106].mxu1  ;;  %v4890_v22 = vpop.f32.mrb[107].mxu0 }
 0x7c1   :  { %v4954_v17 = vpop.f32.mrb[107].mxu1  ;;  %v4634_v26 = vadd.f32 %v4888_v51, %v10310_v32  ;;  %v4891_v13 = vadd.f32 %v4890_v22, %v4889_v48 }
 0x7c2   :  { %v4955_v44 = vadd.f32 %v4954_v17, %v4953_v2 }
 0x7c3   :  { %v4731_v15 = vadd.f32 %v4952_v52, %v4634_v26  ;;  %v4637_v30 = vadd.f32 %v4891_v13, %v10310_v32 }
 0x7c5   :  { %4782 = vst.msk [vmem:[%s10401_s9 + $0x20] sm:$0xff] %vm4777_vm1, %v4731_v15  ;;  %v4734_v29 = vadd.f32 %v4955_v44, %v4637_v30  ;;  %v4892_v56 = vpop.f32.mrb[108].mxu0 }
 0x7c6   :  { %v4956_v33 = vpop.f32.mrb[108].mxu1  ;;  %v4893_v37 = vpop.f32.mrb[109].mxu0 }
 0x7c7   :  { %v4957_v55 = vpop.f32.mrb[109].mxu1  ;;  %4783 = vst.msk [vmem:[%s10401_s9 + $0x28] sm:$0xff] %vm4777_vm1, %v4734_v29  ;;  %v4894_v19 = vadd.f32 %v4893_v37, %v4892_v56  ;;  %v4895_v4 = vpop.f32.mrb[110].mxu0 }
 0x7c8   :  { %v4958_v7 = vadd.f32 %v4957_v55, %v4956_v33  ;;  %v4959_v5 = vpop.f32.mrb[110].mxu1  ;;  %v4896_v9 = vpop.f32.mrb[111].mxu0 }
 0x7c9   :  { %v4960_v20 = vpop.f32.mrb[111].mxu1  ;;  %v4642_v0 = vadd.f32 %v4894_v19, %v10310_v32  ;;  %v4897_v31 = vadd.f32 %v4896_v9, %v4895_v4 }
 0x7ca   :  { %v4961_v24 = vadd.f32 %v4960_v20, %v4959_v5 }
 0x7cb   :  { %v4739_v41 = vadd.f32 %v4958_v7, %v4642_v0  ;;  %v4645_v35 = vadd.f32 %v4897_v31, %v10310_v32 }
 0x7cd   :  { %4784 = vst.msk [vmem:[%s10401_s9 + $0x30] sm:$0xff] %vm4777_vm1, %v4739_v41  ;;  %v4742_v6 = vadd.f32 %v4961_v24, %v4645_v35  ;;  %v4898_v11 = vpop.f32.mrb[112].mxu0 }
 0x7ce   :  { %v4962_v61 = vpop.f32.mrb[112].mxu1  ;;  %v4899_v27 = vpop.f32.mrb[113].mxu0 }
 0x7cf   :  { %v4963_v8 = vpop.f32.mrb[113].mxu1  ;;  %4785 = vst.msk [vmem:[%s10401_s9 + $0x38] sm:$0xff] %vm4777_vm1, %v4742_v6  ;;  %v4900_v36 = vadd.f32 %v4899_v27, %v4898_v11  ;;  %v4901_v23 = vpop.f32.mrb[114].mxu0 }
 0x7d0   :  { %v4964_v62 = vadd.f32 %v4963_v8, %v4962_v61  ;;  %v4965_v54 = vpop.f32.mrb[114].mxu1  ;;  %v4902_v39 = vpop.f32.mrb[115].mxu0 }
 0x7d1   :  { %v4966_v53 = vpop.f32.mrb[115].mxu1  ;;  %v4650_v43 = vadd.f32 %v4900_v36, %v10310_v32  ;;  %v4903_v45 = vadd.f32 %v4902_v39, %v4901_v23 }
 0x7d2   :  { %v4967_v59 = vadd.f32 %v4966_v53, %v4965_v54 }
 0x7d3   :  { %v4747_v28 = vadd.f32 %v4964_v62, %v4650_v43  ;;  %v4653_v42 = vadd.f32 %v4903_v45, %v10310_v32 }
 0x7d5   :  { %4786 = vst.msk [vmem:[%s10401_s9 + $0x40] sm:$0xff] %vm4777_vm1, %v4747_v28  ;;  %v4750_v63 = vadd.f32 %v4967_v59, %v4653_v42  ;;  %v4904_v38 = vpop.f32.mrb[116].mxu0 }
 0x7d6   :  { %v4968_v57 = vpop.f32.mrb[116].mxu1  ;;  %v4905_v49 = vpop.f32.mrb[117].mxu0 }
 0x7d7   :  { %v4969_v16 = vpop.f32.mrb[117].mxu1  ;;  %4787 = vst.msk [vmem:[%s10401_s9 + $0x48] sm:$0xff] %vm4777_vm1, %v4750_v63  ;;  %v4906_v50 = vadd.f32 %v4905_v49, %v4904_v38  ;;  %v4907_v18 = vpop.f32.mrb[118].mxu0 }
 0x7d8   :  { %v4970_v46 = vadd.f32 %v4969_v16, %v4968_v57  ;;  %v4971_v14 = vpop.f32.mrb[118].mxu1  ;;  %v4908_v12 = vpop.f32.mrb[119].mxu0 }
 0x7d9   :  { %v4972_v3 = vpop.f32.mrb[119].mxu1  ;;  %v4658_v60 = vadd.f32 %v4906_v50, %v10310_v32  ;;  %v4909_v1 = vadd.f32 %v4908_v12, %v4907_v18 }
 0x7da   :  { %v4973_v21 = vadd.f32 %v4972_v3, %v4971_v14 }
 0x7db   :  { %v4755_v25 = vadd.f32 %v4970_v46, %v4658_v60  ;;  %v4661_v40 = vadd.f32 %v4909_v1, %v10310_v32 }
 0x7dd   :  { %4788 = vst.msk [vmem:[%s10401_s9 + $0x50] sm:$0xff] %vm4777_vm1, %v4755_v25  ;;  %v4758_v58 = vadd.f32 %v4973_v21, %v4661_v40  ;;  %v4910_v47 = vpop.f32.mrb[120].mxu0 }
 0x7de   :  { %v4974_v34 = vpop.f32.mrb[120].mxu1  ;;  %v4911_v10 = vpop.f32.mrb[121].mxu0 }
 0x7df   :  { %v4975_v51 = vpop.f32.mrb[121].mxu1  ;;  %4789 = vst.msk [vmem:[%s10401_s9 + $0x58] sm:$0xff] %vm4777_vm1, %v4758_v58  ;;  %v4912_v52 = vadd.f32 %v4911_v10, %v4910_v47  ;;  %v4913_v2 = vpop.f32.mrb[122].mxu0 }
 0x7e0   :  { %v4976_v48 = vadd.f32 %v4975_v51, %v4974_v34  ;;  %v4977_v22 = vpop.f32.mrb[122].mxu1  ;;  %v4914_v17 = vpop.f32.mrb[123].mxu0 }
 0x7e1   :  { %v4978_v26 = vpop.f32.mrb[123].mxu1  ;;  %v4666_v13 = vadd.f32 %v4912_v52, %v10310_v32  ;;  %v4915_v44 = vadd.f32 %v4914_v17, %v4913_v2 }
 0x7e2   :  { %v4979_v15 = vadd.f32 %v4978_v26, %v4977_v22 }
 0x7e3   :  { %v4763_v30 = vadd.f32 %v4976_v48, %v4666_v13  ;;  %v4669_v29 = vadd.f32 %v4915_v44, %v10310_v32 }
 0x7e5   :  { %4790 = vst.msk [vmem:[%s10401_s9 + $0x60] sm:$0xff] %vm4777_vm1, %v4763_v30  ;;  %v4766_v56 = vadd.f32 %v4979_v15, %v4669_v29  ;;  %v4916_v33 = vpop.f32.mrb[124].mxu0 }
 0x7e6   :  { %v4980_v37 = vpop.f32.mrb[124].mxu1  ;;  %v4917_v55 = vpop.f32.mrb[125].mxu0 }
 0x7e7   :  { %v4981_v19 = vpop.f32.mrb[125].mxu1  ;;  %4791 = vst.msk [vmem:[%s10401_s9 + $0x68] sm:$0xff] %vm4777_vm1, %v4766_v56  ;;  %v4918_v7 = vadd.f32 %v4917_v55, %v4916_v33  ;;  %v4919_v5 = vpop.f32.mrb[126].mxu0 }
 0x7e8   :  { %v4982_v4 = vadd.f32 %v4981_v19, %v4980_v37  ;;  %v4983_v9 = vpop.f32.mrb[126].mxu1  ;;  %v4920_v20 = vpop.f32.mrb[127].mxu0 }
 0x7e9   :  { %v4984_v0 = vpop.f32.mrb[127].mxu1  ;;  %v4674_v31 = vadd.f32 %v4918_v7, %v10310_v32  ;;  %v4921_v24 = vadd.f32 %v4920_v20, %v4919_v5 }
 0x7ea   :  { %v4985_v41 = vadd.f32 %v4984_v0, %v4983_v9 }
 0x7eb   :  { %v4771_v35 = vadd.f32 %v4982_v4, %v4674_v31  ;;  %v4677_v6 = vadd.f32 %v4921_v24, %v10310_v32 }
 0x7ed   :  { %4792 = vst.msk [vmem:[%s10401_s9 + $0x70] sm:$0xff] %vm4777_vm1, %v4771_v35  ;;  %v4774_v11 = vadd.f32 %v4985_v41, %v4677_v6 }
 0x7ef   :  { %4793 = vst.msk [vmem:[%s10401_s9 + $0x78] sm:$0xff] %vm4777_vm1, %v4774_v11 }
 0x7f0   :  { %4798 = vsyncmov [#allocation5] }
 0x7f3   :  { %s4799_s28 = vpop.sfrf %4798 }
 0x7f4   :  { %p4855_p0 = scmp.ne.s32.totalorder %s4799_s28, 0 }
 0x7f6   :  { %4803 = shalt.err (%p4855_p0)  }
 0x7f7   :  { %4805 = vsyncmov [#allocation5 + $0x1] }
 0x7fa   :  { %s4806_s29 = vpop.sfrf %4805 }
 0x7fb   :  { %p4856_p1 = scmp.ne.s32.totalorder %s4806_s29, 0 }
 0x7fd   :  { %4810 = shalt.err (%p4856_p1)  }
 0x7fe   :  { %4812 = vsyncmov [#allocation5 + $0x2] }
 0x801   :  { %s4813_s30 = vpop.sfrf %4812 }
 0x802   :  { %p4857_p2 = scmp.ne.s32.totalorder %s4813_s30, 0 }
 0x804   :  { %4817 = shalt.err (%p4857_p2)  }

</bundles_post_ra>
